<compile_context>
chip_gen: v5e
topology: v5e:2x2
jax: 0.10.0
libtpu: 0.0.40
codegen_flags: <defaults>
</compile_context>

<pallas_src>
import numpy as np
import jax
import jax.numpy as jnp
from jax.experimental import pallas as pl
from jax.experimental.pallas import tpu as pltpu


# ----------------------------- Pallas kernels -------------------------------

def _wx_bias_relu_kernel(a_ref, w_ref, b_ref, o_ref):
    """o = relu(W @ A + b).  W: (O,K) bf16, A: (K,tm) bf16, b: (O,1) f32."""
    acc = jnp.dot(w_ref[...], a_ref[...], preferred_element_type=jnp.float32)
    o_ref[...] = jnp.maximum(acc + b_ref[...], 0.0).astype(o_ref.dtype)


def _xw_bias_relu_kernel(a_ref, w_ref, b_ref, o_ref):
    """o = relu(A @ W + b).  A: (M,K) bf16, W: (K,tn) bf16, b: (1,tn) f32."""
    acc = jnp.dot(a_ref[...], w_ref[...], preferred_element_type=jnp.float32)
    o_ref[...] = jnp.maximum(acc + b_ref[...], 0.0).astype(o_ref.dtype)


# ------------------------------ conv layer -----------------------------------

def conv2d_relu(x, w_flat, b_col, kh, kw, stride, *, tm=512):
    """PyTorch Conv2d(stride, padding=0) + ReLU, bf16 activations.

    x: (N, C, H, W) bf16 (NCHW), w_flat: (O, C*kh*kw) bf16 (weight.view(O,-1)),
    b_col: (O, 1) f32.  Returns (N, O, Ho, Wo) bf16 (NCHW).
    """
    Nb, C, H, W = x.shape
    O, K = w_flat.shape
    assert K == C * kh * kw
    Ho = (H - kh) // stride + 1
    Wo = (W - kw) // stride + 1
    M = Ho * Wo

    # One fused patch-extraction op (bf16 in -> bf16 out); feature dim ordered
    # (C slowest, kh, kw) matching weight.view(O, C*kh*kw).
    patches = jax.lax.conv_general_dilated_patches(
        x, (kh, kw), (stride, stride), "VALID",
        dimension_numbers=("NCHW", "OIHW", "NCHW"))      # (Nb, K, Ho, Wo)
    patches = patches.reshape(Nb, K, M)                  # (Nb, K, M)

    # Tile the big lane dim (M) for real pipelining; fall back to a single
    # full-extent block when M is small (conv2/3/4).  The boundary block for
    # a non-divisible M is masked on store, and the matmul only contracts over
    # K, so out-of-bounds lane garbage never reaches a stored element.
    if M > tm:
        assert tm % 128 == 0
        tm_eff, grid_m = tm, pl.cdiv(M, tm)
    else:
        tm_eff, grid_m = M, 1

    out = pl.pallas_call(
        _wx_bias_relu_kernel,
        out_shape=jax.ShapeDtypeStruct((Nb, O, M), jnp.bfloat16),
        grid_spec=pltpu.PrefetchScalarGridSpec(
            num_scalar_prefetch=0,
            grid=(Nb, grid_m),
            in_specs=[
                pl.BlockSpec((None, K, tm_eff), lambda n, j: (n, 0, j)),
                # Constant block index -> weight/bias stay resident, no re-DMA
                # across grid steps.
                pl.BlockSpec((O, K), lambda n, j: (0, 0)),
                pl.BlockSpec((O, 1), lambda n, j: (0, 0)),
            ],
            out_specs=pl.BlockSpec((None, O, tm_eff), lambda n, j: (n, 0, j)),
        ),
        compiler_params=pltpu.CompilerParams(
            dimension_semantics=("parallel", "parallel")),
    )(patches, w_flat, b_col)

    return out.reshape(Nb, O, Ho, Wo)                    # already NCHW


# ------------------------------ linear layer ----------------------------------

def linear_relu(x, w_kn, b_row, *, tn=256):
    """relu(x @ w_kn + b).  x: (M,K) bf16, w_kn: (K,N) bf16, b_row: (1,N) f32.

    Two 256-wide parallel output tiles: on v7x the two halves (and their
    weight DMAs) run on separate TensorCores; elsewhere the second weight DMA
    overlaps the first (trivial) matmul.
    """
    M, K = x.shape
    K2, Nout = w_kn.shape
    assert K == K2 and Nout % tn == 0

    return pl.pallas_call(
        _xw_bias_relu_kernel,
        out_shape=jax.ShapeDtypeStruct((M, Nout), jnp.float32),
        grid_spec=pltpu.PrefetchScalarGridSpec(
            num_scalar_prefetch=0,
            grid=(Nout // tn,),
            in_specs=[
                pl.BlockSpec((M, K), lambda j: (0, 0)),
                pl.BlockSpec((K, tn), lambda j: (0, j)),
                pl.BlockSpec((1, tn), lambda j: (0, j)),
            ],
            out_specs=pl.BlockSpec((M, tn), lambda j: (0, j)),
        ),
        compiler_params=pltpu.CompilerParams(
            dimension_semantics=("parallel",)),
    )(x, w_kn, b_row)


# ------------------------------- CONVPolicy ----------------------------------

_CONV_SPECS = (("c1", 8, 8, 4), ("c2", 5, 5, 2), ("c3", 4, 4, 2), ("c4", 3, 3, 1))


def init_params(num_inputs, key):
    # Deterministic synthetic init (PyTorch shapes / conventions).
    # TODO(synk): nn.init.orthogonal_ * relu_gain not reproduced exactly
    # (scaled normals with matching shapes; biases zero as in weights_init).
    relu_gain = float(np.sqrt(2.0))
    ks = jax.random.split(key, 5)

    def w(k, shape):
        fan_in = int(np.prod(shape[1:]))
        return relu_gain / np.sqrt(fan_in) * jax.random.normal(k, shape, jnp.float32)

    return {
        "c1_w": w(ks[0], (32, num_inputs, 8, 8)), "c1_b": jnp.zeros((32,), jnp.float32),
        "c2_w": w(ks[1], (64, 32, 5, 5)),         "c2_b": jnp.zeros((64,), jnp.float32),
        "c3_w": w(ks[2], (32, 64, 4, 4)),         "c3_b": jnp.zeros((32,), jnp.float32),
        "c4_w": w(ks[3], (16, 32, 3, 3)),         "c4_b": jnp.zeros((16,), jnp.float32),
        "fc_w": w(ks[4], (512, 16 * 7 * 7)),      "fc_b": jnp.zeros((512,), jnp.float32),
    }


def prepare_params(params):
    """One-time weight prep (hoisted out of the hot path): flatten, transpose,
    bf16-cast the matmul operands; reshape biases for in-kernel broadcast."""
    prep = {}
    for name, _, _, _ in _CONV_SPECS:
        w = params[name + "_w"]
        O = w.shape[0]
        prep[name + "_w"] = w.reshape(O, -1).astype(jnp.bfloat16)      # (O, K)
        prep[name + "_b"] = params[name + "_b"].reshape(O, 1)          # (O, 1) f32
    prep["fc_w"] = params["fc_w"].T.astype(jnp.bfloat16)               # (784, 512)
    prep["fc_b"] = params["fc_b"].reshape(1, -1)                       # (1, 512) f32
    return prep


def convpolicy_forward(inputs, states, masks, prep):
    """CONVPolicy.forward: x = self.main(inputs); return (x, x, states)."""
    del masks  # unused by CONVPolicy.forward, kept for signature fidelity
    h = inputs.astype(jnp.bfloat16)         # bf16 activation path end-to-end
    for name, kh, kw, s in _CONV_SPECS:
        h = conv2d_relu(h, prep[name + "_w"], prep[name + "_b"], kh, kw, s)
    flat = h.reshape(h.shape[0], -1)                                   # Flatten (bf16)
    x = linear_relu(flat, prep["fc_w"], prep["fc_b"])                  # (N, 512) f32
    return x, x, states


# --------------------------- pure-JAX reference -------------------------------

def reference_forward(inputs, params):
    h = inputs
    for name, s in (("c1", 4), ("c2", 2), ("c3", 2), ("c4", 1)):
        h = jax.lax.conv_general_dilated(
            h, params[name + "_w"], (s, s), "VALID",
            dimension_numbers=("NCHW", "OIHW", "NCHW"),
            precision=jax.lax.Precision.HIGHEST)
        h = jnp.maximum(h + params[name + "_b"][None, :, None, None], 0.0)
    flat = h.reshape(h.shape[0], -1)
    return jnp.maximum(
        jnp.dot(flat, params["fc_w"].T, precision=jax.lax.Precision.HIGHEST)
        + params["fc_b"], 0.0)


if __name__ == "__main__":
    key = jax.random.PRNGKey(0)
    k_in, k_p = jax.random.split(key)

    # Smallest spatial size consistent with Linear(16*7*7, 512): 176x176.
    N, C, H, W = 2, 4, 176, 176
    x = jax.random.normal(k_in, (N, C, H, W), jnp.float32)
    states = jnp.zeros((N, 8), jnp.float32)
    masks = jnp.ones((N, 1), jnp.float32)

    params = init_params(C, k_p)
    prep = prepare_params(params)           # one-time, outside the hot path

    fwd = jax.jit(convpolicy_forward)
    hidden_critic, hidden_actor, states_out = fwd(x, states, masks, prep)
    hidden_critic = jax.block_until_ready(hidden_critic)

    assert hidden_critic.shape == (N, 512)
    ref = jax.jit(reference_forward)(x, params)
    # bf16 matmul inputs + bf16 activation storage vs f32 HIGHEST reference:
    # tolerance relaxed to 5e-2 per review guidance.
    np.testing.assert_allclose(np.asarray(hidden_critic), np.asarray(ref),
                               rtol=5e-2, atol=5e-2)
    print("KERNEL_OK")
</pallas_src>

<mosaic_0001>
module attributes {stable_mosaic.version = 11 : i64} {
  func.func @_wx_bias_relu_kernel(%arg0: i32, %arg1: i32, %arg2: memref<1x256x512xbf16, #tpu.memory_space<vmem>>, %arg3: memref<32x256xbf16, #tpu.memory_space<vmem>>, %arg4: memref<32x1xf32, #tpu.memory_space<vmem>>, %arg5: memref<1x32x512xbf16, #tpu.memory_space<vmem>>) attributes {dimension_semantics = [#tpu.dimension_semantics<parallel>, #tpu.dimension_semantics<parallel>], iteration_bounds = array<i64: 2, 4>, scalar_prefetch = 0 : i64, scratch_operands = 0 : i64, tpu.core_type = #tpu.core_type<tc>, window_params = [{transform_indices = @transform_0, window_bounds = array<i64: 1, 256, 512>}, {pipeline_mode = #tpu.pipeline_mode<synchronous>, transform_indices = @transform_1, window_bounds = array<i64: 32, 256>}, {pipeline_mode = #tpu.pipeline_mode<synchronous>, transform_indices = @transform_2, window_bounds = array<i64: 32, 1>}, {transform_indices = @transform_3, window_bounds = array<i64: 1, 32, 512>}]} {
    %c0 = arith.constant 0 : index
    %c0_0 = arith.constant 0 : index
    %0 = vector.load %arg3[%c0, %c0_0] : memref<32x256xbf16, #tpu.memory_space<vmem>>, vector<32x256xbf16>
    %c0_1 = arith.constant 0 : index
    %c0_2 = arith.constant 0 : index
    %c0_3 = arith.constant 0 : index
    %1 = vector.load %arg2[%c0_1, %c0_2, %c0_3] : memref<1x256x512xbf16, #tpu.memory_space<vmem>>, vector<1x256x512xbf16>
    %2 = vector.shape_cast %1 : vector<1x256x512xbf16> to vector<256x512xbf16>
    %cst = arith.constant dense<0.000000e+00> : vector<32x512xf32>
    %3 = tpu.matmul %0, %2, %cst {dimension_numbers = #tpu.dot_dimension_numbers<[1], [0], [0], [1], [0, 0, 1, 1], [], []>} : vector<32x256xbf16>, vector<256x512xbf16>, vector<32x512xf32> -> vector<32x512xf32>
    %c0_4 = arith.constant 0 : index
    %c0_5 = arith.constant 0 : index
    %4 = vector.load %arg4[%c0_4, %c0_5] : memref<32x1xf32, #tpu.memory_space<vmem>>, vector<32x1xf32>
    %5 = vector.broadcast %4 : vector<32x1xf32> to vector<32x512xf32>
    %6 = arith.addf %3, %5 : vector<32x512xf32>
    %cst_6 = arith.constant 0.000000e+00 : f32
    %7 = vector.broadcast %cst_6 : f32 to vector<32x512xf32>
    %8 = arith.maximumf %6, %7 : vector<32x512xf32>
    %9 = arith.truncf %8 : vector<32x512xf32> to vector<32x512xbf16>
    %c0_7 = arith.constant 0 : index
    %c0_8 = arith.constant 0 : index
    %c0_9 = arith.constant 0 : index
    %10 = vector.load %arg5[%c0_7, %c0_8, %c0_9] : memref<1x32x512xbf16, #tpu.memory_space<vmem>>, vector<1x32x512xbf16>
    %11 = vector.shape_cast %10 : vector<1x32x512xbf16> to vector<32x512xbf16>
    %12 = vector.shape_cast %9 : vector<32x512xbf16> to vector<1x32x512xbf16>
    tpu.vector_store %arg5[%c0_7, %c0_8, %c0_9], %12 {strides = array<i32>} : memref<1x32x512xbf16, #tpu.memory_space<vmem>>, vector<1x32x512xbf16>,
    return
  }
  func.func @transform_0(%arg0: i32, %arg1: i32) -> (i32, i32, i32) {
    %c0_i32 = arith.constant 0 : i32
    %c0_i32_0 = arith.constant 0 : i32
    return %arg0, %c0_i32, %arg1 : i32, i32, i32
  }
  func.func @transform_1(%arg0: i32, %arg1: i32) -> (i32, i32) {
    %c0_i32 = arith.constant 0 : i32
    %c0_i32_0 = arith.constant 0 : i32
    %c0_i32_1 = arith.constant 0 : i32
    return %c0_i32, %c0_i32_0 : i32, i32
  }
  func.func @transform_2(%arg0: i32, %arg1: i32) -> (i32, i32) {
    %c0_i32 = arith.constant 0 : i32
    %c0_i32_0 = arith.constant 0 : i32
    %c0_i32_1 = arith.constant 0 : i32
    return %c0_i32, %c0_i32_0 : i32, i32
  }
  func.func @transform_3(%arg0: i32, %arg1: i32) -> (i32, i32, i32) {
    %c0_i32 = arith.constant 0 : i32
    %c0_i32_0 = arith.constant 0 : i32
    return %arg0, %c0_i32, %arg1 : i32, i32, i32
  }
}

module attributes {stable_mosaic.version = 11 : i64} {
  func.func @_wx_bias_relu_kernel(%arg0: i32, %arg1: i32, %arg2: memref<1x800x400xbf16, #tpu.memory_space<vmem>>, %arg3: memref<64x800xbf16, #tpu.memory_space<vmem>>, %arg4: memref<64x1xf32, #tpu.memory_space<vmem>>, %arg5: memref<1x64x400xbf16, #tpu.memory_space<vmem>>) attributes {dimension_semantics = [#tpu.dimension_semantics<parallel>, #tpu.dimension_semantics<parallel>], iteration_bounds = array<i64: 2, 1>, scalar_prefetch = 0 : i64, scratch_operands = 0 : i64, tpu.core_type = #tpu.core_type<tc>, window_params = [{transform_indices = @transform_0, window_bounds = array<i64: 1, 800, 400>}, {pipeline_mode = #tpu.pipeline_mode<synchronous>, transform_indices = @transform_1, window_bounds = array<i64: 64, 800>}, {pipeline_mode = #tpu.pipeline_mode<synchronous>, transform_indices = @transform_2, window_bounds = array<i64: 64, 1>}, {transform_indices = @transform_3, window_bounds = array<i64: 1, 64, 400>}]} {
    %c0 = arith.constant 0 : index
    %c0_0 = arith.constant 0 : index
    %0 = vector.load %arg3[%c0, %c0_0] : memref<64x800xbf16, #tpu.memory_space<vmem>>, vector<64x800xbf16>
    %c0_1 = arith.constant 0 : index
    %c0_2 = arith.constant 0 : index
    %c0_3 = arith.constant 0 : index
    %1 = vector.load %arg2[%c0_1, %c0_2, %c0_3] : memref<1x800x400xbf16, #tpu.memory_space<vmem>>, vector<1x800x400xbf16>
    %2 = vector.shape_cast %1 : vector<1x800x400xbf16> to vector<800x400xbf16>
    %cst = arith.constant dense<0.000000e+00> : vector<64x400xf32>
    %3 = tpu.matmul %0, %2, %cst {dimension_numbers = #tpu.dot_dimension_numbers<[1], [0], [0], [1], [0, 0, 1, 1], [], []>} : vector<64x800xbf16>, vector<800x400xbf16>, vector<64x400xf32> -> vector<64x400xf32>
    %c0_4 = arith.constant 0 : index
    %c0_5 = arith.constant 0 : index
    %4 = vector.load %arg4[%c0_4, %c0_5] : memref<64x1xf32, #tpu.memory_space<vmem>>, vector<64x1xf32>
    %5 = vector.broadcast %4 : vector<64x1xf32> to vector<64x400xf32>
    %6 = arith.addf %3, %5 : vector<64x400xf32>
    %cst_6 = arith.constant 0.000000e+00 : f32
    %7 = vector.broadcast %cst_6 : f32 to vector<64x400xf32>
    %8 = arith.maximumf %6, %7 : vector<64x400xf32>
    %9 = arith.truncf %8 : vector<64x400xf32> to vector<64x400xbf16>
    %c0_7 = arith.constant 0 : index
    %c0_8 = arith.constant 0 : index
    %c0_9 = arith.constant 0 : index
    %10 = vector.load %arg5[%c0_7, %c0_8, %c0_9] : memref<1x64x400xbf16, #tpu.memory_space<vmem>>, vector<1x64x400xbf16>
    %11 = vector.shape_cast %10 : vector<1x64x400xbf16> to vector<64x400xbf16>
    %12 = vector.shape_cast %9 : vector<64x400xbf16> to vector<1x64x400xbf16>
    tpu.vector_store %arg5[%c0_7, %c0_8, %c0_9], %12 {strides = array<i32>} : memref<1x64x400xbf16, #tpu.memory_space<vmem>>, vector<1x64x400xbf16>,
    return
  }
  func.func @transform_0(%arg0: i32, %arg1: i32) -> (i32, i32, i32) {
    %c0_i32 = arith.constant 0 : i32
    %c0_i32_0 = arith.constant 0 : i32
    return %arg0, %c0_i32, %arg1 : i32, i32, i32
  }
  func.func @transform_1(%arg0: i32, %arg1: i32) -> (i32, i32) {
    %c0_i32 = arith.constant 0 : i32
    %c0_i32_0 = arith.constant 0 : i32
    %c0_i32_1 = arith.constant 0 : i32
    return %c0_i32, %c0_i32_0 : i32, i32
  }
  func.func @transform_2(%arg0: i32, %arg1: i32) -> (i32, i32) {
    %c0_i32 = arith.constant 0 : i32
    %c0_i32_0 = arith.constant 0 : i32
    %c0_i32_1 = arith.constant 0 : i32
    return %c0_i32, %c0_i32_0 : i32, i32
  }
  func.func @transform_3(%arg0: i32, %arg1: i32) -> (i32, i32, i32) {
    %c0_i32 = arith.constant 0 : i32
    %c0_i32_0 = arith.constant 0 : i32
    return %arg0, %c0_i32, %arg1 : i32, i32, i32
  }
}

module attributes {stable_mosaic.version = 11 : i64} {
  func.func @_wx_bias_relu_kernel(%arg0: i32, %arg1: i32, %arg2: memref<1x1024x81xbf16, #tpu.memory_space<vmem>>, %arg3: memref<32x1024xbf16, #tpu.memory_space<vmem>>, %arg4: memref<32x1xf32, #tpu.memory_space<vmem>>, %arg5: memref<1x32x81xbf16, #tpu.memory_space<vmem>>) attributes {dimension_semantics = [#tpu.dimension_semantics<parallel>, #tpu.dimension_semantics<parallel>], iteration_bounds = array<i64: 2, 1>, scalar_prefetch = 0 : i64, scratch_operands = 0 : i64, tpu.core_type = #tpu.core_type<tc>, window_params = [{transform_indices = @transform_0, window_bounds = array<i64: 1, 1024, 81>}, {pipeline_mode = #tpu.pipeline_mode<synchronous>, transform_indices = @transform_1, window_bounds = array<i64: 32, 1024>}, {pipeline_mode = #tpu.pipeline_mode<synchronous>, transform_indices = @transform_2, window_bounds = array<i64: 32, 1>}, {transform_indices = @transform_3, window_bounds = array<i64: 1, 32, 81>}]} {
    %c0 = arith.constant 0 : index
    %c0_0 = arith.constant 0 : index
    %0 = vector.load %arg3[%c0, %c0_0] : memref<32x1024xbf16, #tpu.memory_space<vmem>>, vector<32x1024xbf16>
    %c0_1 = arith.constant 0 : index
    %c0_2 = arith.constant 0 : index
    %c0_3 = arith.constant 0 : index
    %1 = vector.load %arg2[%c0_1, %c0_2, %c0_3] : memref<1x1024x81xbf16, #tpu.memory_space<vmem>>, vector<1x1024x81xbf16>
    %2 = vector.shape_cast %1 : vector<1x1024x81xbf16> to vector<1024x81xbf16>
    %cst = arith.constant dense<0.000000e+00> : vector<32x81xf32>
    %3 = tpu.matmul %0, %2, %cst {dimension_numbers = #tpu.dot_dimension_numbers<[1], [0], [0], [1], [0, 0, 1, 1], [], []>} : vector<32x1024xbf16>, vector<1024x81xbf16>, vector<32x81xf32> -> vector<32x81xf32>
    %c0_4 = arith.constant 0 : index
    %c0_5 = arith.constant 0 : index
    %4 = vector.load %arg4[%c0_4, %c0_5] : memref<32x1xf32, #tpu.memory_space<vmem>>, vector<32x1xf32>
    %5 = vector.broadcast %4 : vector<32x1xf32> to vector<32x81xf32>
    %6 = arith.addf %3, %5 : vector<32x81xf32>
    %cst_6 = arith.constant 0.000000e+00 : f32
    %7 = vector.broadcast %cst_6 : f32 to vector<32x81xf32>
    %8 = arith.maximumf %6, %7 : vector<32x81xf32>
    %9 = arith.truncf %8 : vector<32x81xf32> to vector<32x81xbf16>
    %c0_7 = arith.constant 0 : index
    %c0_8 = arith.constant 0 : index
    %c0_9 = arith.constant 0 : index
    %10 = vector.load %arg5[%c0_7, %c0_8, %c0_9] : memref<1x32x81xbf16, #tpu.memory_space<vmem>>, vector<1x32x81xbf16>
    %11 = vector.shape_cast %10 : vector<1x32x81xbf16> to vector<32x81xbf16>
    %12 = vector.shape_cast %9 : vector<32x81xbf16> to vector<1x32x81xbf16>
    tpu.vector_store %arg5[%c0_7, %c0_8, %c0_9], %12 {strides = array<i32>} : memref<1x32x81xbf16, #tpu.memory_space<vmem>>, vector<1x32x81xbf16>,
    return
  }
  func.func @transform_0(%arg0: i32, %arg1: i32) -> (i32, i32, i32) {
    %c0_i32 = arith.constant 0 : i32
    %c0_i32_0 = arith.constant 0 : i32
    return %arg0, %c0_i32, %arg1 : i32, i32, i32
  }
  func.func @transform_1(%arg0: i32, %arg1: i32) -> (i32, i32) {
    %c0_i32 = arith.constant 0 : i32
    %c0_i32_0 = arith.constant 0 : i32
    %c0_i32_1 = arith.constant 0 : i32
    return %c0_i32, %c0_i32_0 : i32, i32
  }
  func.func @transform_2(%arg0: i32, %arg1: i32) -> (i32, i32) {
    %c0_i32 = arith.constant 0 : i32
    %c0_i32_0 = arith.constant 0 : i32
    %c0_i32_1 = arith.constant 0 : i32
    return %c0_i32, %c0_i32_0 : i32, i32
  }
  func.func @transform_3(%arg0: i32, %arg1: i32) -> (i32, i32, i32) {
    %c0_i32 = arith.constant 0 : i32
    %c0_i32_0 = arith.constant 0 : i32
    return %arg0, %c0_i32, %arg1 : i32, i32, i32
  }
}

module attributes {stable_mosaic.version = 11 : i64} {
  func.func @_wx_bias_relu_kernel(%arg0: i32, %arg1: i32, %arg2: memref<1x288x49xbf16, #tpu.memory_space<vmem>>, %arg3: memref<16x288xbf16, #tpu.memory_space<vmem>>, %arg4: memref<16x1xf32, #tpu.memory_space<vmem>>, %arg5: memref<1x16x49xbf16, #tpu.memory_space<vmem>>) attributes {dimension_semantics = [#tpu.dimension_semantics<parallel>, #tpu.dimension_semantics<parallel>], iteration_bounds = array<i64: 2, 1>, scalar_prefetch = 0 : i64, scratch_operands = 0 : i64, tpu.core_type = #tpu.core_type<tc>, window_params = [{transform_indices = @transform_0, window_bounds = array<i64: 1, 288, 49>}, {pipeline_mode = #tpu.pipeline_mode<synchronous>, transform_indices = @transform_1, window_bounds = array<i64: 16, 288>}, {pipeline_mode = #tpu.pipeline_mode<synchronous>, transform_indices = @transform_2, window_bounds = array<i64: 16, 1>}, {transform_indices = @transform_3, window_bounds = array<i64: 1, 16, 49>}]} {
    %c0 = arith.constant 0 : index
    %c0_0 = arith.constant 0 : index
    %0 = vector.load %arg3[%c0, %c0_0] : memref<16x288xbf16, #tpu.memory_space<vmem>>, vector<16x288xbf16>
    %c0_1 = arith.constant 0 : index
    %c0_2 = arith.constant 0 : index
    %c0_3 = arith.constant 0 : index
    %1 = vector.load %arg2[%c0_1, %c0_2, %c0_3] : memref<1x288x49xbf16, #tpu.memory_space<vmem>>, vector<1x288x49xbf16>
    %2 = vector.shape_cast %1 : vector<1x288x49xbf16> to vector<288x49xbf16>
    %cst = arith.constant dense<0.000000e+00> : vector<16x49xf32>
    %3 = tpu.matmul %0, %2, %cst {dimension_numbers = #tpu.dot_dimension_numbers<[1], [0], [0], [1], [0, 0, 1, 1], [], []>} : vector<16x288xbf16>, vector<288x49xbf16>, vector<16x49xf32> -> vector<16x49xf32>
    %c0_4 = arith.constant 0 : index
    %c0_5 = arith.constant 0 : index
    %4 = vector.load %arg4[%c0_4, %c0_5] : memref<16x1xf32, #tpu.memory_space<vmem>>, vector<16x1xf32>
    %5 = vector.broadcast %4 : vector<16x1xf32> to vector<16x49xf32>
    %6 = arith.addf %3, %5 : vector<16x49xf32>
    %cst_6 = arith.constant 0.000000e+00 : f32
    %7 = vector.broadcast %cst_6 : f32 to vector<16x49xf32>
    %8 = arith.maximumf %6, %7 : vector<16x49xf32>
    %9 = arith.truncf %8 : vector<16x49xf32> to vector<16x49xbf16>
    %c0_7 = arith.constant 0 : index
    %c0_8 = arith.constant 0 : index
    %c0_9 = arith.constant 0 : index
    %10 = vector.load %arg5[%c0_7, %c0_8, %c0_9] : memref<1x16x49xbf16, #tpu.memory_space<vmem>>, vector<1x16x49xbf16>
    %11 = vector.shape_cast %10 : vector<1x16x49xbf16> to vector<16x49xbf16>
    %12 = vector.shape_cast %9 : vector<16x49xbf16> to vector<1x16x49xbf16>
    tpu.vector_store %arg5[%c0_7, %c0_8, %c0_9], %12 {strides = array<i32>} : memref<1x16x49xbf16, #tpu.memory_space<vmem>>, vector<1x16x49xbf16>,
    return
  }
  func.func @transform_0(%arg0: i32, %arg1: i32) -> (i32, i32, i32) {
    %c0_i32 = arith.constant 0 : i32
    %c0_i32_0 = arith.constant 0 : i32
    return %arg0, %c0_i32, %arg1 : i32, i32, i32
  }
  func.func @transform_1(%arg0: i32, %arg1: i32) -> (i32, i32) {
    %c0_i32 = arith.constant 0 : i32
    %c0_i32_0 = arith.constant 0 : i32
    %c0_i32_1 = arith.constant 0 : i32
    return %c0_i32, %c0_i32_0 : i32, i32
  }
  func.func @transform_2(%arg0: i32, %arg1: i32) -> (i32, i32) {
    %c0_i32 = arith.constant 0 : i32
    %c0_i32_0 = arith.constant 0 : i32
    %c0_i32_1 = arith.constant 0 : i32
    return %c0_i32, %c0_i32_0 : i32, i32
  }
  func.func @transform_3(%arg0: i32, %arg1: i32) -> (i32, i32, i32) {
    %c0_i32 = arith.constant 0 : i32
    %c0_i32_0 = arith.constant 0 : i32
    return %arg0, %c0_i32, %arg1 : i32, i32, i32
  }
}

module attributes {stable_mosaic.version = 11 : i64} {
  func.func @_xw_bias_relu_kernel(%arg0: i32, %arg1: memref<2x784xbf16, #tpu.memory_space<vmem>>, %arg2: memref<784x256xbf16, #tpu.memory_space<vmem>>, %arg3: memref<1x256xf32, #tpu.memory_space<vmem>>, %arg4: memref<2x256xf32, #tpu.memory_space<vmem>>) attributes {dimension_semantics = [#tpu.dimension_semantics<parallel>], iteration_bounds = array<i64: 2>, scalar_prefetch = 0 : i64, scratch_operands = 0 : i64, tpu.core_type = #tpu.core_type<tc>, window_params = [{pipeline_mode = #tpu.pipeline_mode<synchronous>, transform_indices = @transform_0, window_bounds = array<i64: 2, 784>}, {transform_indices = @transform_1, window_bounds = array<i64: 784, 256>}, {transform_indices = @transform_2, window_bounds = array<i64: 1, 256>}, {transform_indices = @transform_3, window_bounds = array<i64: 2, 256>}]} {
    %c0 = arith.constant 0 : index
    %c0_0 = arith.constant 0 : index
    %0 = vector.load %arg1[%c0, %c0_0] : memref<2x784xbf16, #tpu.memory_space<vmem>>, vector<2x784xbf16>
    %c0_1 = arith.constant 0 : index
    %c0_2 = arith.constant 0 : index
    %1 = vector.load %arg2[%c0_1, %c0_2] : memref<784x256xbf16, #tpu.memory_space<vmem>>, vector<784x256xbf16>
    %cst = arith.constant dense<0.000000e+00> : vector<2x256xf32>
    %2 = tpu.matmul %0, %1, %cst {dimension_numbers = #tpu.dot_dimension_numbers<[1], [0], [0], [1], [0, 0, 1, 1], [], []>} : vector<2x784xbf16>, vector<784x256xbf16>, vector<2x256xf32> -> vector<2x256xf32>
    %c0_3 = arith.constant 0 : index
    %c0_4 = arith.constant 0 : index
    %3 = vector.load %arg3[%c0_3, %c0_4] : memref<1x256xf32, #tpu.memory_space<vmem>>, vector<1x256xf32>
    %4 = vector.broadcast %3 : vector<1x256xf32> to vector<2x256xf32>
    %5 = arith.addf %2, %4 : vector<2x256xf32>
    %cst_5 = arith.constant 0.000000e+00 : f32
    %6 = vector.broadcast %cst_5 : f32 to vector<2x256xf32>
    %7 = arith.maximumf %5, %6 : vector<2x256xf32>
    %c0_6 = arith.constant 0 : index
    %c0_7 = arith.constant 0 : index
    %8 = vector.load %arg4[%c0_6, %c0_7] : memref<2x256xf32, #tpu.memory_space<vmem>>, vector<2x256xf32>
    tpu.vector_store %arg4[%c0_6, %c0_7], %7 {strides = array<i32>} : memref<2x256xf32, #tpu.memory_space<vmem>>, vector<2x256xf32>,
    return
  }
  func.func @transform_0(%arg0: i32) -> (i32, i32) {
    %c0_i32 = arith.constant 0 : i32
    %c0_i32_0 = arith.constant 0 : i32
    %c0_i32_1 = arith.constant 0 : i32
    return %c0_i32, %c0_i32_0 : i32, i32
  }
  func.func @transform_1(%arg0: i32) -> (i32, i32) {
    %c0_i32 = arith.constant 0 : i32
    %c0_i32_0 = arith.constant 0 : i32
    return %c0_i32, %arg0 : i32, i32
  }
  func.func @transform_2(%arg0: i32) -> (i32, i32) {
    %c0_i32 = arith.constant 0 : i32
    %c0_i32_0 = arith.constant 0 : i32
    return %c0_i32, %arg0 : i32, i32
  }
  func.func @transform_3(%arg0: i32) -> (i32, i32) {
    %c0_i32 = arith.constant 0 : i32
    %c0_i32_0 = arith.constant 0 : i32
    return %c0_i32, %arg0 : i32, i32
  }
}

</mosaic_0001>

<bundles_post_ra>
// kernel: convpolicy_forward.5
= control target key start
LH: loop header
LB: loop body
LE: loop exit
PB: predicated region body
PF: predicated region fallthrough
CT: control target
= control target key end

     0   :  { %s2589_s12 = smov 0   ;;  %s2591_s13 = smov 0   ;;  %s3696_s0 = inlined_call_operand.vmem [shape: bf16[2,256,1849], index: 0, kind: input, shape index: {}]   ;;  %s3697_s1 = inlined_call_operand.vmem [shape: bf16[32,256], index: 1, kind: input, shape index: {}]   ;;  %s3698_s2 = inlined_call_operand.vmem [shape: f32[32,1], index: 2, kind: input, shape index: {}]   ;;  %s3699_s3 = inlined_call_operand.vmem [shape: bf16[2,32,1849], index: 3, kind: output, shape index: {}]  }
   0x1   :  { %s2593_s14 = smov 0   ;;  %s2595_s15 = smov 0  }
   0x2   :  { %s2597_s16 = smov 0   ;;  %s2599_s17 = smov 0  }
   0x3   :  { %s2601_s18 = smov 0  }
   0x4 LB: > { %s22_s19 = sadd.s32 1, %s2458_s16  ;;  %s25_s20 = sadd.s32 1, %s2462_s17  ;;  %s2466_s18 = sphi %s2601_s18, %s13_s18   ;;  %s2462_s17 = sphi %s2599_s17, %s3731_s17   ;;  %s2458_s16 = sphi %s2597_s16, %s3730_s16   ;;  %s2454_s15 = sphi %s2595_s15, %s3729_s15   ;;  %s2450_s14 = sphi %s2593_s14, %s3728_s14   ;;  %s2446_s13 = sphi %s2591_s13, %s3727_s13   ;;  %s2442_s12 = sphi %s2589_s12, %s3726_s12  }
   0x5   : > { %p23_p0 = scmp.ge.s32.totalorder %s22_s19, 4  ;;  %s1658_s21 = sadd.s32 4294967295, %s2466_s18  }
   0x6   : > { %p41_p1 = scmp.ne.s32.totalorder %s2446_s13, %s2442_s12  ;;  %p42_p2 = scmp.eq.s32.totalorder %s2466_s18, 0 }
   0x7   : > { %s3733_s19 = smov (%p23_p0, %s22_s19), 0  ;;  %s3735_s20 = smov (!%p23_p0, %s25_s20), %s2462_s17 }
   0x8   : > { %p27_p3 = scmp.ge.s32.totalorder %s3735_s20, 2  ;;  %p115_p4 = scmp.eq.s32.totalorder %s1658_s21, 7 }
   0x9   : > { %s30_s22 = ssub.s32 %s2458_s16, %s3733_s19  ;;  %p43_p5 = por %p42_p2, %p41_p1 }
   0xa   : > { %s3737_s20 = smov (%p27_p3, %s3735_s20), 0  ;;  %p2637_p6 = por %p115_p4, %p41_p1 }
   0xb   : > { %s29_s24 = ssub.s32 %s2462_s17, %s3737_s20  ;;  %s34_s26 = sadd.s32 1, %s2446_s13 }
   0xc   : > { %s31_s25 = sor.u32 %s30_s22, %s29_s24  ;;  %p1661_p8 = scmp.ge.s32.totalorder %s2466_s18, 8 }
   0xd   : > { %p32_p7 = scmp.eq.s32.totalorder %s31_s25, 0 }
   0xe   : > { %143 = sbr.rel (%p1661_p8) target bundleno = 186 (0xba), region = 24 }
   0xf   : > { %s2645_s27 = scalar_select %p32_p7, %s2446_s13, %s34_s26  }
  0x13   : > { %146 = sbr.rel (!%p43_p5) target bundleno = 186 (0xba), region = 28  ;;  %s148_s28 = sand.u32 (%p43_p5), 1, %s2446_s13  }
  0x14   : > { %s1663_s29 = sshll.u32 (%p43_p5), %s2458_s16, 2  ;;  %s1662_s30 = sshll.u32 (%p43_p5), %s148_s28, 9 }
  0x15   : > { %s152_s4 = ssub.s32 (%p43_p5), 15, %s1663_s29  ;;  %s2057_s5 = smul.u32 (%p43_p5), 480, %s2462_s17 }
  0x16   : > { %p153_p9 = scmp.lt.s32.totalorder (%p43_p5), %s152_s4, 4  ;;  %s2658_s22 = scalar_lea.vmem (%p43_p5), [#allocation2], %s1662_s30  }
  0x17   : > { %s158_s6 = sadd.s32 (%p43_p5), %s2057_s5, %s1663_s29 }
  0x18   : > { %s3739_s4 = smov (!%p153_p9, %s152_s4), 4  ;;  %s1666_s8 = sshll.u32 %s158_s6, 2 }
  0x19   : > { %s1664_s7 = sshll.u32 %s3739_s4, 7  ;;  %s2654_s11 = scalar_lea.vmem %s3696_s0, %s1666_s8  }
  0x1a   : > { %s2656_s21 = sshll.u32 %s3739_s4, 2  ;;  %p1668_p10 = scmp.eq.s32.totalorder %s1664_s7, 0 }
  0x1b   : > { %p165_p11 = scmp.lt.u32.totalorder (!%p1668_p10), %s2656_s21, 8 }
  0x1c   : > { %164 = sbr.rel (%p1668_p10) target bundleno = 186 (0xba), region = 32 }
  0x21   : > { %168 = sbr.rel (%p165_p11) target bundleno = 146 (0x92), region = 36  ;;  %s2662_s24 = sand.u32 (!%p165_p11), 7, %s2656_s21  }
  0x22   : > { %p247_p12 = scmp.eq.s32.totalorder (!%p165_p11), %s2662_s24, 0  ;;  %p1669_p13 = scmp.ne.s32.totalorder (!%p165_p11), %s2662_s24, 0 }
  0x26   : > { %250 = sbr.rel (%p1669_p13) target bundleno = 76 (0x4c), region = 51  ;;  %s251_s25 = sshrl.u32 (!%p1669_p13), %s2656_s21, 3 }
  0x27   : > { %s3701_s26 = smov (!%p1669_p13), %s2658_s22  ;;  %s3702_s28 = smov (!%p1669_p13), %s2654_s11 }
  0x28   : > { %s2673_s29 = smov (!%p1669_p13), 0   ;;  %s2675_s30 = smov (!%p1669_p13), 0  }
  0x2b LB: >> { %v261_v0 = vld [vmem:[%s2474_s28] sm:$0xff]  ;;  %v265_v2 = vld [vmem:[%s2474_s28 + $0x78] sm:$0xff]  ;;  %s325_s4 = sadd.s32 1, %s2478_s29  ;;  %v269_v4 = vld [vmem:[%s2474_s28 + $0xf0] sm:$0xff]  ;;  %s255_s30 = sadd.s32 1, %s2482_s30   ;;  %s2482_s30 = sphi %s2675_s30, %s255_s30   ;;  %s2478_s29 = sphi %s2673_s29, %s3705_s29   ;;  %s2474_s28 = sphi %s3702_s28, %s3704_s28   ;;  %s2470_s26 = sphi %s3701_s26, %s3703_s26  }
  0x2c   : >> { %v263_v1 = vld [vmem:[%s2474_s28 + $0x3c] sm:$0xff]  ;;  %262 = vst [vmem:[%s2470_s26] sm:$0xff] %v261_v0  ;;  %v267_v3 = vld [vmem:[%s2474_s28 + $0xb4] sm:$0xff]  ;;  %p326_p0 = scmp.ge.s32.totalorder %s325_s4, %s251_s25  ;;  %v271_v5 = vld [vmem:[%s2474_s28 + $0x12c] sm:$0xff]  ;;  %p254_p1 = scmp.ge.s32.totalorder %s255_s30, %s251_s25 }
  0x2d   : >> { %264 = vst [vmem:[%s2470_s26 + $0x10] sm:$0xff] %v263_v1  ;;  %v273_v6 = vld [vmem:[%s2474_s28 + $0x168] sm:$0xff]  ;;  %v277_v8 = vld [vmem:[%s2474_s28 + $0x1e0] sm:$0xff]  ;;  %v281_v10 = vld [vmem:[%s2474_s28 + $0x258] sm:$0xff] }
  0x2e   : >> { %266 = vst [vmem:[%s2470_s26 + $0x20] sm:$0xff] %v265_v2  ;;  %s3741_s4 = smov (%p326_p0, %s325_s4), 0  ;;  %v275_v7 = vld [vmem:[%s2474_s28 + $0x1a4] sm:$0xff]  ;;  %v279_v9 = vld [vmem:[%s2474_s28 + $0x21c] sm:$0xff]  ;;  %v283_v11 = vld [vmem:[%s2474_s28 + $0x294] sm:$0xff] }
  0x2f   : >> { %268 = vst [vmem:[%s2470_s26 + $0x30] sm:$0xff] %v267_v3  ;;  %s1671_s5 = sshll.u32 %s3741_s4, 3  ;;  %v285_v12 = vld [vmem:[%s2474_s28 + $0x2d0] sm:$0xff]  ;;  %v289_v14 = vld [vmem:[%s2474_s28 + $0x348] sm:$0xff]  ;;  %v293_v16 = vld [vmem:[%s2474_s28 + $0x3c0] sm:$0xff]  ;;  %s3705_s29 = smov %s3741_s4 }
  0x30   : >> { %270 = vst [vmem:[%s2470_s26 + $0x40] sm:$0xff] %v269_v4  ;;  %s2708_s6 = scalar_lea.vmem %s2654_s11, %s1671_s5   ;;  %s2711_s7 = scalar_lea.vmem %s2658_s22, %s1671_s5 [#allocation2]   ;;  %v287_v13 = vld [vmem:[%s2474_s28 + $0x30c] sm:$0xff]  ;;  %v291_v15 = vld [vmem:[%s2474_s28 + $0x384] sm:$0xff]  ;;  %v295_v17 = vld [vmem:[%s2474_s28 + $0x3fc] sm:$0xff] }
  0x31   : >> { %272 = vst [vmem:[%s2470_s26 + $0x50] sm:$0xff] %v271_v5  ;;  %v297_v18 = vld [vmem:[%s2474_s28 + $0x438] sm:$0xff]  ;;  %v301_v20 = vld [vmem:[%s2474_s28 + $0x4b0] sm:$0xff]  ;;  %v305_v22 = vld [vmem:[%s2474_s28 + $0x528] sm:$0xff] }
  0x32   : >> { %274 = vst [vmem:[%s2470_s26 + $0x60] sm:$0xff] %v273_v6  ;;  %v299_v19 = vld [vmem:[%s2474_s28 + $0x474] sm:$0xff]  ;;  %v303_v21 = vld [vmem:[%s2474_s28 + $0x4ec] sm:$0xff]  ;;  %v307_v23 = vld [vmem:[%s2474_s28 + $0x564] sm:$0xff] }
  0x33   : >> { %276 = vst [vmem:[%s2470_s26 + $0x70] sm:$0xff] %v275_v7  ;;  %v309_v24 = vld [vmem:[%s2474_s28 + $0x5a0] sm:$0xff]  ;;  %v313_v26 = vld [vmem:[%s2474_s28 + $0x618] sm:$0xff]  ;;  %v317_v28 = vld [vmem:[%s2474_s28 + $0x690] sm:$0xff] }
  0x34   : >> { %278 = vst [vmem:[%s2470_s26 + $0x80] sm:$0xff] %v277_v8  ;;  %v311_v25 = vld [vmem:[%s2474_s28 + $0x5dc] sm:$0xff]  ;;  %v315_v27 = vld [vmem:[%s2474_s28 + $0x654] sm:$0xff]  ;;  %v319_v29 = vld [vmem:[%s2474_s28 + $0x6cc] sm:$0xff] }
  0x35   : >> { %280 = vst [vmem:[%s2470_s26 + $0x90] sm:$0xff] %v279_v9  ;;  %v321_v30 = vld [vmem:[%s2474_s28 + $0x708] sm:$0xff] }
  0x36   : >> { %282 = vst [vmem:[%s2470_s26 + $0xa0] sm:$0xff] %v281_v10  ;;  %v323_v31 = vld [vmem:[%s2474_s28 + $0x744] sm:$0xff]  ;;  %s3704_s28 = smov %s2708_s6 }
  0x37   : >> { %284 = vst [vmem:[%s2470_s26 + $0xb0] sm:$0xff] %v283_v11 }
  0x38   : >> { %286 = vst [vmem:[%s2470_s26 + $0xc0] sm:$0xff] %v285_v12 }
  0x39   : >> { %288 = vst [vmem:[%s2470_s26 + $0xd0] sm:$0xff] %v287_v13 }
  0x3a   : >> { %290 = vst [vmem:[%s2470_s26 + $0xe0] sm:$0xff] %v289_v14 }
  0x3b   : >> { %292 = vst [vmem:[%s2470_s26 + $0xf0] sm:$0xff] %v291_v15 }
  0x3c   : >> { %294 = vst [vmem:[%s2470_s26 + $0x100] sm:$0xff] %v293_v16 }
  0x3d   : >> { %296 = vst [vmem:[%s2470_s26 + $0x110] sm:$0xff] %v295_v17 }
  0x3e   : >> { %298 = vst [vmem:[%s2470_s26 + $0x120] sm:$0xff] %v297_v18 }
  0x3f   : >> { %300 = vst [vmem:[%s2470_s26 + $0x130] sm:$0xff] %v299_v19 }
  0x40   : >> { %302 = vst [vmem:[%s2470_s26 + $0x140] sm:$0xff] %v301_v20 }
  0x41   : >> { %304 = vst [vmem:[%s2470_s26 + $0x150] sm:$0xff] %v303_v21 }
  0x42   : >> { %306 = vst [vmem:[%s2470_s26 + $0x160] sm:$0xff] %v305_v22 }
  0x43   : >> { %308 = vst [vmem:[%s2470_s26 + $0x170] sm:$0xff] %v307_v23 }
  0x44   : >> { %310 = vst [vmem:[%s2470_s26 + $0x180] sm:$0xff] %v309_v24 }
  0x45   : >> { %312 = vst [vmem:[%s2470_s26 + $0x190] sm:$0xff] %v311_v25 }
  0x46   : >> { %314 = vst [vmem:[%s2470_s26 + $0x1a0] sm:$0xff] %v313_v26 }
  0x47   : >> { %316 = vst [vmem:[%s2470_s26 + $0x1b0] sm:$0xff] %v315_v27  ;;  %257 = sbr.rel (!%p254_p1) target bundleno = 43 (0x2b), region = 213 }
  0x48   : >> { %318 = vst [vmem:[%s2470_s26 + $0x1c0] sm:$0xff] %v317_v28 }
  0x49   : >> { %320 = vst [vmem:[%s2470_s26 + $0x1d0] sm:$0xff] %v319_v29 }
  0x4a   : >> { %322 = vst [vmem:[%s2470_s26 + $0x1e0] sm:$0xff] %v321_v30 }
  0x4b   : >> { %324 = vst [vmem:[%s2470_s26 + $0x1f0] sm:$0xff] %v323_v31  ;;  %s3703_s26 = smov %s2711_s7 }
  0x4c PF: > { %334 = sbr.rel (%p247_p12) target bundleno = 146 (0x92), region = 62  ;;  %s336_s8 = ssub.s32 (!%p247_p12), %s2656_s21, %s2662_s24 }
  0x4d   : > { %s340_s9 = sshrl.u32 (!%p247_p12), %s2656_s21, 3  ;;  %s2782_s10 = scalar_lea.vmem (!%p247_p12), %s2654_s11, %s336_s8 }
  0x4e   : > { %s2785_s5 = scalar_lea.vmem (!%p247_p12), %s2658_s22, %s336_s8 [#allocation2]  ;;  %s3706_s30 = smov (!%p247_p12), %s2658_s22 }
  0x4f   : > { %s3707_s25 = smov (!%p247_p12), %s2654_s11  ;;  %s2793_s26 = smov (!%p247_p12), 0  }
  0x50   : > { %s2795_s28 = smov (!%p247_p12), 0  }
  0x51 LB: >> { %v350_v32 = vld [vmem:[%s2490_s25] sm:$0xff]  ;;  %v354_v34 = vld [vmem:[%s2490_s25 + $0x78] sm:$0xff]  ;;  %s414_s29 = sadd.s32 1, %s2494_s26  ;;  %v358_v36 = vld [vmem:[%s2490_s25 + $0xf0] sm:$0xff]  ;;  %s344_s28 = sadd.s32 1, %s2498_s28   ;;  %s2498_s28 = sphi %s2795_s28, %s344_s28   ;;  %s2494_s26 = sphi %s2793_s26, %s3710_s26   ;;  %s2490_s25 = sphi %s3707_s25, %s3709_s25   ;;  %s2486_s30 = sphi %s3706_s30, %s3708_s30  }
  0x52   : >> { %v352_v33 = vld [vmem:[%s2490_s25 + $0x3c] sm:$0xff]  ;;  %351 = vst [vmem:[%s2486_s30] sm:$0xff] %v350_v32  ;;  %v356_v35 = vld [vmem:[%s2490_s25 + $0xb4] sm:$0xff]  ;;  %p415_p2 = scmp.ge.s32.totalorder %s414_s29, %s340_s9  ;;  %v360_v37 = vld [vmem:[%s2490_s25 + $0x12c] sm:$0xff]  ;;  %p343_p3 = scmp.ge.s32.totalorder %s344_s28, %s340_s9 }
  0x53   : >> { %353 = vst [vmem:[%s2486_s30 + $0x10] sm:$0xff] %v352_v33  ;;  %v362_v38 = vld [vmem:[%s2490_s25 + $0x168] sm:$0xff]  ;;  %v366_v40 = vld [vmem:[%s2490_s25 + $0x1e0] sm:$0xff]  ;;  %v370_v42 = vld [vmem:[%s2490_s25 + $0x258] sm:$0xff]  ;;  %s2564_s8 = smov (%p343_p3), 1  }
  0x54   : >> { %355 = vst [vmem:[%s2486_s30 + $0x20] sm:$0xff] %v354_v34  ;;  %s3743_s29 = smov (%p415_p2, %s414_s29), 0  ;;  %v364_v39 = vld [vmem:[%s2490_s25 + $0x1a4] sm:$0xff]  ;;  %v368_v41 = vld [vmem:[%s2490_s25 + $0x21c] sm:$0xff]  ;;  %v372_v43 = vld [vmem:[%s2490_s25 + $0x294] sm:$0xff] }
  0x55   : >> { %357 = vst [vmem:[%s2486_s30 + $0x30] sm:$0xff] %v356_v35  ;;  %s1674_s4 = sshll.u32 %s3743_s29, 3  ;;  %v374_v44 = vld [vmem:[%s2490_s25 + $0x2d0] sm:$0xff]  ;;  %v378_v46 = vld [vmem:[%s2490_s25 + $0x348] sm:$0xff]  ;;  %v382_v48 = vld [vmem:[%s2490_s25 + $0x3c0] sm:$0xff]  ;;  %s3710_s26 = smov %s3743_s29 }
  0x56   : >> { %359 = vst [vmem:[%s2486_s30 + $0x40] sm:$0xff] %v358_v36  ;;  %s2828_s6 = scalar_lea.vmem %s2654_s11, %s1674_s4   ;;  %s2831_s7 = scalar_lea.vmem %s2658_s22, %s1674_s4 [#allocation2]   ;;  %v376_v45 = vld [vmem:[%s2490_s25 + $0x30c] sm:$0xff]  ;;  %v380_v47 = vld [vmem:[%s2490_s25 + $0x384] sm:$0xff]  ;;  %v384_v49 = vld [vmem:[%s2490_s25 + $0x3fc] sm:$0xff] }
  0x57   : >> { %361 = vst [vmem:[%s2486_s30 + $0x50] sm:$0xff] %v360_v37  ;;  %v386_v50 = vld [vmem:[%s2490_s25 + $0x438] sm:$0xff]  ;;  %v390_v52 = vld [vmem:[%s2490_s25 + $0x4b0] sm:$0xff]  ;;  %v394_v54 = vld [vmem:[%s2490_s25 + $0x528] sm:$0xff]  ;;  %s421_s29 = sshll.u32 (%p343_p3), %s2564_s8, %s2662_s24 }
  0x58   : >> { %363 = vst [vmem:[%s2486_s30 + $0x60] sm:$0xff] %v362_v38  ;;  %v388_v51 = vld [vmem:[%s2490_s25 + $0x474] sm:$0xff]  ;;  %v392_v53 = vld [vmem:[%s2490_s25 + $0x4ec] sm:$0xff]  ;;  %v396_v55 = vld [vmem:[%s2490_s25 + $0x564] sm:$0xff]  ;;  %s2897_s4 = sadd.s32 (%p343_p3), 4294967295, %s421_s29 }
  0x59   : >> { %365 = vst [vmem:[%s2486_s30 + $0x70] sm:$0xff] %v364_v39  ;;  %v398_v56 = vld [vmem:[%s2490_s25 + $0x5a0] sm:$0xff]  ;;  %v402_v58 = vld [vmem:[%s2490_s25 + $0x618] sm:$0xff]  ;;  %v406_v60 = vld [vmem:[%s2490_s25 + $0x690] sm:$0xff] }
  0x5a   : >> { %367 = vst [vmem:[%s2486_s30 + $0x80] sm:$0xff] %v366_v40  ;;  %v400_v57 = vld [vmem:[%s2490_s25 + $0x5dc] sm:$0xff]  ;;  %v404_v59 = vld [vmem:[%s2490_s25 + $0x654] sm:$0xff]  ;;  %v408_v61 = vld [vmem:[%s2490_s25 + $0x6cc] sm:$0xff] }
  0x5b   : >> { %369 = vst [vmem:[%s2486_s30 + $0x90] sm:$0xff] %v368_v41  ;;  %v410_v62 = vld [vmem:[%s2490_s25 + $0x708] sm:$0xff]  ;;  %v431_v0 = vld [vmem:[%s2782_s10] sm:%s2897_s4] (%p343_p3) }
  0x5c   : >> { %371 = vst [vmem:[%s2486_s30 + $0xa0] sm:$0xff] %v370_v42  ;;  %v412_v63 = vld [vmem:[%s2490_s25 + $0x744] sm:$0xff]  ;;  %s3709_s25 = smov %s2828_s6  ;;  %v433_v1 = vld [vmem:[%s2782_s10 + $0x3c] sm:%s2897_s4] (%p343_p3) }
  0x5d   : >> { %373 = vst [vmem:[%s2486_s30 + $0xb0] sm:$0xff] %v372_v43  ;;  %v435_v2 = vld [vmem:[%s2782_s10 + $0x78] sm:%s2897_s4] (%p343_p3) }
  0x5e   : >> { %375 = vst [vmem:[%s2486_s30 + $0xc0] sm:$0xff] %v374_v44  ;;  %v437_v3 = vld [vmem:[%s2782_s10 + $0xb4] sm:%s2897_s4] (%p343_p3) }
  0x5f   : >> { %377 = vst [vmem:[%s2486_s30 + $0xd0] sm:$0xff] %v376_v45  ;;  %v439_v4 = vld [vmem:[%s2782_s10 + $0xf0] sm:%s2897_s4] (%p343_p3) }
  0x60   : >> { %379 = vst [vmem:[%s2486_s30 + $0xe0] sm:$0xff] %v378_v46  ;;  %v441_v5 = vld [vmem:[%s2782_s10 + $0x12c] sm:%s2897_s4] (%p343_p3) }
  0x61   : >> { %381 = vst [vmem:[%s2486_s30 + $0xf0] sm:$0xff] %v380_v47  ;;  %v443_v6 = vld [vmem:[%s2782_s10 + $0x168] sm:%s2897_s4] (%p343_p3) }
  0x62   : >> { %383 = vst [vmem:[%s2486_s30 + $0x100] sm:$0xff] %v382_v48  ;;  %v445_v7 = vld [vmem:[%s2782_s10 + $0x1a4] sm:%s2897_s4] (%p343_p3) }
  0x63   : >> { %385 = vst [vmem:[%s2486_s30 + $0x110] sm:$0xff] %v384_v49  ;;  %v447_v8 = vld [vmem:[%s2782_s10 + $0x1e0] sm:%s2897_s4] (%p343_p3) }
  0x64   : >> { %387 = vst [vmem:[%s2486_s30 + $0x120] sm:$0xff] %v386_v50  ;;  %v449_v9 = vld [vmem:[%s2782_s10 + $0x21c] sm:%s2897_s4] (%p343_p3) }
  0x65   : >> { %389 = vst [vmem:[%s2486_s30 + $0x130] sm:$0xff] %v388_v51  ;;  %v451_v10 = vld [vmem:[%s2782_s10 + $0x258] sm:%s2897_s4] (%p343_p3) }
  0x66   : >> { %391 = vst [vmem:[%s2486_s30 + $0x140] sm:$0xff] %v390_v52  ;;  %v453_v11 = vld [vmem:[%s2782_s10 + $0x294] sm:%s2897_s4] (%p343_p3) }
  0x67   : >> { %393 = vst [vmem:[%s2486_s30 + $0x150] sm:$0xff] %v392_v53  ;;  %v455_v12 = vld [vmem:[%s2782_s10 + $0x2d0] sm:%s2897_s4] (%p343_p3) }
  0x68   : >> { %395 = vst [vmem:[%s2486_s30 + $0x160] sm:$0xff] %v394_v54  ;;  %v457_v13 = vld [vmem:[%s2782_s10 + $0x30c] sm:%s2897_s4] (%p343_p3) }
  0x69   : >> { %397 = vst [vmem:[%s2486_s30 + $0x170] sm:$0xff] %v396_v55  ;;  %v459_v14 = vld [vmem:[%s2782_s10 + $0x348] sm:%s2897_s4] (%p343_p3) }
  0x6a   : >> { %399 = vst [vmem:[%s2486_s30 + $0x180] sm:$0xff] %v398_v56  ;;  %v461_v15 = vld [vmem:[%s2782_s10 + $0x384] sm:%s2897_s4] (%p343_p3) }
  0x6b   : >> { %401 = vst [vmem:[%s2486_s30 + $0x190] sm:$0xff] %v400_v57  ;;  %v463_v16 = vld [vmem:[%s2782_s10 + $0x3c0] sm:%s2897_s4] (%p343_p3) }
  0x6c   : >> { %403 = vst [vmem:[%s2486_s30 + $0x1a0] sm:$0xff] %v402_v58  ;;  %v465_v17 = vld [vmem:[%s2782_s10 + $0x3fc] sm:%s2897_s4] (%p343_p3) }
  0x6d   : >> { %405 = vst [vmem:[%s2486_s30 + $0x1b0] sm:$0xff] %v404_v59  ;;  %346 = sbr.rel (!%p343_p3) target bundleno = 81 (0x51), region = 224  ;;  %v467_v18 = vld [vmem:[%s2782_s10 + $0x438] sm:%s2897_s4] (%p343_p3) }
  0x6e   : >> { %407 = vst [vmem:[%s2486_s30 + $0x1c0] sm:$0xff] %v406_v60  ;;  %v469_v19 = vld [vmem:[%s2782_s10 + $0x474] sm:%s2897_s4] (%p343_p3) }
  0x6f   : >> { %409 = vst [vmem:[%s2486_s30 + $0x1d0] sm:$0xff] %v408_v61  ;;  %v471_v20 = vld [vmem:[%s2782_s10 + $0x4b0] sm:%s2897_s4] (%p343_p3) }
  0x70   : >> { %411 = vst [vmem:[%s2486_s30 + $0x1e0] sm:$0xff] %v410_v62  ;;  %v473_v21 = vld [vmem:[%s2782_s10 + $0x4ec] sm:%s2897_s4] (%p343_p3) }
  0x71   : >> { %413 = vst [vmem:[%s2486_s30 + $0x1f0] sm:$0xff] %v412_v63  ;;  %s3708_s30 = smov %s2831_s7  ;;  %v475_v22 = vld [vmem:[%s2782_s10 + $0x528] sm:%s2897_s4] (%p343_p3) }
  0x72   : > { %432 = vst [vmem:[%s2785_s5] sm:%s2897_s4] %v431_v0  ;;  %v477_v23 = vld [vmem:[%s2782_s10 + $0x564] sm:%s2897_s4] }
  0x73   : > { %434 = vst [vmem:[%s2785_s5 + $0x10] sm:%s2897_s4] %v433_v1  ;;  %v479_v24 = vld [vmem:[%s2782_s10 + $0x5a0] sm:%s2897_s4] }
  0x74   : > { %436 = vst [vmem:[%s2785_s5 + $0x20] sm:%s2897_s4] %v435_v2  ;;  %v481_v25 = vld [vmem:[%s2782_s10 + $0x5dc] sm:%s2897_s4] }
  0x75   : > { %438 = vst [vmem:[%s2785_s5 + $0x30] sm:%s2897_s4] %v437_v3  ;;  %v483_v26 = vld [vmem:[%s2782_s10 + $0x618] sm:%s2897_s4] }
  0x76   : > { %440 = vst [vmem:[%s2785_s5 + $0x40] sm:%s2897_s4] %v439_v4  ;;  %v485_v27 = vld [vmem:[%s2782_s10 + $0x654] sm:%s2897_s4] }
  0x77   : > { %442 = vst [vmem:[%s2785_s5 + $0x50] sm:%s2897_s4] %v441_v5  ;;  %v487_v28 = vld [vmem:[%s2782_s10 + $0x690] sm:%s2897_s4] }
  0x78   : > { %444 = vst [vmem:[%s2785_s5 + $0x60] sm:%s2897_s4] %v443_v6  ;;  %v489_v29 = vld [vmem:[%s2782_s10 + $0x6cc] sm:%s2897_s4] }
  0x79   : > { %446 = vst [vmem:[%s2785_s5 + $0x70] sm:%s2897_s4] %v445_v7  ;;  %v491_v30 = vld [vmem:[%s2782_s10 + $0x708] sm:%s2897_s4] }
  0x7a   : > { %448 = vst [vmem:[%s2785_s5 + $0x80] sm:%s2897_s4] %v447_v8  ;;  %v493_v31 = vld [vmem:[%s2782_s10 + $0x744] sm:%s2897_s4] }
  0x7b   : > { %450 = vst [vmem:[%s2785_s5 + $0x90] sm:%s2897_s4] %v449_v9 }
  0x7c   : > { %452 = vst [vmem:[%s2785_s5 + $0xa0] sm:%s2897_s4] %v451_v10 }
  0x7d   : > { %454 = vst [vmem:[%s2785_s5 + $0xb0] sm:%s2897_s4] %v453_v11 }
  0x7e   : > { %456 = vst [vmem:[%s2785_s5 + $0xc0] sm:%s2897_s4] %v455_v12 }
  0x7f   : > { %458 = vst [vmem:[%s2785_s5 + $0xd0] sm:%s2897_s4] %v457_v13 }
  0x80   : > { %460 = vst [vmem:[%s2785_s5 + $0xe0] sm:%s2897_s4] %v459_v14 }
  0x81   : > { %462 = vst [vmem:[%s2785_s5 + $0xf0] sm:%s2897_s4] %v461_v15 }
  0x82   : > { %464 = vst [vmem:[%s2785_s5 + $0x100] sm:%s2897_s4] %v463_v16 }
  0x83   : > { %466 = vst [vmem:[%s2785_s5 + $0x110] sm:%s2897_s4] %v465_v17 }
  0x84   : > { %468 = vst [vmem:[%s2785_s5 + $0x120] sm:%s2897_s4] %v467_v18 }
  0x85   : > { %470 = vst [vmem:[%s2785_s5 + $0x130] sm:%s2897_s4] %v469_v19 }
  0x86   : > { %472 = vst [vmem:[%s2785_s5 + $0x140] sm:%s2897_s4] %v471_v20 }
  0x87   : > { %474 = vst [vmem:[%s2785_s5 + $0x150] sm:%s2897_s4] %v473_v21 }
  0x88   : > { %476 = vst [vmem:[%s2785_s5 + $0x160] sm:%s2897_s4] %v475_v22 }
  0x89   : > { %478 = vst [vmem:[%s2785_s5 + $0x170] sm:%s2897_s4] %v477_v23 }
  0x8a   : > { %480 = vst [vmem:[%s2785_s5 + $0x180] sm:%s2897_s4] %v479_v24 }
  0x8b   : > { %482 = vst [vmem:[%s2785_s5 + $0x190] sm:%s2897_s4] %v481_v25 }
  0x8c   : > { %484 = vst [vmem:[%s2785_s5 + $0x1a0] sm:%s2897_s4] %v483_v26 }
  0x8d   : > { %486 = vst [vmem:[%s2785_s5 + $0x1b0] sm:%s2897_s4] %v485_v27 }
  0x8e   : > { %488 = vst [vmem:[%s2785_s5 + $0x1c0] sm:%s2897_s4] %v487_v28 }
  0x8f   : > { %490 = vst [vmem:[%s2785_s5 + $0x1d0] sm:%s2897_s4] %v489_v29 }
  0x90   : > { %492 = vst [vmem:[%s2785_s5 + $0x1e0] sm:%s2897_s4] %v491_v30 }
  0x91   : > { %494 = vst [vmem:[%s2785_s5 + $0x1f0] sm:%s2897_s4] %v493_v31 }
  0x92 PF: > { %p1677_p4 = scmp.ge.u32.totalorder %s2656_s21, 8 }
  0x93   : > { %s2565_s24 = smov (!%p1677_p4), 1  }
  0x94   : > { %171 = sbr.rel (%p1677_p4) target bundleno = 186 (0xba), region = 40  ;;  %s172_s9 = sshll.u32 (!%p1677_p4), %s2565_s24, %s2656_s21 }
  0x95   : > { %s3029_s10 = sadd.s32 (!%p1677_p4), 4294967295, %s172_s9 }
  0x99   : > { %v182_v32 = vld [vmem:[%s2654_s11] sm:%s3029_s10]  ;;  %v186_v34 = vld [vmem:[%s2654_s11 + $0x78] sm:%s3029_s10] }
  0x9a   : > { %v184_v33 = vld [vmem:[%s2654_s11 + $0x3c] sm:%s3029_s10]  ;;  %183 = vst [vmem:[%s2658_s22] sm:%s3029_s10] %v182_v32 }
  0x9b   : > { %185 = vst [vmem:[%s2658_s22 + $0x10] sm:%s3029_s10] %v184_v33  ;;  %v188_v35 = vld [vmem:[%s2654_s11 + $0xb4] sm:%s3029_s10] }
  0x9c   : > { %187 = vst [vmem:[%s2658_s22 + $0x20] sm:%s3029_s10] %v186_v34  ;;  %v190_v36 = vld [vmem:[%s2654_s11 + $0xf0] sm:%s3029_s10] }
  0x9d   : > { %189 = vst [vmem:[%s2658_s22 + $0x30] sm:%s3029_s10] %v188_v35  ;;  %v192_v37 = vld [vmem:[%s2654_s11 + $0x12c] sm:%s3029_s10] }
  0x9e   : > { %191 = vst [vmem:[%s2658_s22 + $0x40] sm:%s3029_s10] %v190_v36  ;;  %v194_v38 = vld [vmem:[%s2654_s11 + $0x168] sm:%s3029_s10] }
  0x9f   : > { %193 = vst [vmem:[%s2658_s22 + $0x50] sm:%s3029_s10] %v192_v37  ;;  %v196_v39 = vld [vmem:[%s2654_s11 + $0x1a4] sm:%s3029_s10] }
  0xa0   : > { %195 = vst [vmem:[%s2658_s22 + $0x60] sm:%s3029_s10] %v194_v38  ;;  %v198_v40 = vld [vmem:[%s2654_s11 + $0x1e0] sm:%s3029_s10] }
  0xa1   : > { %197 = vst [vmem:[%s2658_s22 + $0x70] sm:%s3029_s10] %v196_v39  ;;  %v200_v41 = vld [vmem:[%s2654_s11 + $0x21c] sm:%s3029_s10] }
  0xa2   : > { %199 = vst [vmem:[%s2658_s22 + $0x80] sm:%s3029_s10] %v198_v40  ;;  %v202_v42 = vld [vmem:[%s2654_s11 + $0x258] sm:%s3029_s10] }
  0xa3   : > { %201 = vst [vmem:[%s2658_s22 + $0x90] sm:%s3029_s10] %v200_v41  ;;  %v204_v43 = vld [vmem:[%s2654_s11 + $0x294] sm:%s3029_s10] }
  0xa4   : > { %203 = vst [vmem:[%s2658_s22 + $0xa0] sm:%s3029_s10] %v202_v42  ;;  %v206_v44 = vld [vmem:[%s2654_s11 + $0x2d0] sm:%s3029_s10] }
  0xa5   : > { %205 = vst [vmem:[%s2658_s22 + $0xb0] sm:%s3029_s10] %v204_v43  ;;  %v208_v45 = vld [vmem:[%s2654_s11 + $0x30c] sm:%s3029_s10] }
  0xa6   : > { %207 = vst [vmem:[%s2658_s22 + $0xc0] sm:%s3029_s10] %v206_v44  ;;  %v210_v46 = vld [vmem:[%s2654_s11 + $0x348] sm:%s3029_s10] }
  0xa7   : > { %209 = vst [vmem:[%s2658_s22 + $0xd0] sm:%s3029_s10] %v208_v45  ;;  %v212_v47 = vld [vmem:[%s2654_s11 + $0x384] sm:%s3029_s10] }
  0xa8   : > { %211 = vst [vmem:[%s2658_s22 + $0xe0] sm:%s3029_s10] %v210_v46  ;;  %v214_v48 = vld [vmem:[%s2654_s11 + $0x3c0] sm:%s3029_s10] }
  0xa9   : > { %213 = vst [vmem:[%s2658_s22 + $0xf0] sm:%s3029_s10] %v212_v47  ;;  %v216_v49 = vld [vmem:[%s2654_s11 + $0x3fc] sm:%s3029_s10] }
  0xaa   : > { %215 = vst [vmem:[%s2658_s22 + $0x100] sm:%s3029_s10] %v214_v48  ;;  %v218_v50 = vld [vmem:[%s2654_s11 + $0x438] sm:%s3029_s10] }
  0xab   : > { %217 = vst [vmem:[%s2658_s22 + $0x110] sm:%s3029_s10] %v216_v49  ;;  %v220_v51 = vld [vmem:[%s2654_s11 + $0x474] sm:%s3029_s10] }
  0xac   : > { %219 = vst [vmem:[%s2658_s22 + $0x120] sm:%s3029_s10] %v218_v50  ;;  %v222_v52 = vld [vmem:[%s2654_s11 + $0x4b0] sm:%s3029_s10] }
  0xad   : > { %221 = vst [vmem:[%s2658_s22 + $0x130] sm:%s3029_s10] %v220_v51  ;;  %v224_v53 = vld [vmem:[%s2654_s11 + $0x4ec] sm:%s3029_s10] }
  0xae   : > { %223 = vst [vmem:[%s2658_s22 + $0x140] sm:%s3029_s10] %v222_v52  ;;  %v226_v54 = vld [vmem:[%s2654_s11 + $0x528] sm:%s3029_s10] }
  0xaf   : > { %225 = vst [vmem:[%s2658_s22 + $0x150] sm:%s3029_s10] %v224_v53  ;;  %v228_v55 = vld [vmem:[%s2654_s11 + $0x564] sm:%s3029_s10] }
  0xb0   : > { %227 = vst [vmem:[%s2658_s22 + $0x160] sm:%s3029_s10] %v226_v54  ;;  %v230_v56 = vld [vmem:[%s2654_s11 + $0x5a0] sm:%s3029_s10] }
  0xb1   : > { %229 = vst [vmem:[%s2658_s22 + $0x170] sm:%s3029_s10] %v228_v55  ;;  %v232_v57 = vld [vmem:[%s2654_s11 + $0x5dc] sm:%s3029_s10] }
  0xb2   : > { %231 = vst [vmem:[%s2658_s22 + $0x180] sm:%s3029_s10] %v230_v56  ;;  %v234_v58 = vld [vmem:[%s2654_s11 + $0x618] sm:%s3029_s10] }
  0xb3   : > { %233 = vst [vmem:[%s2658_s22 + $0x190] sm:%s3029_s10] %v232_v57  ;;  %v236_v59 = vld [vmem:[%s2654_s11 + $0x654] sm:%s3029_s10] }
  0xb4   : > { %235 = vst [vmem:[%s2658_s22 + $0x1a0] sm:%s3029_s10] %v234_v58  ;;  %v238_v60 = vld [vmem:[%s2654_s11 + $0x690] sm:%s3029_s10] }
  0xb5   : > { %237 = vst [vmem:[%s2658_s22 + $0x1b0] sm:%s3029_s10] %v236_v59  ;;  %v240_v61 = vld [vmem:[%s2654_s11 + $0x6cc] sm:%s3029_s10] }
  0xb6   : > { %239 = vst [vmem:[%s2658_s22 + $0x1c0] sm:%s3029_s10] %v238_v60  ;;  %v242_v62 = vld [vmem:[%s2654_s11 + $0x708] sm:%s3029_s10] }
  0xb7   : > { %241 = vst [vmem:[%s2658_s22 + $0x1d0] sm:%s3029_s10] %v240_v61  ;;  %v244_v63 = vld [vmem:[%s2654_s11 + $0x744] sm:%s3029_s10] }
  0xb8   : > { %243 = vst [vmem:[%s2658_s22 + $0x1e0] sm:%s3029_s10] %v242_v62 }
  0xb9   : > { %245 = vst [vmem:[%s2658_s22 + $0x1f0] sm:%s3029_s10] %v244_v63 }
  0xba PF: > { %p1679_p5 = scmp.ge.s32.totalorder %s2466_s18, 1  ;;  %p497_p7 = scmp.lt.s32.totalorder %s2466_s18, 9 }
  0xbc   : > { %p498_p8 = pnand %p1679_p5, %p497_p7 }
  0xbd   : > { %s504_s21 = sand.u32 (!%p498_p8), 1, %s2442_s12  }
  0xbe   : > { %501 = sbr.rel (%p498_p8) target bundleno = 581 (0x245), region = 80  ;;  %s1680_s5 = sshll.u32 (!%p498_p8), %s504_s21, 9 }
  0xbf   : > { %s3164_s30 = scalar_lea.vmem (!%p498_p8), [#allocation2], %s1680_s5 }
  0xc3   : > { %v1812_v0 = vld [vmem:[%s3164_s30 + $0xe0] sm:$0xf]  ;;  %v2019_v1 = vld [vmem:[%s3164_s30 + $0xec] sm:$0xf0]  ;;  %v2017_v5 = vld [vmem:[%s3164_s30 + $0xe4] sm:$0xf] }
  0xc4   : > { %v1940_v2 = vld [vmem:[%s3164_s30 + $0x1e0] sm:$0xf]  ;;  %v1813_v3 = vor.u32 %v2019_v1, %v1812_v0  ;;  %v2051_v4 = vld [vmem:[%s3164_s30 + $0x1ec] sm:$0xf0]  ;;  %v1814_v6 = vld [vmem:[%s3164_s30 + $0xf0] sm:$0xf0] }
  0xc5   : > { %v1941_v7 = vor.u32 %v2051_v4, %v1940_v2  ;;  %v1817_v8 = vor.u32 %v2017_v5, %v1814_v6  ;;  %v2049_v9 = vld [vmem:[%s3164_s30 + $0x1e4] sm:$0xf]  ;;  %v1942_v10 = vld [vmem:[%s3164_s30 + $0x1f0] sm:$0xf0]  ;;  %v1796_v11 = vld [vmem:[%s3164_s30 + $0xc0] sm:$0xf] }
  0xc6   : > { %968 = vmatpush.bf16.msra.mxu0 %v1813_v3  ;;  %v1945_v12 = vor.u32 %v2049_v9, %v1942_v10  ;;  %v2015_v13 = vld [vmem:[%s3164_s30 + $0xcc] sm:$0xf0]  ;;  %v1924_v14 = vld [vmem:[%s3164_s30 + $0x1c0] sm:$0xf]  ;;  %v2013_v18 = vld [vmem:[%s3164_s30 + $0xc4] sm:$0xf] }
  0xc7   : > { %v2047_v15 = vld [vmem:[%s3164_s30 + $0x1cc] sm:$0xf0]  ;;  %987 = vmatpush.bf16.msra.mxu1 %v1941_v7  ;;  %1006 = vmatpush.bf16.msra.mxu2 %v1817_v8  ;;  %v1797_v16 = vor.u32 %v2015_v13, %v1796_v11  ;;  %v1798_v19 = vld [vmem:[%s3164_s30 + $0xd0] sm:$0xf0]  ;;  %v2045_v20 = vld [vmem:[%s3164_s30 + $0x1c4] sm:$0xf] }
  0xc8   : > { %v1925_v17 = vor.u32 %v2047_v15, %v1924_v14  ;;  %1025 = vmatpush.bf16.msra.mxu3 %v1945_v12  ;;  %v1801_v21 = vor.u32 %v2013_v18, %v1798_v19  ;;  %v1926_v22 = vld [vmem:[%s3164_s30 + $0x1d0] sm:$0xf0]  ;;  %v1780_v23 = vld [vmem:[%s3164_s30 + $0xa0] sm:$0xf]  ;;  %v2011_v24 = vld [vmem:[%s3164_s30 + $0xac] sm:$0xf0] }
  0xc9   : > { %v1929_v25 = vor.u32 %v2045_v20, %v1926_v22  ;;  %v1908_v26 = vld [vmem:[%s3164_s30 + $0x1a0] sm:$0xf]  ;;  %v2043_v27 = vld [vmem:[%s3164_s30 + $0x1ac] sm:$0xf0]  ;;  %v2009_v28 = vld [vmem:[%s3164_s30 + $0xa4] sm:$0xf]  ;;  %v1781_v29 = vor.u32 %v2011_v24, %v1780_v23 }
  0xca   : > { %969 = vmatpush.bf16.msra.mxu0 %v1797_v16  ;;  %v1782_v30 = vld [vmem:[%s3164_s30 + $0xb0] sm:$0xf0]  ;;  %v2041_v31 = vld [vmem:[%s3164_s30 + $0x1a4] sm:$0xf]  ;;  %v1909_v33 = vor.u32 %v2043_v27, %v1908_v26  ;;  %v1764_v35 = vld [vmem:[%s3164_s30 + $0x80] sm:$0xf] }
  0xcb   : > { %v1910_v32 = vld [vmem:[%s3164_s30 + $0x1b0] sm:$0xf0]  ;;  %988 = vmatpush.bf16.msra.mxu1 %v1925_v17  ;;  %1007 = vmatpush.bf16.msra.mxu2 %v1801_v21  ;;  %v1785_v34 = vor.u32 %v2009_v28, %v1782_v30  ;;  %v2007_v36 = vld [vmem:[%s3164_s30 + $0x8c] sm:$0xf0]  ;;  %v1892_v37 = vld [vmem:[%s3164_s30 + $0x180] sm:$0xf] }
  0xcc   : > { %1026 = vmatpush.bf16.msra.mxu3 %v1929_v25  ;;  %v1913_v38 = vor.u32 %v2041_v31, %v1910_v32  ;;  %v2039_v39 = vld [vmem:[%s3164_s30 + $0x18c] sm:$0xf0]  ;;  %v2005_v40 = vld [vmem:[%s3164_s30 + $0x84] sm:$0xf]  ;;  %v1766_v41 = vld [vmem:[%s3164_s30 + $0x90] sm:$0xf0]  ;;  %v1765_v44 = vor.u32 %v2007_v36, %v1764_v35 }
  0xcd   : > { %v2037_v42 = vld [vmem:[%s3164_s30 + $0x184] sm:$0xf]  ;;  %v1894_v43 = vld [vmem:[%s3164_s30 + $0x190] sm:$0xf0]  ;;  %v1893_v45 = vor.u32 %v2039_v39, %v1892_v37  ;;  %v1769_v46 = vor.u32 %v2005_v40, %v1766_v41  ;;  %v1748_v47 = vld [vmem:[%s3164_s30 + $0x60] sm:$0xf] }
  0xce   : > { %970 = vmatpush.bf16.msra.mxu0 %v1781_v29  ;;  %v2003_v48 = vld [vmem:[%s3164_s30 + $0x6c] sm:$0xf0]  ;;  %v1876_v49 = vld [vmem:[%s3164_s30 + $0x160] sm:$0xf]  ;;  %v1897_v50 = vor.u32 %v2037_v42, %v1894_v43  ;;  %v2001_v52 = vld [vmem:[%s3164_s30 + $0x64] sm:$0xf] }
  0xcf   : > { %989 = vmatpush.bf16.msra.mxu1 %v1909_v33  ;;  %1008 = vmatpush.bf16.msra.mxu2 %v1785_v34  ;;  %v2035_v51 = vld [vmem:[%s3164_s30 + $0x16c] sm:$0xf0]  ;;  %v1750_v53 = vld [vmem:[%s3164_s30 + $0x70] sm:$0xf0]  ;;  %v2033_v54 = vld [vmem:[%s3164_s30 + $0x164] sm:$0xf]  ;;  %v1749_v56 = vor.u32 %v2003_v48, %v1748_v47 }
  0xd0   : > { %1027 = vmatpush.bf16.msra.mxu3 %v1913_v38  ;;  %v1878_v55 = vld [vmem:[%s3164_s30 + $0x170] sm:$0xf0]  ;;  %v1877_v57 = vor.u32 %v2035_v51, %v1876_v49  ;;  %v1753_v58 = vor.u32 %v2001_v52, %v1750_v53  ;;  %v1732_v59 = vld [vmem:[%s3164_s30 + $0x40] sm:$0xf]  ;;  %v1999_v60 = vld [vmem:[%s3164_s30 + $0x4c] sm:$0xf0] }
  0xd1   : > { %v1860_v61 = vld [vmem:[%s3164_s30 + $0x140] sm:$0xf]  ;;  %v1881_v62 = vor.u32 %v2033_v54, %v1878_v55  ;;  %v2031_v63 = vld [vmem:[%s3164_s30 + $0x14c] sm:$0xf0]  ;;  %v1997_v0 = vld [vmem:[%s3164_s30 + $0x44] sm:$0xf]  ;;  %v1733_v4 = vor.u32 %v1999_v60, %v1732_v59 }
  0xd2   : > { %971 = vmatpush.bf16.msra.mxu0 %v1765_v44  ;;  %v1734_v1 = vld [vmem:[%s3164_s30 + $0x50] sm:$0xf0]  ;;  %v2029_v2 = vld [vmem:[%s3164_s30 + $0x144] sm:$0xf]  ;;  %v1861_v5 = vor.u32 %v2031_v63, %v1860_v61  ;;  %v1716_v7 = vld [vmem:[%s3164_s30 + $0x20] sm:$0xf] }
  0xd3   : > { %990 = vmatpush.bf16.msra.mxu1 %v1893_v45  ;;  %1009 = vmatpush.bf16.msra.mxu2 %v1769_v46  ;;  %v1862_v3 = vld [vmem:[%s3164_s30 + $0x150] sm:$0xf0]  ;;  %v1737_v6 = vor.u32 %v1997_v0, %v1734_v1  ;;  %v1995_v8 = vld [vmem:[%s3164_s30 + $0x2c] sm:$0xf0]  ;;  %v1844_v9 = vld [vmem:[%s3164_s30 + $0x120] sm:$0xf] }
  0xd4   : > { %1028 = vmatpush.bf16.msra.mxu3 %v1897_v50  ;;  %v1865_v10 = vor.u32 %v2029_v2, %v1862_v3  ;;  %v2027_v11 = vld [vmem:[%s3164_s30 + $0x12c] sm:$0xf0]  ;;  %v1993_v12 = vld [vmem:[%s3164_s30 + $0x24] sm:$0xf]  ;;  %v1718_v13 = vld [vmem:[%s3164_s30 + $0x30] sm:$0xf0]  ;;  %v1717_v16 = vor.u32 %v1995_v8, %v1716_v7 }
  0xd5   : > { %v2025_v14 = vld [vmem:[%s3164_s30 + $0x124] sm:$0xf]  ;;  %v1846_v15 = vld [vmem:[%s3164_s30 + $0x130] sm:$0xf0]  ;;  %v1700_v17 = vld [vmem:[%s3164_s30] sm:$0xf]  ;;  %v1845_v19 = vor.u32 %v2027_v11, %v1844_v9  ;;  %v1721_v20 = vor.u32 %v1993_v12, %v1718_v13 }
  0xd6   : > { %972 = vmatpush.bf16.msra.mxu0 %v1749_v56  ;;  %v1991_v18 = vld [vmem:[%s3164_s30 + $0xc] sm:$0xf0]  ;;  %v1828_v21 = vld [vmem:[%s3164_s30 + $0x100] sm:$0xf]  ;;  %v1989_v23 = vld [vmem:[%s3164_s30 + $0x4] sm:$0xf]  ;;  %v1849_v24 = vor.u32 %v2025_v14, %v1846_v15 }
  0xd7   : > { %991 = vmatpush.bf16.msra.mxu1 %v1877_v57  ;;  %1010 = vmatpush.bf16.msra.mxu2 %v1753_v58  ;;  %v2023_v22 = vld [vmem:[%s3164_s30 + $0x10c] sm:$0xf0]  ;;  %v1702_v25 = vld [vmem:[%s3164_s30 + $0x10] sm:$0xf0]  ;;  %v2021_v26 = vld [vmem:[%s3164_s30 + $0x104] sm:$0xf]  ;;  %v1701_v31 = vor.u32 %v1991_v18, %v1700_v17 }
  0xd8   : > { %1029 = vmatpush.bf16.msra.mxu3 %v1881_v62  ;;  %v1830_v27 = vld [vmem:[%s3164_s30 + $0x110] sm:$0xf0]  ;;  %v1684_v28 = vld [vmem:[%s3697_s1] sm:$0xf]  ;;  %v2018_v29 = vld [vmem:[%s3164_s30 + $0xec] sm:$0xf]  ;;  %v1829_v35 = vor.u32 %v2023_v22, %v1828_v21  ;;  %v1705_v36 = vor.u32 %v1989_v23, %v1702_v25 }
  0xd9   : > { %v1822_v30 = vld [vmem:[%s3164_s30 + $0xf8] sm:$0xf0]  ;;  %v1986_v32 = vld [vmem:[%s3697_s1 + $0x4] sm:$0xf0]  ;;  %v2052_v34 = vld [vmem:[%s3164_s30 + $0x1f4] sm:$0xf0]  ;;  %v1833_v40 = vor.u32 %v2021_v26, %v1830_v27 }
  0xda   : > { %973 = vmatpush.bf16.msra.mxu0 %v1733_v4  ;;  %v1948_v33 = vld [vmem:[%s3164_s30 + $0x1e8] sm:$0xf]  ;;  %v1985_v37 = vld [vmem:[%s3697_s1 + $0x4] sm:$0xf]  ;;  %v1686_v38 = vld [vmem:[%s3697_s1 + $0x8] sm:$0xf0]  ;;  %v1825_v41 = vor.u32 %v2018_v29, %v1822_v30  ;;  %v3250_v45 = vor.u32 %v1986_v32, %v1684_v28 }
  0xdb   : > { %992 = vmatpush.bf16.msra.mxu1 %v1861_v5  ;;  %1011 = vmatpush.bf16.msra.mxu2 %v1737_v6  ;;  %v1820_v39 = vld [vmem:[%s3164_s30 + $0xe8] sm:$0xf]  ;;  %v2020_v42 = vld [vmem:[%s3164_s30 + $0xf4] sm:$0xf0]  ;;  %v2050_v43 = vld [vmem:[%s3164_s30 + $0x1ec] sm:$0xf]  ;;  %v1949_v46 = vor.u32 %v2052_v34, %v1948_v33  ;;  %v3254_v49 = vor.u32 %v1985_v37, %v1686_v38 }
  0xdc   : > { %1030 = vmatpush.bf16.msra.mxu3 %v1865_v10  ;;  %v1950_v44 = vld [vmem:[%s3164_s30 + $0x1f8] sm:$0xf0]  ;;  %v2014_v47 = vld [vmem:[%s3164_s30 + $0xcc] sm:$0xf]  ;;  %v1932_v50 = vld [vmem:[%s3164_s30 + $0x1c8] sm:$0xf]  ;;  %v1821_v53 = vor.u32 %v2020_v42, %v1820_v39 }
  0xdd   : > { %v1806_v48 = vld [vmem:[%s3164_s30 + $0xd8] sm:$0xf0]  ;;  %v2048_v51 = vld [vmem:[%s3164_s30 + $0x1d4] sm:$0xf0]  ;;  %v2566_v52 = vmov 0   ;;  %v1953_v54 = vor.u32 %v2050_v43, %v1950_v44  ;;  %v604_v1 = vld [vmem:[%s3698_s2] sm:$0xff] }
  0xde   : > { %974 = vmatpush.bf16.msra.mxu0 %v1717_v16  ;;  %2312 = vset.pattern.permute.xlu0 %v2566_v52  ;;  %v1809_v55 = vor.u32 %v2014_v47, %v1806_v48  ;;  %v1804_v56 = vld [vmem:[%s3164_s30 + $0xc8] sm:$0xf]  ;;  %v2016_v57 = vld [vmem:[%s3164_s30 + $0xd4] sm:$0xf0]  ;;  %v2046_v58 = vld [vmem:[%s3164_s30 + $0x1cc] sm:$0xf]  ;;  %v1933_v59 = vor.u32 %v2048_v51, %v1932_v50 }
  0xdf   : > { %993 = vmatpush.bf16.msra.mxu1 %v1845_v19  ;;  %1012 = vmatpush.bf16.msra.mxu2 %v1721_v20  ;;  %v1934_v60 = vld [vmem:[%s3164_s30 + $0x1d8] sm:$0xf0]  ;;  %v2010_v61 = vld [vmem:[%s3164_s30 + $0xac] sm:$0xf]  ;;  %v1916_v63 = vld [vmem:[%s3164_s30 + $0x1a8] sm:$0xf]  ;;  %v1805_v2 = vor.u32 %v2016_v57, %v1804_v56 }
  0xe0   : > { %1031 = vmatpush.bf16.msra.mxu3 %v1849_v24  ;;  %v1790_v62 = vld [vmem:[%s3164_s30 + $0xb8] sm:$0xf0]  ;;  %v2044_v0 = vld [vmem:[%s3164_s30 + $0x1b4] sm:$0xf0]  ;;  %v1937_v3 = vor.u32 %v2046_v58, %v1934_v60  ;;  %v1788_v5 = vld [vmem:[%s3164_s30 + $0xa8] sm:$0xf]  ;;  %610 = vperm.xlu0 %2312, %v604_v1  }
  0xe1   : > { %v1793_v4 = vor.u32 %v2010_v61, %v1790_v62  ;;  %v2012_v6 = vld [vmem:[%s3164_s30 + $0xb4] sm:$0xf0]  ;;  %v2042_v7 = vld [vmem:[%s3164_s30 + $0x1ac] sm:$0xf]  ;;  %v1917_v8 = vor.u32 %v2044_v0, %v1916_v63  ;;  %v1918_v9 = vld [vmem:[%s3164_s30 + $0x1b8] sm:$0xf0]  ;;  %2313 = vset.pattern.permute.xlu1 %v2566_v52 }
  0xe2   : > { %975 = vmatpush.bf16.msra.mxu0 %v1701_v31  ;;  %v2006_v10 = vld [vmem:[%s3164_s30 + $0x8c] sm:$0xf]  ;;  %v1774_v11 = vld [vmem:[%s3164_s30 + $0x98] sm:$0xf0]  ;;  %v1900_v12 = vld [vmem:[%s3164_s30 + $0x188] sm:$0xf]  ;;  %v1789_v14 = vor.u32 %v2012_v6, %v1788_v5  ;;  %v1921_v18 = vor.u32 %v2042_v7, %v1918_v9 }
  0xe3   : > { %994 = vmatpush.bf16.msra.mxu1 %v1829_v35  ;;  %1013 = vmatpush.bf16.msra.mxu2 %v1705_v36  ;;  %v2040_v13 = vld [vmem:[%s3164_s30 + $0x194] sm:$0xf0]  ;;  %v1772_v15 = vld [vmem:[%s3164_s30 + $0x88] sm:$0xf]  ;;  %v2038_v17 = vld [vmem:[%s3164_s30 + $0x18c] sm:$0xf]  ;;  %v1777_v19 = vor.u32 %v2006_v10, %v1774_v11 }
  0xe4   : > { %1032 = vmatpush.bf16.msra.mxu3 %v1833_v40  ;;  %v2008_v16 = vld [vmem:[%s3164_s30 + $0x94] sm:$0xf0]  ;;  %v1902_v20 = vld [vmem:[%s3164_s30 + $0x198] sm:$0xf0]  ;;  %v1692_v21 = vld [vmem:[%s3697_s1 + $0x10] sm:$0xf]  ;;  %v1901_v23 = vor.u32 %v2040_v13, %v1900_v12 }
  0xe5   : > { %976 = vmatmul.bf16.vlgmr.msra.gmra.mxu0 %v3250_v45  ;;  %v1988_v22 = vld [vmem:[%s3697_s1 + $0x14] sm:$0xf0]  ;;  %v2002_v24 = vld [vmem:[%s3164_s30 + $0x6c] sm:$0xf]  ;;  %v1758_v25 = vld [vmem:[%s3164_s30 + $0x78] sm:$0xf0]  ;;  %v1773_v30 = vor.u32 %v2008_v16, %v1772_v15  ;;  %v1905_v33 = vor.u32 %v2038_v17, %v1902_v20 }
  0xe6   : > { %995 = vmatmul.bf16.vlgmr.msra.gmra.mxu1 %v3254_v49  ;;  %1014 = vmatmul.bf16.vlgmr.msra.gmra.mxu2 %v3250_v45  ;;  %v1884_v26 = vld [vmem:[%s3164_s30 + $0x168] sm:$0xf]  ;;  %v2036_v27 = vld [vmem:[%s3164_s30 + $0x174] sm:$0xf0]  ;;  %v606_v29 = vld [vmem:[%s3698_s2 + $0x10] sm:$0xff]  ;;  %v1761_v34 = vor.u32 %v2002_v24, %v1758_v25  ;;  %v3310_v38 = vor.u32 %v1988_v22, %v1692_v21  ;;  %s1955_s12 = sshll.u32 (%p2637_p6), %s2450_s14, 2 }
  0xe7   : > { %1082 = vmatpush.bf16.msrb.mxu2 %v1825_v41  ;;  %1063 = vmatpush.bf16.msrb.mxu1 %v1949_v46  ;;  %v605_v28 = vld [vmem:[%s3698_s2 + $0x8] sm:$0xff]  ;;  %v1987_v31 = vld [vmem:[%s3697_s1 + $0x14] sm:$0xf]  ;;  %v1694_v32 = vld [vmem:[%s3697_s1 + $0x18] sm:$0xf0]  ;;  %v1885_v39 = vor.u32 %v2036_v27, %v1884_v26  ;;  %s1160_s9 = ssub.s32 (%p2637_p6), 15, %s1955_s12 }
  0xe8   : > { %1033 = vmatmul.bf16.vlgmr.msra.gmra.mxu3 %v3254_v49  ;;  %1044 = vmatpush.bf16.msrb.mxu0 %v1821_v53  ;;  %v1756_v35 = vld [vmem:[%s3164_s30 + $0x68] sm:$0xf]  ;;  %v2004_v36 = vld [vmem:[%s3164_s30 + $0x74] sm:$0xf0]  ;;  %v2034_v37 = vld [vmem:[%s3164_s30 + $0x16c] sm:$0xf]  ;;  %v3315_v43 = vor.u32 %v1987_v31, %v1694_v32 }
  0xe9   : > { %1101 = vmatpush.bf16.msrb.mxu3 %v1953_v54  ;;  %620 = vperm.xlu1 %2313, %v606_v29   ;;  %v1886_v40 = vld [vmem:[%s3164_s30 + $0x178] sm:$0xf0]  ;;  %v1998_v41 = vld [vmem:[%s3164_s30 + $0x4c] sm:$0xf]  ;;  %v1868_v44 = vld [vmem:[%s3164_s30 + $0x148] sm:$0xf]  ;;  %v1757_v47 = vor.u32 %v2004_v36, %v1756_v35 }
  0xea   : > { %615 = vperm.xlu0 %2312, %v605_v28   ;;  %v1742_v42 = vld [vmem:[%s3164_s30 + $0x58] sm:$0xf0]  ;;  %v2032_v46 = vld [vmem:[%s3164_s30 + $0x154] sm:$0xf0]  ;;  %v1889_v48 = vor.u32 %v2034_v37, %v1886_v40  ;;  %v1740_v51 = vld [vmem:[%s3164_s30 + $0x48] sm:$0xf] }
  0xeb   : > { %1083 = vmatpush.bf16.msrb.mxu2 %v1809_v55  ;;  %1064 = vmatpush.bf16.msrb.mxu1 %v1933_v59  ;;  %v1745_v50 = vor.u32 %v1998_v41, %v1742_v42  ;;  %v2000_v52 = vld [vmem:[%s3164_s30 + $0x54] sm:$0xf0]  ;;  %v2030_v53 = vld [vmem:[%s3164_s30 + $0x14c] sm:$0xf]  ;;  %v1869_v54 = vor.u32 %v2032_v46, %v1868_v44  ;;  %v1870_v55 = vld [vmem:[%s3164_s30 + $0x158] sm:$0xf0] }
  0xec   : > { %1045 = vmatpush.bf16.msrb.mxu0 %v1805_v2  ;;  %v1994_v56 = vld [vmem:[%s3164_s30 + $0x2c] sm:$0xf]  ;;  %v1726_v57 = vld [vmem:[%s3164_s30 + $0x38] sm:$0xf0]  ;;  %v1852_v58 = vld [vmem:[%s3164_s30 + $0x128] sm:$0xf]  ;;  %v1741_v61 = vor.u32 %v2000_v52, %v1740_v51  ;;  %v1873_v62 = vor.u32 %v2030_v53, %v1870_v55 }
  0xed   : > { %1102 = vmatpush.bf16.msrb.mxu3 %v1937_v3  ;;  %v2028_v59 = vld [vmem:[%s3164_s30 + $0x134] sm:$0xf0]  ;;  %v1729_v63 = vor.u32 %v1994_v56, %v1726_v57  ;;  %v1724_v0 = vld [vmem:[%s3164_s30 + $0x28] sm:$0xf]  ;;  %v2026_v2 = vld [vmem:[%s3164_s30 + $0x12c] sm:$0xf] }
  0xee   : > { %v607_v60 = vld [vmem:[%s3698_s2 + $0x18] sm:$0xff]  ;;  %v1853_v3 = vor.u32 %v2028_v59, %v1852_v58  ;;  %v1990_v5 = vld [vmem:[%s3164_s30 + $0xc] sm:$0xf]  ;;  %v1836_v7 = vld [vmem:[%s3164_s30 + $0x108] sm:$0xf]  ;;  %p1161_p9 = scmp.lt.s32.totalorder (%p2637_p6), %s1160_s9, 4 }
  0xef   : > { %1084 = vmatpush.bf16.msrb.mxu2 %v1793_v4  ;;  %1065 = vmatpush.bf16.msrb.mxu1 %v1917_v8  ;;  %v1996_v1 = vld [vmem:[%s3164_s30 + $0x34] sm:$0xf0]  ;;  %v1854_v4 = vld [vmem:[%s3164_s30 + $0x138] sm:$0xf0]  ;;  %v1708_v12 = vld [vmem:[%s3164_s30 + $0x8] sm:$0xf] }
  0xf0   : > { %1046 = vmatpush.bf16.msrb.mxu0 %v1789_v14  ;;  %v1710_v6 = vld [vmem:[%s3164_s30 + $0x18] sm:$0xf0]  ;;  %v2024_v8 = vld [vmem:[%s3164_s30 + $0x114] sm:$0xf0]  ;;  %v1725_v9 = vor.u32 %v1996_v1, %v1724_v0  ;;  %v1857_v10 = vor.u32 %v2026_v2, %v1854_v4  ;;  %v2022_v15 = vld [vmem:[%s3164_s30 + $0x10c] sm:$0xf] }
  0xf1   : > { %1103 = vmatpush.bf16.msrb.mxu3 %v1921_v18  ;;  %625 = vperm.xlu1 %2313, %v607_v60   ;;  %v1713_v11 = vor.u32 %v1990_v5, %v1710_v6  ;;  %v1992_v13 = vld [vmem:[%s3164_s30 + $0x14] sm:$0xf0]  ;;  %v1837_v14 = vor.u32 %v2024_v8, %v1836_v7  ;;  %v1838_v16 = vld [vmem:[%s3164_s30 + $0x118] sm:$0xf0]  ;;  %s1681_s30 = sshll.u32 %s504_s21, 6  ;;  %s2058_s21 = smul.u32 (%p2637_p6), 60, %s2454_s15 }
  0xf2   : > { %v1709_v17 = vor.u32 %v1992_v13, %v1708_v12  ;;  %v1841_v18 = vor.u32 %v2022_v15, %v1838_v16  ;;  %s3361_s24 = scalar_lea.vmem [#allocation3], %s1681_s30  }
  0xf3   : > { %1085 = vmatpush.bf16.msrb.mxu2 %v1777_v19  ;;  %1066 = vmatpush.bf16.msrb.mxu1 %v1901_v23  ;;  %s1166_s10 = sadd.s32 (%p2637_p6), %s2058_s21, %s1955_s12 }
  0xf4   : > { %1047 = vmatpush.bf16.msrb.mxu0 %v1773_v30  ;;  %s1958_s5 = sshll.u32 (%p2637_p6), %s1166_s10, 2 }
  0xf5   : > { %1104 = vmatpush.bf16.msrb.mxu3 %v1905_v33  ;;  %981 = vmatmul.bf16.gmra.mxu0 %v3310_v38  ;;  %s3385_s25 = scalar_lea.vmem (%p2637_p6), %s3699_s3, %s1958_s5  }
  0xf6   : > { %1000 = vmatmul.bf16.gmra.mxu1 %v3315_v43  ;;  %1019 = vmatmul.bf16.gmra.mxu2 %v3310_v38 }
  0xf7   : > { %1086 = vmatpush.bf16.msrb.mxu2 %v1761_v34  ;;  %1067 = vmatpush.bf16.msrb.mxu1 %v1885_v39 }
  0xf8   : > { %1038 = vmatmul.bf16.gmra.mxu3 %v3315_v43  ;;  %1048 = vmatpush.bf16.msrb.mxu0 %v1757_v47 }
  0xf9   : > { %1105 = vmatpush.bf16.msrb.mxu3 %v1889_v48 }
  0xfb   : > { %1087 = vmatpush.bf16.msrb.mxu2 %v1745_v50  ;;  %1068 = vmatpush.bf16.msrb.mxu1 %v1869_v54 }
  0xfc   : > { %1049 = vmatpush.bf16.msrb.mxu0 %v1741_v61 }
  0xfd   : > { %1106 = vmatpush.bf16.msrb.mxu3 %v1873_v62 }
  0xff   : > { %1088 = vmatpush.bf16.msrb.mxu2 %v1729_v63  ;;  %1069 = vmatpush.bf16.msrb.mxu1 %v1853_v3 }
 0x100   : > { %1050 = vmatpush.bf16.msrb.mxu0 %v1725_v9 }
 0x101   : > { %1107 = vmatpush.bf16.msrb.mxu3 %v1857_v10 }
 0x103   : > { %1089 = vmatpush.bf16.msrb.mxu2 %v1713_v11  ;;  %1070 = vmatpush.bf16.msrb.mxu1 %v1837_v14 }
 0x104   : > { %1051 = vmatpush.bf16.msrb.mxu0 %v1709_v17 }
 0x105   : > { %1108 = vmatpush.bf16.msrb.mxu3 %v1841_v18 }
 0x106   : > { %1071 = vmatmul.bf16.vlgmr.msrb.gmra.mxu1 %v3254_v49  ;;  %1090 = vmatmul.bf16.vlgmr.msrb.gmra.mxu2 %v3250_v45 }
 0x107   : > { %1052 = vmatmul.bf16.vlgmr.msrb.gmra.mxu0 %v3250_v45 }
 0x108   : > { %1109 = vmatmul.bf16.vlgmr.msrb.gmra.mxu3 %v3254_v49 }
 0x116   : > { %1076 = vmatmul.bf16.gmra.mxu1 %v3315_v43  ;;  %1095 = vmatmul.bf16.gmra.mxu2 %v3310_v38 }
 0x117   : > { %1057 = vmatmul.bf16.gmra.mxu0 %v3310_v38 }
 0x118   : > { %1114 = vmatmul.bf16.gmra.mxu3 %v3315_v43 }
 0x152   : > { %v611_v19 = vpop.permute.xlu0 %610 }
 0x15b   : > { %v3359_v34 = vpop.permute.xlu1 %620 }
 0x15c   : > { %v3354_v27 = vpop.permute.xlu0 %615 }
 0x162   : > { %v977_v20 = vpop.f32.mrf.mxu0 }
 0x163   : > { %v996_v21 = vpop.f32.mrf.mxu1  ;;  %v978_v22 = vadd.f32 %v977_v20, %v611_v19  ;;  %v626_v52 = vpop.permute.xlu1 %625 }
 0x165   : > { %v997_v23 = vadd.f32 %v996_v21, %v978_v22 }
 0x167   : > { %v1120_v28 = vmax.f32 %v997_v23, 0.0 }
 0x169   : > { %v1015_v24 = vpop.f32.mrf.mxu2 }
 0x16a   : > { %v1016_v25 = vadd.f32 %v1015_v24, %v611_v19  ;;  %v979_v45 = vpop.f32.mrf.mxu0 }
 0x16b   : > { %v1034_v26 = vpop.f32.mrf.mxu3  ;;  %v998_v49 = vpop.f32.mrf.mxu1  ;;  %v980_v31 = vadd.f32 %v979_v45, %v3354_v27 }
 0x16c   : > { %v1035_v29 = vadd.f32 %v1034_v26, %v1016_v25 }
 0x16d   : > { %v999_v35 = vadd.f32 %v998_v49, %v980_v31 }
 0x16e   : > { %v1121_v30 = vmax.f32 %v1035_v29, 0.0 }
 0x16f   : > { %v1124_v42 = vmax.f32 %v999_v35, 0.0 }
 0x170   : > { %v1136_v32 = vpack.c.bf16 %v1121_v30, %v1120_v28 }
 0x171   : > { %v1017_v33 = vpop.f32.mrf.mxu2 }
 0x172   : > { %1144 = vst [vmem:[%s3361_s24] sm:$0xff] %v1136_v32  ;;  %v1018_v36 = vadd.f32 %v1017_v33, %v3354_v27  ;;  %v982_v38 = vpop.f32.mrf.mxu0 }
 0x173   : > { %v1036_v37 = vpop.f32.mrf.mxu3  ;;  %v1001_v39 = vpop.f32.mrf.mxu1  ;;  %v983_v41 = vadd.f32 %v982_v38, %v3359_v34 }
 0x174   : > { %v1037_v40 = vadd.f32 %v1036_v37, %v1018_v36 }
 0x175   : > { %v1002_v46 = vadd.f32 %v1001_v39, %v983_v41 }
 0x176   : > { %v1125_v43 = vmax.f32 %v1037_v40, 0.0 }
 0x177   : > { %v1128_v54 = vmax.f32 %v1002_v46, 0.0 }
 0x178   : > { %v1138_v44 = vpack.c.bf16 %v1125_v43, %v1124_v42 }
 0x179   : > { %v1020_v47 = vpop.f32.mrf.mxu2 }
 0x17a   : > { %1146 = vst [vmem:[%s3361_s24 + $0x10] sm:$0xff] %v1138_v44  ;;  %v1021_v48 = vadd.f32 %v1020_v47, %v3359_v34  ;;  %v984_v51 = vpop.f32.mrf.mxu0 }
 0x17b   : > { %v1039_v50 = vpop.f32.mrf.mxu3  ;;  %v1003_v53 = vpop.f32.mrf.mxu1  ;;  %v985_v57 = vadd.f32 %v984_v51, %v626_v52 }
 0x17c   : > { %v1040_v55 = vadd.f32 %v1039_v50, %v1021_v48 }
 0x17d   : > { %v1004_v60 = vadd.f32 %v1003_v53, %v985_v57 }
 0x17e   : > { %v1129_v56 = vmax.f32 %v1040_v55, 0.0 }
 0x17f   : > { %v1132_v3 = vmax.f32 %v1004_v60, 0.0 }
 0x180   : > { %v1140_v58 = vpack.c.bf16 %v1129_v56, %v1128_v54 }
 0x181   : > { %v1022_v59 = vpop.f32.mrf.mxu2 }
 0x182   : > { %1148 = vst [vmem:[%s3361_s24 + $0x20] sm:$0xff] %v1140_v58  ;;  %v1023_v61 = vadd.f32 %v1022_v59, %v626_v52 }
 0x183   : > { %v1041_v62 = vpop.f32.mrf.mxu3  ;;  %v1072_v1 = vpop.f32.mrf.mxu1 }
 0x184   : > { %v1053_v63 = vpop.f32.mrf.mxu0  ;;  %v1042_v0 = vadd.f32 %v1041_v62, %v1023_v61 }
 0x185   : > { %v1054_v2 = vadd.f32 %v1053_v63, %v611_v19 }
 0x186   : > { %v1133_v4 = vmax.f32 %v1042_v0, 0.0 }
 0x187   : > { %v1073_v6 = vadd.f32 %v1072_v1, %v1054_v2 }
 0x188   : > { %v1142_v5 = vpack.c.bf16 %v1133_v4, %v1132_v3 }
 0x189   : > { %v1091_v7 = vpop.f32.mrf.mxu2  ;;  %v1122_v11 = vmax.f32 %v1073_v6, 0.0 }
 0x18a   : > { %1150 = vst [vmem:[%s3361_s24 + $0x30] sm:$0xff] %v1142_v5  ;;  %v1092_v9 = vadd.f32 %v1091_v7, %v611_v19 }
 0x18b   : > { %v1110_v8 = vpop.f32.mrf.mxu3  ;;  %v1074_v13 = vpop.f32.mrf.mxu1 }
 0x18c   : > { %v1055_v10 = vpop.f32.mrf.mxu0  ;;  %v1111_v12 = vadd.f32 %v1110_v8, %v1092_v9 }
 0x18d   : > { %v1056_v15 = vadd.f32 %v1055_v10, %v3354_v27 }
 0x18e   : > { %v1123_v14 = vmax.f32 %v1111_v12, 0.0 }
 0x18f   : > { %v1075_v20 = vadd.f32 %v1074_v13, %v1056_v15 }
 0x190   : > { %v1137_v16 = vpack.c.bf16 %v1123_v14, %v1122_v11 }
 0x191   : > { %v1093_v17 = vpop.f32.mrf.mxu2  ;;  %v1126_v19 = vmax.f32 %v1075_v20, 0.0 }
 0x192   : > { %1145 = vst [vmem:[%s3361_s24 + $0x8] sm:$0xff] %v1137_v16  ;;  %v1094_v21 = vadd.f32 %v1093_v17, %v3354_v27 }
 0x193   : > { %v1112_v18 = vpop.f32.mrf.mxu3  ;;  %v1077_v26 = vpop.f32.mrf.mxu1 }
 0x194   : > { %v1058_v22 = vpop.f32.mrf.mxu0  ;;  %v1113_v23 = vadd.f32 %v1112_v18, %v1094_v21 }
 0x195   : > { %v1059_v24 = vadd.f32 %v1058_v22, %v3359_v34 }
 0x196   : > { %v1127_v25 = vmax.f32 %v1113_v23, 0.0 }
 0x197   : > { %v1078_v49 = vadd.f32 %v1077_v26, %v1059_v24 }
 0x198   : > { %v1139_v45 = vpack.c.bf16 %v1127_v25, %v1126_v19 }
 0x199   : > { %v1096_v28 = vpop.f32.mrf.mxu2  ;;  %v1130_v32 = vmax.f32 %v1078_v49, 0.0 }
 0x19a   : > { %1147 = vst [vmem:[%s3361_s24 + $0x18] sm:$0xff] %v1139_v45  ;;  %v1097_v30 = vadd.f32 %v1096_v28, %v3359_v34 }
 0x19b   : > { %v1115_v29 = vpop.f32.mrf.mxu3  ;;  %v1079_v37 = vpop.f32.mrf.mxu1 }
 0x19c   : > { %v1060_v31 = vpop.f32.mrf.mxu0  ;;  %v1116_v33 = vadd.f32 %v1115_v29, %v1097_v30 }
 0x19d   : > { %v1061_v35 = vadd.f32 %v1060_v31, %v626_v52 }
 0x19e   : > { %v1131_v27 = vmax.f32 %v1116_v33, 0.0 }
 0x19f   : > { %v1080_v39 = vadd.f32 %v1079_v37, %v1061_v35 }
 0x1a0   : > { %v1141_v36 = vpack.c.bf16 %v1131_v27, %v1130_v32 }
 0x1a1   : > { %v1098_v38 = vpop.f32.mrf.mxu2  ;;  %v1134_v43 = vmax.f32 %v1080_v39, 0.0 }
 0x1a2   : > { %1149 = vst [vmem:[%s3361_s24 + $0x28] sm:$0xff] %v1141_v36  ;;  %v1099_v40 = vadd.f32 %v1098_v38, %v626_v52 }
 0x1a3   : > { %v1117_v41 = vpop.f32.mrf.mxu3 }
 0x1a4   : > { %v1118_v42 = vadd.f32 %v1117_v41, %v1099_v40 }
 0x1a6   : > { %v1135_v44 = vmax.f32 %v1118_v42, 0.0  ;;  %1158 = sbr.rel (!%p2637_p6) target bundleno = 581 (0x245), region = 88 }
 0x1a8   : > { %v1143_v46 = vpack.c.bf16 %v1135_v44, %v1134_v43 }
 0x1aa   : > { %1151 = vst [vmem:[%s3361_s24 + $0x38] sm:$0xff] %v1143_v46 }
 0x1ab   : > { %s3745_s9 = smov (!%p1161_p9, %s1160_s9), 4 }
 0x1ac   : > { %s1956_s26 = sshll.u32 %s3745_s9, 4  ;;  %s3387_s28 = sshll.u32 %s3745_s9, 2 }
 0x1ad   : > { %p1960_p10 = scmp.eq.s32.totalorder %s1956_s26, 0 }
 0x1ae   : > { %p1173_p6 = scmp.lt.u32.totalorder (!%p1960_p10), %s3387_s28, 8 }
 0x1af   : > { %1172 = sbr.rel (%p1960_p10) target bundleno = 581 (0x245), region = 92 }
 0x1b4   : > { %1176 = sbr.rel (%p1173_p6) target bundleno = 569 (0x239), region = 96  ;;  %s3391_s14 = sand.u32 (!%p1173_p6), 7, %s3387_s28  }
 0x1b5   : > { %p1199_p11 = scmp.eq.s32.totalorder (!%p1173_p6), %s3391_s14, 0  ;;  %p1961_p12 = scmp.ne.s32.totalorder (!%p1173_p6), %s3391_s14, 0 }
 0x1b9   : > { %1202 = sbr.rel (%p1961_p12) target bundleno = 501 (0x1f5), region = 111  ;;  %s1203_s15 = sshrl.u32 (!%p1961_p12), %s3387_s28, 3 }
 0x1ba   : > { %s3398_s23 = sshrl.u32 (!%p1961_p12), %s1203_s15, 3 }
 0x1bb   : > { %p1962_p13 = scmp.le.s32.totalorder (!%p1961_p12), %s3398_s23, 0 }
 0x1be   : > { %1575 = sbr.rel (%p1962_p13) target bundleno = 484 (0x1e4), region = 229  ;;  %s3711_s6 = smov (!%p1962_p13), %s3385_s25 }
 0x1bf   : > { %s3712_s7 = smov (!%p1962_p13), %s3361_s24  ;;  %s3407_s8 = smov (!%p1962_p13), 0  }
 0x1c0   : > { %s3409_s29 = smov (!%p1962_p13), 0  }
 0x1c3 LB: >> { %v1228_v34 = vld [vmem:[%s2506_s7 + $0x38] sm:$0xff]  ;;  %v1244_v47 = vld [vmem:[%s2506_s7 + $0x48] sm:$0xff]  ;;  %v1214_v50 = vld [vmem:[%s2506_s7] sm:$0xff]  ;;  %s1278_s4 = sadd.s32 1, %s2510_s8  ;;  %s1208_s29 = sadd.s32 1, %s2514_s29   ;;  %s2514_s29 = sphi %s3409_s29, %s1208_s29   ;;  %s2510_s8 = sphi %s3407_s8, %s3715_s8   ;;  %s2506_s7 = sphi %s3712_s7, %s3714_s7   ;;  %s2502_s6 = sphi %s3711_s6, %s3713_s6  }
 0x1c4   : >> { %v1260_v48 = vld [vmem:[%s2506_s7 + $0x58] sm:$0xff]  ;;  %1229 = vst [vmem:[%s2502_s6 + $0x38] sm:$0xff] %v1228_v34  ;;  %v1216_v51 = vld [vmem:[%s2506_s7 + $0x8] sm:$0xff]  ;;  %v1218_v52 = vld [vmem:[%s2506_s7 + $0x10] sm:$0xff]  ;;  %p1279_p0 = scmp.ge.s32.totalorder %s1278_s4, %s3398_s23  ;;  %p1207_p1 = scmp.ge.s32.totalorder %s1208_s29, %s3398_s23 }
 0x1c5   : >> { %1245 = vst [vmem:[%s2502_s6 + $0x74] sm:$0xff] %v1244_v47  ;;  %v1220_v53 = vld [vmem:[%s2506_s7 + $0x18] sm:$0xff]  ;;  %v1222_v54 = vld [vmem:[%s2506_s7 + $0x20] sm:$0xff]  ;;  %v1224_v55 = vld [vmem:[%s2506_s7 + $0x28] sm:$0xff] }
 0x1c6   : >> { %1261 = vst [vmem:[%s2502_s6 + $0xb0] sm:$0xff] %v1260_v48  ;;  %s3747_s4 = smov (%p1279_p0, %s1278_s4), 0  ;;  %v1226_v56 = vld [vmem:[%s2506_s7 + $0x30] sm:$0xff]  ;;  %v1242_v57 = vld [vmem:[%s2506_s7 + $0x40] sm:$0xff]  ;;  %v1276_v60 = vld [vmem:[%s2506_s7 + $0x68] sm:$0xff] }
 0x1c7   : >> { %1215 = vst [vmem:[%s2502_s6] sm:$0xff] %v1214_v50  ;;  %s1963_s30 = sshll.u32 %s3747_s4, 6  ;;  %v1258_v58 = vld [vmem:[%s2506_s7 + $0x50] sm:$0xff]  ;;  %v1274_v59 = vld [vmem:[%s2506_s7 + $0x60] sm:$0xff]  ;;  %s3715_s8 = smov %s3747_s4 }
 0x1c8   : >> { %1217 = vst [vmem:[%s2502_s6 + $0x8] sm:$0xff] %v1216_v51  ;;  %s3444_s12 = scalar_lea.vmem %s3361_s24, %s1963_s30 [#allocation3]   ;;  %s3447_s21 = scalar_lea.vmem %s3385_s25, %s1963_s30  }
 0x1c9   : >> { %1219 = vst [vmem:[%s2502_s6 + $0x10] sm:$0xff] %v1218_v52  ;;  %s3714_s7 = smov %s3444_s12 }
 0x1ca   : >> { %1221 = vst [vmem:[%s2502_s6 + $0x18] sm:$0xff] %v1220_v53 }
 0x1cb   : >> { %1223 = vst [vmem:[%s2502_s6 + $0x20] sm:$0xff] %v1222_v54 }
 0x1cc   : >> { %1225 = vst [vmem:[%s2502_s6 + $0x28] sm:$0xff] %v1224_v55 }
 0x1cd   : >> { %1227 = vst [vmem:[%s2502_s6 + $0x30] sm:$0xff] %v1226_v56 }
 0x1ce   : >> { %1231 = vst [vmem:[%s2502_s6 + $0x3c] sm:$0xff] %v1218_v52 }
 0x1cf   : >> { %1233 = vst [vmem:[%s2502_s6 + $0x44] sm:$0xff] %v1220_v53 }
 0x1d0   : >> { %1235 = vst [vmem:[%s2502_s6 + $0x4c] sm:$0xff] %v1222_v54 }
 0x1d1   : >> { %1237 = vst [vmem:[%s2502_s6 + $0x54] sm:$0xff] %v1224_v55 }
 0x1d2   : >> { %1239 = vst [vmem:[%s2502_s6 + $0x5c] sm:$0xff] %v1226_v56 }
 0x1d3   : >> { %1241 = vst [vmem:[%s2502_s6 + $0x64] sm:$0xff] %v1228_v34 }
 0x1d4   : >> { %1243 = vst [vmem:[%s2502_s6 + $0x6c] sm:$0xff] %v1242_v57 }
 0x1d5   : >> { %1247 = vst [vmem:[%s2502_s6 + $0x78] sm:$0xff] %v1222_v54 }
 0x1d6   : >> { %1249 = vst [vmem:[%s2502_s6 + $0x80] sm:$0xff] %v1224_v55 }
 0x1d7   : >> { %1251 = vst [vmem:[%s2502_s6 + $0x88] sm:$0xff] %v1226_v56 }
 0x1d8   : >> { %1253 = vst [vmem:[%s2502_s6 + $0x90] sm:$0xff] %v1228_v34 }
 0x1d9   : >> { %1255 = vst [vmem:[%s2502_s6 + $0x98] sm:$0xff] %v1242_v57 }
 0x1da   : >> { %1257 = vst [vmem:[%s2502_s6 + $0xa0] sm:$0xff] %v1244_v47 }
 0x1db   : >> { %1259 = vst [vmem:[%s2502_s6 + $0xa8] sm:$0xff] %v1258_v58 }
 0x1dc   : >> { %1263 = vst [vmem:[%s2502_s6 + $0xb4] sm:$0xff] %v1226_v56 }
 0x1dd   : >> { %1265 = vst [vmem:[%s2502_s6 + $0xbc] sm:$0xff] %v1228_v34 }
 0x1de   : >> { %1267 = vst [vmem:[%s2502_s6 + $0xc4] sm:$0xff] %v1242_v57 }
 0x1df   : >> { %1269 = vst [vmem:[%s2502_s6 + $0xcc] sm:$0xff] %v1244_v47  ;;  %1210 = sbr.rel (!%p1207_p1) target bundleno = 451 (0x1c3), region = 235 }
 0x1e0   : >> { %1271 = vst [vmem:[%s2502_s6 + $0xd4] sm:$0xff] %v1258_v58 }
 0x1e1   : >> { %1273 = vst [vmem:[%s2502_s6 + $0xdc] sm:$0xff] %v1260_v48 }
 0x1e2   : >> { %1275 = vst [vmem:[%s2502_s6 + $0xe4] sm:$0xff] %v1274_v59 }
 0x1e3   : >> { %1277 = vst [vmem:[%s2502_s6 + $0xec] sm:$0xff] %v1276_v60  ;;  %s3713_s6 = smov %s3447_s21 }
 0x1e4 PF: > { %s3492_s9 = sand.u32 7, %s1203_s15   ;;  %s2053_s10 = sshll.u32 %s3398_s23, 6 }
 0x1e5   : > { %s3496_s5 = scalar_lea.vmem %s3361_s24, %s2053_s10 [#allocation3]   ;;  %s3499_s11 = scalar_lea.vmem %s3385_s25, %s2053_s10  }
 0x1e6   : > { %p1968_p2 = scmp.le.s32.totalorder %s3492_s9, 0 }
 0x1e7   : > { %s3716_s22 = smov (!%p1968_p2), %s3499_s11  ;;  %s3717_s26 = smov (!%p1968_p2), %s3496_s5 }
 0x1e8   : > { %1589 = sbr.rel (%p1968_p2) target bundleno = 501 (0x1f5), region = 240  ;;  %s3508_s6 = smov (!%p1968_p2), 0  }
 0x1e9   : > { %s2528_s7 = smov (!%p1968_p2), 0  }
 0x1ed LB: >> { %v1301_v61 = vld [vmem:[%s2522_s26] sm:$0xff]  ;;  %v1303_v62 = vld [vmem:[%s2522_s26 + $0x10] sm:$0xff]  ;;  %s1309_s15 = sadd.s32 1, %s2526_s6  ;;  %s1295_s7 = sadd.s32 1, %s2530_s7   ;;  %s2530_s7 = sphi %s2528_s7, %s1295_s7   ;;  %s2526_s6 = sphi %s3508_s6, %s3718_s6   ;;  %s2522_s26 = sphi %s3717_s26, %s1314_s26   ;;  %s2518_s22 = sphi %s3716_s22, %s1315_s22  }
 0x1ee   : >> { %v1305_v63 = vld [vmem:[%s2522_s26 + $0x20] sm:$0xff]  ;;  %1302 = vst [vmem:[%s2518_s22] sm:$0xff] %v1301_v61  ;;  %v1307_v0 = vld [vmem:[%s2522_s26 + $0x30] sm:$0xff]  ;;  %p1310_p3 = scmp.ge.s32.totalorder %s1309_s15, %s3492_s9  ;;  %p1294_p4 = scmp.ge.s32.totalorder %s1295_s7, %s3492_s9 }
 0x1ef   : >> { %1304 = vst [vmem:[%s2518_s22 + $0x3c] sm:$0xff] %v1303_v62 }
 0x1f0   : >> { %1306 = vst [vmem:[%s2518_s22 + $0x78] sm:$0xff] %v1305_v63  ;;  %s3749_s15 = smov (%p1310_p3, %s1309_s15), 0  ;;  %1297 = sbr.rel (!%p1294_p4) target bundleno = 493 (0x1ed), region = 246 }
 0x1f1   : >> { %1308 = vst [vmem:[%s2518_s22 + $0xb4] sm:$0xff] %v1307_v0  ;;  %s1969_s23 = sshll.u32 %s3749_s15, 3  ;;  %s3718_s6 = smov %s3749_s15 }
 0x1f2   : >> { %s1314_s26 = scalar_lea.vmem %s3496_s5, %s1969_s23 [#allocation3]   ;;  %s1315_s22 = scalar_lea.vmem %s3499_s11, %s1969_s23  }
 0x1f5 PF: > { %1318 = sbr.rel (%p1199_p11) target bundleno = 569 (0x239), region = 129  ;;  %s1320_s8 = ssub.s32 (!%p1199_p11), %s3387_s28, %s3391_s14 }
 0x1f6   : > { %s1324_s29 = sshrl.u32 (!%p1199_p11), %s3387_s28, 3  ;;  %s3529_s4 = scalar_lea.vmem (!%p1199_p11), %s3361_s24, %s1320_s8 [#allocation3] }
 0x1f7   : > { %s3532_s30 = scalar_lea.vmem (!%p1199_p11), %s3385_s25, %s1320_s8  ;;  %s3536_s12 = sshrl.u32 (!%p1199_p11), %s1324_s29, 3 }
 0x1f8   : > { %p1971_p5 = scmp.le.s32.totalorder (!%p1199_p11), %s3536_s12, 0 }
 0x1fa   : > { %1603 = sbr.rel (%p1971_p5) target bundleno = 544 (0x220), region = 251  ;;  %s3719_s21 = smov (!%p1971_p5), %s3385_s25 }
 0x1fb   : > { %s3720_s9 = smov (!%p1971_p5), %s3361_s24  ;;  %s3545_s10 = smov (!%p1971_p5), 0  }
 0x1fc   : > { %s3547_s5 = smov (!%p1971_p5), 0  }
 0x1ff LB: >> { %v1349_v1 = vld [vmem:[%s2538_s9 + $0x38] sm:$0xff]  ;;  %v1365_v2 = vld [vmem:[%s2538_s9 + $0x48] sm:$0xff]  ;;  %v1335_v4 = vld [vmem:[%s2538_s9] sm:$0xff]  ;;  %s1399_s11 = sadd.s32 1, %s2542_s10  ;;  %s1329_s5 = sadd.s32 1, %s2546_s5   ;;  %s2546_s5 = sphi %s3547_s5, %s1329_s5   ;;  %s2542_s10 = sphi %s3545_s10, %s3723_s10   ;;  %s2538_s9 = sphi %s3720_s9, %s3722_s9   ;;  %s2534_s21 = sphi %s3719_s21, %s3721_s21  }
 0x200   : >> { %v1381_v3 = vld [vmem:[%s2538_s9 + $0x58] sm:$0xff]  ;;  %1350 = vst [vmem:[%s2534_s21 + $0x38] sm:$0xff] %v1349_v1  ;;  %v1337_v5 = vld [vmem:[%s2538_s9 + $0x8] sm:$0xff]  ;;  %v1339_v6 = vld [vmem:[%s2538_s9 + $0x10] sm:$0xff]  ;;  %p1400_p7 = scmp.ge.s32.totalorder %s1399_s11, %s3536_s12  ;;  %p1328_p8 = scmp.ge.s32.totalorder %s1329_s5, %s3536_s12 }
 0x201   : >> { %1366 = vst [vmem:[%s2534_s21 + $0x74] sm:$0xff] %v1365_v2  ;;  %v1341_v7 = vld [vmem:[%s2538_s9 + $0x18] sm:$0xff]  ;;  %v1343_v8 = vld [vmem:[%s2538_s9 + $0x20] sm:$0xff]  ;;  %v1345_v9 = vld [vmem:[%s2538_s9 + $0x28] sm:$0xff] }
 0x202   : >> { %1382 = vst [vmem:[%s2534_s21 + $0xb0] sm:$0xff] %v1381_v3  ;;  %s3751_s11 = smov (%p1400_p7, %s1399_s11), 0  ;;  %v1347_v10 = vld [vmem:[%s2538_s9 + $0x30] sm:$0xff]  ;;  %v1363_v11 = vld [vmem:[%s2538_s9 + $0x40] sm:$0xff]  ;;  %v1397_v14 = vld [vmem:[%s2538_s9 + $0x68] sm:$0xff] }
 0x203   : >> { %1336 = vst [vmem:[%s2534_s21] sm:$0xff] %v1335_v4  ;;  %s1972_s22 = sshll.u32 %s3751_s11, 6  ;;  %v1379_v12 = vld [vmem:[%s2538_s9 + $0x50] sm:$0xff]  ;;  %v1395_v13 = vld [vmem:[%s2538_s9 + $0x60] sm:$0xff]  ;;  %s3723_s10 = smov %s3751_s11 }
 0x204   : >> { %1338 = vst [vmem:[%s2534_s21 + $0x8] sm:$0xff] %v1337_v5  ;;  %s3582_s26 = scalar_lea.vmem %s3361_s24, %s1972_s22 [#allocation3]   ;;  %s3585_s6 = scalar_lea.vmem %s3385_s25, %s1972_s22  }
 0x205   : >> { %1340 = vst [vmem:[%s2534_s21 + $0x10] sm:$0xff] %v1339_v6  ;;  %s3722_s9 = smov %s3582_s26 }
 0x206   : >> { %1342 = vst [vmem:[%s2534_s21 + $0x18] sm:$0xff] %v1341_v7 }
 0x207   : >> { %1344 = vst [vmem:[%s2534_s21 + $0x20] sm:$0xff] %v1343_v8 }
 0x208   : >> { %1346 = vst [vmem:[%s2534_s21 + $0x28] sm:$0xff] %v1345_v9 }
 0x209   : >> { %1348 = vst [vmem:[%s2534_s21 + $0x30] sm:$0xff] %v1347_v10 }
 0x20a   : >> { %1352 = vst [vmem:[%s2534_s21 + $0x3c] sm:$0xff] %v1339_v6 }
 0x20b   : >> { %1354 = vst [vmem:[%s2534_s21 + $0x44] sm:$0xff] %v1341_v7 }
 0x20c   : >> { %1356 = vst [vmem:[%s2534_s21 + $0x4c] sm:$0xff] %v1343_v8 }
 0x20d   : >> { %1358 = vst [vmem:[%s2534_s21 + $0x54] sm:$0xff] %v1345_v9 }
 0x20e   : >> { %1360 = vst [vmem:[%s2534_s21 + $0x5c] sm:$0xff] %v1347_v10 }
 0x20f   : >> { %1362 = vst [vmem:[%s2534_s21 + $0x64] sm:$0xff] %v1349_v1 }
 0x210   : >> { %1364 = vst [vmem:[%s2534_s21 + $0x6c] sm:$0xff] %v1363_v11 }
 0x211   : >> { %1368 = vst [vmem:[%s2534_s21 + $0x78] sm:$0xff] %v1343_v8 }
 0x212   : >> { %1370 = vst [vmem:[%s2534_s21 + $0x80] sm:$0xff] %v1345_v9 }
 0x213   : >> { %1372 = vst [vmem:[%s2534_s21 + $0x88] sm:$0xff] %v1347_v10 }
 0x214   : >> { %1374 = vst [vmem:[%s2534_s21 + $0x90] sm:$0xff] %v1349_v1 }
 0x215   : >> { %1376 = vst [vmem:[%s2534_s21 + $0x98] sm:$0xff] %v1363_v11 }
 0x216   : >> { %1378 = vst [vmem:[%s2534_s21 + $0xa0] sm:$0xff] %v1365_v2 }
 0x217   : >> { %1380 = vst [vmem:[%s2534_s21 + $0xa8] sm:$0xff] %v1379_v12 }
 0x218   : >> { %1384 = vst [vmem:[%s2534_s21 + $0xb4] sm:$0xff] %v1347_v10 }
 0x219   : >> { %1386 = vst [vmem:[%s2534_s21 + $0xbc] sm:$0xff] %v1349_v1 }
 0x21a   : >> { %1388 = vst [vmem:[%s2534_s21 + $0xc4] sm:$0xff] %v1363_v11 }
 0x21b   : >> { %1390 = vst [vmem:[%s2534_s21 + $0xcc] sm:$0xff] %v1365_v2  ;;  %1331 = sbr.rel (!%p1328_p8) target bundleno = 511 (0x1ff), region = 257 }
 0x21c   : >> { %1392 = vst [vmem:[%s2534_s21 + $0xd4] sm:$0xff] %v1379_v12 }
 0x21d   : >> { %1394 = vst [vmem:[%s2534_s21 + $0xdc] sm:$0xff] %v1381_v3 }
 0x21e   : >> { %1396 = vst [vmem:[%s2534_s21 + $0xe4] sm:$0xff] %v1395_v13 }
 0x21f   : >> { %1398 = vst [vmem:[%s2534_s21 + $0xec] sm:$0xff] %v1397_v14  ;;  %s3721_s21 = smov %s3585_s6 }
 0x220 PF: > { %s3630_s7 = sand.u32 7, %s1324_s29   ;;  %s2055_s15 = sshll.u32 %s3536_s12, 6 }
 0x221   : > { %s3634_s23 = scalar_lea.vmem %s3361_s24, %s2055_s15 [#allocation3]   ;;  %s3637_s8 = scalar_lea.vmem %s3385_s25, %s2055_s15  }
 0x222   : > { %p1977_p9 = scmp.le.s32.totalorder %s3630_s7, 0 }
 0x223   : > { %s3724_s5 = smov (!%p1977_p9), %s3637_s8  ;;  %s3725_s21 = smov (!%p1977_p9), %s3634_s23 }
 0x224   : > { %1617 = sbr.rel (%p1977_p9) target bundleno = 561 (0x231), region = 262  ;;  %s2556_s9 = smov (!%p1977_p9), 0  }
 0x225   : > { %s2560_s10 = smov (!%p1977_p9), 0  }
 0x229 LB: >> { %v1422_v15 = vld [vmem:[%s2554_s21] sm:$0xff]  ;;  %v1424_v16 = vld [vmem:[%s2554_s21 + $0x10] sm:$0xff]  ;;  %s1430_s29 = sadd.s32 1, %s2558_s9  ;;  %s1416_s10 = sadd.s32 1, %s2562_s10   ;;  %s2562_s10 = sphi %s2560_s10, %s1416_s10   ;;  %s2558_s9 = sphi %s2556_s9, %s2557_s9   ;;  %s2554_s21 = sphi %s3725_s21, %s1435_s21   ;;  %s2550_s5 = sphi %s3724_s5, %s1436_s5  }
 0x22a   : >> { %v1426_v17 = vld [vmem:[%s2554_s21 + $0x20] sm:$0xff]  ;;  %1423 = vst [vmem:[%s2550_s5] sm:$0xff] %v1422_v15  ;;  %v1428_v18 = vld [vmem:[%s2554_s21 + $0x30] sm:$0xff]  ;;  %p1431_p10 = scmp.ge.s32.totalorder %s1430_s29, %s3630_s7  ;;  %p1415_p6 = scmp.ge.s32.totalorder %s1416_s10, %s3630_s7 }
 0x22b   : >> { %1425 = vst [vmem:[%s2550_s5 + $0x3c] sm:$0xff] %v1424_v16 }
 0x22c   : >> { %1427 = vst [vmem:[%s2550_s5 + $0x78] sm:$0xff] %v1426_v17  ;;  %s3753_s29 = smov (%p1431_p10, %s1430_s29), 0  ;;  %1418 = sbr.rel (!%p1415_p6) target bundleno = 553 (0x229), region = 268 }
 0x22d   : >> { %1429 = vst [vmem:[%s2550_s5 + $0xb4] sm:$0xff] %v1428_v18  ;;  %s1978_s12 = sshll.u32 %s3753_s29, 3  ;;  %s2557_s9 = smov %s3753_s29  }
 0x22e   : >> { %s1435_s21 = scalar_lea.vmem %s3634_s23, %s1978_s12 [#allocation3]   ;;  %s1436_s5 = scalar_lea.vmem %s3637_s8, %s1978_s12  }
 0x231 PF: > { %s2567_s11 = smov 1  }
 0x232   : > { %s1437_s22 = sshll.u32 %s2567_s11, %s3391_s14 }
 0x233   : > { %s1980_s26 = sadd.s32 4294967295, %s1437_s22 }
 0x234   : > { %v1447_v20 = vld [vmem:[%s3529_s4] sm:%s1980_s26]  ;;  %v1449_v21 = vld [vmem:[%s3529_s4 + $0x10] sm:%s1980_s26] }
 0x235   : > { %1448 = vst [vmem:[%s3532_s30] sm:%s1980_s26] %v1447_v20  ;;  %v1451_v22 = vld [vmem:[%s3529_s4 + $0x20] sm:%s1980_s26] }
 0x236   : > { %1450 = vst [vmem:[%s3532_s30 + $0x3c] sm:%s1980_s26] %v1449_v21  ;;  %v1453_v23 = vld [vmem:[%s3529_s4 + $0x30] sm:%s1980_s26] }
 0x237   : > { %1452 = vst [vmem:[%s3532_s30 + $0x78] sm:%s1980_s26] %v1451_v22 }
 0x238   : > { %1454 = vst [vmem:[%s3532_s30 + $0xb4] sm:%s1980_s26] %v1453_v23 }
 0x239 PF: > { %p1981_p11 = scmp.ge.u32.totalorder %s3387_s28, 8 }
 0x23a   : > { %s2568_s6 = smov (!%p1981_p11), 1  }
 0x23b   : > { %1179 = sbr.rel (%p1981_p11) target bundleno = 581 (0x245), region = 100  ;;  %s1180_s14 = sshll.u32 (!%p1981_p11), %s2568_s6, %s3387_s28 }
 0x23c   : > { %s1982_s7 = sadd.s32 (!%p1981_p11), 4294967295, %s1180_s14 }
 0x240   : > { %v1190_v24 = vld [vmem:[%s3361_s24] sm:%s1982_s7]  ;;  %v1192_v19 = vld [vmem:[%s3361_s24 + $0x10] sm:%s1982_s7] }
 0x241   : > { %1191 = vst [vmem:[%s3385_s25] sm:%s1982_s7] %v1190_v24  ;;  %v1194_v25 = vld [vmem:[%s3361_s24 + $0x20] sm:%s1982_s7] }
 0x242   : > { %1193 = vst [vmem:[%s3385_s25 + $0x3c] sm:%s1982_s7] %v1192_v19  ;;  %v1196_v26 = vld [vmem:[%s3361_s24 + $0x30] sm:%s1982_s7] }
 0x243   : > { %1195 = vst [vmem:[%s3385_s25 + $0x78] sm:%s1982_s7] %v1194_v25 }
 0x244   : > { %1197 = vst [vmem:[%s3385_s25 + $0xb4] sm:%s1982_s7] %v1196_v26 }
 0x245 PF: > { %s13_s18 = sadd.s32 1, %s2466_s18   ;;  %s3726_s12 = smov %s2446_s13 }
 0x246   : > { %p10_p12 = scmp.ge.s32.totalorder %s13_s18, 10   ;;  %s3727_s13 = smov %s2645_s27 }
 0x247   : > { %s3728_s14 = smov %s2458_s16  ;;  %s3729_s15 = smov %s2462_s17 }
 0x248   : > { %s3730_s16 = smov %s3733_s19  ;;  %s3731_s17 = smov %s3737_s20 }
 0x249   :  { %12 = sbr.rel (!%p10_p12) target bundleno = 4 (0x4), region = 279 }

// kernel: convpolicy_forward.6
= control target key start
LH: loop header
LB: loop body
LE: loop exit
PB: predicated region body
PF: predicated region fallthrough
CT: control target
= control target key end

     0   :  { %s3851_s12 = smov 0   ;;  %s3853_s13 = smov 0   ;;  %s5010_s0 = inlined_call_operand.vmem [shape: bf16[2,800,400], index: 0, kind: input, shape index: {}]   ;;  %s5011_s1 = inlined_call_operand.vmem [shape: bf16[64,800], index: 1, kind: input, shape index: {}]   ;;  %s5012_s2 = inlined_call_operand.vmem [shape: f32[64,1], index: 2, kind: input, shape index: {}]   ;;  %s5013_s3 = inlined_call_operand.vmem [shape: bf16[2,64,400], index: 3, kind: output, shape index: {}]  }
   0x1   :  { %s3855_s14 = smov 0  }
   0x2 LB: > { %s25_s15 = sadd.s32 1, %s3824_s13  ;;  %p2614_p0 = scmp.ge.s32.totalorder %s3828_s14, 1  ;;  %s3828_s14 = sphi %s3855_s14, %s13_s14   ;;  %s3824_s13 = sphi %s3853_s13, %s5099_s13   ;;  %s3820_s12 = sphi %s3851_s12, %s5098_s12  }
   0x3   : > { %p27_p1 = scmp.ge.s32.totalorder %s25_s15, 2  ;;  %p158_p2 = scmp.lt.s32.totalorder %s3828_s14, 3 }
   0x5   : > { %s5101_s15 = smov (%p27_p1, %s25_s15), 0  ;;  %p159_p3 = pnand %p2614_p0, %p158_p2 }
   0x7   : > { %162 = sbr.rel (%p159_p3) target bundleno = 636 (0x27c), region = 32 }
   0xc   : > { %p191_p4 = scmp.lt.s32.totalorder %s3820_s12, 1  ;;  %vm1631_vm0 = vcmask 261120   ;;  %vm2505_vm1 = vcmask 1043456   ;;  %vm2506_vm2 = vcmask 130052  }
   0xd   : > { %vm4949_vm3 = vmor %vm2506_vm2, %vm2505_vm1 }
   0xe   : > { %s5103_s12 = smov (!%p191_p4, %s3820_s12), 1 }
   0xf   : > { %s3777_s16 = smul.u32 1600, %s5103_s12  ;;  %s3548_s11 = sshll.u32 %s5103_s12, 7 }
  0x10   : > { %s4755_s17 = scalar_lea.vmem %s5013_s3, %s3548_s11 }
  0x11   : > { %s3875_s19 = scalar_lea.vmem %s5010_s0, %s3777_s16 }
  0x12   : > { %v2844_v0 = vld [vmem:[%s3875_s19 + $0xe0] sm:$0xf]  ;;  %v3607_v1 = vld [vmem:[%s3875_s19 + $0xec] sm:$0xf0] }
  0x13   : > { %v2972_v2 = vld [vmem:[%s3875_s19 + $0x1e0] sm:$0xf]  ;;  %v2845_v3 = vor.u32 %v3607_v1, %v2844_v0  ;;  %v3639_v4 = vld [vmem:[%s3875_s19 + $0x1ec] sm:$0xf0] }
  0x14   : > { %v3100_v5 = vld [vmem:[%s3875_s19 + $0x2e0] sm:$0xf]  ;;  %v3671_v6 = vld [vmem:[%s3875_s19 + $0x2ec] sm:$0xf0]  ;;  %v2973_v7 = vor.u32 %v3639_v4, %v2972_v2 }
  0x15   : > { %v3101_v8 = vor.u32 %v3671_v6, %v3100_v5  ;;  %v3228_v9 = vld [vmem:[%s3875_s19 + $0x3e0] sm:$0xf]  ;;  %v3703_v10 = vld [vmem:[%s3875_s19 + $0x3ec] sm:$0xf0]  ;;  %1644 = vmatpush.bf16.msra.mxu0 %v2845_v3 }
  0x16   : > { %v2828_v11 = vld [vmem:[%s3875_s19 + $0xc0] sm:$0xf]  ;;  %v3229_v12 = vor.u32 %v3703_v10, %v3228_v9  ;;  %v3603_v13 = vld [vmem:[%s3875_s19 + $0xcc] sm:$0xf0]  ;;  %1673 = vmatpush.bf16.msra.mxu1 %v2973_v7 }
  0x17   : > { %v2956_v14 = vld [vmem:[%s3875_s19 + $0x1c0] sm:$0xf]  ;;  %v3635_v15 = vld [vmem:[%s3875_s19 + $0x1cc] sm:$0xf0]  ;;  %1702 = vmatpush.bf16.msra.mxu2 %v3101_v8  ;;  %v2829_v16 = vor.u32 %v3603_v13, %v2828_v11 }
  0x18   : > { %v2957_v17 = vor.u32 %v3635_v15, %v2956_v14  ;;  %v3084_v18 = vld [vmem:[%s3875_s19 + $0x2c0] sm:$0xf]  ;;  %v3667_v19 = vld [vmem:[%s3875_s19 + $0x2cc] sm:$0xf0]  ;;  %1731 = vmatpush.bf16.msra.mxu3 %v3229_v12 }
  0x19   : > { %v3212_v20 = vld [vmem:[%s3875_s19 + $0x3c0] sm:$0xf]  ;;  %v3085_v21 = vor.u32 %v3667_v19, %v3084_v18  ;;  %v3699_v22 = vld [vmem:[%s3875_s19 + $0x3cc] sm:$0xf0]  ;;  %1645 = vmatpush.bf16.msra.mxu0 %v2829_v16 }
  0x1a   : > { %v2812_v23 = vld [vmem:[%s3875_s19 + $0xa0] sm:$0xf]  ;;  %v3599_v24 = vld [vmem:[%s3875_s19 + $0xac] sm:$0xf0]  ;;  %v3213_v25 = vor.u32 %v3699_v22, %v3212_v20  ;;  %1674 = vmatpush.bf16.msra.mxu1 %v2957_v17 }
  0x1b   : > { %v2940_v26 = vld [vmem:[%s3875_s19 + $0x1a0] sm:$0xf]  ;;  %v3631_v27 = vld [vmem:[%s3875_s19 + $0x1ac] sm:$0xf0]  ;;  %v2813_v29 = vor.u32 %v3599_v24, %v2812_v23  ;;  %1703 = vmatpush.bf16.msra.mxu2 %v3085_v21 }
  0x1c   : > { %v3068_v28 = vld [vmem:[%s3875_s19 + $0x2a0] sm:$0xf]  ;;  %v3663_v30 = vld [vmem:[%s3875_s19 + $0x2ac] sm:$0xf0]  ;;  %v2941_v33 = vor.u32 %v3631_v27, %v2940_v26  ;;  %1732 = vmatpush.bf16.msra.mxu3 %v3213_v25 }
  0x1d   : > { %v3196_v31 = vld [vmem:[%s3875_s19 + $0x3a0] sm:$0xf]  ;;  %v3695_v32 = vld [vmem:[%s3875_s19 + $0x3ac] sm:$0xf0]  ;;  %v3069_v34 = vor.u32 %v3663_v30, %v3068_v28  ;;  %1646 = vmatpush.bf16.msra.mxu0 %v2813_v29  ;;  %v3552_v29 = vld [vmem:[%s5011_s1 + $0x18] sm:$0xf0] }
  0x1e   : > { %v2796_v35 = vld [vmem:[%s3875_s19 + $0x80] sm:$0xf]  ;;  %v3595_v36 = vld [vmem:[%s3875_s19 + $0x8c] sm:$0xf0]  ;;  %v3197_v38 = vor.u32 %v3695_v32, %v3196_v31  ;;  %1675 = vmatpush.bf16.msra.mxu1 %v2941_v33  ;;  %v3549_v30 = vld [vmem:[%s5011_s1 + $0x4] sm:$0xf] }
  0x1f   : > { %v2924_v37 = vld [vmem:[%s3875_s19 + $0x180] sm:$0xf]  ;;  %v3627_v39 = vld [vmem:[%s3875_s19 + $0x18c] sm:$0xf0]  ;;  %v2797_v44 = vor.u32 %v3595_v36, %v2796_v35  ;;  %1704 = vmatpush.bf16.msra.mxu2 %v3069_v34  ;;  %v3605_v36 = vld [vmem:[%s3875_s19 + $0xe4] sm:$0xf] }
  0x20   : > { %v3052_v40 = vld [vmem:[%s3875_s19 + $0x280] sm:$0xf]  ;;  %v3659_v41 = vld [vmem:[%s3875_s19 + $0x28c] sm:$0xf0]  ;;  %v2925_v45 = vor.u32 %v3627_v39, %v2924_v37  ;;  %1733 = vmatpush.bf16.msra.mxu3 %v3197_v38  ;;  %v2846_v37 = vld [vmem:[%s3875_s19 + $0xf0] sm:$0xf0] }
  0x21   : > { %v3180_v42 = vld [vmem:[%s3875_s19 + $0x380] sm:$0xf]  ;;  %v3691_v43 = vld [vmem:[%s3875_s19 + $0x38c] sm:$0xf0]  ;;  %v3053_v46 = vor.u32 %v3659_v41, %v3052_v40  ;;  %1647 = vmatpush.bf16.msra.mxu0 %v2797_v44  ;;  %v3830_v38 = vmov 0  }
  0x22   : > { %v2780_v47 = vld [vmem:[%s3875_s19 + $0x60] sm:$0xf]  ;;  %v3591_v48 = vld [vmem:[%s3875_s19 + $0x6c] sm:$0xf0]  ;;  %v3181_v50 = vor.u32 %v3691_v43, %v3180_v42  ;;  %1676 = vmatpush.bf16.msra.mxu1 %v2925_v45  ;;  %3803 = vset.pattern.permute.xlu0 %v3830_v38  ;;  %v2628_v41 = vld [vmem:[%s5011_s1 + $0x8] sm:$0xf] }
  0x23   : > { %v2908_v49 = vld [vmem:[%s3875_s19 + $0x160] sm:$0xf]  ;;  %v3623_v51 = vld [vmem:[%s3875_s19 + $0x16c] sm:$0xf0]  ;;  %v2781_v56 = vor.u32 %v3591_v48, %v2780_v47  ;;  %1705 = vmatpush.bf16.msra.mxu2 %v3053_v46  ;;  %v3553_v42 = vld [vmem:[%s5011_s1 + $0x20] sm:$0xf0]  ;;  %3804 = vset.pattern.permute.xlu1 %v3830_v38 }
  0x24   : > { %v3036_v52 = vld [vmem:[%s3875_s19 + $0x260] sm:$0xf]  ;;  %v3655_v53 = vld [vmem:[%s3875_s19 + $0x26c] sm:$0xf0]  ;;  %v2909_v57 = vor.u32 %v3623_v51, %v2908_v49  ;;  %1734 = vmatpush.bf16.msra.mxu3 %v3181_v50  ;;  %v3550_v43 = vld [vmem:[%s5011_s1 + $0xc] sm:$0xf]  ;;  %v2849_v50 = vor.u32 %v3605_v36, %v2846_v37  ;;  %3805 = vset.pattern.permute.xlu2 %v3830_v38 }
  0x25   : > { %v3164_v54 = vld [vmem:[%s3875_s19 + $0x360] sm:$0xf]  ;;  %v3687_v55 = vld [vmem:[%s3875_s19 + $0x36c] sm:$0xf0]  ;;  %v3037_v58 = vor.u32 %v3655_v53, %v3036_v52  ;;  %1648 = vmatpush.bf16.msra.mxu0 %v2781_v56  ;;  %v2630_v45 = vld [vmem:[%s5011_s1 + $0x24] sm:$0xf0] }
  0x26   : > { %v2764_v59 = vld [vmem:[%s3875_s19 + $0x40] sm:$0xf]  ;;  %v3587_v60 = vld [vmem:[%s3875_s19 + $0x4c] sm:$0xf0]  ;;  %v3165_v62 = vor.u32 %v3687_v55, %v3164_v54  ;;  %1677 = vmatpush.bf16.msra.mxu1 %v2909_v57  ;;  %v3980_v54 = vor.u32 %v3553_v42, %v2628_v41  ;;  %v3601_v55 = vld [vmem:[%s3875_s19 + $0xc4] sm:$0xf]  ;;  %v3984_v57 = vor.u32 %v3550_v43, %v2630_v45 }
  0x27   : > { %v2892_v61 = vld [vmem:[%s3875_s19 + $0x140] sm:$0xf]  ;;  %v3619_v63 = vld [vmem:[%s3875_s19 + $0x14c] sm:$0xf0]  ;;  %v2765_v4 = vor.u32 %v3587_v60, %v2764_v59  ;;  %1706 = vmatpush.bf16.msra.mxu2 %v3037_v58  ;;  %v2830_v56 = vld [vmem:[%s3875_s19 + $0xd0] sm:$0xf0] }
  0x28   : > { %v3020_v0 = vld [vmem:[%s3875_s19 + $0x240] sm:$0xf]  ;;  %v3651_v1 = vld [vmem:[%s3875_s19 + $0x24c] sm:$0xf0]  ;;  %v2893_v5 = vor.u32 %v3619_v63, %v2892_v61  ;;  %1735 = vmatpush.bf16.msra.mxu3 %v3165_v62  ;;  %5038 = vst [vmem:[#allocation2_spill] sm:$0xff] %v3984_v57  ;;  %v2833_v62 = vor.u32 %v3601_v55, %v2830_v56 }
  0x29   : > { %v3148_v2 = vld [vmem:[%s3875_s19 + $0x340] sm:$0xf]  ;;  %v3683_v3 = vld [vmem:[%s3875_s19 + $0x34c] sm:$0xf0]  ;;  %v3021_v6 = vor.u32 %v3651_v1, %v3020_v0  ;;  %1649 = vmatpush.bf16.msra.mxu0 %v2765_v4  ;;  %v444_v1 = vld [vmem:[%s5012_s2 + $0x8] sm:$0xff] }
  0x2a   : > { %v2748_v7 = vld [vmem:[%s3875_s19 + $0x20] sm:$0xf]  ;;  %v3583_v8 = vld [vmem:[%s3875_s19 + $0x2c] sm:$0xf0]  ;;  %v3149_v10 = vor.u32 %v3683_v3, %v3148_v2  ;;  %1678 = vmatpush.bf16.msra.mxu1 %v2893_v5  ;;  %v3597_v2 = vld [vmem:[%s3875_s19 + $0xa4] sm:$0xf] }
  0x2b   : > { %v2876_v9 = vld [vmem:[%s3875_s19 + $0x120] sm:$0xf]  ;;  %v3615_v11 = vld [vmem:[%s3875_s19 + $0x12c] sm:$0xf0]  ;;  %v2749_v17 = vor.u32 %v3583_v8, %v2748_v7  ;;  %1707 = vmatpush.bf16.msra.mxu2 %v3021_v6  ;;  %v2814_v3 = vld [vmem:[%s3875_s19 + $0xb0] sm:$0xf0] }
  0x2c   : > { %v3004_v12 = vld [vmem:[%s3875_s19 + $0x220] sm:$0xf]  ;;  %v3647_v13 = vld [vmem:[%s3875_s19 + $0x22c] sm:$0xf0]  ;;  %v2877_v21 = vor.u32 %v3615_v11, %v2876_v9  ;;  %1736 = vmatpush.bf16.msra.mxu3 %v3149_v10  ;;  %v2817_v9 = vor.u32 %v3597_v2, %v2814_v3  ;;  %v3585_v45 = vld [vmem:[%s3875_s19 + $0x44] sm:$0xf] }
  0x2d   : > { %v3132_v14 = vld [vmem:[%s3875_s19 + $0x320] sm:$0xf]  ;;  %v3679_v15 = vld [vmem:[%s3875_s19 + $0x32c] sm:$0xf0]  ;;  %v3005_v22 = vor.u32 %v3647_v13, %v3004_v12  ;;  %1650 = vmatpush.bf16.msra.mxu0 %v2749_v17  ;;  %v3593_v12 = vld [vmem:[%s3875_s19 + $0x84] sm:$0xf] }
  0x2e   : > { %v2732_v16 = vld [vmem:[%s3875_s19] sm:$0xf]  ;;  %v3579_v18 = vld [vmem:[%s3875_s19 + $0xc] sm:$0xf0]  ;;  %v3133_v26 = vor.u32 %v3679_v15, %v3132_v14  ;;  %1679 = vmatpush.bf16.msra.mxu1 %v2877_v21  ;;  %v2798_v13 = vld [vmem:[%s3875_s19 + $0x90] sm:$0xf0] }
  0x2f   : > { %v2860_v19 = vld [vmem:[%s3875_s19 + $0x100] sm:$0xf]  ;;  %v3611_v20 = vld [vmem:[%s3875_s19 + $0x10c] sm:$0xf0]  ;;  %v2733_v34 = vor.u32 %v3579_v18, %v2732_v16  ;;  %1708 = vmatpush.bf16.msra.mxu2 %v3005_v22  ;;  %v2648_v18 = vld [vmem:[%s5011_s1 + $0x38] sm:$0xf] }
  0x30   : > { %v2988_v23 = vld [vmem:[%s3875_s19 + $0x200] sm:$0xf]  ;;  %v3643_v24 = vld [vmem:[%s3875_s19 + $0x20c] sm:$0xf0]  ;;  %v2861_v39 = vor.u32 %v3611_v20, %v2860_v19  ;;  %1737 = vmatpush.bf16.msra.mxu3 %v3133_v26  ;;  %v3559_v19 = vld [vmem:[%s5011_s1 + $0x50] sm:$0xf0] }
  0x31   : > { %v3116_v25 = vld [vmem:[%s3875_s19 + $0x300] sm:$0xf]  ;;  %v3675_v27 = vld [vmem:[%s3875_s19 + $0x30c] sm:$0xf0]  ;;  %v2989_v40 = vor.u32 %v3643_v24, %v2988_v23  ;;  %1651 = vmatpush.bf16.msra.mxu0 %v2733_v34  ;;  %v3556_v23 = vld [vmem:[%s5011_s1 + $0x3c] sm:$0xf] }
  0x32   : > { %v2620_v28 = vld [vmem:[%s5011_s1] sm:$0xf]  ;;  %v3775_v32 = vld [vmem:[%s3875_s19 + $0x62c] sm:$0xf0]  ;;  %v3117_v44 = vor.u32 %v3675_v27, %v3116_v25  ;;  %1680 = vmatpush.bf16.msra.mxu1 %v2861_v39  ;;  %v2650_v24 = vld [vmem:[%s5011_s1 + $0x54] sm:$0xf0]  ;;  %v2801_v25 = vor.u32 %v3593_v12, %v2798_v13  ;;  %v4045_v39 = vor.u32 %v3559_v19, %v2648_v18 }
  0x33   : > { %v3516_v31 = vld [vmem:[%s3875_s19 + $0x620] sm:$0xf]  ;;  %v3735_v48 = vld [vmem:[%s3875_s19 + $0x4ec] sm:$0xf0]  ;;  %v3974_v49 = vor.u32 %v3552_v29, %v2620_v28  ;;  %1709 = vmatpush.bf16.msra.mxu2 %v2989_v40  ;;  %v3589_v28 = vld [vmem:[%s3875_s19 + $0x64] sm:$0xf]  ;;  %v4049_v43 = vor.u32 %v3556_v23, %v2650_v24 }
  0x34   : > { %v443_v33 = vld [vmem:[%s5012_s2] sm:$0xff]  ;;  %v3517_v46 = vor.u32 %v3775_v32, %v3516_v31  ;;  %v3767_v52 = vld [vmem:[%s3875_s19 + $0x5ec] sm:$0xf0]  ;;  %1738 = vmatpush.bf16.msra.mxu3 %v3117_v44  ;;  %v2782_v29 = vld [vmem:[%s3875_s19 + $0x70] sm:$0xf0] }
  0x35   : > { %v2622_v35 = vld [vmem:[%s5011_s1 + $0x1c] sm:$0xf0]  ;;  %453 = vperm.xlu0 %3803, %v443_v33   ;;  %v3731_v61 = vld [vmem:[%s3875_s19 + $0x4cc] sm:$0xf0]  ;;  %1652 = vmatmul.bf16.vlgmr.msra.gmra.mxu0 %v3974_v49  ;;  %v3560_v32 = vld [vmem:[%s5011_s1 + $0x58] sm:$0xf0]  ;;  %v2785_v40 = vor.u32 %v3589_v28, %v2782_v29 }
  0x36   : > { %v3356_v47 = vld [vmem:[%s3875_s19 + $0x4e0] sm:$0xf]  ;;  %v3978_v53 = vor.u32 %v3549_v30, %v2622_v35  ;;  %v3763_v0 = vld [vmem:[%s3875_s19 + $0x5cc] sm:$0xf0]  ;;  %1710 = vmatmul.bf16.vlgmr.msra.gmra.mxu2 %v3980_v54  ;;  %v446_v30 = vld [vmem:[%s5012_s2 + $0x18] sm:$0xff] }
  0x37   : > { %v3484_v51 = vld [vmem:[%s3875_s19 + $0x5e0] sm:$0xf]  ;;  %v3357_v58 = vor.u32 %v3735_v48, %v3356_v47  ;;  %1824 = vmatpush.bf16.msrb.mxu2 %v3517_v46  ;;  %v445_v4 = vld [vmem:[%s5012_s2 + $0x10] sm:$0xff]  ;;  %1739 = vmatmul.bf16.vlgmr.msra.gmra.mxu3 %v3984_v57  ;;  %v3557_v33 = vld [vmem:[%s5011_s1 + $0x44] sm:$0xf] }
  0x38   : > { %v3485_v59 = vor.u32 %v3767_v52, %v3484_v51  ;;  %v3340_v60 = vld [vmem:[%s3875_s19 + $0x4c0] sm:$0xf]  ;;  %1847 = vmatpush.bf16.msrb.mxu3 %v2849_v50  ;;  %1681 = vmatmul.bf16.vlgmr.msra.gmra.mxu1 %v3978_v53  ;;  %v3727_v8 = vld [vmem:[%s3875_s19 + $0x4ac] sm:$0xf0]  ;;  %v2766_v46 = vld [vmem:[%s3875_s19 + $0x50] sm:$0xf0] }
  0x39   : > { %v3468_v63 = vld [vmem:[%s3875_s19 + $0x5c0] sm:$0xf]  ;;  %1760 = vmatpush.bf16.msrb.mxu0 %v3357_v58  ;;  %v3341_v5 = vor.u32 %v3731_v61, %v3340_v60  ;;  %v3759_v11 = vld [vmem:[%s3875_s19 + $0x5ac] sm:$0xf0]  ;;  %463 = vperm.xlu1 %3804, %v445_v4   ;;  %v2769_v55 = vor.u32 %v3585_v45, %v2766_v46  ;;  %v3581_v60 = vld [vmem:[%s3875_s19 + $0x24] sm:$0xf] }
  0x3a   : > { %1789 = vmatpush.bf16.msrb.mxu1 %v3485_v59  ;;  %v3469_v6 = vor.u32 %v3763_v0, %v3468_v63  ;;  %v3324_v7 = vld [vmem:[%s3875_s19 + $0x4a0] sm:$0xf]  ;;  %v3771_v15 = vld [vmem:[%s3875_s19 + $0x60c] sm:$0xf0]  ;;  %v2750_v0 = vld [vmem:[%s3875_s19 + $0x30] sm:$0xf0] }
  0x3b   : > { %v3452_v10 = vld [vmem:[%s3875_s19 + $0x5a0] sm:$0xf]  ;;  %v3325_v16 = vor.u32 %v3727_v8, %v3324_v7  ;;  %v3723_v22 = vld [vmem:[%s3875_s19 + $0x48c] sm:$0xf0]  ;;  %v3577_v4 = vld [vmem:[%s3875_s19 + $0x4] sm:$0xf] }
  0x3c   : > { %1848 = vmatpush.bf16.msrb.mxu3 %v2833_v62  ;;  %v3500_v14 = vld [vmem:[%s3875_s19 + $0x600] sm:$0xf]  ;;  %v3453_v20 = vor.u32 %v3759_v11, %v3452_v10  ;;  %v3755_v27 = vld [vmem:[%s3875_s19 + $0x58c] sm:$0xf0]  ;;  %v2684_v18 = vld [vmem:[%s5011_s1 + $0x78] sm:$0xf] }
  0x3d   : > { %458 = vperm.xlu0 %3803, %v444_v1   ;;  %1761 = vmatpush.bf16.msrb.mxu0 %v3341_v5  ;;  %v3501_v17 = vor.u32 %v3771_v15, %v3500_v14  ;;  %v3308_v21 = vld [vmem:[%s3875_s19 + $0x480] sm:$0xf]  ;;  %v3719_v38 = vld [vmem:[%s3875_s19 + $0x46c] sm:$0xf0]  ;;  %v2753_v1 = vor.u32 %v3581_v60, %v2750_v0  ;;  %v2734_v5 = vld [vmem:[%s3875_s19 + $0x10] sm:$0xf0] }
  0x3e   : > { %1790 = vmatpush.bf16.msrb.mxu1 %v3469_v6  ;;  %v3436_v26 = vld [vmem:[%s3875_s19 + $0x580] sm:$0xf]  ;;  %v3309_v34 = vor.u32 %v3723_v22, %v3308_v21  ;;  %v3751_v42 = vld [vmem:[%s3875_s19 + $0x56c] sm:$0xf0]  ;;  %v2737_v11 = vor.u32 %v3577_v4, %v2734_v5  ;;  %v3566_v15 = vld [vmem:[%s5011_s1 + $0x88] sm:$0xf0] }
  0x3f   : > { %1825 = vmatpush.bf16.msrb.mxu2 %v3501_v17  ;;  %v2656_v31 = vld [vmem:[%s5011_s1 + $0x40] sm:$0xf]  ;;  %v3437_v36 = vor.u32 %v3755_v27, %v3436_v26  ;;  %v3715_v52 = vld [vmem:[%s3875_s19 + $0x44c] sm:$0xf0]  ;;  %v3567_v19 = vld [vmem:[%s5011_s1 + $0x90] sm:$0xf0] }
  0x40   : > { %1849 = vmatpush.bf16.msrb.mxu3 %v2817_v9  ;;  %v2658_v35 = vld [vmem:[%s5011_s1 + $0x5c] sm:$0xf0]  ;;  %v4051_v44 = vor.u32 %v3560_v32, %v2656_v31  ;;  %v3747_v58 = vld [vmem:[%s3875_s19 + $0x54c] sm:$0xf0]  ;;  %v3564_v21 = vld [vmem:[%s5011_s1 + $0x7c] sm:$0xf]  ;;  %v4108_v26 = vor.u32 %v3567_v19, %v2684_v18 }
  0x41   : > { %1762 = vmatpush.bf16.msrb.mxu0 %v3325_v16  ;;  %v3292_v37 = vld [vmem:[%s3875_s19 + $0x460] sm:$0xf]  ;;  %468 = vperm.xlu1 %3804, %v446_v30   ;;  %v4055_v47 = vor.u32 %v3557_v33, %v2658_v35  ;;  %v3711_v63 = vld [vmem:[%s3875_s19 + $0x42c] sm:$0xf0]  ;;  %v3563_v16 = vld [vmem:[%s5011_s1 + $0x74] sm:$0xf] }
  0x42   : > { %1791 = vmatpush.bf16.msrb.mxu1 %v3453_v20  ;;  %v3420_v41 = vld [vmem:[%s3875_s19 + $0x560] sm:$0xf]  ;;  %v3293_v48 = vor.u32 %v3719_v38, %v3292_v37  ;;  %v3743_v3 = vld [vmem:[%s3875_s19 + $0x52c] sm:$0xf0]  ;;  %v2686_v22 = vld [vmem:[%s5011_s1 + $0x94] sm:$0xf0] }
  0x43   : > { %5039 = vst [vmem:[#allocation3_spill] sm:$0xff] %v4055_v47  ;;  %v3421_v50 = vor.u32 %v3751_v42, %v3420_v41  ;;  %v3276_v51 = vld [vmem:[%s3875_s19 + $0x440] sm:$0xf]  ;;  %v449_v7 = vld [vmem:[%s5012_s2 + $0x30] sm:$0xff]  ;;  %v4110_v27 = vor.u32 %v3564_v21, %v2686_v22  ;;  %v3701_v28 = vld [vmem:[%s3875_s19 + $0x3e4] sm:$0xf] }
  0x44   : > { %1850 = vmatpush.bf16.msrb.mxu3 %v2801_v25  ;;  %v3404_v56 = vld [vmem:[%s3875_s19 + $0x540] sm:$0xf]  ;;  %v3277_v59 = vor.u32 %v3715_v52, %v3276_v51  ;;  %v3707_v10 = vld [vmem:[%s3875_s19 + $0x40c] sm:$0xf0]  ;;  %5042 = vst [vmem:[#allocation6_spill] sm:$0xff] %v4108_v26  ;;  %v450_v38 = vld [vmem:[%s5012_s2 + $0x38] sm:$0xff] }
  0x45   : > { %1763 = vmatpush.bf16.msrb.mxu0 %v3309_v34  ;;  %v3405_v61 = vor.u32 %v3747_v58, %v3404_v56  ;;  %v3260_v62 = vld [vmem:[%s3875_s19 + $0x420] sm:$0xf]  ;;  %483 = vperm.xlu0 %3803, %v449_v7   ;;  %v3739_v13 = vld [vmem:[%s3875_s19 + $0x50c] sm:$0xf0]  ;;  %5043 = vst [vmem:[#allocation7_spill] sm:$0xff] %v4110_v27  ;;  %v448_v4 = vld [vmem:[%s5012_s2 + $0x28] sm:$0xff] }
  0x46   : > { %1792 = vmatpush.bf16.msrb.mxu1 %v3437_v36  ;;  %1657 = vmatmul.bf16.gmra.mxu0 %v4045_v39  ;;  %v3388_v2 = vld [vmem:[%s3875_s19 + $0x520] sm:$0xf]  ;;  %v3261_v6 = vor.u32 %v3711_v63, %v3260_v62  ;;  %v2676_v14 = vld [vmem:[%s5011_s1 + $0x70] sm:$0xf]  ;;  %v3230_v29 = vld [vmem:[%s3875_s19 + $0x3f0] sm:$0xf0] }
  0x47   : > { %1715 = vmatmul.bf16.gmra.mxu2 %v4051_v44  ;;  %1744 = vmatmul.bf16.gmra.mxu3 %v4055_v47  ;;  %v3389_v8 = vor.u32 %v3743_v3, %v3388_v2  ;;  %v3244_v9 = vld [vmem:[%s3875_s19 + $0x400] sm:$0xf]  ;;  %v2678_v17 = vld [vmem:[%s5011_s1 + $0x8c] sm:$0xf0]  ;;  %v4104_v24 = vor.u32 %v3566_v15, %v2676_v14  ;;  %v3637_v30 = vld [vmem:[%s3875_s19 + $0x1e4] sm:$0xf]  ;;  %v3233_v31 = vor.u32 %v3701_v28, %v3230_v29 }
  0x48   : > { %1851 = vmatpush.bf16.msrb.mxu3 %v2785_v40  ;;  %1686 = vmatmul.bf16.gmra.mxu1 %v4049_v43  ;;  %v3372_v12 = vld [vmem:[%s3875_s19 + $0x500] sm:$0xf]  ;;  %v3245_v20 = vor.u32 %v3707_v10, %v3244_v9  ;;  %v4106_v25 = vor.u32 %v3563_v16, %v2678_v17  ;;  %v2974_v32 = vld [vmem:[%s3875_s19 + $0x1f0] sm:$0xf0]  ;;  %v3733_v33 = vld [vmem:[%s3875_s19 + $0x4e4] sm:$0xf] }
  0x49   : > { %1764 = vmatpush.bf16.msrb.mxu0 %v3293_v48  ;;  %v3373_v23 = vor.u32 %v3739_v13, %v3372_v12  ;;  %5040 = vst [vmem:[#allocation4_spill] sm:$0xff] %v4104_v24  ;;  %v3358_v34 = vld [vmem:[%s3875_s19 + $0x4f0] sm:$0xf0]  ;;  %v2977_v35 = vor.u32 %v3637_v30, %v2974_v32  ;;  %v447_v37 = vld [vmem:[%s5012_s2 + $0x20] sm:$0xff]  ;;  %1934 = vmatpush.bf16.msra.mxu2 %v3233_v31  ;;  %v3570_v63 = vld [vmem:[%s5011_s1 + $0xac] sm:$0xf] }
  0x4a   : > { %1793 = vmatpush.bf16.msrb.mxu1 %v3421_v50  ;;  %5041 = vst [vmem:[#allocation5_spill] sm:$0xff] %v4106_v25  ;;  %v3361_v36 = vor.u32 %v3733_v33, %v3358_v34  ;;  %v3669_v40 = vld [vmem:[%s3875_s19 + $0x2e4] sm:$0xf]  ;;  %473 = vperm.xlu2 %3805, %v447_v37   ;;  %v3102_v41 = vld [vmem:[%s3875_s19 + $0x2f0] sm:$0xf0] }
  0x4b   : > { %v3697_v42 = vld [vmem:[%s3875_s19 + $0x3c4] sm:$0xf]  ;;  %v3214_v45 = vld [vmem:[%s3875_s19 + $0x3d0] sm:$0xf0]  ;;  %v3105_v46 = vor.u32 %v3669_v40, %v3102_v41  ;;  %488 = vperm.xlu1 %3804, %v450_v38   ;;  %v2706_v0 = vld [vmem:[%s5011_s1 + $0xc4] sm:$0xf0] }
  0x4c   : > { %1852 = vmatpush.bf16.msrb.mxu3 %v2769_v55  ;;  %v3217_v48 = vor.u32 %v3697_v42, %v3214_v45  ;;  %v3633_v50 = vld [vmem:[%s3875_s19 + $0x1c4] sm:$0xf]  ;;  %v2958_v51 = vld [vmem:[%s3875_s19 + $0x1d0] sm:$0xf0]  ;;  %v2712_v2 = vld [vmem:[%s5011_s1 + $0xb0] sm:$0xf] }
  0x4d   : > { %1765 = vmatpush.bf16.msrb.mxu0 %v3277_v59  ;;  %v3729_v52 = vld [vmem:[%s3875_s19 + $0x4c4] sm:$0xf]  ;;  %v2961_v55 = vor.u32 %v3633_v50, %v2958_v51  ;;  %v3342_v56 = vld [vmem:[%s3875_s19 + $0x4d0] sm:$0xf0]  ;;  %v2704_v59 = vld [vmem:[%s5011_s1 + $0xa8] sm:$0xf] }
  0x4e   : > { %1794 = vmatpush.bf16.msrb.mxu1 %v3405_v61  ;;  %v3665_v58 = vld [vmem:[%s3875_s19 + $0x2c4] sm:$0xf]  ;;  %v3345_v60 = vor.u32 %v3729_v52, %v3342_v56  ;;  %v3086_v61 = vld [vmem:[%s3875_s19 + $0x2d0] sm:$0xf0]  ;;  %1935 = vmatpush.bf16.msra.mxu2 %v3217_v48  ;;  %v3574_v3 = vld [vmem:[%s5011_s1 + $0xc8] sm:$0xf0] }
  0x4f   : > { %v3573_v62 = vld [vmem:[%s5011_s1 + $0xc0] sm:$0xf0]  ;;  %v3571_v5 = vld [vmem:[%s5011_s1 + $0xb4] sm:$0xf]  ;;  %v4169_v9 = vor.u32 %v3574_v3, %v2712_v2  ;;  %v2636_v40 = vld [vmem:[%s5011_s1 + $0x10] sm:$0xf] }
  0x50   : > { %1853 = vmatpush.bf16.msrb.mxu3 %v2753_v1  ;;  %v3089_v1 = vor.u32 %v3665_v58, %v3086_v61  ;;  %v4165_v7 = vor.u32 %v3573_v62, %v2704_v59  ;;  %v3198_v12 = vld [vmem:[%s3875_s19 + $0x3b0] sm:$0xf0]  ;;  %v3629_v13 = vld [vmem:[%s3875_s19 + $0x1a4] sm:$0xf]  ;;  %v3554_v41 = vld [vmem:[%s5011_s1 + $0x28] sm:$0xf0] }
  0x51   : > { %1766 = vmatpush.bf16.msrb.mxu0 %v3261_v6  ;;  %v2714_v6 = vld [vmem:[%s5011_s1 + $0xcc] sm:$0xf0]  ;;  %v2942_v15 = vld [vmem:[%s3875_s19 + $0x1b0] sm:$0xf0]  ;;  %v3725_v16 = vld [vmem:[%s3875_s19 + $0x4a4] sm:$0xf]  ;;  %v4211_v50 = vor.u32 %v3554_v41, %v2636_v40 }
  0x52   : > { %1795 = vmatpush.bf16.msrb.mxu1 %v3389_v8  ;;  %5044 = vst [vmem:[#allocation8_spill] sm:$0xff] %v4165_v7  ;;  %v4167_v8 = vor.u32 %v3570_v63, %v2706_v0  ;;  %478 = vperm.xlu2 %3805, %v448_v4   ;;  %v4171_v10 = vor.u32 %v3571_v5, %v2714_v6  ;;  %v3326_v17 = vld [vmem:[%s3875_s19 + $0x4b0] sm:$0xf0]  ;;  %v3689_v22 = vld [vmem:[%s3875_s19 + $0x384] sm:$0xf] }
  0x53   : > { %v2945_v18 = vor.u32 %v3629_v13, %v2942_v15  ;;  %v3329_v19 = vor.u32 %v3725_v16, %v3326_v17  ;;  %v3070_v21 = vld [vmem:[%s3875_s19 + $0x2b0] sm:$0xf0]  ;;  %v3625_v29 = vld [vmem:[%s3875_s19 + $0x184] sm:$0xf]  ;;  %v2638_v45 = vld [vmem:[%s5011_s1 + $0x2c] sm:$0xf0] }
  0x54   : > { %1854 = vmatpush.bf16.msrb.mxu3 %v2737_v11  ;;  %5045 = vst [vmem:[#allocation9_spill] sm:$0xff] %v4167_v8  ;;  %v3693_v11 = vld [vmem:[%s3875_s19 + $0x3a4] sm:$0xf]  ;;  %v3182_v28 = vld [vmem:[%s3875_s19 + $0x390] sm:$0xf0] }
  0x55   : > { %1767 = vmatpush.bf16.msrb.mxu0 %v3245_v20  ;;  %v3201_v14 = vor.u32 %v3693_v11, %v3198_v12  ;;  %v3661_v20 = vld [vmem:[%s3875_s19 + $0x2a4] sm:$0xf]  ;;  %v2926_v30 = vld [vmem:[%s3875_s19 + $0x190] sm:$0xf0]  ;;  %v3185_v31 = vor.u32 %v3689_v22, %v3182_v28  ;;  %5046 = vst [vmem:[#allocation10_spill] sm:$0xff] %v4211_v50 }
  0x56   : > { %1796 = vmatpush.bf16.msrb.mxu1 %v3373_v23  ;;  %1662 = vmatmul.bf16.gmra.mxu0 %v4104_v24  ;;  %v3073_v23 = vor.u32 %v3661_v20, %v3070_v21  ;;  %v2929_v32 = vor.u32 %v3625_v29, %v2926_v30  ;;  %v3721_v33 = vld [vmem:[%s3875_s19 + $0x484] sm:$0xf]  ;;  %v3310_v34 = vld [vmem:[%s3875_s19 + $0x490] sm:$0xf0]  ;;  %v2664_v20 = vld [vmem:[%s5011_s1 + $0x48] sm:$0xf] }
  0x57   : > { %1720 = vmatmul.bf16.gmra.mxu2 %v4108_v26  ;;  %1749 = vmatmul.bf16.gmra.mxu3 %v4110_v27  ;;  %v3054_v37 = vld [vmem:[%s3875_s19 + $0x290] sm:$0xf0]  ;;  %v3621_v58 = vld [vmem:[%s3875_s19 + $0x164] sm:$0xf]  ;;  %v3558_v22 = vld [vmem:[%s5011_s1 + $0x4c] sm:$0xf] }
  0x58   : > { %1691 = vmatmul.bf16.gmra.mxu1 %v4106_v25  ;;  %1963 = vmatpush.bf16.msra.mxu3 %v3361_v36  ;;  %v3313_v36 = vor.u32 %v3721_v33, %v3310_v34  ;;  %v3551_v42 = vld [vmem:[%s5011_s1 + $0x14] sm:$0xf]  ;;  %v3717_v61 = vld [vmem:[%s3875_s19 + $0x464] sm:$0xf]  ;;  %v2672_v28 = vld [vmem:[%s5011_s1 + $0x50] sm:$0xf] }
  0x59   : > { %1876 = vmatpush.bf16.msra.mxu0 %v2977_v35  ;;  %1936 = vmatpush.bf16.msra.mxu2 %v3201_v14  ;;  %v3657_v35 = vld [vmem:[%s3875_s19 + $0x284] sm:$0xf]  ;;  %v3555_v48 = vld [vmem:[%s5011_s1 + $0x30] sm:$0xf0]  ;;  %v4213_v51 = vor.u32 %v3551_v42, %v2638_v45  ;;  %v3562_v29 = vld [vmem:[%s5011_s1 + $0x68] sm:$0xf0] }
  0x5a   : > { %1905 = vmatpush.bf16.msra.mxu1 %v3105_v46  ;;  %v3057_v38 = vor.u32 %v3657_v35, %v3054_v37  ;;  %v2644_v46 = vld [vmem:[%s5011_s1 + $0x18] sm:$0xf]  ;;  %v3166_v56 = vld [vmem:[%s3875_s19 + $0x370] sm:$0xf0]  ;;  %v3681_v3 = vld [vmem:[%s3875_s19 + $0x344] sm:$0xf] }
  0x5b   : > { %5047 = vst [vmem:[#allocation11_spill] sm:$0xff] %v4213_v51  ;;  %v4215_v52 = vor.u32 %v3555_v48, %v2644_v46  ;;  %v3294_v62 = vld [vmem:[%s3875_s19 + $0x470] sm:$0xf0]  ;;  %v3617_v6 = vld [vmem:[%s3875_s19 + $0x144] sm:$0xf] }
  0x5c   : > { %1964 = vmatpush.bf16.msra.mxu3 %v3345_v60  ;;  %v2910_v60 = vld [vmem:[%s3875_s19 + $0x170] sm:$0xf0]  ;;  %v3297_v0 = vor.u32 %v3717_v61, %v3294_v62  ;;  %v3713_v14 = vld [vmem:[%s3875_s19 + $0x444] sm:$0xf] }
  0x5d   : > { %1877 = vmatpush.bf16.msra.mxu0 %v2961_v55  ;;  %1937 = vmatpush.bf16.msra.mxu2 %v3185_v31  ;;  %v3685_v55 = vld [vmem:[%s3875_s19 + $0x364] sm:$0xf]  ;;  %v2913_v63 = vor.u32 %v3621_v58, %v2910_v60  ;;  %v3038_v2 = vld [vmem:[%s3875_s19 + $0x270] sm:$0xf0] }
  0x5e   : > { %1906 = vmatpush.bf16.msra.mxu1 %v3089_v1  ;;  %v3169_v59 = vor.u32 %v3685_v55, %v3166_v56  ;;  %v3653_v1 = vld [vmem:[%s3875_s19 + $0x264] sm:$0xf]  ;;  %v3150_v5 = vld [vmem:[%s3875_s19 + $0x350] sm:$0xf0] }
  0x5f   : > { %v3041_v4 = vor.u32 %v3653_v1, %v3038_v2  ;;  %v2894_v11 = vld [vmem:[%s3875_s19 + $0x150] sm:$0xf0]  ;;  %v3153_v12 = vor.u32 %v3681_v3, %v3150_v5  ;;  %v3649_v16 = vld [vmem:[%s3875_s19 + $0x244] sm:$0xf]  ;;  %v3568_v5 = vld [vmem:[%s5011_s1 + $0x98] sm:$0xf0] }
  0x60   : > { %1965 = vmatpush.bf16.msra.mxu3 %v3329_v19  ;;  %v2897_v13 = vor.u32 %v3617_v6, %v2894_v11  ;;  %v3278_v15 = vld [vmem:[%s3875_s19 + $0x450] sm:$0xf0]  ;;  %v3561_v21 = vld [vmem:[%s5011_s1 + $0x60] sm:$0xf0]  ;;  %v2694_v11 = vld [vmem:[%s5011_s1 + $0x9c] sm:$0xf0] }
  0x61   : > { %1878 = vmatpush.bf16.msra.mxu0 %v2945_v18  ;;  %1938 = vmatpush.bf16.msra.mxu2 %v3169_v59  ;;  %v3281_v17 = vor.u32 %v3713_v14, %v3278_v15  ;;  %v3022_v18 = vld [vmem:[%s3875_s19 + $0x250] sm:$0xf0]  ;;  %v4256_v30 = vor.u32 %v3561_v21, %v2664_v20  ;;  %v3677_v33 = vld [vmem:[%s3875_s19 + $0x324] sm:$0xf] }
  0x62   : > { %1907 = vmatpush.bf16.msra.mxu1 %v3073_v23  ;;  %v3025_v19 = vor.u32 %v3649_v16, %v3022_v18  ;;  %v2666_v23 = vld [vmem:[%s5011_s1 + $0x64] sm:$0xf0]  ;;  %v3134_v34 = vld [vmem:[%s3875_s19 + $0x330] sm:$0xf0]  ;;  %v3613_v35 = vld [vmem:[%s3875_s19 + $0x124] sm:$0xf] }
  0x63   : > { %5048 = vst [vmem:[#allocation12_spill] sm:$0xff] %v4256_v30  ;;  %v4258_v31 = vor.u32 %v3558_v22, %v2666_v23  ;;  %v2878_v37 = vld [vmem:[%s3875_s19 + $0x130] sm:$0xf0]  ;;  %v3645_v45 = vld [vmem:[%s3875_s19 + $0x224] sm:$0xf] }
  0x64   : > { %1966 = vmatpush.bf16.msra.mxu3 %v3313_v36  ;;  %v3137_v36 = vor.u32 %v3677_v33, %v3134_v34  ;;  %v3262_v40 = vld [vmem:[%s3875_s19 + $0x430] sm:$0xf0]  ;;  %v2881_v41 = vor.u32 %v3613_v35, %v2878_v37  ;;  %v3673_v48 = vld [vmem:[%s3875_s19 + $0x304] sm:$0xf]  ;;  %v3608_v18 = vld [vmem:[%s3875_s19 + $0xf4] sm:$0xf0] }
  0x65   : > { %1879 = vmatpush.bf16.msra.mxu0 %v2929_v32  ;;  %1939 = vmatpush.bf16.msra.mxu2 %v3153_v12  ;;  %5049 = vst [vmem:[#allocation13_spill] sm:$0xff] %v4258_v31  ;;  %v4260_v32 = vor.u32 %v3562_v29, %v2672_v28  ;;  %v3006_v46 = vld [vmem:[%s3875_s19 + $0x230] sm:$0xf0]  ;;  %v3609_v58 = vld [vmem:[%s3875_s19 + $0x104] sm:$0xf] }
  0x66   : > { %1667 = vmatmul.bf16.gmra.mxu0 %v4165_v7  ;;  %1908 = vmatpush.bf16.msra.mxu1 %v3057_v38  ;;  %v3709_v38 = vld [vmem:[%s3875_s19 + $0x424] sm:$0xf]  ;;  %v3009_v55 = vor.u32 %v3645_v45, %v3006_v46  ;;  %v3118_v56 = vld [vmem:[%s3875_s19 + $0x310] sm:$0xf0]  ;;  %v2700_v12 = vld [vmem:[%s5011_s1 + $0x88] sm:$0xf] }
  0x67   : > { %1725 = vmatmul.bf16.gmra.mxu2 %v4169_v9  ;;  %1754 = vmatmul.bf16.gmra.mxu3 %v4171_v10  ;;  %v3265_v42 = vor.u32 %v3709_v38, %v3262_v40  ;;  %v2862_v59 = vld [vmem:[%s3875_s19 + $0x110] sm:$0xf0]  ;;  %v3121_v60 = vor.u32 %v3673_v48, %v3118_v56  ;;  %v3705_v62 = vld [vmem:[%s3875_s19 + $0x404] sm:$0xf]  ;;  %v2980_v22 = vld [vmem:[%s3875_s19 + $0x1e8] sm:$0xf] }
  0x68   : > { %1696 = vmatmul.bf16.gmra.mxu1 %v4167_v8  ;;  %1967 = vmatpush.bf16.msra.mxu3 %v3297_v0  ;;  %v2865_v61 = vor.u32 %v3609_v58, %v2862_v59  ;;  %v3641_v0 = vld [vmem:[%s3875_s19 + $0x204] sm:$0xf]  ;;  %v2990_v2 = vld [vmem:[%s3875_s19 + $0x210] sm:$0xf0]  ;;  %v3640_v23 = vld [vmem:[%s3875_s19 + $0x1f4] sm:$0xf0] }
  0x69   : > { %1880 = vmatpush.bf16.msra.mxu0 %v2913_v63  ;;  %1940 = vmatpush.bf16.msra.mxu2 %v3137_v36  ;;  %v3246_v63 = vld [vmem:[%s3875_s19 + $0x410] sm:$0xf0]  ;;  %v2993_v3 = vor.u32 %v3641_v0, %v2990_v2  ;;  %v3565_v6 = vld [vmem:[%s5011_s1 + $0x84] sm:$0xf]  ;;  %v2981_v29 = vor.u32 %v3640_v23, %v2980_v22  ;;  %v2720_v33 = vld [vmem:[%s5011_s1 + $0xb8] sm:$0xf] }
  0x6a   : > { %1909 = vmatpush.bf16.msra.mxu1 %v3041_v4  ;;  %v3249_v1 = vor.u32 %v3705_v62, %v3246_v63  ;;  %v2692_v4 = vld [vmem:[%s5011_s1 + $0x80] sm:$0xf]  ;;  %v4303_v15 = vor.u32 %v3565_v6, %v2694_v11  ;;  %v3486_v21 = vld [vmem:[%s3875_s19 + $0x5f0] sm:$0xf0]  ;;  %v3773_v35 = vld [vmem:[%s3875_s19 + $0x624] sm:$0xf] }
  0x6b   : > { %v4301_v14 = vor.u32 %v3568_v5, %v2692_v4  ;;  %v3575_v34 = vld [vmem:[%s5011_s1 + $0xd0] sm:$0xf0]  ;;  %v3572_v37 = vld [vmem:[%s5011_s1 + $0xbc] sm:$0xf]  ;;  %v2836_v40 = vld [vmem:[%s3875_s19 + $0xc8] sm:$0xf] }
  0x6c   : > { %1968 = vmatpush.bf16.msra.mxu3 %v3281_v17  ;;  %5051 = vst [vmem:[#allocation15_spill] sm:$0xff] %v4303_v15  ;;  %v2852_v17 = vld [vmem:[%s3875_s19 + $0xe8] sm:$0xf]  ;;  %v3518_v36 = vld [vmem:[%s3875_s19 + $0x630] sm:$0xf0]  ;;  %v4344_v62 = vor.u32 %v3575_v34, %v2720_v33 }
  0x6d   : > { %1881 = vmatpush.bf16.msra.mxu0 %v2897_v13  ;;  %1941 = vmatpush.bf16.msra.mxu2 %v3121_v60  ;;  %v3569_v13 = vld [vmem:[%s5011_s1 + $0xa0] sm:$0xf0]  ;;  %5050 = vst [vmem:[#allocation14_spill] sm:$0xff] %v4301_v14  ;;  %v2853_v20 = vor.u32 %v3608_v18, %v2852_v17  ;;  %v3521_v38 = vor.u32 %v3773_v35, %v3518_v36  ;;  %v3470_v46 = vld [vmem:[%s3875_s19 + $0x5d0] sm:$0xf0] }
  0x6e   : > { %1910 = vmatpush.bf16.msra.mxu1 %v3025_v19  ;;  %v4305_v16 = vor.u32 %v3569_v13, %v2700_v12  ;;  %v3765_v19 = vld [vmem:[%s3875_s19 + $0x5e4] sm:$0xf]  ;;  %v2964_v48 = vld [vmem:[%s3875_s19 + $0x1c8] sm:$0xf]  ;;  %v2722_v56 = vld [vmem:[%s5011_s1 + $0xd4] sm:$0xf0] }
  0x6f   : > { %v3489_v28 = vor.u32 %v3765_v19, %v3486_v21  ;;  %v2728_v58 = vld [vmem:[%s5011_s1 + $0xc0] sm:$0xf]  ;;  %v3576_v59 = vld [vmem:[%s5011_s1 + $0xd8] sm:$0xf0]  ;;  %5053 = vst [vmem:[#allocation17_spill] sm:$0xff] %v4344_v62  ;;  %v4346_v63 = vor.u32 %v3572_v37, %v2722_v56 }
  0x70   : > { %1969 = vmatpush.bf16.msra.mxu3 %v3265_v42  ;;  %5052 = vst [vmem:[#allocation16_spill] sm:$0xff] %v4305_v16  ;;  %v3761_v42 = vld [vmem:[%s3875_s19 + $0x5c4] sm:$0xf]  ;;  %v4348_v0 = vor.u32 %v3576_v59, %v2728_v58  ;;  %v3600_v2 = vld [vmem:[%s3875_s19 + $0xb4] sm:$0xf0] }
  0x71   : > { %1882 = vmatpush.bf16.msra.mxu0 %v2881_v41  ;;  %v3604_v41 = vld [vmem:[%s3875_s19 + $0xd4] sm:$0xf0]  ;;  %v3473_v60 = vor.u32 %v3761_v42, %v3470_v46  ;;  %5054 = vst [vmem:[#allocation18_spill] sm:$0xff] %v4346_v63  ;;  %v3454_v5 = vld [vmem:[%s3875_s19 + $0x5b0] sm:$0xf0] }
  0x72   : > { %1911 = vmatpush.bf16.msra.mxu1 %v3009_v55  ;;  %v2837_v45 = vor.u32 %v3604_v41, %v2836_v40  ;;  %v3636_v55 = vld [vmem:[%s3875_s19 + $0x1d4] sm:$0xf0]  ;;  %5055 = vst [vmem:[#allocation19_spill] sm:$0xff] %v4348_v0  ;;  %v2948_v6 = vld [vmem:[%s3875_s19 + $0x1a8] sm:$0xf] }
  0x73   : > { %v3632_v11 = vld [vmem:[%s3875_s19 + $0x1b4] sm:$0xf0]  ;;  %v2804_v17 = vld [vmem:[%s3875_s19 + $0x88] sm:$0xf]  ;;  %v3753_v19 = vld [vmem:[%s3875_s19 + $0x584] sm:$0xf] }
  0x74   : > { %1970 = vmatpush.bf16.msra.mxu3 %v3249_v1  ;;  %v2820_v1 = vld [vmem:[%s3875_s19 + $0xa8] sm:$0xf]  ;;  %v2949_v13 = vor.u32 %v3632_v11, %v2948_v6  ;;  %v3596_v18 = vld [vmem:[%s3875_s19 + $0x94] sm:$0xf0]  ;;  %v3438_v22 = vld [vmem:[%s3875_s19 + $0x590] sm:$0xf0] }
  0x75   : > { %1883 = vmatpush.bf16.msra.mxu0 %v2865_v61  ;;  %v2965_v61 = vor.u32 %v3636_v55, %v2964_v48  ;;  %v2821_v4 = vor.u32 %v3600_v2, %v2820_v1  ;;  %v2805_v21 = vor.u32 %v3596_v18, %v2804_v17  ;;  %v2932_v23 = vld [vmem:[%s3875_s19 + $0x188] sm:$0xf]  ;;  %v3592_v40 = vld [vmem:[%s3875_s19 + $0x74] sm:$0xf0]  ;;  %v3749_v41 = vld [vmem:[%s3875_s19 + $0x564] sm:$0xf] }
  0x76   : > { %1768 = vmatmul.bf16.vlgmr.msrb.gmra.mxu0 %v4211_v50  ;;  %1912 = vmatpush.bf16.msra.mxu1 %v2993_v3  ;;  %v3757_v3 = vld [vmem:[%s3875_s19 + $0x5a4] sm:$0xf]  ;;  %v3422_v46 = vld [vmem:[%s3875_s19 + $0x570] sm:$0xf0]  ;;  %v2916_v48 = vld [vmem:[%s3875_s19 + $0x168] sm:$0xf] }
  0x77   : > { %3530 = vmatmul.msk.bf16.vlgmr.msrb.gmra.mxu2 %vm1631_vm0, %v4215_v52  ;;  %1855 = vmatmul.bf16.vlgmr.msrb.gmra.mxu3 %v3974_v49  ;;  %v3457_v12 = vor.u32 %v3757_v3, %v3454_v5  ;;  %v3624_v55 = vld [vmem:[%s3875_s19 + $0x174] sm:$0xf0]  ;;  %v3425_v58 = vor.u32 %v3749_v41, %v3422_v46  ;;  %v3769_v5 = vld [vmem:[%s3875_s19 + $0x604] sm:$0xf]  ;;  %v3502_v6 = vld [vmem:[%s3875_s19 + $0x610] sm:$0xf0] }
  0x78   : > { %1797 = vmatmul.bf16.vlgmr.msrb.gmra.mxu1 %v4213_v51  ;;  %2050 = vmatpush.bf16.msrb.mxu2 %v2853_v20  ;;  %v2917_v59 = vor.u32 %v3624_v55, %v2916_v48  ;;  %v3588_v17 = vld [vmem:[%s3875_s19 + $0x54] sm:$0xf0]  ;;  %v3745_v18 = vld [vmem:[%s3875_s19 + $0x544] sm:$0xf]  ;;  %v2756_v46 = vld [vmem:[%s3875_s19 + $0x28] sm:$0xf] }
  0x79   : > { %1992 = vmatpush.bf16.msrb.mxu0 %v3489_v28  ;;  %2079 = vmatpush.bf16.msrb.mxu3 %v2981_v29  ;;  %v3628_v28 = vld [vmem:[%s3875_s19 + $0x194] sm:$0xf0]  ;;  %v3441_v29 = vor.u32 %v3753_v19, %v3438_v22  ;;  %v3406_v22 = vld [vmem:[%s3875_s19 + $0x550] sm:$0xf0]  ;;  %v3741_v55 = vld [vmem:[%s3875_s19 + $0x524] sm:$0xf] }
  0x7a   : > { %2027 = vmatpush.bf16.msrb.mxu1 %v3521_v38  ;;  %v2933_v33 = vor.u32 %v3628_v28, %v2932_v23  ;;  %v2788_v38 = vld [vmem:[%s3875_s19 + $0x68] sm:$0xf]  ;;  %v3620_v28 = vld [vmem:[%s3875_s19 + $0x154] sm:$0xf0] }
  0x7b   : > { %v2900_v23 = vld [vmem:[%s3875_s19 + $0x148] sm:$0xf]  ;;  %v3584_v48 = vld [vmem:[%s3875_s19 + $0x34] sm:$0xf0] }
  0x7c   : > { %2051 = vmatpush.bf16.msrb.mxu2 %v2837_v45  ;;  %v2789_v45 = vor.u32 %v3592_v40, %v2788_v38 }
  0x7d   : > { %1993 = vmatpush.bf16.msrb.mxu0 %v3473_v60  ;;  %2080 = vmatpush.bf16.msrb.mxu3 %v2965_v61 }
  0x80   : > { %2052 = vmatpush.bf16.msrb.mxu2 %v2821_v4 }
  0x81   : > { %1994 = vmatpush.bf16.msrb.mxu0 %v3457_v12  ;;  %2081 = vmatpush.bf16.msrb.mxu3 %v2949_v13  ;;  %v3505_v12 = vor.u32 %v3769_v5, %v3502_v6  ;;  %v2772_v13 = vld [vmem:[%s3875_s19 + $0x48] sm:$0xf] }
  0x83   : > { %2028 = vmatpush.bf16.msrb.mxu1 %v3505_v12 }
  0x84   : > { %2053 = vmatpush.bf16.msrb.mxu2 %v2805_v21  ;;  %v2773_v21 = vor.u32 %v3588_v17, %v2772_v13 }
  0x85   : > { %1995 = vmatpush.bf16.msrb.mxu0 %v3441_v29  ;;  %2082 = vmatpush.bf16.msrb.mxu3 %v2933_v33  ;;  %v3409_v29 = vor.u32 %v3745_v18, %v3406_v22  ;;  %v2901_v33 = vor.u32 %v3620_v28, %v2900_v23  ;;  %v3580_v22 = vld [vmem:[%s3875_s19 + $0x14] sm:$0xf0]  ;;  %v3737_v23 = vld [vmem:[%s3875_s19 + $0x504] sm:$0xf] }
  0x86   : > { %1773 = vmatmul.bf16.gmra.mxu0 %v4256_v30 }
  0x87   : > { %3531 = vmatmul.msk.bf16.gmra.mxu2 %vm1631_vm0, %v4260_v32  ;;  %1860 = vmatmul.bf16.gmra.mxu3 %v4045_v39 }
  0x88   : > { %1802 = vmatmul.bf16.gmra.mxu1 %v4258_v31  ;;  %2054 = vmatpush.bf16.msrb.mxu2 %v2789_v45 }
  0x89   : > { %1996 = vmatpush.bf16.msrb.mxu0 %v3425_v58  ;;  %2083 = vmatpush.bf16.msrb.mxu3 %v2917_v59  ;;  %v2757_v58 = vor.u32 %v3584_v48, %v2756_v46  ;;  %v3390_v59 = vld [vmem:[%s3875_s19 + $0x530] sm:$0xf0] }
  0x8c   : > { %2055 = vmatpush.bf16.msrb.mxu2 %v2773_v21  ;;  %v2740_v21 = vld [vmem:[%s3875_s19 + $0x8] sm:$0xf] }
  0x8d   : > { %1997 = vmatpush.bf16.msrb.mxu0 %v3409_v29  ;;  %2084 = vmatpush.bf16.msrb.mxu3 %v2901_v33  ;;  %v2741_v29 = vor.u32 %v3580_v22, %v2740_v21  ;;  %v3374_v33 = vld [vmem:[%s3875_s19 + $0x510] sm:$0xf0] }
  0x90   : > { %2056 = vmatpush.bf16.msrb.mxu2 %v2757_v58 }
  0x94   : > { %2057 = vmatpush.bf16.msrb.mxu2 %v2741_v29 }
  0x96   : > { %1778 = vmatmul.bf16.gmra.mxu0 %v4301_v14 }
  0x97   : > { %3532 = vmatmul.msk.bf16.gmra.mxu2 %vm1631_vm0, %v4305_v16  ;;  %1865 = vmatmul.bf16.gmra.mxu3 %v4104_v24 }
  0x98   : > { %1807 = vmatmul.bf16.gmra.mxu1 %v4303_v15 }
  0xa4   : > { %v4416_v28 = vpop.permute.xlu2 %473 }
  0xa6   : > { %1783 = vmatmul.bf16.gmra.mxu0 %v4344_v62 }
  0xa7   : > { %3533 = vmatmul.msk.bf16.gmra.mxu2 %vm1631_vm0, %v4348_v0  ;;  %1870 = vmatmul.bf16.gmra.mxu3 %v4165_v7  ;;  %v4364_v20 = vpop.permute.xlu0 %453 }
  0xa8   : > { %1812 = vmatmul.bf16.gmra.mxu1 %v4346_v63 }
  0xab   : > { %v4390_v19 = vpop.permute.xlu1 %463 }
  0xaf   : > { %v4377_v42 = vpop.permute.xlu0 %458 }
  0xb2   : > { %v1653_v34 = vpop.f32.mrf.mxu0 }
  0xb3   : > { %v1654_v35 = vadd.f32 %v1653_v34, %v4364_v20 }
  0xb5   : > { %v1682_v36 = vpop.f32.mrf.mxu1 }
  0xb6   : > { %v1683_v37 = vadd.f32 %v1682_v36, %v1654_v35  ;;  %1884 = vmatmul.bf16.vlgmr.msra.gmra.mxu0 %v3978_v53 }
  0xb7   : > { %1942 = vmatmul.bf16.vlgmr.msra.gmra.mxu2 %v3984_v57  ;;  %1971 = vmatmul.bf16.vlgmr.msra.gmra.mxu3 %v4211_v50 }
  0xb8   : > { %1913 = vmatmul.bf16.vlgmr.msra.gmra.mxu1 %v3980_v54 }
  0xb9   : > { %v1711_v56 = vpop.f32.mrf.mxu2 }
  0xba   : > { %v1712_v60 = vadd.f32 %v1711_v56, %v1683_v37  ;;  %v1740_v61 = vpop.f32.mrf.mxu3  ;;  %v1655_v1 = vpop.f32.mrf.mxu0 }
  0xbb   : > { %v1656_v2 = vadd.f32 %v1655_v1, %v4377_v42  ;;  %v4405_v56 = vpop.permute.xlu1 %468 }
  0xbc   : > { %v4383_v4 = vadd.f32 %v1740_v61, %v1712_v60  ;;  %v2884_v60 = vld [vmem:[%s3875_s19 + $0x128] sm:$0xf]  ;;  %v3616_v61 = vld [vmem:[%s3875_s19 + $0x134] sm:$0xf0] }
  0xbd   : > { %v1684_v3 = vpop.f32.mrf.mxu1 }
  0xbe   : > { %v1685_v11 = vadd.f32 %v1684_v3, %v1656_v2  ;;  %v3393_v2 = vor.u32 %v3741_v55, %v3390_v59  ;;  %v2885_v3 = vor.u32 %v3616_v61, %v2884_v60  ;;  %v3364_v60 = vld [vmem:[%s3875_s19 + $0x4e8] sm:$0xf]  ;;  %v3736_v61 = vld [vmem:[%s3875_s19 + $0x4f4] sm:$0xf0] }
  0xc0   : > { %1998 = vmatpush.bf16.msrb.mxu0 %v3393_v2  ;;  %2085 = vmatpush.bf16.msrb.mxu3 %v2885_v3  ;;  %v4431_v2 = vpop.permute.xlu2 %478  ;;  %v3365_v3 = vor.u32 %v3736_v61, %v3364_v60  ;;  %v3764_v60 = vld [vmem:[%s3875_s19 + $0x5d4] sm:$0xf0] }
  0xc1   : > { %v1713_v34 = vpop.f32.mrf.mxu2 }
  0xc2   : > { %v1714_v35 = vadd.f32 %v1713_v34, %v1685_v11  ;;  %v1742_v36 = vpop.f32.mrf.mxu3  ;;  %v2868_v34 = vld [vmem:[%s3875_s19 + $0x108] sm:$0xf]  ;;  %2166 = vmatpush.bf16.msra.mxu2 %v3365_v3  ;;  %v4447_v3 = vpop.permute.xlu0 %483 }
  0xc3   : > { %v1658_v37 = vpop.f32.mrf.mxu0  ;;  %5056 = vst [vmem:[#allocation20_spill] sm:$0xff] %v4447_v3 }
  0xc4   : > { %v1659_v38 = vadd.f32 %v1658_v37, %v4390_v19  ;;  %v4396_v41 = vadd.f32 %v1742_v36, %v1714_v35  ;;  %v3612_v35 = vld [vmem:[%s3875_s19 + $0x114] sm:$0xf0]  ;;  %v3377_v36 = vor.u32 %v3737_v23, %v3374_v33 }
  0xc5   : > { %v1687_v40 = vpop.f32.mrf.mxu1  ;;  %v2869_v37 = vor.u32 %v3612_v35, %v2868_v34  ;;  %v3236_v35 = vld [vmem:[%s3875_s19 + $0x3e8] sm:$0xf] }
  0xc6   : > { %v1688_v45 = vadd.f32 %v1687_v40, %v1659_v38  ;;  %1889 = vmatmul.bf16.gmra.mxu0 %v4049_v43 }
  0xc7   : > { %1947 = vmatmul.bf16.gmra.mxu2 %v4055_v47  ;;  %1976 = vmatmul.bf16.gmra.mxu3 %v4256_v30 }
  0xc8   : > { %1918 = vmatmul.bf16.gmra.mxu1 %v4051_v44  ;;  %1999 = vmatpush.bf16.msrb.mxu0 %v3377_v36  ;;  %v3704_v36 = vld [vmem:[%s3875_s19 + $0x3f4] sm:$0xf0] }
  0xc9   : > { %2086 = vmatpush.bf16.msrb.mxu3 %v2869_v37 }
  0xca   : > { %v1716_v1 = vpop.f32.mrf.mxu2  ;;  %v1745_v6 = vpop.f32.mrf.mxu3 }
  0xcb   : > { %v1717_v5 = vadd.f32 %v1716_v1, %v1688_v45  ;;  %v1660_v11 = vpop.f32.mrf.mxu0  ;;  %v3108_v1 = vld [vmem:[%s3875_s19 + $0x2e8] sm:$0xf] }
  0xcc   : > { %v1661_v12 = vadd.f32 %v1660_v11, %v4405_v56  ;;  %v3768_v11 = vld [vmem:[%s3875_s19 + $0x5f4] sm:$0xf0] }
  0xcd   : > { %v1689_v13 = vpop.f32.mrf.mxu1  ;;  %v4411_v17 = vadd.f32 %v1745_v6, %v1717_v5  ;;  %v3672_v5 = vld [vmem:[%s3875_s19 + $0x2f4] sm:$0xf0]  ;;  %v3492_v6 = vld [vmem:[%s3875_s19 + $0x5e8] sm:$0xf] }
  0xce   : > { %v1690_v18 = vadd.f32 %v1689_v13, %v1661_v12  ;;  %v3109_v13 = vor.u32 %v3672_v5, %v3108_v1 }
  0xd0   : > { %2108 = vmatpush.bf16.msra.mxu0 %v3109_v13 }
  0xd2   : > { %v1718_v38 = vpop.f32.mrf.mxu2  ;;  %v1747_v45 = vpop.f32.mrf.mxu3 }
  0xd3   : > { %v1719_v40 = vadd.f32 %v1718_v38, %v1690_v18  ;;  %v1663_v46 = vpop.f32.mrf.mxu0  ;;  %v3493_v18 = vor.u32 %v3768_v11, %v3492_v6  ;;  %v3237_v38 = vor.u32 %v3704_v36, %v3236_v35  ;;  %v3332_v35 = vld [vmem:[%s3875_s19 + $0x4a8] sm:$0xf]  ;;  %v3728_v36 = vld [vmem:[%s3875_s19 + $0x4b4] sm:$0xf0] }
  0xd4   : > { %v1664_v48 = vadd.f32 %v1663_v46, %v4416_v28  ;;  %v3092_v46 = vld [vmem:[%s3875_s19 + $0x2c8] sm:$0xf] }
  0xd5   : > { %v1692_v55 = vpop.f32.mrf.mxu1  ;;  %v4422_v58 = vadd.f32 %v1747_v45, %v1719_v40  ;;  %2195 = vmatpush.bf16.msra.mxu3 %v3493_v18  ;;  %v3348_v40 = vld [vmem:[%s3875_s19 + $0x4c8] sm:$0xf]  ;;  %v3732_v45 = vld [vmem:[%s3875_s19 + $0x4d4] sm:$0xf0]  ;;  %2137 = vmatpush.bf16.msra.mxu1 %v3237_v38  ;;  %v4461_v38 = vpop.permute.xlu1 %488 }
  0xd6   : > { %v1693_v59 = vadd.f32 %v1692_v55, %v1664_v48  ;;  %1894 = vmatmul.bf16.gmra.mxu0 %v4106_v25  ;;  %v3349_v48 = vor.u32 %v3732_v45, %v3348_v40  ;;  %v3668_v55 = vld [vmem:[%s3875_s19 + $0x2d4] sm:$0xf0]  ;;  %5057 = vst [vmem:[#allocation21_spill] sm:$0xff] %v4461_v38  ;;  %v3333_v40 = vor.u32 %v3728_v36, %v3332_v35 }
  0xd7   : > { %1952 = vmatmul.bf16.gmra.mxu2 %v4110_v27  ;;  %1981 = vmatmul.bf16.gmra.mxu3 %v4301_v14  ;;  %v3093_v61 = vor.u32 %v3668_v55, %v3092_v46  ;;  %v3664_v45 = vld [vmem:[%s3875_s19 + $0x2b4] sm:$0xf0]  ;;  %v3460_v46 = vld [vmem:[%s3875_s19 + $0x5a8] sm:$0xf] }
  0xd8   : > { %1923 = vmatmul.bf16.gmra.mxu1 %v4108_v26  ;;  %2167 = vmatpush.bf16.msra.mxu2 %v3349_v48  ;;  %v3760_v48 = vld [vmem:[%s3875_s19 + $0x5b4] sm:$0xf0] }
  0xd9   : > { %2109 = vmatpush.bf16.msra.mxu0 %v3093_v61  ;;  %v3724_v35 = vld [vmem:[%s3875_s19 + $0x494] sm:$0xf0] }
  0xda   : > { %v1721_v12 = vpop.f32.mrf.mxu2  ;;  %v1750_v22 = vpop.f32.mrf.mxu3 }
  0xdb   : > { %v1722_v21 = vadd.f32 %v1721_v12, %v1693_v59  ;;  %v1665_v23 = vpop.f32.mrf.mxu0  ;;  %v3476_v59 = vld [vmem:[%s3875_s19 + $0x5c8] sm:$0xf] }
  0xdc   : > { %v1666_v29 = vadd.f32 %v1665_v23, %v4431_v2  ;;  %v3477_v1 = vor.u32 %v3764_v60, %v3476_v59  ;;  %v3700_v23 = vld [vmem:[%s3875_s19 + $0x3d4] sm:$0xf0]  ;;  %v3461_v60 = vor.u32 %v3760_v48, %v3460_v46  ;;  %2168 = vmatpush.bf16.msra.mxu2 %v3333_v40 }
  0xdd   : > { %v1694_v33 = vpop.f32.mrf.mxu1  ;;  %v4437_v34 = vadd.f32 %v1750_v22, %v1722_v21  ;;  %v3220_v22 = vld [vmem:[%s3875_s19 + $0x3c8] sm:$0xf]  ;;  %v3756_v40 = vld [vmem:[%s3875_s19 + $0x594] sm:$0xf0] }
  0xde   : > { %v1695_v37 = vadd.f32 %v1694_v33, %v1666_v29  ;;  %2196 = vmatpush.bf16.msra.mxu3 %v3477_v1  ;;  %v3221_v33 = vor.u32 %v3700_v23, %v3220_v22 }
  0xe0   : > { %2138 = vmatpush.bf16.msra.mxu1 %v3221_v33  ;;  %v3316_v33 = vld [vmem:[%s3875_s19 + $0x488] sm:$0xf] }
  0xe1   : > { %v3317_v36 = vor.u32 %v3724_v35, %v3316_v33  ;;  %v3044_v33 = vld [vmem:[%s3875_s19 + $0x268] sm:$0xf] }
  0xe2   : > { %v1723_v5 = vpop.f32.mrf.mxu2  ;;  %v1752_v11 = vpop.f32.mrf.mxu3  ;;  %2197 = vmatpush.bf16.msra.mxu3 %v3461_v60 }
  0xe3   : > { %v1724_v6 = vadd.f32 %v1723_v5, %v1695_v37  ;;  %v1668_v12 = vpop.f32.mrf.mxu0  ;;  %v3076_v37 = vld [vmem:[%s3875_s19 + $0x2a8] sm:$0xf]  ;;  %2169 = vmatpush.bf16.msra.mxu2 %v3317_v36 }
  0xe4   : > { %v1669_v18 = vadd.f32 %v1668_v12, %v4447_v3  ;;  %v3077_v59 = vor.u32 %v3664_v45, %v3076_v37  ;;  %v3660_v37 = vld [vmem:[%s3875_s19 + $0x294] sm:$0xf0]  ;;  %v3444_v45 = vld [vmem:[%s3875_s19 + $0x588] sm:$0xf] }
  0xe5   : > { %v1697_v13 = vpop.f32.mrf.mxu1  ;;  %v4450_v21 = vadd.f32 %v1752_v11, %v1724_v6  ;;  %v3445_v48 = vor.u32 %v3756_v40, %v3444_v45  ;;  %v3428_v36 = vld [vmem:[%s3875_s19 + $0x568] sm:$0xf] }
  0xe6   : > { %1899 = vmatmul.bf16.gmra.mxu0 %v4167_v8  ;;  %v1698_v29 = vadd.f32 %v1697_v13, %v1669_v18  ;;  %v3204_v13 = vld [vmem:[%s3875_s19 + $0x3a8] sm:$0xf]  ;;  %v3696_v18 = vld [vmem:[%s3875_s19 + $0x3b4] sm:$0xf0] }
  0xe7   : > { %1957 = vmatmul.bf16.gmra.mxu2 %v4171_v10  ;;  %1986 = vmatmul.bf16.gmra.mxu3 %v4344_v62  ;;  %v3205_v23 = vor.u32 %v3696_v18, %v3204_v13  ;;  %v3692_v13 = vld [vmem:[%s3875_s19 + $0x394] sm:$0xf0] }
  0xe8   : > { %1928 = vmatmul.bf16.gmra.mxu1 %v4169_v9  ;;  %2110 = vmatpush.bf16.msra.mxu0 %v3077_v59 }
  0xe9   : > { %2139 = vmatpush.bf16.msra.mxu1 %v3205_v23  ;;  %2198 = vmatpush.bf16.msra.mxu3 %v3445_v48 }
  0xea   : > { %v1726_v55 = vpop.f32.mrf.mxu2  ;;  %v1755_v1 = vpop.f32.mrf.mxu3 }
  0xeb   : > { %v1727_v61 = vadd.f32 %v1726_v55, %v1698_v29  ;;  %v1670_v5 = vpop.f32.mrf.mxu0  ;;  %v3060_v29 = vld [vmem:[%s3875_s19 + $0x288] sm:$0xf] }
  0xec   : > { %v1671_v6 = vadd.f32 %v1670_v5, %v4461_v38  ;;  %v3061_v46 = vor.u32 %v3660_v37, %v3060_v29  ;;  %v3656_v29 = vld [vmem:[%s3875_s19 + $0x274] sm:$0xf0] }
  0xed   : > { %v1699_v11 = vpop.f32.mrf.mxu1  ;;  %v4467_v12 = vadd.f32 %v1755_v1, %v1727_v61  ;;  %v3752_v37 = vld [vmem:[%s3875_s19 + $0x574] sm:$0xf0]  ;;  %v3045_v40 = vor.u32 %v3656_v29, %v3044_v33  ;;  %v3412_v29 = vld [vmem:[%s3875_s19 + $0x548] sm:$0xf] }
  0xee   : > { %v1700_v22 = vadd.f32 %v1699_v11, %v1671_v6  ;;  %2111 = vmatpush.bf16.msra.mxu0 %v3061_v46  ;;  %v3188_v11 = vld [vmem:[%s3875_s19 + $0x388] sm:$0xf]  ;;  %v3429_v46 = vor.u32 %v3752_v37, %v3428_v36  ;;  %v3652_v33 = vld [vmem:[%s3875_s19 + $0x254] sm:$0xf0] }
  0xef   : > { %v3189_v23 = vor.u32 %v3692_v13, %v3188_v11  ;;  %v3748_v36 = vld [vmem:[%s3875_s19 + $0x554] sm:$0xf0] }
  0xf0   : > { %2199 = vmatpush.bf16.msra.mxu3 %v3429_v46  ;;  %v3413_v37 = vor.u32 %v3748_v36, %v3412_v29 }
  0xf1   : > { %2140 = vmatpush.bf16.msra.mxu1 %v3189_v23  ;;  %v3284_v23 = vld [vmem:[%s3875_s19 + $0x448] sm:$0xf] }
  0xf2   : > { %v1728_v55 = vpop.f32.mrf.mxu2  ;;  %v1757_v60 = vpop.f32.mrf.mxu3  ;;  %2112 = vmatpush.bf16.msra.mxu0 %v3045_v40 }
  0xf3   : > { %v1729_v59 = vadd.f32 %v1728_v55, %v1700_v22  ;;  %v1769_v61 = vpop.f32.mrf.mxu0  ;;  %v3720_v22 = vld [vmem:[%s3875_s19 + $0x474] sm:$0xf0] }
  0xf4   : > { %v1770_v1 = vadd.f32 %v1769_v61, %v4383_v4  ;;  %v3300_v4 = vld [vmem:[%s3875_s19 + $0x468] sm:$0xf]  ;;  %2200 = vmatpush.bf16.msra.mxu3 %v3413_v37 }
  0xf5   : > { %v1798_v5 = vpop.f32.mrf.mxu1  ;;  %v4478_v6 = vadd.f32 %v1757_v60, %v1729_v59  ;;  %v3301_v35 = vor.u32 %v3720_v22, %v3300_v4  ;;  %v3716_v4 = vld [vmem:[%s3875_s19 + $0x454] sm:$0xf0] }
  0xf6   : > { %v1799_v18 = vadd.f32 %v1798_v5, %v1770_v1  ;;  %2000 = vmatmul.bf16.vlgmr.msrb.gmra.mxu0 %v4213_v51  ;;  %v3172_v1 = vld [vmem:[%s3875_s19 + $0x368] sm:$0xf]  ;;  %v3688_v5 = vld [vmem:[%s3875_s19 + $0x374] sm:$0xf0]  ;;  %v3285_v22 = vor.u32 %v3716_v4, %v3284_v23 }
  0xf7   : > { %2058 = vmatmul.bf16.vlgmr.msrb.gmra.mxu2 %v3974_v49  ;;  %2087 = vmatmul.bf16.vlgmr.msrb.gmra.mxu3 %v3978_v53  ;;  %v3173_v13 = vor.u32 %v3688_v5, %v3172_v1  ;;  %v3684_v1 = vld [vmem:[%s3875_s19 + $0x354] sm:$0xf0] }
  0xf8   : > { %3534 = vmatmul.msk.bf16.vlgmr.msrb.gmra.mxu1 %vm1631_vm0, %v4215_v52  ;;  %2170 = vmatpush.bf16.msra.mxu2 %v3301_v35  ;;  %v3712_v23 = vld [vmem:[%s3875_s19 + $0x434] sm:$0xf0] }
  0xf9   : > { %2141 = vmatpush.bf16.msra.mxu1 %v3173_v13 }
  0xfa   : > { %v1827_v45 = vpop.f32.mrf.mxu2  ;;  %v4495_v55 = vpop.f32.mrf.mxu3 }
  0xfb   : > { %v4493_v48 = vadd.f32 %v1827_v45, %v1799_v18  ;;  %v1771_v59 = vpop.f32.mrf.mxu0  ;;  %v3028_v18 = vld [vmem:[%s3875_s19 + $0x248] sm:$0xf] }
  0xfc   : > { %v1772_v60 = vadd.f32 %v1771_v59, %v4396_v41  ;;  %v3029_v35 = vor.u32 %v3652_v33, %v3028_v18  ;;  %2171 = vmatpush.bf16.msra.mxu2 %v3285_v22  ;;  %v3648_v18 = vld [vmem:[%s3875_s19 + $0x234] sm:$0xf0]  ;;  %v3396_v22 = vld [vmem:[%s3875_s19 + $0x528] sm:$0xf] }
  0xfd   : > { %v1800_v61 = vpop.f32.mrf.mxu1  ;;  %v3744_v33 = vld [vmem:[%s3875_s19 + $0x534] sm:$0xf0] }
  0xfe   : > { %v1801_v11 = vadd.f32 %v1800_v61, %v1772_v60  ;;  %2113 = vmatpush.bf16.msra.mxu0 %v3029_v35  ;;  %v3156_v61 = vld [vmem:[%s3875_s19 + $0x348] sm:$0xf]  ;;  %v3397_v35 = vor.u32 %v3744_v33, %v3396_v22  ;;  %v3644_v22 = vld [vmem:[%s3875_s19 + $0x214] sm:$0xf0] }
  0xff   : > { %v3157_v13 = vor.u32 %v3684_v1, %v3156_v61  ;;  %v3140_v61 = vld [vmem:[%s3875_s19 + $0x328] sm:$0xf]  ;;  %v3680_v1 = vld [vmem:[%s3875_s19 + $0x334] sm:$0xf0] }
 0x100   : > { %2201 = vmatpush.bf16.msra.mxu3 %v3397_v35  ;;  %v3380_v33 = vld [vmem:[%s3875_s19 + $0x508] sm:$0xf]  ;;  %v3676_v35 = vld [vmem:[%s3875_s19 + $0x314] sm:$0xf0] }
 0x101   : > { %2142 = vmatpush.bf16.msra.mxu1 %v3157_v13 }
 0x102   : > { %v1829_v41 = vpop.f32.mrf.mxu2  ;;  %v4508_v40 = vpop.f32.mrf.mxu3 }
 0x103   : > { %v4506_v45 = vadd.f32 %v1829_v41, %v1801_v11  ;;  %v1774_v46 = vpop.f32.mrf.mxu0  ;;  %v3268_v11 = vld [vmem:[%s3875_s19 + $0x428] sm:$0xf] }
 0x104   : > { %v1775_v59 = vadd.f32 %v1774_v46, %v4411_v17  ;;  %v3012_v17 = vld [vmem:[%s3875_s19 + $0x228] sm:$0xf]  ;;  %v3269_v4 = vor.u32 %v3712_v23, %v3268_v11  ;;  %v3141_v11 = vor.u32 %v3680_v1, %v3140_v61  ;;  %v3708_v23 = vld [vmem:[%s3875_s19 + $0x414] sm:$0xf0] }
 0x105   : > { %v1803_v60 = vpop.f32.mrf.mxu1  ;;  %v3013_v36 = vor.u32 %v3648_v18, %v3012_v17  ;;  %v2996_v17 = vld [vmem:[%s3875_s19 + $0x208] sm:$0xf] }
 0x106   : > { %v1804_v5 = vadd.f32 %v1803_v60, %v1775_v59  ;;  %2005 = vmatmul.bf16.gmra.mxu0 %v4258_v31  ;;  %2172 = vmatpush.bf16.msra.mxu2 %v3269_v4  ;;  %v2997_v4 = vor.u32 %v3644_v22, %v2996_v17  ;;  %v3110_v22 = vld [vmem:[%s3875_s19 + $0x2f8] sm:$0xf0] }
 0x107   : > { %2063 = vmatmul.bf16.gmra.mxu2 %v4045_v39  ;;  %2092 = vmatmul.bf16.gmra.mxu3 %v4049_v43 }
 0x108   : > { %3535 = vmatmul.msk.bf16.gmra.mxu1 %vm1631_vm0, %v4260_v32  ;;  %2114 = vmatpush.bf16.msra.mxu0 %v3013_v36  ;;  %v3124_v36 = vld [vmem:[%s3875_s19 + $0x308] sm:$0xf] }
 0x109   : > { %2143 = vmatpush.bf16.msra.mxu1 %v3141_v11  ;;  %v3125_v61 = vor.u32 %v3676_v35, %v3124_v36 }
 0x10a   : > { %v1832_v29 = vpop.f32.mrf.mxu2  ;;  %v4526_v41 = vpop.f32.mrf.mxu3 }
 0x10b   : > { %v4524_v37 = vadd.f32 %v1832_v29, %v1804_v5  ;;  %v1776_v46 = vpop.f32.mrf.mxu0  ;;  %v3252_v5 = vld [vmem:[%s3875_s19 + $0x408] sm:$0xf]  ;;  %v3740_v29 = vld [vmem:[%s3875_s19 + $0x514] sm:$0xf0] }
 0x10c   : > { %v1777_v59 = vadd.f32 %v1776_v46, %v4422_v58  ;;  %v3253_v18 = vor.u32 %v3708_v23, %v3252_v5  ;;  %v3381_v38 = vor.u32 %v3740_v29, %v3380_v33  ;;  %2115 = vmatpush.bf16.msra.mxu0 %v2997_v4  ;;  %v3524_v23 = vld [vmem:[%s3875_s19 + $0x628] sm:$0xf] }
 0x10d   : > { %v1805_v60 = vpop.f32.mrf.mxu1  ;;  %2144 = vmatpush.bf16.msra.mxu1 %v3125_v61 }
 0x10e   : > { %v1806_v13 = vadd.f32 %v1805_v60, %v1777_v59  ;;  %2173 = vmatpush.bf16.msra.mxu2 %v3253_v18  ;;  %2202 = vmatpush.bf16.msra.mxu3 %v3381_v38  ;;  %v3638_v38 = vld [vmem:[%s3875_s19 + $0x1ec] sm:$0xf]  ;;  %v3776_v18 = vld [vmem:[%s3875_s19 + $0x634] sm:$0xf0] }
 0x10f   : > { %v3525_v29 = vor.u32 %v3776_v18, %v3524_v23  ;;  %v3634_v23 = vld [vmem:[%s3875_s19 + $0x1cc] sm:$0xf]  ;;  %v2966_v18 = vld [vmem:[%s3875_s19 + $0x1d8] sm:$0xf0] }
 0x111   : > { %2230 = vmatpush.bf16.msrb.mxu0 %v3525_v29 }
 0x112   : > { %v1834_v58 = vpop.f32.mrf.mxu2  ;;  %v4541_v59 = vpop.f32.mrf.mxu3 }
 0x113   : > { %v4539_v46 = vadd.f32 %v1834_v58, %v1806_v13  ;;  %v1779_v60 = vpop.f32.mrf.mxu0  ;;  %v2982_v13 = vld [vmem:[%s3875_s19 + $0x1f8] sm:$0xf0] }
 0x114   : > { %v1780_v1 = vadd.f32 %v1779_v60, %v4437_v34  ;;  %v2985_v17 = vor.u32 %v3638_v38, %v2982_v13  ;;  %v3670_v34 = vld [vmem:[%s3875_s19 + $0x2ec] sm:$0xf] }
 0x115   : > { %v1808_v11 = vpop.f32.mrf.mxu1  ;;  %v3113_v4 = vor.u32 %v3670_v34, %v3110_v22  ;;  %v2969_v34 = vor.u32 %v3634_v23, %v2966_v18  ;;  %v3094_v22 = vld [vmem:[%s3875_s19 + $0x2d8] sm:$0xf0] }
 0x116   : > { %v1809_v5 = vadd.f32 %v1808_v11, %v1780_v1  ;;  %2010 = vmatmul.bf16.gmra.mxu0 %v4303_v15  ;;  %2282 = vmatpush.bf16.msrb.mxu2 %v2985_v17  ;;  %v3606_v1 = vld [vmem:[%s3875_s19 + $0xec] sm:$0xf]  ;;  %v2854_v11 = vld [vmem:[%s3875_s19 + $0xf8] sm:$0xf0] }
 0x117   : > { %2068 = vmatmul.bf16.gmra.mxu2 %v4104_v24  ;;  %2097 = vmatmul.bf16.gmra.mxu3 %v4106_v25  ;;  %v2857_v13 = vor.u32 %v3606_v1, %v2854_v11  ;;  %v2838_v1 = vld [vmem:[%s3875_s19 + $0xd8] sm:$0xf0] }
 0x118   : > { %3536 = vmatmul.msk.bf16.gmra.mxu1 %vm1631_vm0, %v4305_v16  ;;  %2311 = vmatpush.bf16.msrb.mxu3 %v3113_v4  ;;  %v2950_v23 = vld [vmem:[%s3875_s19 + $0x1b8] sm:$0xf0] }
 0x119   : > { %2253 = vmatpush.bf16.msrb.mxu1 %v2857_v13  ;;  %v3366_v24 = vld [vmem:[%s3875_s19 + $0x4f8] sm:$0xf0] }
 0x11a   : > { %v1837_v33 = vpop.f32.mrf.mxu2  ;;  %v4557_v36 = vpop.f32.mrf.mxu3  ;;  %2283 = vmatpush.bf16.msrb.mxu2 %v2969_v34 }
 0x11b   : > { %v4555_v58 = vadd.f32 %v1837_v33, %v1809_v5  ;;  %v1781_v35 = vpop.f32.mrf.mxu0  ;;  %v3666_v5 = vld [vmem:[%s3875_s19 + $0x2cc] sm:$0xf] }
 0x11c   : > { %v1782_v60 = vadd.f32 %v1781_v35, %v4450_v21  ;;  %v3097_v33 = vor.u32 %v3666_v5, %v3094_v22  ;;  %v3078_v5 = vld [vmem:[%s3875_s19 + $0x2b8] sm:$0xf0] }
 0x11d   : > { %5058 = vst [vmem:[#allocation22_spill] sm:$0xff] %v4555_v58  ;;  %v1810_v61 = vpop.f32.mrf.mxu1  ;;  %v2742_v58 = vld [vmem:[%s3875_s19 + $0x18] sm:$0xf0] }
 0x11e   : > { %v1811_v38 = vadd.f32 %v1810_v61, %v1782_v60  ;;  %2312 = vmatpush.bf16.msrb.mxu3 %v3097_v33  ;;  %v3602_v61 = vld [vmem:[%s3875_s19 + $0xcc] sm:$0xf] }
 0x11f   : > { %v2841_v13 = vor.u32 %v3602_v61, %v2838_v1  ;;  %v3598_v61 = vld [vmem:[%s3875_s19 + $0xac] sm:$0xf]  ;;  %v2822_v1 = vld [vmem:[%s3875_s19 + $0xb8] sm:$0xf0] }
 0x121   : > { %2254 = vmatpush.bf16.msrb.mxu1 %v2841_v13 }
 0x122   : > { %v1839_v17 = vpop.f32.mrf.mxu2  ;;  %v4568_v29 = vpop.f32.mrf.mxu3 }
 0x123   : > { %v4566_v21 = vadd.f32 %v1839_v17, %v1811_v38  ;;  %v1784_v4 = vpop.f32.mrf.mxu0  ;;  %v3630_v38 = vld [vmem:[%s3875_s19 + $0x1ac] sm:$0xf] }
 0x124   : > { %v1785_v35 = vadd.f32 %v1784_v4, %v4467_v12  ;;  %v3662_v12 = vld [vmem:[%s3875_s19 + $0x2ac] sm:$0xf]  ;;  %v2953_v18 = vor.u32 %v3630_v38, %v2950_v23  ;;  %v2825_v38 = vor.u32 %v3598_v61, %v2822_v1 }
 0x125   : > { %5059 = vst [vmem:[#allocation23_spill] sm:$0xff] %v4566_v21  ;;  %v1813_v60 = vpop.f32.mrf.mxu1  ;;  %v3081_v22 = vor.u32 %v3662_v12, %v3078_v5  ;;  %v3626_v23 = vld [vmem:[%s3875_s19 + $0x18c] sm:$0xf] }
 0x126   : > { %v1814_v11 = vadd.f32 %v1813_v60, %v1785_v35  ;;  %2015 = vmatmul.bf16.gmra.mxu0 %v4346_v63  ;;  %2284 = vmatpush.bf16.msrb.mxu2 %v2953_v18  ;;  %v3658_v12 = vld [vmem:[%s3875_s19 + $0x28c] sm:$0xf] }
 0x127   : > { %2073 = vmatmul.bf16.gmra.mxu2 %v4165_v7  ;;  %2102 = vmatmul.bf16.gmra.mxu3 %v4167_v8  ;;  %v2934_v8 = vld [vmem:[%s3875_s19 + $0x198] sm:$0xf0]  ;;  %v3622_v1 = vld [vmem:[%s3875_s19 + $0x16c] sm:$0xf] }
 0x128   : > { %3537 = vmatmul.msk.bf16.gmra.mxu1 %vm1631_vm0, %v4348_v0  ;;  %2313 = vmatpush.bf16.msrb.mxu3 %v3081_v22  ;;  %v2937_v5 = vor.u32 %v3626_v23, %v2934_v8  ;;  %v3594_v8 = vld [vmem:[%s3875_s19 + $0x8c] sm:$0xf] }
 0x129   : > { %2255 = vmatpush.bf16.msrb.mxu1 %v2825_v38  ;;  %v3508_v38 = vld [vmem:[%s3875_s19 + $0x608] sm:$0xf]  ;;  %v3610_v0 = vld [vmem:[%s3875_s19 + $0x10c] sm:$0xf] }
 0x12a   : > { %v1842_v34 = vpop.f32.mrf.mxu2  ;;  %v4584_v17 = vpop.f32.mrf.mxu3  ;;  %2285 = vmatpush.bf16.msrb.mxu2 %v2937_v5  ;;  %v3654_v5 = vld [vmem:[%s3875_s19 + $0x26c] sm:$0xf] }
 0x12b   : > { %v4582_v33 = vadd.f32 %v1842_v34, %v1814_v11  ;;  %5061 = vst [vmem:[#allocation25_spill] sm:$0xff] %v4584_v17  ;;  %v1786_v4 = vpop.f32.mrf.mxu0  ;;  %v3062_v11 = vld [vmem:[%s3875_s19 + $0x298] sm:$0xf0] }
 0x12c   : > { %v1787_v35 = vadd.f32 %v1786_v4, %v4478_v6  ;;  %v3065_v34 = vor.u32 %v3658_v12, %v3062_v11  ;;  %v3772_v12 = vld [vmem:[%s3875_s19 + $0x614] sm:$0xf0]  ;;  %v3046_v11 = vld [vmem:[%s3875_s19 + $0x278] sm:$0xf0] }
 0x12d   : > { %5060 = vst [vmem:[#allocation24_spill] sm:$0xff] %v4582_v33  ;;  %v1815_v60 = vpop.f32.mrf.mxu1  ;;  %v3650_v33 = vld [vmem:[%s3875_s19 + $0x24c] sm:$0xf] }
 0x12e   : > { %v1816_v13 = vadd.f32 %v1815_v60, %v1787_v35  ;;  %2314 = vmatpush.bf16.msrb.mxu3 %v3065_v34  ;;  %v2806_v60 = vld [vmem:[%s3875_s19 + $0x98] sm:$0xf0] }
 0x12f   : > { %v2809_v61 = vor.u32 %v3594_v8, %v2806_v60  ;;  %v3049_v8 = vor.u32 %v3654_v5, %v3046_v11 }
 0x131   : > { %2256 = vmatpush.bf16.msrb.mxu1 %v2809_v61 }
 0x132   : > { %v1844_v18 = vpop.f32.mrf.mxu2  ;;  %v4595_v22 = vpop.f32.mrf.mxu3  ;;  %2315 = vmatpush.bf16.msrb.mxu3 %v3049_v8  ;;  %v3586_v8 = vld [vmem:[%s3875_s19 + $0x4c] sm:$0xf] }
 0x133   : > { %v4593_v6 = vadd.f32 %v1844_v18, %v1816_v13  ;;  %5063 = vst [vmem:[#allocation27_spill] sm:$0xff] %v4595_v22  ;;  %v4597_v4 = vpop.f32.mrf.mxu0  ;;  %v2918_v13 = vld [vmem:[%s3875_s19 + $0x178] sm:$0xf0]  ;;  %v3509_v18 = vor.u32 %v3772_v12, %v3508_v38 }
 0x134   : > { %v2921_v23 = vor.u32 %v3622_v1, %v2918_v13  ;;  %v3590_v1 = vld [vmem:[%s3875_s19 + $0x6c] sm:$0xf]  ;;  %v2790_v13 = vld [vmem:[%s3875_s19 + $0x78] sm:$0xf0] }
 0x135   : > { %5062 = vst [vmem:[#allocation26_spill] sm:$0xff] %v4593_v6  ;;  %v4599_v35 = vpop.f32.mrf.mxu1  ;;  %2231 = vmatpush.bf16.msrb.mxu0 %v3509_v18  ;;  %v2902_v6 = vld [vmem:[%s3875_s19 + $0x158] sm:$0xf0] }
 0x136   : > { %2116 = vmatmul.bf16.vlgmr.msra.gmra.mxu0 %v3980_v54  ;;  %2286 = vmatpush.bf16.msrb.mxu2 %v2921_v23  ;;  %v3030_v38 = vld [vmem:[%s3875_s19 + $0x258] sm:$0xf0] }
 0x137   : > { %2174 = vmatmul.bf16.vlgmr.msra.gmra.mxu2 %v4211_v50  ;;  %2203 = vmatmul.bf16.vlgmr.msra.gmra.mxu3 %v4213_v51  ;;  %v2793_v50 = vor.u32 %v3590_v1, %v2790_v13  ;;  %v3033_v12 = vor.u32 %v3650_v33, %v3030_v38  ;;  %v2774_v1 = vld [vmem:[%s3875_s19 + $0x58] sm:$0xf0]  ;;  %v3646_v33 = vld [vmem:[%s3875_s19 + $0x22c] sm:$0xf] }
 0x138   : > { %2145 = vmatmul.bf16.vlgmr.msra.gmra.mxu1 %v3984_v57  ;;  %v3618_v57 = vld [vmem:[%s3875_s19 + $0x14c] sm:$0xf]  ;;  %v3014_v13 = vld [vmem:[%s3875_s19 + $0x238] sm:$0xf0] }
 0x139   : > { %v2905_v7 = vor.u32 %v3618_v57, %v2902_v6  ;;  %2257 = vmatpush.bf16.msrb.mxu1 %v2793_v50  ;;  %2316 = vmatpush.bf16.msrb.mxu3 %v3033_v12  ;;  %v2777_v57 = vor.u32 %v3586_v8, %v2774_v1  ;;  %v2886_v50 = vld [vmem:[%s3875_s19 + $0x138] sm:$0xf0]  ;;  %v3017_v12 = vor.u32 %v3646_v33, %v3014_v13 }
 0x13a   : > { %v4613_v34 = vpop.f32.mrf.mxu2  ;;  %v4615_v60 = vpop.f32.mrf.mxu3  ;;  %v2998_v22 = vld [vmem:[%s3875_s19 + $0x218] sm:$0xf0] }
 0x13b   : > { %v4617_v61 = vpop.f32.mrf.mxu0  ;;  %2287 = vmatpush.bf16.msrb.mxu2 %v2905_v7  ;;  %v3614_v7 = vld [vmem:[%s3875_s19 + $0x12c] sm:$0xf] }
 0x13c   : > { %v2889_v6 = vor.u32 %v3614_v7, %v2886_v50  ;;  %v2870_v7 = vld [vmem:[%s3875_s19 + $0x118] sm:$0xf0]  ;;  %v3642_v50 = vld [vmem:[%s3875_s19 + $0x20c] sm:$0xf] }
 0x13d   : > { %v4619_v51 = vpop.f32.mrf.mxu1  ;;  %2258 = vmatpush.bf16.msrb.mxu1 %v2777_v57  ;;  %2317 = vmatpush.bf16.msrb.mxu3 %v3017_v12  ;;  %v3582_v57 = vld [vmem:[%s3875_s19 + $0x2c] sm:$0xf]  ;;  %v2873_v21 = vor.u32 %v3610_v0, %v2870_v7  ;;  %v3001_v33 = vor.u32 %v3642_v50, %v2998_v22  ;;  %v3494_v7 = vld [vmem:[%s3875_s19 + $0x5f8] sm:$0xf0] }
 0x13e   : > { %v3702_v50 = vld [vmem:[%s3875_s19 + $0x3ec] sm:$0xf] }
 0x13f   : > { %2288 = vmatpush.bf16.msrb.mxu2 %v2889_v6  ;;  %v3578_v6 = vld [vmem:[%s3875_s19 + $0xc] sm:$0xf] }
 0x141   : > { %2318 = vmatpush.bf16.msrb.mxu3 %v3001_v33 }
 0x142   : > { %v4627_v23 = vpop.f32.mrf.mxu2  ;;  %v4629_v5 = vpop.f32.mrf.mxu3 }
 0x143   : > { %v4631_v11 = vpop.f32.mrf.mxu0  ;;  %2289 = vmatpush.bf16.msrb.mxu2 %v2873_v21 }
 0x145   : > { %v4633_v18 = vpop.f32.mrf.mxu1 }
 0x146   : > { %2121 = vmatmul.bf16.gmra.mxu0 %v4051_v44 }
 0x147   : > { %2179 = vmatmul.bf16.gmra.mxu2 %v4256_v30  ;;  %2208 = vmatmul.bf16.gmra.mxu3 %v4258_v31  ;;  %v2758_v30 = vld [vmem:[%s3875_s19 + $0x38] sm:$0xf0] }
 0x148   : > { %2150 = vmatmul.bf16.gmra.mxu1 %v4055_v47  ;;  %v2761_v47 = vor.u32 %v3582_v57, %v2758_v30  ;;  %v2745_v30 = vor.u32 %v3578_v6, %v2742_v58  ;;  %v3766_v57 = vld [vmem:[%s3875_s19 + $0x5ec] sm:$0xf]  ;;  %v3238_v6 = vld [vmem:[%s3875_s19 + $0x3f8] sm:$0xf0] }
 0x149   : > { %v3497_v33 = vor.u32 %v3766_v57, %v3494_v7 }
 0x14a   : > { %v4645_v38 = vpop.f32.mrf.mxu2  ;;  %v4647_v8 = vpop.f32.mrf.mxu3  ;;  %2259 = vmatpush.bf16.msrb.mxu1 %v2761_v47 }
 0x14b   : > { %v4649_v1 = vpop.f32.mrf.mxu0  ;;  %2398 = vmatpush.bf16.msra.mxu2 %v3497_v33  ;;  %v3758_v33 = vld [vmem:[%s3875_s19 + $0x5ac] sm:$0xf] }
 0x14d   : > { %v4651_v31 = vpop.f32.mrf.mxu1 }
 0x14e   : > { %2260 = vmatpush.bf16.msrb.mxu1 %v2745_v30  ;;  %v3774_v30 = vld [vmem:[%s3875_s19 + $0x62c] sm:$0xf] }
 0x152   : > { %v4659_v13 = vpop.f32.mrf.mxu2  ;;  %v4663_v12 = vpop.f32.mrf.mxu3 }
 0x153   : > { %v4665_v25 = vpop.f32.mrf.mxu0 }
 0x155   : > { %v4667_v0 = vpop.f32.mrf.mxu1 }
 0x156   : > { %2126 = vmatmul.bf16.gmra.mxu0 %v4108_v26  ;;  %v3734_v26 = vld [vmem:[%s3875_s19 + $0x4ec] sm:$0xf] }
 0x157   : > { %2184 = vmatmul.bf16.gmra.mxu2 %v4301_v14  ;;  %2213 = vmatmul.bf16.gmra.mxu3 %v4303_v15  ;;  %v3526_v14 = vld [vmem:[%s3875_s19 + $0x638] sm:$0xf0]  ;;  %v3369_v16 = vor.u32 %v3734_v26, %v3366_v24  ;;  %v1857_v24 = vadd.f32 %v4495_v55, %v4364_v20 }
 0x158   : > { %2155 = vmatmul.bf16.gmra.mxu1 %v4110_v27  ;;  %v3241_v27 = vor.u32 %v3702_v50, %v3238_v6  ;;  %v3529_v15 = vor.u32 %v3774_v30, %v3526_v14  ;;  %v3762_v50 = vld [vmem:[%s3875_s19 + $0x5cc] sm:$0xf]  ;;  %v3478_v14 = vld [vmem:[%s3875_s19 + $0x5d8] sm:$0xf0] }
 0x159   : > { %2369 = vmatpush.bf16.msra.mxu1 %v3369_v16  ;;  %v3698_v6 = vld [vmem:[%s3875_s19 + $0x3cc] sm:$0xf]  ;;  %v3481_v30 = vor.u32 %v3762_v50, %v3478_v14  ;;  %v3462_v50 = vld [vmem:[%s3875_s19 + $0x5b8] sm:$0xf0] }
 0x15a   : > { %v4673_v47 = vpop.f32.mrf.mxu2  ;;  %v4675_v21 = vpop.f32.mrf.mxu3  ;;  %2340 = vmatpush.bf16.msra.mxu0 %v3241_v27  ;;  %2433 = vmatpush.bf16.msra.mxu3 %v3529_v15  ;;  %v1886_v15 = vadd.f32 %v4597_v4, %v1857_v24  ;;  %v3694_v14 = vld [vmem:[%s3875_s19 + $0x3ac] sm:$0xf]  ;;  %v3465_v4 = vor.u32 %v3758_v33, %v3462_v50 }
 0x15b   : > { %5064 = vst [vmem:[#allocation28_spill] sm:$0xff] %v4675_v21  ;;  %v4677_v58 = vpop.f32.mrf.mxu0  ;;  %v3730_v21 = vld [vmem:[%s3875_s19 + $0x4cc] sm:$0xf]  ;;  %2399 = vmatpush.bf16.msra.mxu2 %v3481_v30  ;;  %v1859_v30 = vadd.f32 %v4508_v40, %v4377_v42 }
 0x15c   : > { %5065 = vst [vmem:[#allocation29_spill] sm:$0xff] %v4677_v58  ;;  %v3350_v58 = vld [vmem:[%s3875_s19 + $0x4d8] sm:$0xf0]  ;;  %v3726_v24 = vld [vmem:[%s3875_s19 + $0x4ac] sm:$0xf] }
 0x15d   : > { %v4679_v22 = vpop.f32.mrf.mxu1  ;;  %v3353_v27 = vor.u32 %v3730_v21, %v3350_v58  ;;  %v1915_v21 = vadd.f32 %v4599_v35, %v1886_v15  ;;  %v1888_v35 = vadd.f32 %v4617_v61, %v1859_v30  ;;  %v1862_v61 = vadd.f32 %v4526_v41, %v4390_v19  ;;  %v3722_v30 = vld [vmem:[%s3875_s19 + $0x48c] sm:$0xf] }
 0x15e   : > { %5066 = vst [vmem:[#allocation30_spill] sm:$0xff] %v4679_v22  ;;  %v3222_v22 = vld [vmem:[%s3875_s19 + $0x3d8] sm:$0xf0] }
 0x15f   : > { %v3225_v26 = vor.u32 %v3698_v6, %v3222_v22  ;;  %2370 = vmatpush.bf16.msra.mxu1 %v3353_v27  ;;  %v3206_v6 = vld [vmem:[%s3875_s19 + $0x3b8] sm:$0xf0]  ;;  %2400 = vmatpush.bf16.msra.mxu2 %v3465_v4  ;;  %v1891_v41 = vadd.f32 %v4631_v11, %v1862_v61 }
 0x160   : > { %v3209_v27 = vor.u32 %v3694_v14, %v3206_v6  ;;  %v3754_v14 = vld [vmem:[%s3875_s19 + $0x58c] sm:$0xf]  ;;  %v3446_v4 = vld [vmem:[%s3875_s19 + $0x598] sm:$0xf0] }
 0x161   : > { %2341 = vmatpush.bf16.msra.mxu0 %v3225_v26  ;;  %v1944_v26 = vadd.f32 %v4613_v34, %v1915_v21  ;;  %v1917_v34 = vadd.f32 %v4619_v51, %v1888_v35  ;;  %v3690_v6 = vld [vmem:[%s3875_s19 + $0x38c] sm:$0xf] }
 0x162   : > { %v4689_v17 = vpop.f32.mrf.mxu2  ;;  %v4691_v57 = vpop.f32.mrf.mxu3 }
 0x163   : > { %v4693_v7 = vpop.f32.mrf.mxu0  ;;  %v1973_v15 = vadd.f32 %v4615_v60, %v1944_v26  ;;  %v3318_v60 = vld [vmem:[%s3875_s19 + $0x498] sm:$0xf0]  ;;  %v1946_v26 = vadd.f32 %v4627_v23, %v1917_v34  ;;  %v1920_v34 = vadd.f32 %v4633_v18, %v1891_v41 }
 0x164   : > { %v3321_v35 = vor.u32 %v3722_v30, %v3318_v60  ;;  %v3770_v30 = vld [vmem:[%s3875_s19 + $0x60c] sm:$0xf]  ;;  %v3510_v60 = vld [vmem:[%s3875_s19 + $0x618] sm:$0xf0] }
 0x165   : > { %v4695_v3 = vpop.f32.mrf.mxu1  ;;  %2342 = vmatpush.bf16.msra.mxu0 %v3209_v27 }
 0x166   : > { %2131 = vmatmul.bf16.gmra.mxu0 %v4169_v9 }
 0x167   : > { %2189 = vmatmul.bf16.gmra.mxu2 %v4344_v62  ;;  %2218 = vmatmul.bf16.gmra.mxu3 %v4346_v63  ;;  %v3334_v63 = vld [vmem:[%s3875_s19 + $0x4b8] sm:$0xf0] }
 0x168   : > { %2160 = vmatmul.bf16.gmra.mxu1 %v4171_v10  ;;  %v3337_v62 = vor.u32 %v3726_v24, %v3334_v63  ;;  %v3449_v24 = vor.u32 %v3754_v14, %v3446_v4  ;;  %v3750_v14 = vld [vmem:[%s3875_s19 + $0x56c] sm:$0xf]  ;;  %v3430_v4 = vld [vmem:[%s3875_s19 + $0x578] sm:$0xf0] }
 0x16a   : > { %v4710_v16 = vpop.f32.mrf.mxu2  ;;  %v4712_v55 = vpop.f32.mrf.mxu3  ;;  %2371 = vmatpush.bf16.msra.mxu1 %v3337_v62  ;;  %v3190_v62 = vld [vmem:[%s3875_s19 + $0x398] sm:$0xf0]  ;;  %2401 = vmatpush.bf16.msra.mxu2 %v3449_v24  ;;  %v3433_v24 = vor.u32 %v3750_v14, %v3430_v4 }
 0x16b   : > { %v4714_v22 = vpop.f32.mrf.mxu0  ;;  %v3193_v51 = vor.u32 %v3690_v6, %v3190_v62  ;;  %v3686_v6 = vld [vmem:[%s3875_s19 + $0x36c] sm:$0xf]  ;;  %v3174_v62 = vld [vmem:[%s3875_s19 + $0x378] sm:$0xf0] }
 0x16d   : > { %v4717_v58 = vpop.f32.mrf.mxu1  ;;  %2343 = vmatpush.bf16.msra.mxu0 %v3193_v51  ;;  %v3513_v51 = vor.u32 %v3770_v30, %v3510_v60  ;;  %v3286_v60 = vld [vmem:[%s3875_s19 + $0x458] sm:$0xf0] }
 0x16e   : > { %2372 = vmatpush.bf16.msra.mxu1 %v3321_v35  ;;  %v3718_v35 = vld [vmem:[%s3875_s19 + $0x46c] sm:$0xf]  ;;  %2402 = vmatpush.bf16.msra.mxu2 %v3433_v24  ;;  %v1867_v24 = vadd.f32 %v4557_v36, %v4416_v28 }
 0x16f   : > { %2434 = vmatpush.bf16.msra.mxu3 %v3513_v51 }
 0x172   : > { %v4730_v33 = vpop.f32.mrf.mxu2  ;;  %v4732_v40 = vpop.f32.mrf.mxu3 }
 0x173   : > { %v2001_v50 = vpop.f32.mrf.mxu0 }
 0x174   : > { %v2002_v21 = vadd.f32 %v2001_v50, %v1973_v15  ;;  %v2456_v15 = vmax.f32 %v4493_v48, 0.0 }
 0x175   : > { %v2030_v63 = vpop.f32.mrf.mxu1 }
 0x176   : > { %v2031_v27 = vadd.f32 %v2030_v63, %v2002_v21  ;;  %3538 = vmatmul.msk.bf16.vlgmr.msrb.gmra.mxu0 %vm1631_vm0, %v4215_v52 }
 0x177   : > { %2290 = vmatmul.bf16.vlgmr.msrb.gmra.mxu2 %v3978_v53  ;;  %2319 = vmatmul.bf16.vlgmr.msrb.gmra.mxu3 %v3980_v54 }
 0x178   : > { %2261 = vmatmul.bf16.vlgmr.msrb.gmra.mxu1 %v3974_v49  ;;  %v2457_v50 = vmax.f32 %v2031_v27, 0.0  ;;  %v1975_v49 = vadd.f32 %v4629_v5, %v1946_v26  ;;  %v1864_v5 = vadd.f32 %v4541_v59, %v4405_v56  ;;  %v1949_v26 = vadd.f32 %v4645_v38, %v1920_v34 }
 0x179   : > { %v3177_v27 = vor.u32 %v3686_v6, %v3174_v62  ;;  %v3682_v6 = vld [vmem:[%s3875_s19 + $0x34c] sm:$0xf] }
 0x17a   : > { %v2488_v53 = vpack.c.bf16 %v2457_v50, %v2456_v15  ;;  %v2059_v48 = vpop.f32.mrf.mxu2  ;;  %v2088_v23 = vpop.f32.mrf.mxu3  ;;  %v3302_v15 = vld [vmem:[%s3875_s19 + $0x478] sm:$0xf0]  ;;  %v2460_v50 = vmax.f32 %v4506_v45, 0.0  ;;  %v1893_v59 = vadd.f32 %v4649_v1, %v1864_v5  ;;  %v1978_v38 = vadd.f32 %v4647_v8, %v1949_v26  ;;  %v3714_v5 = vld [vmem:[%s3875_s19 + $0x44c] sm:$0xf] }
 0x17b   : > { %v2060_v54 = vadd.f32 %v2059_v48, %v4364_v20  ;;  %v2003_v11 = vpop.f32.mrf.mxu0  ;;  %v3305_v41 = vor.u32 %v3718_v35, %v3302_v15  ;;  %2344 = vmatpush.bf16.msra.mxu0 %v3177_v27  ;;  %v3158_v8 = vld [vmem:[%s3875_s19 + $0x358] sm:$0xf0]  ;;  %v3289_v26 = vor.u32 %v3714_v5, %v3286_v60  ;;  %v1896_v27 = vadd.f32 %v4665_v25, %v1867_v24  ;;  %v3674_v24 = vld [vmem:[%s3875_s19 + $0x30c] sm:$0xf] }
 0x17c   : > { %2504 = vst [vmem:[%s4755_s17] sm:$0xff] %v2488_v53  ;;  %v2004_v21 = vadd.f32 %v2003_v11, %v1975_v49  ;;  %v1922_v45 = vadd.f32 %v4651_v31, %v1893_v59  ;;  %v3161_v31 = vor.u32 %v3682_v6, %v3158_v8  ;;  %v3738_v8 = vld [vmem:[%s3875_s19 + $0x50c] sm:$0xf]  ;;  %v3382_v5 = vld [vmem:[%s3875_s19 + $0x518] sm:$0xf0] }
 0x17d   : > { %v2032_v63 = vpop.f32.mrf.mxu1  ;;  %v4766_v61 = vadd.f32 %v2088_v23, %v2060_v54  ;;  %2373 = vmatpush.bf16.msra.mxu1 %v3305_v41  ;;  %v1925_v25 = vadd.f32 %v4667_v0, %v1896_v27  ;;  %v3742_v41 = vld [vmem:[%s3875_s19 + $0x52c] sm:$0xf]  ;;  %v3126_v60 = vld [vmem:[%s3875_s19 + $0x318] sm:$0xf0]  ;;  %v5069_v27 = vld [vmem:[#allocation30_spill] sm:$0xff] }
 0x17e   : > { %v2033_v18 = vadd.f32 %v2032_v63, %v2004_v21  ;;  %v3746_v21 = vld [vmem:[%s3875_s19 + $0x54c] sm:$0xf]  ;;  %v3414_v63 = vld [vmem:[%s3875_s19 + $0x558] sm:$0xf0]  ;;  %v1951_v62 = vadd.f32 %v4659_v13, %v1922_v45 }
 0x17f   : > { %v3417_v4 = vor.u32 %v3746_v21, %v3414_v63  ;;  %2345 = vmatpush.bf16.msra.mxu0 %v3161_v31 }
 0x180   : > { %v2461_v49 = vmax.f32 %v2033_v18, 0.0  ;;  %v2464_v18 = vmax.f32 %v4524_v37, 0.0 }
 0x181   : > { %2403 = vmatpush.bf16.msra.mxu2 %v3417_v4  ;;  %2374 = vmatpush.bf16.msra.mxu1 %v3289_v26  ;;  %v3706_v26 = vld [vmem:[%s3875_s19 + $0x40c] sm:$0xf] }
 0x182   : > { %v2490_v53 = vpack.c.bf16 %v2461_v49, %v2460_v50  ;;  %v2061_v48 = vpop.f32.mrf.mxu2  ;;  %v2090_v23 = vpop.f32.mrf.mxu3  ;;  %v3398_v50 = vld [vmem:[%s3875_s19 + $0x538] sm:$0xf0] }
 0x183   : > { %v2062_v54 = vadd.f32 %v2061_v48, %v4377_v42  ;;  %v2006_v11 = vpop.f32.mrf.mxu0  ;;  %v3401_v49 = vor.u32 %v3742_v41, %v3398_v50  ;;  %v1869_v48 = vadd.f32 %v4568_v29, %v4431_v2  ;;  %v5068_v29 = vld [vmem:[#allocation28_spill] sm:$0xff] }
 0x184   : > { %2509 = vst [vmem:[%s4755_s17 + $0x10] sm:$0xff] %v2490_v53  ;;  %v2007_v1 = vadd.f32 %v2006_v11, %v1978_v38  ;;  %v3678_v38 = vld [vmem:[%s3875_s19 + $0x32c] sm:$0xf]  ;;  %v3270_v11 = vld [vmem:[%s3875_s19 + $0x438] sm:$0xf0]  ;;  %v5072_v50 = vld [vmem:[#allocation16_spill] sm:$0xff] }
 0x185   : > { %v2035_v34 = vpop.f32.mrf.mxu1  ;;  %v4782_v14 = vadd.f32 %v2090_v23, %v2062_v54  ;;  %v3710_v53 = vld [vmem:[%s3875_s19 + $0x42c] sm:$0xf]  ;;  %v1954_v54 = vadd.f32 %v4673_v47, %v1925_v25  ;;  %2404 = vmatpush.bf16.msra.mxu2 %v3401_v49  ;;  %v5071_v25 = vld [vmem:[#allocation25_spill] sm:$0xff]  ;;  %v5073_v49 = vld [vmem:[#allocation4_spill] sm:$0xff] }
 0x186   : > { %v2036_v30 = vadd.f32 %v2035_v34, %v2007_v1  ;;  %3539 = vmatmul.msk.bf16.gmra.mxu0 %vm1631_vm0, %v4260_v32  ;;  %v3273_v45 = vor.u32 %v3710_v53, %v3270_v11  ;;  %v2468_v1 = vmax.f32 %v4539_v46, 0.0  ;;  %v5067_v34 = vld [vmem:[#allocation29_spill] sm:$0xff]  ;;  %v3385_v46 = vor.u32 %v3738_v8, %v3382_v5  ;;  %v5079_v5 = vld [vmem:[#allocation23_spill] sm:$0xff] }
 0x187   : > { %2295 = vmatmul.bf16.gmra.mxu2 %v4049_v43  ;;  %2324 = vmatmul.bf16.gmra.mxu3 %v4051_v44  ;;  %v1898_v21 = vadd.f32 %v5067_v34, %v1869_v48  ;;  %v1983_v4 = vadd.f32 %v5068_v29, %v1954_v54 }
 0x188   : > { %2266 = vmatmul.bf16.gmra.mxu1 %v4045_v39  ;;  %v2465_v36 = vmax.f32 %v2036_v30, 0.0  ;;  %v1980_v39 = vadd.f32 %v4663_v12, %v1951_v62  ;;  %v3142_v12 = vld [vmem:[%s3875_s19 + $0x338] sm:$0xf0] }
 0x189   : > { %v3145_v23 = vor.u32 %v3678_v38, %v3142_v12  ;;  %2375 = vmatpush.bf16.msra.mxu1 %v3273_v45  ;;  %2405 = vmatpush.bf16.msra.mxu2 %v3385_v46  ;;  %v5074_v38 = vld [vmem:[#allocation5_spill] sm:$0xff]  ;;  %v5075_v12 = vld [vmem:[#allocation22_spill] sm:$0xff] }
 0x18a   : > { %v2492_v43 = vpack.c.bf16 %v2465_v36, %v2464_v18  ;;  %v2064_v13 = vpop.f32.mrf.mxu2  ;;  %v2093_v37 = vpop.f32.mrf.mxu3  ;;  %v3254_v18 = vld [vmem:[%s3875_s19 + $0x418] sm:$0xf0]  ;;  %v1927_v36 = vadd.f32 %v5069_v27, %v1898_v21  ;;  %v2472_v53 = vmax.f32 %v5075_v12, 0.0 }
 0x18b   : > { %v2065_v51 = vadd.f32 %v2064_v13, %v4390_v19  ;;  %v2008_v35 = vpop.f32.mrf.mxu0  ;;  %2346 = vmatpush.bf16.msra.mxu0 %v3145_v23  ;;  %v3129_v13 = vor.u32 %v3674_v24, %v3126_v60  ;;  %v2476_v24 = vmax.f32 %v5079_v5, 0.0 }
 0x18c   : > { %2511 = vst [vmem:[%s4755_s17 + $0x20] sm:$0xff] %v2492_v43  ;;  %v2009_v15 = vadd.f32 %v2008_v35, %v1980_v39  ;;  %v5070_v35 = vld [vmem:[#allocation20_spill] sm:$0xff] }
 0x18d   : > { %v2037_v44 = vpop.f32.mrf.mxu1  ;;  %v4804_v59 = vadd.f32 %v2093_v37, %v2065_v51  ;;  %v3257_v51 = vor.u32 %v3706_v26, %v3254_v18 }
 0x18e   : > { %v2038_v0 = vadd.f32 %v2037_v44, %v2009_v15  ;;  %v1872_v15 = vadd.f32 %v5071_v25, %v5070_v35  ;;  %v1956_v44 = vadd.f32 %v4689_v17, %v1927_v36  ;;  %v5083_v25 = vld [vmem:[#allocation24_spill] sm:$0xff] }
 0x18f   : > { %2376 = vmatpush.bf16.msra.mxu1 %v3257_v51  ;;  %2347 = vmatpush.bf16.msra.mxu0 %v3129_v13  ;;  %v5080_v13 = vld [vmem:[#allocation19_spill] sm:$0xff]  ;;  %v5082_v51 = vld [vmem:[#allocation9_spill] sm:$0xff] }
 0x190   : > { %v2469_v63 = vmax.f32 %v2038_v0, 0.0  ;;  %v1901_v48 = vadd.f32 %v4693_v7, %v1872_v15  ;;  %v5076_v0 = vld [vmem:[#allocation6_spill] sm:$0xff]  ;;  %v1985_v17 = vadd.f32 %v4691_v57, %v1956_v44  ;;  %v5077_v7 = vld [vmem:[#allocation21_spill] sm:$0xff]  ;;  %v2480_v15 = vmax.f32 %v5083_v25, 0.0 }
 0x192   : > { %v2494_v47 = vpack.c.bf16 %v2469_v63, %v2468_v1  ;;  %v2066_v6 = vpop.f32.mrf.mxu2  ;;  %v2095_v30 = vpop.f32.mrf.mxu3  ;;  %v1930_v21 = vadd.f32 %v4695_v3, %v1901_v48 }
 0x193   : > { %v2067_v62 = vadd.f32 %v2066_v6, %v4405_v56  ;;  %v2011_v31 = vpop.f32.mrf.mxu0 }
 0x194   : > { %2513 = vst [vmem:[%s4755_s17 + $0x30] sm:$0xff] %v2494_v47  ;;  %v2012_v39 = vadd.f32 %v2011_v31, %v1983_v4  ;;  %v5078_v47 = vld [vmem:[#allocation27_spill] sm:$0xff]  ;;  %v1959_v8 = vadd.f32 %v4710_v16, %v1930_v21 }
 0x195   : > { %v2040_v43 = vpop.f32.mrf.mxu1  ;;  %v4825_v37 = vadd.f32 %v2095_v30, %v2067_v62  ;;  %v1874_v6 = vadd.f32 %v5078_v47, %v5077_v7 }
 0x196   : > { %v2041_v41 = vadd.f32 %v2040_v43, %v2012_v39  ;;  %3540 = vmatmul.msk.bf16.gmra.mxu0 %vm1631_vm0, %v5072_v50  ;;  %v1988_v31 = vadd.f32 %v4712_v55, %v1959_v8  ;;  %v5081_v55 = vld [vmem:[#allocation8_spill] sm:$0xff]  ;;  %v5086_v8 = vld [vmem:[#allocation10_spill] sm:$0xff] }
 0x197   : > { %2300 = vmatmul.bf16.gmra.mxu2 %v5074_v38  ;;  %2329 = vmatmul.bf16.gmra.mxu3 %v5076_v0  ;;  %v1903_v62 = vadd.f32 %v4714_v22, %v1874_v6  ;;  %v5085_v6 = vld [vmem:[#allocation2_spill] sm:$0xff] }
 0x198   : > { %2271 = vmatmul.bf16.gmra.mxu1 %v5073_v49  ;;  %v2473_v54 = vmax.f32 %v2041_v41, 0.0 }
 0x199   : > { %v1932_v27 = vadd.f32 %v4717_v58, %v1903_v62 }
 0x19a   : > { %v2496_v23 = vpack.c.bf16 %v2473_v54, %v2472_v53  ;;  %v2069_v11 = vpop.f32.mrf.mxu2  ;;  %v2098_v1 = vpop.f32.mrf.mxu3 }
 0x19b   : > { %v2070_v45 = vadd.f32 %v2069_v11, %v4416_v28  ;;  %v2013_v34 = vpop.f32.mrf.mxu0  ;;  %v1961_v43 = vadd.f32 %v4730_v33, %v1932_v27 }
 0x19c   : > { %2515 = vst [vmem:[%s4755_s17 + $0x40] sm:$0xff] %v2496_v23  ;;  %v2014_v63 = vadd.f32 %v2013_v34, %v1985_v17  ;;  %v5084_v17 = vld [vmem:[#allocation26_spill] sm:$0xff] }
 0x19d   : > { %v2042_v29 = vpop.f32.mrf.mxu1  ;;  %v4841_v4 = vadd.f32 %v2098_v1, %v2070_v45  ;;  %v1990_v58 = vadd.f32 %v4732_v40, %v1961_v43  ;;  %v2484_v23 = vmax.f32 %v5084_v17, 0.0 }
 0x19e   : > { %v2043_v57 = vadd.f32 %v2042_v29, %v2014_v63 }
 0x1a0   : > { %v2477_v30 = vmax.f32 %v2043_v57, 0.0  ;;  %v5087_v57 = vld [vmem:[#allocation11_spill] sm:$0xff] }
 0x1a2   : > { %v2498_v3 = vpack.c.bf16 %v2477_v30, %v2476_v24  ;;  %v2071_v46 = vpop.f32.mrf.mxu2  ;;  %v2100_v26 = vpop.f32.mrf.mxu3 }
 0x1a3   : > { %v2072_v60 = vadd.f32 %v2071_v46, %v4431_v2  ;;  %v2016_v18 = vpop.f32.mrf.mxu0 }
 0x1a4   : > { %2517 = vst [vmem:[%s4755_s17 + $0x50] sm:$0xff] %v2498_v3  ;;  %v2017_v36 = vadd.f32 %v2016_v18, %v1988_v31 }
 0x1a5   : > { %v2045_v39 = vpop.f32.mrf.mxu1  ;;  %v4852_v16 = vadd.f32 %v2100_v26, %v2072_v60 }
 0x1a6   : > { %v2046_v22 = vadd.f32 %v2045_v39, %v2017_v36  ;;  %3541 = vmatmul.msk.bf16.gmra.mxu0 %vm1631_vm0, %v5080_v13 }
 0x1a7   : > { %2305 = vmatmul.bf16.gmra.mxu2 %v5082_v51  ;;  %2334 = vmatmul.bf16.gmra.mxu3 %v4169_v9  ;;  %v5090_v51 = vld [vmem:[#allocation13_spill] sm:$0xff] }
 0x1a8   : > { %2276 = vmatmul.bf16.gmra.mxu1 %v5081_v55  ;;  %v2481_v44 = vmax.f32 %v2046_v22, 0.0  ;;  %v5088_v22 = vld [vmem:[#allocation3_spill] sm:$0xff]  ;;  %v5089_v55 = vld [vmem:[#allocation12_spill] sm:$0xff] }
 0x1aa   : > { %v2500_v41 = vpack.c.bf16 %v2481_v44, %v2480_v15  ;;  %v2074_v49 = vpop.f32.mrf.mxu2  ;;  %v2103_v38 = vpop.f32.mrf.mxu3 }
 0x1ab   : > { %v2075_v33 = vadd.f32 %v2074_v49, %v5070_v35  ;;  %v2018_v12 = vpop.f32.mrf.mxu0 }
 0x1ac   : > { %2519 = vst [vmem:[%s4755_s17 + $0x60] sm:$0xff] %v2500_v41  ;;  %v2019_v53 = vadd.f32 %v2018_v12, %v1990_v58 }
 0x1ad   : > { %v2047_v48 = vpop.f32.mrf.mxu1  ;;  %v4864_v54 = vadd.f32 %v2103_v38, %v2075_v33 }
 0x1ae   : > { %v2048_v0 = vadd.f32 %v2047_v48, %v2019_v53 }
 0x1b0   : > { %v2485_v11 = vmax.f32 %v2048_v0, 0.0 }
 0x1b2   : > { %v2502_v45 = vpack.c.bf16 %v2485_v11, %v2484_v23  ;;  %v2076_v9 = vpop.f32.mrf.mxu2  ;;  %v2105_v1 = vpop.f32.mrf.mxu3  ;;  %v5091_v11 = vld [vmem:[#allocation7_spill] sm:$0xff] }
 0x1b3   : > { %v2077_v40 = vadd.f32 %v2076_v9, %v5077_v7  ;;  %v2117_v34 = vpop.f32.mrf.mxu0 }
 0x1b4   : > { %2521 = vst [vmem:[%s4755_s17 + $0x70] sm:$0xff] %v2502_v45  ;;  %v2118_v21 = vadd.f32 %v2117_v34, %v4766_v61  ;;  %v5093_v45 = vld [vmem:[#allocation15_spill] sm:$0xff] }
 0x1b5   : > { %v2146_v63 = vpop.f32.mrf.mxu1  ;;  %v4870_v29 = vadd.f32 %v2105_v1, %v2077_v40 }
 0x1b6   : > { %v2147_v47 = vadd.f32 %v2146_v63, %v2118_v21  ;;  %2348 = vmatmul.bf16.vlgmr.msra.gmra.mxu0 %v5085_v6 }
 0x1b7   : > { %2406 = vmatmul.bf16.vlgmr.msra.gmra.mxu2 %v5087_v57  ;;  %3542 = vmatmul.msk.bf16.vlgmr.msra.gmra.mxu3 %vm1631_vm0, %v4215_v52 }
 0x1b8   : > { %2377 = vmatmul.bf16.vlgmr.msra.gmra.mxu1 %v5086_v8 }
 0x1ba   : > { %v2175_v5 = vpop.f32.mrf.mxu2  ;;  %v2204_v62 = vpop.f32.mrf.mxu3 }
 0x1bb   : > { %v2176_v24 = vadd.f32 %v2175_v5, %v2147_v47  ;;  %v2119_v30 = vpop.f32.mrf.mxu0 }
 0x1bc   : > { %v2120_v31 = vadd.f32 %v2119_v30, %v4782_v14 }
 0x1bd   : > { %v2148_v61 = vpop.f32.mrf.mxu1  ;;  %v4878_v3 = vadd.f32 %v2204_v62, %v2176_v24 }
 0x1be   : > { %v2149_v46 = vadd.f32 %v2148_v61, %v2120_v31  ;;  %v5095_v31 = vld [vmem:[#allocation18_spill] sm:$0xff] }
 0x1c2   : > { %v2177_v60 = vpop.f32.mrf.mxu2  ;;  %v2206_v18 = vpop.f32.mrf.mxu3 }
 0x1c3   : > { %v2178_v26 = vadd.f32 %v2177_v60, %v2149_v46  ;;  %v2122_v27 = vpop.f32.mrf.mxu0 }
 0x1c4   : > { %v2123_v36 = vadd.f32 %v2122_v27, %v4804_v59 }
 0x1c5   : > { %v2151_v39 = vpop.f32.mrf.mxu1  ;;  %v4881_v43 = vadd.f32 %v2206_v18, %v2178_v26 }
 0x1c6   : > { %v2152_v52 = vadd.f32 %v2151_v39, %v2123_v36  ;;  %2353 = vmatmul.bf16.gmra.mxu0 %v5088_v22 }
 0x1c7   : > { %2411 = vmatmul.bf16.gmra.mxu2 %v5090_v51  ;;  %3543 = vmatmul.msk.bf16.gmra.mxu3 %vm1631_vm0, %v4260_v32  ;;  %v5092_v32 = vld [vmem:[#allocation14_spill] sm:$0xff] }
 0x1c8   : > { %2382 = vmatmul.bf16.gmra.mxu1 %v5089_v55 }
 0x1ca   : > { %v2180_v14 = vpop.f32.mrf.mxu2  ;;  %v2209_v15 = vpop.f32.mrf.mxu3 }
 0x1cb   : > { %v2181_v25 = vadd.f32 %v2180_v14, %v2152_v52  ;;  %v2124_v44 = vpop.f32.mrf.mxu0 }
 0x1cc   : > { %v2125_v58 = vadd.f32 %v2124_v44, %v4825_v37 }
 0x1cd   : > { %v2153_v59 = vpop.f32.mrf.mxu1  ;;  %v2210_v41 = vadd.f32 %v2209_v15, %v2181_v25 }
 0x1ce   : > { %v2154_v49 = vadd.f32 %v2153_v59, %v2125_v58 }
 0x1d2   : > { %v2182_v33 = vpop.f32.mrf.mxu2  ;;  %v2211_v12 = vpop.f32.mrf.mxu3 }
 0x1d3   : > { %v2183_v38 = vadd.f32 %v2182_v33, %v2154_v49  ;;  %v2127_v53 = vpop.f32.mrf.mxu0 }
 0x1d4   : > { %v2128_v48 = vadd.f32 %v2127_v53, %v4841_v4 }
 0x1d5   : > { %v2156_v0 = vpop.f32.mrf.mxu1  ;;  %v2212_v17 = vadd.f32 %v2211_v12, %v2183_v38 }
 0x1d6   : > { %v2157_v23 = vadd.f32 %v2156_v0, %v2128_v48  ;;  %2358 = vmatmul.bf16.gmra.mxu0 %v5091_v11 }
 0x1d7   : > { %2416 = vmatmul.bf16.gmra.mxu2 %v5093_v45  ;;  %3544 = vmatmul.msk.bf16.gmra.mxu3 %vm1631_vm0, %v5072_v50  ;;  %v5094_v50 = vld [vmem:[#allocation17_spill] sm:$0xff] }
 0x1d8   : > { %2387 = vmatmul.bf16.gmra.mxu1 %v5092_v32 }
 0x1da   : > { %v2185_v37 = vpop.f32.mrf.mxu2  ;;  %v2214_v40 = vpop.f32.mrf.mxu3 }
 0x1db   : > { %v2186_v9 = vadd.f32 %v2185_v37, %v2157_v23  ;;  %v2129_v1 = vpop.f32.mrf.mxu0 }
 0x1dc   : > { %v2130_v34 = vadd.f32 %v2129_v1, %v4852_v16 }
 0x1dd   : > { %v2158_v21 = vpop.f32.mrf.mxu1  ;;  %v2215_v4 = vadd.f32 %v2214_v40, %v2186_v9 }
 0x1de   : > { %v2159_v63 = vadd.f32 %v2158_v21, %v2130_v34 }
 0x1e2   : > { %v2187_v47 = vpop.f32.mrf.mxu2  ;;  %v2216_v8 = vpop.f32.mrf.mxu3 }
 0x1e3   : > { %v2188_v6 = vadd.f32 %v2187_v47, %v2159_v63  ;;  %v2132_v57 = vpop.f32.mrf.mxu0 }
 0x1e4   : > { %v2133_v5 = vadd.f32 %v2132_v57, %v4864_v54 }
 0x1e5   : > { %v2161_v24 = vpop.f32.mrf.mxu1  ;;  %v2217_v62 = vadd.f32 %v2216_v8, %v2188_v6 }
 0x1e6   : > { %v2162_v30 = vadd.f32 %v2161_v24, %v2133_v5  ;;  %2363 = vmatmul.bf16.gmra.mxu0 %v4171_v10 }
 0x1e7   : > { %2421 = vmatmul.bf16.gmra.mxu2 %v5095_v31  ;;  %3545 = vmatmul.msk.bf16.gmra.mxu3 %vm1631_vm0, %v5080_v13 }
 0x1e8   : > { %2392 = vmatmul.bf16.gmra.mxu1 %v5094_v50 }
 0x1ea   : > { %v2190_v16 = vpop.f32.mrf.mxu2  ;;  %v2219_v46 = vpop.f32.mrf.mxu3 }
 0x1eb   : > { %v2191_v61 = vadd.f32 %v2190_v16, %v2162_v30  ;;  %v2134_v60 = vpop.f32.mrf.mxu0 }
 0x1ec   : > { %v2135_v26 = vadd.f32 %v2134_v60, %v4870_v29 }
 0x1ed   : > { %v2163_v18 = vpop.f32.mrf.mxu1  ;;  %v2220_v54 = vadd.f32 %v2219_v46, %v2191_v61 }
 0x1ee   : > { %v2164_v27 = vadd.f32 %v2163_v18, %v2135_v26 }
 0x1f2   : > { %v2192_v36 = vpop.f32.mrf.mxu2  ;;  %v2221_v52 = vpop.f32.mrf.mxu3 }
 0x1f3   : > { %v2193_v39 = vadd.f32 %v2192_v36, %v2164_v27  ;;  %v2233_v10 = vpop.f32.mrf.mxu0 }
 0x1f4   : > { %v4904_v22 = vadd.f32 %v2233_v10, %v4878_v3 }
 0x1f5   : > { %v2262_v55 = vpop.f32.mrf.mxu1  ;;  %v2222_v51 = vadd.f32 %v2221_v52, %v2193_v39 }
 0x1f6   : > { %v2263_v47 = vadd.f32 %v2262_v55, %v4364_v20 }
 0x1fa   : > { %v2291_v14 = vpop.f32.mrf.mxu2  ;;  %v2320_v13 = vpop.f32.mrf.mxu3 }
 0x1fb   : > { %v2235_v25 = vpop.f32.mrf.mxu0  ;;  %v2292_v24 = vadd.f32 %v2291_v14, %v2263_v47 }
 0x1fc   : > { %v4907_v15 = vadd.f32 %v2235_v25, %v4881_v43 }
 0x1fd   : > { %v2264_v44 = vpop.f32.mrf.mxu1  ;;  %v2321_v30 = vadd.f32 %v2320_v13, %v2292_v24 }
 0x1fe   : > { %v2265_v61 = vadd.f32 %v2264_v44, %v4377_v42 }
 0x202   : > { %v2293_v29 = vpop.f32.mrf.mxu2  ;;  %v2322_v58 = vpop.f32.mrf.mxu3 }
 0x203   : > { %v2238_v59 = vpop.f32.mrf.mxu0  ;;  %v2294_v60 = vadd.f32 %v2293_v29, %v2265_v61 }
 0x204   : > { %v4909_v49 = vadd.f32 %v2238_v59, %v2210_v41 }
 0x205   : > { %v2267_v33 = vpop.f32.mrf.mxu1  ;;  %v2323_v18 = vadd.f32 %v2322_v58, %v2294_v60 }
 0x20a   : > { %v2296_v38 = vpop.f32.mrf.mxu2  ;;  %v2325_v12 = vpop.f32.mrf.mxu3 }
 0x20b   : > { %v2240_v53 = vpop.f32.mrf.mxu0 }
 0x20c   : > { %v4911_v3 = vadd.f32 %v2240_v53, %v2212_v17 }
 0x20d   : > { %v2269_v48 = vpop.f32.mrf.mxu1 }
 0x212   : > { %v2298_v0 = vpop.f32.mrf.mxu2  ;;  %v4913_v23 = vpop.f32.mrf.mxu3 }
 0x213   : > { %v2243_v11 = vpop.f32.mrf.mxu0 }
 0x214   : > { %v4915_v32 = vadd.f32 %v2243_v11, %v2215_v4 }
 0x215   : > { %v2272_v43 = vpop.f32.mrf.mxu1 }
 0x21a   : > { %v4917_v45 = vpop.f32.mrf.mxu2  ;;  %v4919_v37 = vpop.f32.mrf.mxu3 }
 0x21b   : > { %v2245_v41 = vpop.f32.mrf.mxu0 }
 0x21c   : > { %v4921_v9 = vadd.f32 %v2245_v41, %v2217_v62  ;;  %v2462_v41 = vmax.f32 %v4907_v15, 0.0  ;;  %v2466_v15 = vmax.f32 %v4909_v49, 0.0 }
 0x21d   : > { %v4923_v40 = vpop.f32.mrf.mxu1 }
 0x222   : > { %v4925_v1 = vpop.f32.mrf.mxu2  ;;  %v4927_v17 = vpop.f32.mrf.mxu3 }
 0x223   : > { %v2248_v34 = vpop.f32.mrf.mxu0 }
 0x224   : > { %v4929_v21 = vadd.f32 %v2248_v34, %v2220_v54  ;;  %v2268_v54 = vadd.f32 %v2267_v33, %v4390_v19 }
 0x225   : > { %v4931_v63 = vpop.f32.mrf.mxu1 }
 0x226   : > { %v2297_v14 = vadd.f32 %v2296_v38, %v2268_v54 }
 0x228   : > { %v2326_v29 = vadd.f32 %v2325_v12, %v2297_v14 }
 0x22a   : > { %v4933_v4 = vpop.f32.mrf.mxu2  ;;  %v4936_v6 = vpop.f32.mrf.mxu3 }
 0x22b   : > { %v2250_v8 = vpop.f32.mrf.mxu0 }
 0x22c   : > { %v4938_v57 = vadd.f32 %v2250_v8, %v2222_v51  ;;  %v2458_v51 = vmax.f32 %v4904_v22, 0.0  ;;  %v2270_v22 = vadd.f32 %v2269_v48, %v4405_v56 }
 0x22d   : > { %v4940_v5 = vpop.f32.mrf.mxu1 }
 0x22e   : > { %v2299_v34 = vadd.f32 %v2298_v0, %v2270_v22 }
 0x230   : > { %v2328_v12 = vadd.f32 %v4913_v23, %v2299_v34 }
 0x232   : > { %v4942_v62 = vpop.f32.mrf.mxu2  ;;  %v4944_v50 = vpop.f32.mrf.mxu3 }
 0x233   : > { %v2349_v31 = vpop.f32.mrf.mxu0 }
 0x234   : > { %v2350_v46 = vadd.f32 %v2349_v31, %v2321_v30  ;;  %v2273_v31 = vadd.f32 %v2272_v43, %v4416_v28 }
 0x235   : > { %v2378_v16 = vpop.f32.mrf.mxu1 }
 0x236   : > { %v2379_v20 = vadd.f32 %v2378_v16, %v2350_v46  ;;  %v2302_v0 = vadd.f32 %v4917_v45, %v2273_v31  ;;  %v2470_v45 = vmax.f32 %v4911_v3, 0.0 }
 0x238   : > { %v2331_v54 = vadd.f32 %v4919_v37, %v2302_v0 }
 0x23a   : > { %v2407_v26 = vpop.f32.mrf.mxu2  ;;  %v2436_v36 = vpop.f32.mrf.mxu3 }
 0x23b   : > { %v2408_v27 = vadd.f32 %v2407_v26, %v2379_v20  ;;  %v2351_v39 = vpop.f32.mrf.mxu0 }
 0x23c   : > { %v2352_v55 = vadd.f32 %v2351_v39, %v2323_v18  ;;  %v2275_v39 = vadd.f32 %v4923_v40, %v4431_v2 }
 0x23d   : > { %v2380_v52 = vpop.f32.mrf.mxu1  ;;  %v2437_v10 = vadd.f32 %v2436_v36, %v2408_v27 }
 0x23e   : > { %v2381_v44 = vadd.f32 %v2380_v52, %v2352_v55 }
 0x23f   : > { %v2459_v42 = vmax.f32 %v2437_v10, 0.0  ;;  %v2304_v10 = vadd.f32 %v4925_v1, %v2275_v39  ;;  %v2474_v1 = vmax.f32 %v4915_v32, 0.0 }
 0x241   : > { %v2489_v25 = vpack.c.bf16 %v2459_v42, %v2458_v51  ;;  %v2333_v42 = vadd.f32 %v4927_v17, %v2304_v10 }
 0x242   : > { %v2409_v19 = vpop.f32.mrf.mxu2  ;;  %v2438_v59 = vpop.f32.mrf.mxu3 }
 0x243   : > { %2508 = vst.msk [vmem:[%s4755_s17 + $0x8] sm:$0xff] %vm4949_vm3, %v2489_v25  ;;  %v2410_v58 = vadd.f32 %v2409_v19, %v2381_v44  ;;  %v2354_v33 = vpop.f32.mrf.mxu0  ;;  %v2278_v25 = vadd.f32 %v4931_v63, %v5070_v35 }
 0x244   : > { %v2355_v11 = vadd.f32 %v2354_v33, %v2326_v29 }
 0x245   : > { %v2383_v53 = vpop.f32.mrf.mxu1  ;;  %v2439_v38 = vadd.f32 %v2438_v59, %v2410_v58  ;;  %v2307_v58 = vadd.f32 %v4933_v4, %v2278_v25  ;;  %v2478_v4 = vmax.f32 %v4921_v9, 0.0  ;;  %v2482_v9 = vmax.f32 %v4929_v21, 0.0 }
 0x246   : > { %v2384_v24 = vadd.f32 %v2383_v53, %v2355_v11  ;;  %v2280_v11 = vadd.f32 %v4940_v5, %v5077_v7 }
 0x247   : > { %v2463_v47 = vmax.f32 %v2439_v38, 0.0  ;;  %v2336_v22 = vadd.f32 %v4936_v6, %v2307_v58 }
 0x249   : > { %v2491_v8 = vpack.c.bf16 %v2463_v47, %v2462_v41  ;;  %v2309_v47 = vadd.f32 %v4942_v62, %v2280_v11 }
 0x24a   : > { %v2412_v30 = vpop.f32.mrf.mxu2  ;;  %v2441_v61 = vpop.f32.mrf.mxu3 }
 0x24b   : > { %2510 = vst.msk [vmem:[%s4755_s17 + $0x18] sm:$0xff] %vm4949_vm3, %v2491_v8  ;;  %v2413_v16 = vadd.f32 %v2412_v30, %v2384_v24  ;;  %v2356_v56 = vpop.f32.mrf.mxu0 }
 0x24c   : > { %v2357_v60 = vadd.f32 %v2356_v56, %v2328_v12  ;;  %v2338_v12 = vadd.f32 %v4944_v50, %v2309_v47 }
 0x24d   : > { %v2385_v48 = vpop.f32.mrf.mxu1  ;;  %v2442_v46 = vadd.f32 %v2441_v61, %v2413_v16 }
 0x24e   : > { %v2386_v18 = vadd.f32 %v2385_v48, %v2357_v60 }
 0x24f   : > { %v2467_v20 = vmax.f32 %v2442_v46, 0.0 }
 0x251   : > { %v2493_v26 = vpack.c.bf16 %v2467_v20, %v2466_v15  ;;  %v2486_v20 = vmax.f32 %v4938_v57, 0.0 }
 0x252   : > { %v2414_v23 = vpop.f32.mrf.mxu2  ;;  %v2443_v43 = vpop.f32.mrf.mxu3 }
 0x253   : > { %2512 = vst.msk [vmem:[%s4755_s17 + $0x28] sm:$0xff] %vm4949_vm3, %v2493_v26  ;;  %v2415_v28 = vadd.f32 %v2414_v23, %v2386_v18  ;;  %v2359_v27 = vpop.f32.mrf.mxu0 }
 0x254   : > { %v2360_v52 = vadd.f32 %v2359_v27, %v2331_v54 }
 0x255   : > { %v2388_v36 = vpop.f32.mrf.mxu1  ;;  %v2444_v49 = vadd.f32 %v2443_v43, %v2415_v28 }
 0x256   : > { %v2389_v37 = vadd.f32 %v2388_v36, %v2360_v52 }
 0x257   : > { %v2471_v55 = vmax.f32 %v2444_v49, 0.0 }
 0x259   : > { %v2495_v51 = vpack.c.bf16 %v2471_v55, %v2470_v45 }
 0x25a   : > { %v2417_v14 = vpop.f32.mrf.mxu2  ;;  %v2446_v40 = vpop.f32.mrf.mxu3 }
 0x25b   : > { %2514 = vst.msk [vmem:[%s4755_s17 + $0x38] sm:$0xff] %vm4949_vm3, %v2495_v51  ;;  %v2418_v2 = vadd.f32 %v2417_v14, %v2389_v37  ;;  %v2361_v44 = vpop.f32.mrf.mxu0 }
 0x25c   : > { %v2362_v29 = vadd.f32 %v2361_v44, %v2333_v42 }
 0x25d   : > { %v2390_v19 = vpop.f32.mrf.mxu1  ;;  %v2447_v3 = vadd.f32 %v2446_v40, %v2418_v2 }
 0x25e   : > { %v2391_v17 = vadd.f32 %v2390_v19, %v2362_v29 }
 0x25f   : > { %v2475_v59 = vmax.f32 %v2447_v3, 0.0 }
 0x261   : > { %v2497_v33 = vpack.c.bf16 %v2475_v59, %v2474_v1 }
 0x262   : > { %v2419_v53 = vpop.f32.mrf.mxu2  ;;  %v2448_v63 = vpop.f32.mrf.mxu3 }
 0x263   : > { %2516 = vst.msk [vmem:[%s4755_s17 + $0x48] sm:$0xff] %vm4949_vm3, %v2497_v33  ;;  %v2420_v35 = vadd.f32 %v2419_v53, %v2391_v17  ;;  %v2364_v38 = vpop.f32.mrf.mxu0 }
 0x264   : > { %v2365_v32 = vadd.f32 %v2364_v38, %v2336_v22 }
 0x265   : > { %v2449_v41 = vadd.f32 %v2448_v63, %v2420_v35  ;;  %v2393_v34 = vpop.f32.mrf.mxu1 }
 0x266   : > { %v2394_v6 = vadd.f32 %v2393_v34, %v2365_v32 }
 0x267   : > { %v2479_v8 = vmax.f32 %v2449_v41, 0.0 }
 0x269   : > { %v2499_v24 = vpack.c.bf16 %v2479_v8, %v2478_v4 }
 0x26a   : > { %v2422_v30 = vpop.f32.mrf.mxu2  ;;  %v2451_v16 = vpop.f32.mrf.mxu3 }
 0x26b   : > { %2518 = vst.msk [vmem:[%s4755_s17 + $0x58] sm:$0xff] %vm4949_vm3, %v2499_v24  ;;  %v2423_v31 = vadd.f32 %v2422_v30, %v2394_v6  ;;  %v2366_v7 = vpop.f32.mrf.mxu0 }
 0x26c   : > { %v2367_v61 = vadd.f32 %v2366_v7, %v2338_v12 }
 0x26d   : > { %v2452_v5 = vadd.f32 %v2451_v16, %v2423_v31  ;;  %v2395_v62 = vpop.f32.mrf.mxu1 }
 0x26e   : > { %v2396_v46 = vadd.f32 %v2395_v62, %v2367_v61 }
 0x26f   : > { %v2483_v56 = vmax.f32 %v2452_v5, 0.0 }
 0x271   : > { %v2501_v48 = vpack.c.bf16 %v2483_v56, %v2482_v9 }
 0x272   : > { %v2424_v60 = vpop.f32.mrf.mxu2  ;;  %v2453_v15 = vpop.f32.mrf.mxu3 }
 0x273   : > { %2520 = vst.msk [vmem:[%s4755_s17 + $0x68] sm:$0xff] %vm4949_vm3, %v2501_v48  ;;  %v2425_v50 = vadd.f32 %v2424_v60, %v2396_v46 }
 0x275   : > { %v2454_v0 = vadd.f32 %v2453_v15, %v2425_v50 }
 0x277   : > { %v2487_v26 = vmax.f32 %v2454_v0, 0.0 }
 0x279   : > { %v2503_v18 = vpack.c.bf16 %v2487_v26, %v2486_v20 }
 0x27b   : > { %2522 = vst.msk [vmem:[%s4755_s17 + $0x78] sm:$0xff] %vm4949_vm3, %v2503_v18 }
 0x27c PF: > { %s13_s14 = sadd.s32 1, %s3828_s14   ;;  %s5098_s12 = smov %s3824_s13 }
 0x27d   : > { %p10_p5 = scmp.ge.s32.totalorder %s13_s14, 4   ;;  %s5099_s13 = smov %s5101_s15 }
 0x27f   :  { %12 = sbr.rel (!%p10_p5) target bundleno = 2 (0x2), region = 62 }

// kernel: convpolicy_forward.7
= control target key start
LH: loop header
LB: loop body
LE: loop exit
PB: predicated region body
PF: predicated region fallthrough
CT: control target
= control target key end

     0   :  { %s1567_s12 = smov 0   ;;  %s1569_s13 = smov 0   ;;  %s1788_s0 = inlined_call_operand.vmem [shape: bf16[2,1024,81], index: 0, kind: input, shape index: {}]   ;;  %s1789_s1 = inlined_call_operand.vmem [shape: bf16[32,1024], index: 1, kind: input, shape index: {}]   ;;  %s1790_s2 = inlined_call_operand.vmem [shape: f32[32,1], index: 2, kind: input, shape index: {}]   ;;  %s1791_s3 = inlined_call_operand.vmem [shape: bf16[2,32,81], index: 3, kind: output, shape index: {}]  }
   0x1   :  { %s1571_s14 = smov 0  }
   0x2 LB: > { %s25_s15 = sadd.s32 1, %s1540_s13  ;;  %p1086_p0 = scmp.ge.s32.totalorder %s1544_s14, 1  ;;  %s1544_s14 = sphi %s1571_s14, %s13_s14   ;;  %s1540_s13 = sphi %s1569_s13, %s1793_s13   ;;  %s1536_s12 = sphi %s1567_s12, %s1792_s12  }
   0x3   : > { %p27_p1 = scmp.ge.s32.totalorder %s25_s15, 2  ;;  %p156_p2 = scmp.lt.s32.totalorder %s1544_s14, 3 }
   0x5   : > { %s1795_s15 = smov (%p27_p1, %s25_s15), 0  ;;  %p157_p3 = pnand %p1086_p0, %p156_p2 }
   0x6   : > { %p186_p4 = scmp.lt.s32.totalorder (!%p157_p3), %s1536_s12, 1 }
   0x7   : > { %160 = sbr.rel (%p157_p3) target bundleno = 246 (0xf6), region = 32 }
   0xc   : > { %s1797_s12 = smov (!%p186_p4, %s1536_s12), 1  ;;  %v1546_v16 = vmov 0   ;;  %v346_v21 = vld [vmem:[%s1790_s2] sm:$0xff]  ;;  %v347_v28 = vld [vmem:[%s1790_s2 + $0x8] sm:$0xff]  ;;  %v348_v43 = vld [vmem:[%s1790_s2 + $0x10] sm:$0xff]  ;;  %vm994_vm0 = vcmask 658432  }
   0xd   : > { %s1413_s16 = sshll.u32 %s1797_s12, 9  ;;  %1520 = vset.pattern.permute.xlu0 %v1546_v16  ;;  %1521 = vset.pattern.permute.xlu1 %v1546_v16  ;;  %v1093_v32 = vld [vmem:[%s1789_s1] sm:$0xf]  ;;  %v1415_v34 = vld [vmem:[%s1789_s1 + $0x4] sm:$0xf]  ;;  %v349_v56 = vld [vmem:[%s1790_s2 + $0x18] sm:$0xff] }
   0xe   : > { %s1591_s19 = scalar_lea.vmem %s1788_s0, %s1413_s16  ;;  %352 = vperm.xlu0 %1520, %v346_v21   ;;  %v1419_v33 = vld [vmem:[%s1789_s1 + $0x1c] sm:$0xf0]  ;;  %v1095_v38 = vld [vmem:[%s1789_s1 + $0x20] sm:$0xf0]  ;;  %v1101_v39 = vld [vmem:[%s1789_s1 + $0x8] sm:$0xf]  ;;  %362 = vperm.xlu1 %1521, %v348_v43  }
   0xf   : > { %v1438_v0 = vld [vmem:[%s1591_s19 + $0x38] sm:$0xff]  ;;  %v1437_v4 = vld [vmem:[%s1591_s19 + $0x30] sm:$0xff]  ;;  %v1436_v8 = vld [vmem:[%s1591_s19 + $0x28] sm:$0xff]  ;;  %v1094_v46 = vor.u32 %v1419_v33, %v1093_v32  ;;  %v1098_v47 = vor.u32 %v1415_v34, %v1095_v38 }
  0x10   : > { %v1446_v1 = vld [vmem:[%s1591_s19 + $0x78] sm:$0xff]  ;;  %834 = vmatpush.bf16.msra.mxu0 %v1438_v0  ;;  %v1445_v5 = vld [vmem:[%s1591_s19 + $0x70] sm:$0xff]  ;;  %v1444_v9 = vld [vmem:[%s1591_s19 + $0x68] sm:$0xff] }
  0x11   : > { %v1454_v2 = vld [vmem:[%s1591_s19 + $0xb8] sm:$0xff]  ;;  %853 = vmatpush.bf16.msra.mxu1 %v1446_v1  ;;  %v1453_v6 = vld [vmem:[%s1591_s19 + $0xb0] sm:$0xff]  ;;  %v1452_v10 = vld [vmem:[%s1591_s19 + $0xa8] sm:$0xff] }
  0x12   : > { %v1462_v3 = vld [vmem:[%s1591_s19 + $0xf8] sm:$0xff]  ;;  %872 = vmatpush.bf16.msra.mxu2 %v1454_v2  ;;  %v1461_v7 = vld [vmem:[%s1591_s19 + $0xf0] sm:$0xff]  ;;  %v1460_v11 = vld [vmem:[%s1591_s19 + $0xe8] sm:$0xff] }
  0x13   : > { %891 = vmatpush.bf16.msra.mxu3 %v1462_v3  ;;  %v1435_v12 = vld [vmem:[%s1591_s19 + $0x20] sm:$0xff]  ;;  %v1434_v17 = vld [vmem:[%s1591_s19 + $0x18] sm:$0xff]  ;;  %v1433_v22 = vld [vmem:[%s1591_s19 + $0x10] sm:$0xff] }
  0x14   : > { %835 = vmatpush.bf16.msra.mxu0 %v1437_v4  ;;  %v1443_v13 = vld [vmem:[%s1591_s19 + $0x60] sm:$0xff]  ;;  %v1442_v18 = vld [vmem:[%s1591_s19 + $0x58] sm:$0xff]  ;;  %v1441_v23 = vld [vmem:[%s1591_s19 + $0x50] sm:$0xff] }
  0x15   : > { %854 = vmatpush.bf16.msra.mxu1 %v1445_v5  ;;  %v1451_v14 = vld [vmem:[%s1591_s19 + $0xa0] sm:$0xff]  ;;  %v1450_v19 = vld [vmem:[%s1591_s19 + $0x98] sm:$0xff]  ;;  %v1449_v24 = vld [vmem:[%s1591_s19 + $0x90] sm:$0xff] }
  0x16   : > { %873 = vmatpush.bf16.msra.mxu2 %v1453_v6  ;;  %v1459_v15 = vld [vmem:[%s1591_s19 + $0xe0] sm:$0xff]  ;;  %v1458_v20 = vld [vmem:[%s1591_s19 + $0xd8] sm:$0xff]  ;;  %v1457_v25 = vld [vmem:[%s1591_s19 + $0xd0] sm:$0xff]  ;;  %357 = vperm.xlu0 %1520, %v347_v28  }
  0x17   : > { %892 = vmatpush.bf16.msra.mxu3 %v1461_v7  ;;  %v1432_v26 = vld [vmem:[%s1591_s19 + $0x8] sm:$0xff]  ;;  %v1431_v31 = vld [vmem:[%s1591_s19] sm:$0xff]  ;;  %v1486_v44 = vld [vmem:[%s1591_s19 + $0x1b8] sm:$0xff]  ;;  %367 = vperm.xlu1 %1521, %v349_v56  }
  0x18   : > { %836 = vmatpush.bf16.msra.mxu0 %v1436_v8  ;;  %v1440_v27 = vld [vmem:[%s1591_s19 + $0x48] sm:$0xff]  ;;  %v1439_v35 = vld [vmem:[%s1591_s19 + $0x40] sm:$0xff]  ;;  %v1470_v45 = vld [vmem:[%s1591_s19 + $0x138] sm:$0xff] }
  0x19   : > { %855 = vmatpush.bf16.msra.mxu1 %v1444_v9  ;;  %v1448_v29 = vld [vmem:[%s1591_s19 + $0x88] sm:$0xff]  ;;  %v1447_v36 = vld [vmem:[%s1591_s19 + $0x80] sm:$0xff]  ;;  %v1478_v50 = vld [vmem:[%s1591_s19 + $0x178] sm:$0xff] }
  0x1a   : > { %874 = vmatpush.bf16.msra.mxu2 %v1452_v10  ;;  %v1456_v30 = vld [vmem:[%s1591_s19 + $0xc8] sm:$0xff]  ;;  %v1455_v37 = vld [vmem:[%s1591_s19 + $0xc0] sm:$0xff]  ;;  %v1494_v51 = vld [vmem:[%s1591_s19 + $0x1f8] sm:$0xff] }
  0x1b   : > { %893 = vmatpush.bf16.msra.mxu3 %v1460_v11  ;;  %v1420_v40 = vld [vmem:[%s1789_s1 + $0x24] sm:$0xf0]  ;;  %v1416_v41 = vld [vmem:[%s1789_s1 + $0xc] sm:$0xf]  ;;  %v1485_v52 = vld [vmem:[%s1591_s19 + $0x1b0] sm:$0xff] }
  0x1c   : > { %837 = vmatpush.bf16.msra.mxu0 %v1435_v12  ;;  %v1103_v42 = vld [vmem:[%s1789_s1 + $0x28] sm:$0xf0]  ;;  %v1102_v48 = vor.u32 %v1420_v40, %v1101_v39  ;;  %v1469_v53 = vld [vmem:[%s1591_s19 + $0x130] sm:$0xff]  ;;  %v1483_v61 = vld [vmem:[%s1591_s19 + $0x1a0] sm:$0xff] }
  0x1d   : > { %856 = vmatpush.bf16.msra.mxu1 %v1443_v13  ;;  %v1106_v49 = vor.u32 %v1416_v41, %v1103_v42  ;;  %v1477_v54 = vld [vmem:[%s1591_s19 + $0x170] sm:$0xff]  ;;  %v1484_v57 = vld [vmem:[%s1591_s19 + $0x1a8] sm:$0xff]  ;;  %v1467_v62 = vld [vmem:[%s1591_s19 + $0x120] sm:$0xff] }
  0x1e   : > { %875 = vmatpush.bf16.msra.mxu2 %v1451_v14  ;;  %v1493_v55 = vld [vmem:[%s1591_s19 + $0x1f0] sm:$0xff]  ;;  %v1468_v58 = vld [vmem:[%s1591_s19 + $0x128] sm:$0xff]  ;;  %v1475_v63 = vld [vmem:[%s1591_s19 + $0x160] sm:$0xff] }
  0x1f   : > { %894 = vmatpush.bf16.msra.mxu3 %v1459_v15  ;;  %v1476_v59 = vld [vmem:[%s1591_s19 + $0x168] sm:$0xff]  ;;  %v1491_v0 = vld [vmem:[%s1591_s19 + $0x1e0] sm:$0xff]  ;;  %v1482_v9 = vld [vmem:[%s1591_s19 + $0x198] sm:$0xff] }
  0x20   : > { %838 = vmatpush.bf16.msra.mxu0 %v1434_v17  ;;  %v1492_v60 = vld [vmem:[%s1591_s19 + $0x1e8] sm:$0xff]  ;;  %v1125_v1 = vld [vmem:[%s1789_s1 + $0x40] sm:$0xf]  ;;  %v1423_v3 = vld [vmem:[%s1789_s1 + $0x44] sm:$0xf] }
  0x21   : > { %857 = vmatpush.bf16.msra.mxu1 %v1442_v18  ;;  %v1427_v2 = vld [vmem:[%s1789_s1 + $0x5c] sm:$0xf0]  ;;  %v1127_v4 = vld [vmem:[%s1789_s1 + $0x60] sm:$0xf0]  ;;  %v1133_v5 = vld [vmem:[%s1789_s1 + $0x48] sm:$0xf] }
  0x22   : > { %876 = vmatpush.bf16.msra.mxu2 %v1450_v19  ;;  %v1428_v6 = vld [vmem:[%s1789_s1 + $0x64] sm:$0xf0]  ;;  %v1424_v7 = vld [vmem:[%s1789_s1 + $0x4c] sm:$0xf]  ;;  %v1466_v10 = vld [vmem:[%s1591_s19 + $0x118] sm:$0xff]  ;;  %v1126_v11 = vor.u32 %v1427_v2, %v1125_v1  ;;  %v1130_v12 = vor.u32 %v1423_v3, %v1127_v4 }
  0x23   : > { %895 = vmatpush.bf16.msra.mxu3 %v1458_v20  ;;  %v1135_v8 = vld [vmem:[%s1789_s1 + $0x68] sm:$0xf0]  ;;  %v1134_v13 = vor.u32 %v1428_v6, %v1133_v5  ;;  %v1474_v15 = vld [vmem:[%s1591_s19 + $0x158] sm:$0xff]  ;;  %v1481_v17 = vld [vmem:[%s1591_s19 + $0x190] sm:$0xff] }
  0x24   : > { %839 = vmatpush.bf16.msra.mxu0 %v1433_v22  ;;  %v1138_v14 = vor.u32 %v1424_v7, %v1135_v8  ;;  %v1490_v16 = vld [vmem:[%s1591_s19 + $0x1d8] sm:$0xff]  ;;  %v1465_v18 = vld [vmem:[%s1591_s19 + $0x110] sm:$0xff]  ;;  %v1480_v21 = vld [vmem:[%s1591_s19 + $0x188] sm:$0xff] }
  0x25   : > { %858 = vmatpush.bf16.msra.mxu1 %v1441_v23  ;;  %v1473_v19 = vld [vmem:[%s1591_s19 + $0x150] sm:$0xff]  ;;  %v1464_v22 = vld [vmem:[%s1591_s19 + $0x108] sm:$0xff]  ;;  %v1487_v28 = vld [vmem:[%s1591_s19 + $0x1c0] sm:$0xff] }
  0x26   : > { %877 = vmatpush.bf16.msra.mxu2 %v1449_v24  ;;  %v1489_v20 = vld [vmem:[%s1591_s19 + $0x1d0] sm:$0xff]  ;;  %v1472_v23 = vld [vmem:[%s1591_s19 + $0x148] sm:$0xff]  ;;  %v1117_v33 = vld [vmem:[%s1789_s1 + $0x18] sm:$0xf] }
  0x27   : > { %896 = vmatpush.bf16.msra.mxu3 %v1457_v25  ;;  %v1488_v24 = vld [vmem:[%s1591_s19 + $0x1c8] sm:$0xff]  ;;  %v1479_v25 = vld [vmem:[%s1591_s19 + $0x180] sm:$0xff]  ;;  %v1111_v32 = vld [vmem:[%s1789_s1 + $0x30] sm:$0xf0] }
  0x28   : > { %840 = vmatpush.bf16.msra.mxu0 %v1432_v26  ;;  %v1463_v26 = vld [vmem:[%s1591_s19 + $0x100] sm:$0xff]  ;;  %v1422_v34 = vld [vmem:[%s1789_s1 + $0x34] sm:$0xf0]  ;;  %v1141_v41 = vld [vmem:[%s1789_s1 + $0x50] sm:$0xf] }
  0x29   : > { %859 = vmatpush.bf16.msra.mxu1 %v1440_v27  ;;  %v1471_v27 = vld [vmem:[%s1591_s19 + $0x140] sm:$0xff]  ;;  %v1118_v39 = vor.u32 %v1422_v34, %v1117_v33  ;;  %v1429_v42 = vld [vmem:[%s1789_s1 + $0x6c] sm:$0xf0]  ;;  %v1425_v43 = vld [vmem:[%s1789_s1 + $0x54] sm:$0xf]  ;;  %s1414_s19 = sshll.u32 %s1797_s12, 4 }
  0x2a   : > { %878 = vmatpush.bf16.msra.mxu2 %v1448_v29  ;;  %v1109_v29 = vld [vmem:[%s1789_s1 + $0x10] sm:$0xf]  ;;  %s1769_s27 = scalar_lea.vmem %s1791_s3, %s1414_s19 }
  0x2b   : > { %897 = vmatpush.bf16.msra.mxu3 %v1456_v30  ;;  %v1421_v30 = vld [vmem:[%s1789_s1 + $0x2c] sm:$0xf0] }
  0x2c   : > { %841 = vmatpush.bf16.msra.mxu0 %v1431_v31  ;;  %v1417_v31 = vld [vmem:[%s1789_s1 + $0x14] sm:$0xf] }
  0x2d   : > { %860 = vmatpush.bf16.msra.mxu1 %v1439_v35  ;;  %v1418_v35 = vld [vmem:[%s1789_s1 + $0x1c] sm:$0xf]  ;;  %v1114_v38 = vor.u32 %v1417_v31, %v1111_v32 }
  0x2e   : > { %879 = vmatpush.bf16.msra.mxu2 %v1447_v36  ;;  %v1119_v36 = vld [vmem:[%s1789_s1 + $0x38] sm:$0xf0] }
  0x2f   : > { %898 = vmatpush.bf16.msra.mxu3 %v1455_v37  ;;  %842 = vmatmul.bf16.vlgmr.msra.gmra.mxu0 %v1094_v46  ;;  %v1110_v37 = vor.u32 %v1421_v30, %v1109_v29  ;;  %v1122_v40 = vor.u32 %v1418_v35, %v1119_v36  ;;  %v1430_v46 = vld [vmem:[%s1789_s1 + $0x74] sm:$0xf0] }
  0x30   : > { %910 = vmatpush.bf16.msrb.mxu0 %v1470_v45  ;;  %861 = vmatmul.bf16.vlgmr.msra.gmra.mxu1 %v1098_v47  ;;  %v1149_v45 = vld [vmem:[%s1789_s1 + $0x58] sm:$0xf]  ;;  %v1426_v47 = vld [vmem:[%s1789_s1 + $0x5c] sm:$0xf] }
  0x31   : > { %880 = vmatmul.bf16.vlgmr.msra.gmra.mxu2 %v1102_v48  ;;  %929 = vmatpush.bf16.msrb.mxu1 %v1478_v50  ;;  %v1151_v48 = vld [vmem:[%s1789_s1 + $0x78] sm:$0xf0] }
  0x32   : > { %948 = vmatpush.bf16.msrb.mxu2 %v1486_v44  ;;  %899 = vmatmul.bf16.vlgmr.msra.gmra.mxu3 %v1106_v49  ;;  %v1143_v44 = vld [vmem:[%s1789_s1 + $0x70] sm:$0xf0]  ;;  %v1142_v49 = vor.u32 %v1429_v42, %v1141_v41 }
  0x33   : > { %967 = vmatpush.bf16.msrb.mxu3 %v1494_v51  ;;  %v1146_v50 = vor.u32 %v1425_v43, %v1143_v44  ;;  %v1150_v51 = vor.u32 %v1430_v46, %v1149_v45 }
  0x34   : > { %911 = vmatpush.bf16.msrb.mxu0 %v1469_v53 }
  0x35   : > { %930 = vmatpush.bf16.msrb.mxu1 %v1477_v54 }
  0x36   : > { %949 = vmatpush.bf16.msrb.mxu2 %v1485_v52  ;;  %v1154_v52 = vor.u32 %v1426_v47, %v1151_v48 }
  0x37   : > { %968 = vmatpush.bf16.msrb.mxu3 %v1493_v55 }
  0x38   : > { %912 = vmatpush.bf16.msrb.mxu0 %v1468_v58 }
  0x39   : > { %931 = vmatpush.bf16.msrb.mxu1 %v1476_v59 }
  0x3a   : > { %950 = vmatpush.bf16.msrb.mxu2 %v1484_v57 }
  0x3b   : > { %969 = vmatpush.bf16.msrb.mxu3 %v1492_v60 }
  0x3c   : > { %913 = vmatpush.bf16.msrb.mxu0 %v1467_v62 }
  0x3d   : > { %932 = vmatpush.bf16.msrb.mxu1 %v1475_v63 }
  0x3e   : > { %951 = vmatpush.bf16.msrb.mxu2 %v1483_v61 }
  0x3f   : > { %970 = vmatpush.bf16.msrb.mxu3 %v1491_v0  ;;  %847 = vmatmul.bf16.gmra.mxu0 %v1126_v11 }
  0x40   : > { %914 = vmatpush.bf16.msrb.mxu0 %v1466_v10  ;;  %866 = vmatmul.bf16.gmra.mxu1 %v1130_v12 }
  0x41   : > { %885 = vmatmul.bf16.gmra.mxu2 %v1134_v13  ;;  %933 = vmatpush.bf16.msrb.mxu1 %v1474_v15 }
  0x42   : > { %952 = vmatpush.bf16.msrb.mxu2 %v1482_v9  ;;  %904 = vmatmul.bf16.gmra.mxu3 %v1138_v14 }
  0x43   : > { %971 = vmatpush.bf16.msrb.mxu3 %v1490_v16 }
  0x44   : > { %915 = vmatpush.bf16.msrb.mxu0 %v1465_v18 }
  0x45   : > { %934 = vmatpush.bf16.msrb.mxu1 %v1473_v19 }
  0x46   : > { %953 = vmatpush.bf16.msrb.mxu2 %v1481_v17 }
  0x47   : > { %972 = vmatpush.bf16.msrb.mxu3 %v1489_v20 }
  0x48   : > { %916 = vmatpush.bf16.msrb.mxu0 %v1464_v22 }
  0x49   : > { %935 = vmatpush.bf16.msrb.mxu1 %v1472_v23 }
  0x4a   : > { %954 = vmatpush.bf16.msrb.mxu2 %v1480_v21 }
  0x4b   : > { %973 = vmatpush.bf16.msrb.mxu3 %v1488_v24 }
  0x4c   : > { %917 = vmatpush.bf16.msrb.mxu0 %v1463_v26 }
  0x4d   : > { %936 = vmatpush.bf16.msrb.mxu1 %v1471_v27 }
  0x4e   : > { %955 = vmatpush.bf16.msrb.mxu2 %v1479_v25 }
  0x4f   : > { %974 = vmatpush.bf16.msrb.mxu3 %v1487_v28  ;;  %918 = vmatmul.bf16.vlgmr.msrb.gmra.mxu0 %v1110_v37 }
  0x50   : > { %937 = vmatmul.bf16.vlgmr.msrb.gmra.mxu1 %v1114_v38 }
  0x51   : > { %956 = vmatmul.bf16.vlgmr.msrb.gmra.mxu2 %v1118_v39 }
  0x52   : > { %975 = vmatmul.bf16.vlgmr.msrb.gmra.mxu3 %v1122_v40 }
  0x5f   : > { %923 = vmatmul.bf16.gmra.mxu0 %v1142_v49 }
  0x60   : > { %942 = vmatmul.bf16.gmra.mxu1 %v1146_v50 }
  0x61   : > { %961 = vmatmul.bf16.gmra.mxu2 %v1150_v51 }
  0x62   : > { %980 = vmatmul.bf16.gmra.mxu3 %v1154_v52 }
  0x80   : > { %v353_v63 = vpop.permute.xlu0 %352  ;;  %v363_v13 = vpop.permute.xlu1 %362 }
  0x88   : > { %v358_v6 = vpop.permute.xlu0 %357 }
  0x89   : > { %v368_v29 = vpop.permute.xlu1 %367 }
  0xac   : > { %v843_v53 = vpop.f32.mrf.mxu0 }
  0xad   : > { %v862_v54 = vpop.f32.mrf.mxu1  ;;  %v844_v0 = vadd.f32 %v843_v53, %v353_v63 }
  0xaf   : > { %v863_v3 = vadd.f32 %v862_v54, %v844_v0 }
  0xb4   : > { %v881_v55 = vpop.f32.mrf.mxu2  ;;  %v845_v57 = vpop.f32.mrf.mxu0 }
  0xb5   : > { %v900_v56 = vpop.f32.mrf.mxu3  ;;  %v864_v58 = vpop.f32.mrf.mxu1  ;;  %v882_v7 = vadd.f32 %v881_v55, %v863_v3  ;;  %v846_v8 = vadd.f32 %v845_v57, %v358_v6 }
  0xb7   : > { %v901_v11 = vadd.f32 %v900_v56, %v882_v7  ;;  %v865_v15 = vadd.f32 %v864_v58, %v846_v8 }
  0xbc   : > { %v883_v59 = vpop.f32.mrf.mxu2  ;;  %v848_v61 = vpop.f32.mrf.mxu0 }
  0xbd   : > { %v902_v60 = vpop.f32.mrf.mxu3  ;;  %v867_v62 = vpop.f32.mrf.mxu1  ;;  %v884_v17 = vadd.f32 %v883_v59, %v865_v15  ;;  %v849_v18 = vadd.f32 %v848_v61, %v363_v13 }
  0xbf   : > { %v903_v21 = vadd.f32 %v902_v60, %v884_v17  ;;  %v868_v22 = vadd.f32 %v867_v62, %v849_v18 }
  0xc4   : > { %v886_v1 = vpop.f32.mrf.mxu2  ;;  %v850_v4 = vpop.f32.mrf.mxu0 }
  0xc5   : > { %v905_v2 = vpop.f32.mrf.mxu3  ;;  %v869_v5 = vpop.f32.mrf.mxu1  ;;  %v887_v30 = vadd.f32 %v886_v1, %v868_v22  ;;  %v851_v32 = vadd.f32 %v850_v4, %v368_v29 }
  0xc7   : > { %v906_v36 = vadd.f32 %v905_v2, %v887_v30  ;;  %v870_v40 = vadd.f32 %v869_v5, %v851_v32 }
  0xcc   : > { %v888_v9 = vpop.f32.mrf.mxu2  ;;  %v919_v12 = vpop.f32.mrf.mxu0 }
  0xcd   : > { %v907_v10 = vpop.f32.mrf.mxu3  ;;  %v938_v14 = vpop.f32.mrf.mxu1  ;;  %v920_v16 = vadd.f32 %v919_v12, %v901_v11  ;;  %v889_v44 = vadd.f32 %v888_v9, %v870_v40 }
  0xcf   : > { %v939_v19 = vadd.f32 %v938_v14, %v920_v16  ;;  %v908_v49 = vadd.f32 %v907_v10, %v889_v44 }
  0xd4   : > { %v957_v20 = vpop.f32.mrf.mxu2  ;;  %v921_v25 = vpop.f32.mrf.mxu0 }
  0xd5   : > { %v958_v23 = vadd.f32 %v957_v20, %v939_v19  ;;  %v976_v24 = vpop.f32.mrf.mxu3  ;;  %v940_v26 = vpop.f32.mrf.mxu1  ;;  %v922_v28 = vadd.f32 %v921_v25, %v903_v21 }
  0xd7   : > { %v977_v27 = vadd.f32 %v976_v24, %v958_v23  ;;  %v941_v34 = vadd.f32 %v940_v26, %v922_v28 }
  0xd9   : > { %v986_v31 = vmax.f32 %v977_v27, 0.0 }
  0xdb   : > { %v990_v33 = vpack.c.bf16 %v986_v31, %v986_v31 }
  0xdc   : > { %v959_v35 = vpop.f32.mrf.mxu2  ;;  %v924_v39 = vpop.f32.mrf.mxu0 }
  0xdd   : > { %995 = vst.msk [vmem:[%s1769_s27] sm:$0xf] %vm994_vm0, %v990_v33  ;;  %v960_v37 = vadd.f32 %v959_v35, %v941_v34  ;;  %v978_v38 = vpop.f32.mrf.mxu3  ;;  %v925_v42 = vadd.f32 %v924_v39, %v906_v36  ;;  %v943_v43 = vpop.f32.mrf.mxu1 }
  0xdf   : > { %v979_v41 = vadd.f32 %v978_v38, %v960_v37  ;;  %v944_v47 = vadd.f32 %v943_v43, %v925_v42 }
  0xe1   : > { %v987_v45 = vmax.f32 %v979_v41, 0.0 }
  0xe3   : > { %v991_v46 = vpack.c.bf16 %v987_v45, %v987_v45 }
  0xe4   : > { %v962_v48 = vpop.f32.mrf.mxu2  ;;  %v926_v52 = vpop.f32.mrf.mxu0 }
  0xe5   : > { %996 = vst.msk [vmem:[%s1769_s27 + $0x4] sm:$0xf] %vm994_vm0, %v991_v46  ;;  %v963_v50 = vadd.f32 %v962_v48, %v944_v47  ;;  %v981_v51 = vpop.f32.mrf.mxu3  ;;  %v927_v54 = vadd.f32 %v926_v52, %v908_v49  ;;  %v945_v56 = vpop.f32.mrf.mxu1 }
  0xe7   : > { %v982_v53 = vadd.f32 %v981_v51, %v963_v50  ;;  %v946_v58 = vadd.f32 %v945_v56, %v927_v54 }
  0xe9   : > { %v988_v55 = vmax.f32 %v982_v53, 0.0 }
  0xeb   : > { %v992_v57 = vpack.c.bf16 %v988_v55, %v988_v55 }
  0xec   : > { %v964_v59 = vpop.f32.mrf.mxu2 }
  0xed   : > { %997 = vst.msk [vmem:[%s1769_s27 + $0x8] sm:$0xf] %vm994_vm0, %v992_v57  ;;  %v965_v60 = vadd.f32 %v964_v59, %v946_v58  ;;  %v983_v61 = vpop.f32.mrf.mxu3 }
  0xef   : > { %v984_v62 = vadd.f32 %v983_v61, %v965_v60 }
  0xf1   : > { %v989_v63 = vmax.f32 %v984_v62, 0.0 }
  0xf3   : > { %v993_v0 = vpack.c.bf16 %v989_v63, %v989_v63 }
  0xf5   : > { %998 = vst.msk [vmem:[%s1769_s27 + $0xc] sm:$0xf] %vm994_vm0, %v993_v0 }
  0xf6 PF: > { %s13_s14 = sadd.s32 1, %s1544_s14   ;;  %s1792_s12 = smov %s1540_s13 }
  0xf7   : > { %p10_p5 = scmp.ge.s32.totalorder %s13_s14, 4   ;;  %s1793_s13 = smov %s1795_s15 }
  0xf9   :  { %12 = sbr.rel (!%p10_p5) target bundleno = 2 (0x2), region = 62 }

// kernel: convpolicy_forward.8
= control target key start
LH: loop header
LB: loop body
LE: loop exit
PB: predicated region body
PF: predicated region fallthrough
CT: control target
= control target key end

     0   :  { %s703_s12 = smov 0   ;;  %s705_s13 = smov 0   ;;  %s784_s0 = inlined_call_operand.vmem [shape: bf16[2,288,49], index: 0, kind: input, shape index: {}]   ;;  %s785_s1 = inlined_call_operand.vmem [shape: bf16[16,288], index: 1, kind: input, shape index: {}]   ;;  %s786_s2 = inlined_call_operand.vmem [shape: f32[16,1], index: 2, kind: input, shape index: {}]   ;;  %s787_s3 = inlined_call_operand.vmem [shape: bf16[2,16,49], index: 3, kind: output, shape index: {}]  }
   0x1   :  { %s707_s14 = smov 0  }
   0x2 LB: > { %s25_s15 = sadd.s32 1, %s676_s13  ;;  %p518_p0 = scmp.ge.s32.totalorder %s680_s14, 1  ;;  %s680_s14 = sphi %s707_s14, %s13_s14   ;;  %s676_s13 = sphi %s705_s13, %s789_s13   ;;  %s672_s12 = sphi %s703_s12, %s788_s12  }
   0x3   : > { %p27_p1 = scmp.ge.s32.totalorder %s25_s15, 2  ;;  %p156_p2 = scmp.lt.s32.totalorder %s680_s14, 3 }
   0x5   : > { %s791_s15 = smov (%p27_p1, %s25_s15), 0  ;;  %p157_p3 = pnand %p518_p0, %p156_p2 }
   0x6   : > { %p186_p4 = scmp.lt.s32.totalorder (!%p157_p3), %s672_s12, 1 }
   0x7   : > { %160 = sbr.rel (%p157_p3) target bundleno = 193 (0xc1), region = 32 }
   0xc   : > { %s793_s12 = smov (!%p186_p4, %s672_s12), 1  ;;  %v682_v5 = vmov 0   ;;  %v532_v7 = vld [vmem:[%s785_s1 + $0x8] sm:$0xf]  ;;  %v612_v8 = vld [vmem:[%s785_s1 + $0x10] sm:$0xf0] }
   0xd   : > { %s631_s16 = smul.u32 144, %s793_s12  ;;  %657 = vset.pattern.permute.xlu0 %v682_v5  ;;  %v243_v11 = vld [vmem:[%s786_s2] sm:$0xff]  ;;  %v533_v12 = vor.u32 %v612_v8, %v532_v7  ;;  %vm378_vm0 = vcmask 261120   ;;  %v244_v15 = vld [vmem:[%s786_s2 + $0x8] sm:$0xff]  ;;  %v526_v27 = vld [vmem:[%s785_s1 + $0xc] sm:$0xf0] }
   0xe   : > { %247 = vperm.xlu0 %657, %v243_v11   ;;  %v524_v22 = vld [vmem:[%s785_s1] sm:$0xf]  ;;  %v611_v23 = vld [vmem:[%s785_s1 + $0x8] sm:$0xf0]  ;;  %v610_v24 = vld [vmem:[%s785_s1 + $0x4] sm:$0xf] }
   0xf   : > { %s727_s19 = scalar_lea.vmem %s784_s0, %s631_s16  ;;  %v525_v28 = vor.u32 %v611_v23, %v524_v22  ;;  %v529_v29 = vor.u32 %v610_v24, %v526_v27  ;;  %s609_s9 = sshll.u32 %s793_s12, 3  ;;  %vm428_vm1 = vcmask 396288  }
  0x10   : > { %v620_v0 = vld [vmem:[%s727_s19 + $0x38] sm:$0xff]  ;;  %v619_v2 = vld [vmem:[%s727_s19 + $0x30] sm:$0xff]  ;;  %v630_v4 = vld [vmem:[%s727_s19 + $0x88] sm:$0xff]  ;;  %s201_s16 = scalar_lea.vmem %s787_s3, %s609_s9 }
  0x11   : > { %v628_v1 = vld [vmem:[%s727_s19 + $0x78] sm:$0xff]  ;;  %382 = vmatpush.bf16.msra.mxu0 %v620_v0  ;;  %v627_v3 = vld [vmem:[%s727_s19 + $0x70] sm:$0xff]  ;;  %416 = vmatpush.bf16.msra.mxu2 %v630_v4  ;;  %v629_v6 = vld [vmem:[%s727_s19 + $0x80] sm:$0xff] }
  0x12   : > { %396 = vmatpush.bf16.msra.mxu1 %v628_v1  ;;  %v618_v9 = vld [vmem:[%s727_s19 + $0x28] sm:$0xff]  ;;  %v617_v13 = vld [vmem:[%s727_s19 + $0x20] sm:$0xff]  ;;  %v616_v16 = vld [vmem:[%s727_s19 + $0x18] sm:$0xff] }
  0x13   : > { %v626_v10 = vld [vmem:[%s727_s19 + $0x68] sm:$0xff]  ;;  %v625_v14 = vld [vmem:[%s727_s19 + $0x60] sm:$0xff]  ;;  %v624_v17 = vld [vmem:[%s727_s19 + $0x58] sm:$0xff] }
  0x14   : > { %v615_v18 = vld [vmem:[%s727_s19 + $0x10] sm:$0xff]  ;;  %v614_v20 = vld [vmem:[%s727_s19 + $0x8] sm:$0xff]  ;;  %v613_v25 = vld [vmem:[%s727_s19] sm:$0xff] }
  0x15   : > { %383 = vmatpush.bf16.msra.mxu0 %v619_v2  ;;  %417 = vmatpush.bf16.msra.mxu2 %v629_v6  ;;  %v623_v19 = vld [vmem:[%s727_s19 + $0x50] sm:$0xff]  ;;  %v622_v21 = vld [vmem:[%s727_s19 + $0x48] sm:$0xff]  ;;  %v621_v26 = vld [vmem:[%s727_s19 + $0x40] sm:$0xff] }
  0x16   : > { %397 = vmatpush.bf16.msra.mxu1 %v627_v3  ;;  %252 = vperm.xlu0 %657, %v244_v15  }
  0x18   : > { %606 = vmatmul.msk.bf16.vlgmr.msra.gmra.mxu2 %vm378_vm0, %v533_v12 }
  0x19   : > { %384 = vmatpush.bf16.msra.mxu0 %v618_v9 }
  0x1a   : > { %398 = vmatpush.bf16.msra.mxu1 %v626_v10 }
  0x1d   : > { %385 = vmatpush.bf16.msra.mxu0 %v617_v13 }
  0x1e   : > { %399 = vmatpush.bf16.msra.mxu1 %v625_v14 }
  0x21   : > { %386 = vmatpush.bf16.msra.mxu0 %v616_v16 }
  0x22   : > { %400 = vmatpush.bf16.msra.mxu1 %v624_v17 }
  0x25   : > { %387 = vmatpush.bf16.msra.mxu0 %v615_v18 }
  0x26   : > { %401 = vmatpush.bf16.msra.mxu1 %v623_v19 }
  0x29   : > { %388 = vmatpush.bf16.msra.mxu0 %v614_v20 }
  0x2a   : > { %402 = vmatpush.bf16.msra.mxu1 %v622_v21 }
  0x2d   : > { %389 = vmatpush.bf16.msra.mxu0 %v613_v25 }
  0x2e   : > { %403 = vmatpush.bf16.msra.mxu1 %v621_v26 }
  0x30   : > { %390 = vmatmul.bf16.vlgmr.msra.gmra.mxu0 %v525_v28 }
  0x31   : > { %404 = vmatmul.bf16.vlgmr.msra.gmra.mxu1 %v529_v29 }
  0x80   : > { %v248_v30 = vpop.permute.xlu0 %247 }
  0x88   : > { %v253_v38 = vpop.permute.xlu0 %252 }
  0x9b   : > { %v419_v34 = vpop.f32.mrf.mxu2 }
  0xa3   : > { %v421_v44 = vpop.f32.mrf.mxu2 }
  0xad   : > { %v391_v31 = vpop.f32.mrf.mxu0 }
  0xae   : > { %v405_v32 = vpop.f32.mrf.mxu1  ;;  %v392_v33 = vadd.f32 %v391_v31, %v248_v30 }
  0xb0   : > { %v406_v35 = vadd.f32 %v405_v32, %v392_v33 }
  0xb2   : > { %v420_v36 = vadd.f32 %v419_v34, %v406_v35 }
  0xb4   : > { %v424_v37 = vmax.f32 %v420_v36, 0.0 }
  0xb5   : > { %v393_v39 = vpop.f32.mrf.mxu0 }
  0xb6   : > { %v426_v40 = vpack.c.bf16 %v424_v37, %v424_v37  ;;  %v394_v41 = vadd.f32 %v393_v39, %v253_v38  ;;  %v407_v42 = vpop.f32.mrf.mxu1 }
  0xb8   : > { %429 = vst.msk [vmem:[%s201_s16] sm:$0xf] %vm428_vm1, %v426_v40  ;;  %v408_v43 = vadd.f32 %v407_v42, %v394_v41 }
  0xba   : > { %v422_v45 = vadd.f32 %v421_v44, %v408_v43 }
  0xbc   : > { %v425_v46 = vmax.f32 %v422_v45, 0.0 }
  0xbe   : > { %v427_v47 = vpack.c.bf16 %v425_v46, %v425_v46 }
  0xc0   : > { %430 = vst.msk [vmem:[%s201_s16 + $0x4] sm:$0xf] %vm428_vm1, %v427_v47 }
  0xc1 PF: > { %s13_s14 = sadd.s32 1, %s680_s14   ;;  %s788_s12 = smov %s676_s13 }
  0xc2   : > { %p10_p5 = scmp.ge.s32.totalorder %s13_s14, 4   ;;  %s789_s13 = smov %s791_s15 }
  0xc4   :  { %12 = sbr.rel (!%p10_p5) target bundleno = 2 (0x2), region = 62 }

// kernel: convpolicy_forward.9
= control target key start
LH: loop header
LB: loop body
LE: loop exit
PB: predicated region body
PF: predicated region fallthrough
CT: control target
= control target key end

     0   :  { %s2067_s12 = smov 0   ;;  %s2069_s13 = smov 0   ;;  %s2557_s0 = inlined_call_operand.vmem [shape: bf16[2,784], index: 0, kind: input, shape index: {}]   ;;  %s2558_s1 = inlined_call_operand.vmem [shape: bf16[784,512], index: 1, kind: input, shape index: {}]   ;;  %s2559_s2 = inlined_call_operand.vmem [shape: f32[1,512], index: 2, kind: input, shape index: {}]   ;;  %s2560_s3 = inlined_call_operand.vmem [shape: f32[2,512], index: 3, kind: output, shape index: {}]  }
   0x1   :  { %s2071_s14 = smov 0  }
   0x2 LB: > { %s1492_s15 = sadd.s32 4294967295, %s2045_s14   ;;  %s2084_s16 = sadd.s32 1, %s2045_s14   ;;  %s2045_s14 = sphi %s2071_s14, %s2563_s14   ;;  %s2041_s13 = sphi %s2069_s13, %s2562_s13   ;;  %s2037_s12 = sphi %s2067_s12, %s2561_s12  }
   0x3   : > { %s38_s17 = ssub.s32 %s2045_s14, %s2084_s16  ;;  %s41_s18 = sadd.s32 1, %s2041_s13 }
   0x4   : > { %p39_p0 = scmp.eq.s32.totalorder %s38_s17, 0  ;;  %p48_p1 = scmp.ne.s32.totalorder %s2041_s13, %s2037_s12 }
   0x5   : > { %p49_p2 = scmp.eq.s32.totalorder %s2045_s14, 0  ;;  %p1495_p4 = scmp.ge.s32.totalorder %s2045_s14, 2 }
   0x6   : > { %s2093_s19 = scalar_select %p39_p0, %s2041_s13, %s41_s18  }
   0x7   : > { %p50_p3 = por %p49_p2, %p48_p1  ;;  %129 = sbr.rel (%p1495_p4) target bundleno = 114 (0x72), region = 20 }
   0xc   : > { %132 = sbr.rel (!%p50_p3) target bundleno = 114 (0x72), region = 24  ;;  %s134_s20 = sand.u32 (%p50_p3), 1, %s2041_s13  }
   0xd   : > { %s1898_s21 = sshll.u32 (%p50_p3), %s2045_s14, 3  ;;  %s1997_s22 = smul.u32 (%p50_p3), 784, %s134_s20 }
   0xe   : > { %s2101_s25 = scalar_lea.vmem (%p50_p3), %s2558_s1, %s1898_s21 }
   0xf   : > { %v362_v0 = vld [vmem:[%s2101_s25] sm:$0xff] (%p50_p3)  ;;  %v364_v1 = vld [vmem:[%s2101_s25 + $0x10] sm:$0xff] (%p50_p3)  ;;  %s2106_s26 = scalar_lea.vmem (%p50_p3), [#allocation2], %s1997_s22 }
  0x10   : > { %v366_v2 = vld [vmem:[%s2101_s25 + $0x20] sm:$0xff] (%p50_p3)  ;;  %363 = vst [vmem:[%s2106_s26] sm:$0xff] (%p50_p3), %v362_v0  ;;  %v368_v3 = vld [vmem:[%s2101_s25 + $0x30] sm:$0xff] (%p50_p3) }
  0x11   : > { %365 = vst [vmem:[%s2106_s26 + $0x8] sm:$0xff] %v364_v1  ;;  %v370_v4 = vld [vmem:[%s2101_s25 + $0x40] sm:$0xff]  ;;  %v372_v5 = vld [vmem:[%s2101_s25 + $0x50] sm:$0xff] }
  0x12   : > { %367 = vst [vmem:[%s2106_s26 + $0x10] sm:$0xff] %v366_v2  ;;  %v374_v6 = vld [vmem:[%s2101_s25 + $0x60] sm:$0xff]  ;;  %v376_v7 = vld [vmem:[%s2101_s25 + $0x70] sm:$0xff] }
  0x13   : > { %369 = vst [vmem:[%s2106_s26 + $0x18] sm:$0xff] %v368_v3  ;;  %v378_v8 = vld [vmem:[%s2101_s25 + $0x80] sm:$0xff]  ;;  %v380_v9 = vld [vmem:[%s2101_s25 + $0x90] sm:$0xff] }
  0x14   : > { %371 = vst [vmem:[%s2106_s26 + $0x20] sm:$0xff] %v370_v4  ;;  %v382_v10 = vld [vmem:[%s2101_s25 + $0xa0] sm:$0xff]  ;;  %v384_v11 = vld [vmem:[%s2101_s25 + $0xb0] sm:$0xff] }
  0x15   : > { %373 = vst [vmem:[%s2106_s26 + $0x28] sm:$0xff] %v372_v5  ;;  %v386_v12 = vld [vmem:[%s2101_s25 + $0xc0] sm:$0xff]  ;;  %v388_v13 = vld [vmem:[%s2101_s25 + $0xd0] sm:$0xff] }
  0x16   : > { %375 = vst [vmem:[%s2106_s26 + $0x30] sm:$0xff] %v374_v6  ;;  %v390_v14 = vld [vmem:[%s2101_s25 + $0xe0] sm:$0xff]  ;;  %v392_v15 = vld [vmem:[%s2101_s25 + $0xf0] sm:$0xff] }
  0x17   : > { %377 = vst [vmem:[%s2106_s26 + $0x38] sm:$0xff] %v376_v7  ;;  %v394_v16 = vld [vmem:[%s2101_s25 + $0x100] sm:$0xff]  ;;  %v396_v17 = vld [vmem:[%s2101_s25 + $0x110] sm:$0xff] }
  0x18   : > { %379 = vst [vmem:[%s2106_s26 + $0x40] sm:$0xff] %v378_v8  ;;  %v398_v18 = vld [vmem:[%s2101_s25 + $0x120] sm:$0xff]  ;;  %v400_v19 = vld [vmem:[%s2101_s25 + $0x130] sm:$0xff] }
  0x19   : > { %381 = vst [vmem:[%s2106_s26 + $0x48] sm:$0xff] %v380_v9  ;;  %v402_v20 = vld [vmem:[%s2101_s25 + $0x140] sm:$0xff]  ;;  %v404_v21 = vld [vmem:[%s2101_s25 + $0x150] sm:$0xff] }
  0x1a   : > { %383 = vst [vmem:[%s2106_s26 + $0x50] sm:$0xff] %v382_v10  ;;  %v406_v22 = vld [vmem:[%s2101_s25 + $0x160] sm:$0xff]  ;;  %v408_v23 = vld [vmem:[%s2101_s25 + $0x170] sm:$0xff] }
  0x1b   : > { %385 = vst [vmem:[%s2106_s26 + $0x58] sm:$0xff] %v384_v11  ;;  %v410_v24 = vld [vmem:[%s2101_s25 + $0x180] sm:$0xff]  ;;  %v412_v25 = vld [vmem:[%s2101_s25 + $0x190] sm:$0xff] }
  0x1c   : > { %387 = vst [vmem:[%s2106_s26 + $0x60] sm:$0xff] %v386_v12  ;;  %v414_v26 = vld [vmem:[%s2101_s25 + $0x1a0] sm:$0xff]  ;;  %v416_v27 = vld [vmem:[%s2101_s25 + $0x1b0] sm:$0xff] }
  0x1d   : > { %389 = vst [vmem:[%s2106_s26 + $0x68] sm:$0xff] %v388_v13  ;;  %v418_v28 = vld [vmem:[%s2101_s25 + $0x1c0] sm:$0xff]  ;;  %v420_v29 = vld [vmem:[%s2101_s25 + $0x1d0] sm:$0xff] }
  0x1e   : > { %391 = vst [vmem:[%s2106_s26 + $0x70] sm:$0xff] %v390_v14  ;;  %v422_v30 = vld [vmem:[%s2101_s25 + $0x1e0] sm:$0xff]  ;;  %v424_v31 = vld [vmem:[%s2101_s25 + $0x1f0] sm:$0xff] }
  0x1f   : > { %393 = vst [vmem:[%s2106_s26 + $0x78] sm:$0xff] %v392_v15  ;;  %v426_v32 = vld [vmem:[%s2101_s25 + $0x200] sm:$0xff]  ;;  %v428_v33 = vld [vmem:[%s2101_s25 + $0x210] sm:$0xff] }
  0x20   : > { %395 = vst [vmem:[%s2106_s26 + $0x80] sm:$0xff] %v394_v16  ;;  %v430_v34 = vld [vmem:[%s2101_s25 + $0x220] sm:$0xff]  ;;  %v432_v35 = vld [vmem:[%s2101_s25 + $0x230] sm:$0xff] }
  0x21   : > { %397 = vst [vmem:[%s2106_s26 + $0x88] sm:$0xff] %v396_v17  ;;  %v434_v36 = vld [vmem:[%s2101_s25 + $0x240] sm:$0xff]  ;;  %v436_v37 = vld [vmem:[%s2101_s25 + $0x250] sm:$0xff] }
  0x22   : > { %399 = vst [vmem:[%s2106_s26 + $0x90] sm:$0xff] %v398_v18  ;;  %v438_v38 = vld [vmem:[%s2101_s25 + $0x260] sm:$0xff]  ;;  %v440_v39 = vld [vmem:[%s2101_s25 + $0x270] sm:$0xff] }
  0x23   : > { %401 = vst [vmem:[%s2106_s26 + $0x98] sm:$0xff] %v400_v19  ;;  %v442_v40 = vld [vmem:[%s2101_s25 + $0x280] sm:$0xff]  ;;  %v444_v41 = vld [vmem:[%s2101_s25 + $0x290] sm:$0xff] }
  0x24   : > { %403 = vst [vmem:[%s2106_s26 + $0xa0] sm:$0xff] %v402_v20  ;;  %v446_v42 = vld [vmem:[%s2101_s25 + $0x2a0] sm:$0xff]  ;;  %v448_v43 = vld [vmem:[%s2101_s25 + $0x2b0] sm:$0xff] }
  0x25   : > { %405 = vst [vmem:[%s2106_s26 + $0xa8] sm:$0xff] %v404_v21  ;;  %v450_v44 = vld [vmem:[%s2101_s25 + $0x2c0] sm:$0xff]  ;;  %v452_v45 = vld [vmem:[%s2101_s25 + $0x2d0] sm:$0xff] }
  0x26   : > { %407 = vst [vmem:[%s2106_s26 + $0xb0] sm:$0xff] %v406_v22  ;;  %v454_v46 = vld [vmem:[%s2101_s25 + $0x2e0] sm:$0xff]  ;;  %v456_v47 = vld [vmem:[%s2101_s25 + $0x2f0] sm:$0xff] }
  0x27   : > { %409 = vst [vmem:[%s2106_s26 + $0xb8] sm:$0xff] %v408_v23  ;;  %v458_v48 = vld [vmem:[%s2101_s25 + $0x300] sm:$0xff]  ;;  %v460_v49 = vld [vmem:[%s2101_s25 + $0x310] sm:$0xff] }
  0x28   : > { %411 = vst [vmem:[%s2106_s26 + $0xc0] sm:$0xff] %v410_v24  ;;  %v462_v50 = vld [vmem:[%s2101_s25 + $0x320] sm:$0xff]  ;;  %v464_v51 = vld [vmem:[%s2101_s25 + $0x330] sm:$0xff] }
  0x29   : > { %413 = vst [vmem:[%s2106_s26 + $0xc8] sm:$0xff] %v412_v25  ;;  %v466_v52 = vld [vmem:[%s2101_s25 + $0x340] sm:$0xff]  ;;  %v468_v53 = vld [vmem:[%s2101_s25 + $0x350] sm:$0xff] }
  0x2a   : > { %415 = vst [vmem:[%s2106_s26 + $0xd0] sm:$0xff] %v414_v26  ;;  %v470_v54 = vld [vmem:[%s2101_s25 + $0x360] sm:$0xff]  ;;  %v472_v55 = vld [vmem:[%s2101_s25 + $0x370] sm:$0xff] }
  0x2b   : > { %417 = vst [vmem:[%s2106_s26 + $0xd8] sm:$0xff] %v416_v27  ;;  %v474_v56 = vld [vmem:[%s2101_s25 + $0x380] sm:$0xff]  ;;  %v476_v57 = vld [vmem:[%s2101_s25 + $0x390] sm:$0xff] }
  0x2c   : > { %419 = vst [vmem:[%s2106_s26 + $0xe0] sm:$0xff] %v418_v28  ;;  %v478_v58 = vld [vmem:[%s2101_s25 + $0x3a0] sm:$0xff]  ;;  %v480_v59 = vld [vmem:[%s2101_s25 + $0x3b0] sm:$0xff] }
  0x2d   : > { %421 = vst [vmem:[%s2106_s26 + $0xe8] sm:$0xff] %v420_v29  ;;  %v482_v60 = vld [vmem:[%s2101_s25 + $0x3c0] sm:$0xff]  ;;  %v484_v61 = vld [vmem:[%s2101_s25 + $0x3d0] sm:$0xff] }
  0x2e   : > { %423 = vst [vmem:[%s2106_s26 + $0xf0] sm:$0xff] %v422_v30  ;;  %v486_v62 = vld [vmem:[%s2101_s25 + $0x3e0] sm:$0xff]  ;;  %v488_v63 = vld [vmem:[%s2101_s25 + $0x3f0] sm:$0xff] }
  0x2f   : > { %425 = vst [vmem:[%s2106_s26 + $0xf8] sm:$0xff] %v424_v31  ;;  %v490_v0 = vld [vmem:[%s2101_s25 + $0x400] sm:$0xff]  ;;  %v492_v1 = vld [vmem:[%s2101_s25 + $0x410] sm:$0xff] }
  0x30   : > { %427 = vst [vmem:[%s2106_s26 + $0x100] sm:$0xff] %v426_v32  ;;  %v494_v2 = vld [vmem:[%s2101_s25 + $0x420] sm:$0xff]  ;;  %v496_v3 = vld [vmem:[%s2101_s25 + $0x430] sm:$0xff] }
  0x31   : > { %429 = vst [vmem:[%s2106_s26 + $0x108] sm:$0xff] %v428_v33  ;;  %v498_v4 = vld [vmem:[%s2101_s25 + $0x440] sm:$0xff]  ;;  %v500_v5 = vld [vmem:[%s2101_s25 + $0x450] sm:$0xff] }
  0x32   : > { %431 = vst [vmem:[%s2106_s26 + $0x110] sm:$0xff] %v430_v34  ;;  %v502_v6 = vld [vmem:[%s2101_s25 + $0x460] sm:$0xff]  ;;  %v504_v7 = vld [vmem:[%s2101_s25 + $0x470] sm:$0xff] }
  0x33   : > { %433 = vst [vmem:[%s2106_s26 + $0x118] sm:$0xff] %v432_v35  ;;  %v506_v8 = vld [vmem:[%s2101_s25 + $0x480] sm:$0xff]  ;;  %v508_v9 = vld [vmem:[%s2101_s25 + $0x490] sm:$0xff] }
  0x34   : > { %435 = vst [vmem:[%s2106_s26 + $0x120] sm:$0xff] %v434_v36  ;;  %v510_v10 = vld [vmem:[%s2101_s25 + $0x4a0] sm:$0xff]  ;;  %v512_v11 = vld [vmem:[%s2101_s25 + $0x4b0] sm:$0xff] }
  0x35   : > { %437 = vst [vmem:[%s2106_s26 + $0x128] sm:$0xff] %v436_v37  ;;  %v514_v12 = vld [vmem:[%s2101_s25 + $0x4c0] sm:$0xff]  ;;  %v516_v13 = vld [vmem:[%s2101_s25 + $0x4d0] sm:$0xff] }
  0x36   : > { %439 = vst [vmem:[%s2106_s26 + $0x130] sm:$0xff] %v438_v38  ;;  %v518_v14 = vld [vmem:[%s2101_s25 + $0x4e0] sm:$0xff]  ;;  %v520_v15 = vld [vmem:[%s2101_s25 + $0x4f0] sm:$0xff] }
  0x37   : > { %441 = vst [vmem:[%s2106_s26 + $0x138] sm:$0xff] %v440_v39  ;;  %v522_v16 = vld [vmem:[%s2101_s25 + $0x500] sm:$0xff]  ;;  %v524_v17 = vld [vmem:[%s2101_s25 + $0x510] sm:$0xff] }
  0x38   : > { %443 = vst [vmem:[%s2106_s26 + $0x140] sm:$0xff] %v442_v40  ;;  %v526_v18 = vld [vmem:[%s2101_s25 + $0x520] sm:$0xff]  ;;  %v528_v19 = vld [vmem:[%s2101_s25 + $0x530] sm:$0xff] }
  0x39   : > { %445 = vst [vmem:[%s2106_s26 + $0x148] sm:$0xff] %v444_v41  ;;  %v530_v20 = vld [vmem:[%s2101_s25 + $0x540] sm:$0xff]  ;;  %v532_v21 = vld [vmem:[%s2101_s25 + $0x550] sm:$0xff] }
  0x3a   : > { %447 = vst [vmem:[%s2106_s26 + $0x150] sm:$0xff] %v446_v42  ;;  %v534_v22 = vld [vmem:[%s2101_s25 + $0x560] sm:$0xff]  ;;  %v536_v23 = vld [vmem:[%s2101_s25 + $0x570] sm:$0xff] }
  0x3b   : > { %449 = vst [vmem:[%s2106_s26 + $0x158] sm:$0xff] %v448_v43  ;;  %v538_v24 = vld [vmem:[%s2101_s25 + $0x580] sm:$0xff]  ;;  %v540_v25 = vld [vmem:[%s2101_s25 + $0x590] sm:$0xff] }
  0x3c   : > { %451 = vst [vmem:[%s2106_s26 + $0x160] sm:$0xff] %v450_v44  ;;  %v542_v26 = vld [vmem:[%s2101_s25 + $0x5a0] sm:$0xff]  ;;  %v544_v27 = vld [vmem:[%s2101_s25 + $0x5b0] sm:$0xff] }
  0x3d   : > { %453 = vst [vmem:[%s2106_s26 + $0x168] sm:$0xff] %v452_v45  ;;  %v546_v28 = vld [vmem:[%s2101_s25 + $0x5c0] sm:$0xff]  ;;  %v548_v29 = vld [vmem:[%s2101_s25 + $0x5d0] sm:$0xff] }
  0x3e   : > { %455 = vst [vmem:[%s2106_s26 + $0x170] sm:$0xff] %v454_v46  ;;  %v550_v30 = vld [vmem:[%s2101_s25 + $0x5e0] sm:$0xff]  ;;  %v552_v31 = vld [vmem:[%s2101_s25 + $0x5f0] sm:$0xff] }
  0x3f   : > { %457 = vst [vmem:[%s2106_s26 + $0x178] sm:$0xff] %v456_v47  ;;  %v554_v32 = vld [vmem:[%s2101_s25 + $0x600] sm:$0xff]  ;;  %v556_v33 = vld [vmem:[%s2101_s25 + $0x610] sm:$0xff] }
  0x40   : > { %459 = vst [vmem:[%s2106_s26 + $0x180] sm:$0xff] %v458_v48 }
  0x41   : > { %461 = vst [vmem:[%s2106_s26 + $0x188] sm:$0xff] %v460_v49 }
  0x42   : > { %463 = vst [vmem:[%s2106_s26 + $0x190] sm:$0xff] %v462_v50 }
  0x43   : > { %465 = vst [vmem:[%s2106_s26 + $0x198] sm:$0xff] %v464_v51 }
  0x44   : > { %467 = vst [vmem:[%s2106_s26 + $0x1a0] sm:$0xff] %v466_v52 }
  0x45   : > { %469 = vst [vmem:[%s2106_s26 + $0x1a8] sm:$0xff] %v468_v53 }
  0x46   : > { %471 = vst [vmem:[%s2106_s26 + $0x1b0] sm:$0xff] %v470_v54 }
  0x47   : > { %473 = vst [vmem:[%s2106_s26 + $0x1b8] sm:$0xff] %v472_v55 }
  0x48   : > { %475 = vst [vmem:[%s2106_s26 + $0x1c0] sm:$0xff] %v474_v56 }
  0x49   : > { %477 = vst [vmem:[%s2106_s26 + $0x1c8] sm:$0xff] %v476_v57 }
  0x4a   : > { %479 = vst [vmem:[%s2106_s26 + $0x1d0] sm:$0xff] %v478_v58 }
  0x4b   : > { %481 = vst [vmem:[%s2106_s26 + $0x1d8] sm:$0xff] %v480_v59 }
  0x4c   : > { %483 = vst [vmem:[%s2106_s26 + $0x1e0] sm:$0xff] %v482_v60 }
  0x4d   : > { %485 = vst [vmem:[%s2106_s26 + $0x1e8] sm:$0xff] %v484_v61 }
  0x4e   : > { %487 = vst [vmem:[%s2106_s26 + $0x1f0] sm:$0xff] %v486_v62 }
  0x4f   : > { %489 = vst [vmem:[%s2106_s26 + $0x1f8] sm:$0xff] %v488_v63 }
  0x50   : > { %491 = vst [vmem:[%s2106_s26 + $0x200] sm:$0xff] %v490_v0 }
  0x51   : > { %493 = vst [vmem:[%s2106_s26 + $0x208] sm:$0xff] %v492_v1 }
  0x52   : > { %495 = vst [vmem:[%s2106_s26 + $0x210] sm:$0xff] %v494_v2 }
  0x53   : > { %497 = vst [vmem:[%s2106_s26 + $0x218] sm:$0xff] %v496_v3 }
  0x54   : > { %499 = vst [vmem:[%s2106_s26 + $0x220] sm:$0xff] %v498_v4 }
  0x55   : > { %501 = vst [vmem:[%s2106_s26 + $0x228] sm:$0xff] %v500_v5 }
  0x56   : > { %503 = vst [vmem:[%s2106_s26 + $0x230] sm:$0xff] %v502_v6 }
  0x57   : > { %505 = vst [vmem:[%s2106_s26 + $0x238] sm:$0xff] %v504_v7 }
  0x58   : > { %507 = vst [vmem:[%s2106_s26 + $0x240] sm:$0xff] %v506_v8 }
  0x59   : > { %509 = vst [vmem:[%s2106_s26 + $0x248] sm:$0xff] %v508_v9 }
  0x5a   : > { %511 = vst [vmem:[%s2106_s26 + $0x250] sm:$0xff] %v510_v10 }
  0x5b   : > { %513 = vst [vmem:[%s2106_s26 + $0x258] sm:$0xff] %v512_v11 }
  0x5c   : > { %515 = vst [vmem:[%s2106_s26 + $0x260] sm:$0xff] %v514_v12 }
  0x5d   : > { %517 = vst [vmem:[%s2106_s26 + $0x268] sm:$0xff] %v516_v13 }
  0x5e   : > { %519 = vst [vmem:[%s2106_s26 + $0x270] sm:$0xff] %v518_v14 }
  0x5f   : > { %521 = vst [vmem:[%s2106_s26 + $0x278] sm:$0xff] %v520_v15 }
  0x60   : > { %523 = vst [vmem:[%s2106_s26 + $0x280] sm:$0xff] %v522_v16 }
  0x61   : > { %525 = vst [vmem:[%s2106_s26 + $0x288] sm:$0xff] %v524_v17 }
  0x62   : > { %527 = vst [vmem:[%s2106_s26 + $0x290] sm:$0xff] %v526_v18 }
  0x63   : > { %529 = vst [vmem:[%s2106_s26 + $0x298] sm:$0xff] %v528_v19 }
  0x64   : > { %531 = vst [vmem:[%s2106_s26 + $0x2a0] sm:$0xff] %v530_v20 }
  0x65   : > { %533 = vst [vmem:[%s2106_s26 + $0x2a8] sm:$0xff] %v532_v21 }
  0x66   : > { %535 = vst [vmem:[%s2106_s26 + $0x2b0] sm:$0xff] %v534_v22 }
  0x67   : > { %537 = vst [vmem:[%s2106_s26 + $0x2b8] sm:$0xff] %v536_v23 }
  0x68   : > { %539 = vst [vmem:[%s2106_s26 + $0x2c0] sm:$0xff] %v538_v24 }
  0x69   : > { %541 = vst [vmem:[%s2106_s26 + $0x2c8] sm:$0xff] %v540_v25 }
  0x6a   : > { %543 = vst [vmem:[%s2106_s26 + $0x2d0] sm:$0xff] %v542_v26 }
  0x6b   : > { %545 = vst [vmem:[%s2106_s26 + $0x2d8] sm:$0xff] %v544_v27 }
  0x6c   : > { %547 = vst [vmem:[%s2106_s26 + $0x2e0] sm:$0xff] %v546_v28 }
  0x6d   : > { %549 = vst [vmem:[%s2106_s26 + $0x2e8] sm:$0xff] %v548_v29 }
  0x6e   : > { %551 = vst [vmem:[%s2106_s26 + $0x2f0] sm:$0xff] %v550_v30 }
  0x6f   : > { %553 = vst [vmem:[%s2106_s26 + $0x2f8] sm:$0xff] %v552_v31 }
  0x70   : > { %555 = vst [vmem:[%s2106_s26 + $0x300] sm:$0xff] %v554_v32 }
  0x71   : > { %557 = vst [vmem:[%s2106_s26 + $0x308] sm:$0xff] %v556_v33 }
  0x72 PF: > { %p1498_p5 = scmp.ge.s32.totalorder %s2045_s14, 1  ;;  %p570_p6 = scmp.lt.s32.totalorder %s2045_s14, 3 }
  0x74   : > { %p571_p7 = pnand %p1498_p5, %p570_p6 }
  0x75   : > { %s577_s27 = sand.u32 (!%p571_p7), 1, %s2037_s12   ;;  %s1499_s5 = sshll.u32 (!%p571_p7), %s1492_s15, 1 }
  0x76   : > { %574 = sbr.rel (%p571_p7) target bundleno = 372 (0x174), region = 66  ;;  %p606_p8 = scmp.lt.s32.totalorder (!%p571_p7), %s1499_s5, 3 }
  0x77   : > { %s1998_s30 = smul.u32 (!%p571_p7), 784, %s577_s27 }
  0x79   : > { %s2307_s4 = scalar_lea.vmem (!%p571_p7), [#allocation2], %s1998_s30 }
  0x7b   : > { %v617_v34 = vld [vmem:[%s2557_s0] sm:$0x7f]  ;;  %v1560_v35 = vld [vmem:[%s2307_s4 + $0x70] sm:$0xf]  ;;  %v1552_v46 = vld [vmem:[%s2307_s4 + $0x60] sm:$0xf] }
  0x7c   : > { %723 = vst [vmem:[#allocation1] ss:$9 sm:$0xff] %v617_v34  ;;  %v1914_v36 = vld [vmem:[%s2307_s4 + $0x74] sm:$0xf0]  ;;  %v1688_v37 = vld [vmem:[%s2307_s4 + $0x170] sm:$0xf] }
  0x7d   : > { %v1561_v38 = vor.u32 %v1914_v36, %v1560_v35  ;;  %v1946_v39 = vld [vmem:[%s2307_s4 + $0x174] sm:$0xf0]  ;;  %v1752_v40 = vld [vmem:[%s2307_s4 + $0x1f0] sm:$0xf]  ;;  %v1912_v48 = vld [vmem:[%s2307_s4 + $0x64] sm:$0xf0] }
  0x7e   : > { %v1962_v41 = vld [vmem:[%s2307_s4 + $0x1f4] sm:$0xf0]  ;;  %v1689_v42 = vor.u32 %v1946_v39, %v1688_v37  ;;  %v1624_v44 = vld [vmem:[%s2307_s4 + $0xf0] sm:$0xf]  ;;  %v1680_v49 = vld [vmem:[%s2307_s4 + $0x160] sm:$0xf]  ;;  %v1553_v51 = vor.u32 %v1912_v48, %v1552_v46 }
  0x7f   : > { %v1753_v43 = vor.u32 %v1962_v41, %v1752_v40  ;;  %v1930_v45 = vld [vmem:[%s2307_s4 + $0xf4] sm:$0xf0]  ;;  %1230 = vmatpush.bf16.msra.mxu0 %v1561_v38  ;;  %v1944_v50 = vld [vmem:[%s2307_s4 + $0x164] sm:$0xf0]  ;;  %v1744_v53 = vld [vmem:[%s2307_s4 + $0x1e0] sm:$0xf] }
  0x80   : > { %v1625_v47 = vor.u32 %v1930_v45, %v1624_v44  ;;  %1256 = vmatpush.bf16.msra.mxu2 %v1689_v42  ;;  %v1681_v52 = vor.u32 %v1944_v50, %v1680_v49  ;;  %v1960_v54 = vld [vmem:[%s2307_s4 + $0x1e4] sm:$0xf0]  ;;  %v1616_v55 = vld [vmem:[%s2307_s4 + $0xe0] sm:$0xf]  ;;  %v1544_v58 = vld [vmem:[%s2307_s4 + $0x50] sm:$0xf] }
  0x81   : > { %1269 = vmatpush.bf16.msra.mxu3 %v1753_v43  ;;  %v1745_v56 = vor.u32 %v1960_v54, %v1744_v53  ;;  %v1928_v57 = vld [vmem:[%s2307_s4 + $0xe4] sm:$0xf0]  ;;  %v1910_v59 = vld [vmem:[%s2307_s4 + $0x54] sm:$0xf0]  ;;  %v1672_v61 = vld [vmem:[%s2307_s4 + $0x150] sm:$0xf] }
  0x82   : > { %1243 = vmatpush.bf16.msra.mxu1 %v1625_v47  ;;  %v1617_v60 = vor.u32 %v1928_v57, %v1616_v55  ;;  %v1942_v62 = vld [vmem:[%s2307_s4 + $0x154] sm:$0xf0]  ;;  %v1736_v63 = vld [vmem:[%s2307_s4 + $0x1d0] sm:$0xf]  ;;  %v1545_v0 = vor.u32 %v1910_v59, %v1544_v58  ;;  %v1536_v6 = vld [vmem:[%s2307_s4 + $0x40] sm:$0xf] }
  0x83   : > { %1231 = vmatpush.bf16.msra.mxu0 %v1553_v51  ;;  %v1958_v1 = vld [vmem:[%s2307_s4 + $0x1d4] sm:$0xf0]  ;;  %v1608_v2 = vld [vmem:[%s2307_s4 + $0xd0] sm:$0xf]  ;;  %v1673_v4 = vor.u32 %v1942_v62, %v1672_v61  ;;  %v1908_v7 = vld [vmem:[%s2307_s4 + $0x44] sm:$0xf0] }
  0x84   : > { %v1926_v3 = vld [vmem:[%s2307_s4 + $0xd4] sm:$0xf0]  ;;  %1257 = vmatpush.bf16.msra.mxu2 %v1681_v52  ;;  %v1737_v5 = vor.u32 %v1958_v1, %v1736_v63  ;;  %v1664_v8 = vld [vmem:[%s2307_s4 + $0x140] sm:$0xf]  ;;  %v1940_v10 = vld [vmem:[%s2307_s4 + $0x144] sm:$0xf0]  ;;  %v1537_v15 = vor.u32 %v1908_v7, %v1536_v6 }
  0x85   : > { %1270 = vmatpush.bf16.msra.mxu3 %v1745_v56  ;;  %v1609_v9 = vor.u32 %v1926_v3, %v1608_v2  ;;  %v1728_v11 = vld [vmem:[%s2307_s4 + $0x1c0] sm:$0xf]  ;;  %v1956_v12 = vld [vmem:[%s2307_s4 + $0x1c4] sm:$0xf0]  ;;  %v1665_v16 = vor.u32 %v1940_v10, %v1664_v8  ;;  %v1528_v18 = vld [vmem:[%s2307_s4 + $0x30] sm:$0xf] }
  0x86   : > { %1244 = vmatpush.bf16.msra.mxu1 %v1617_v60  ;;  %v1600_v13 = vld [vmem:[%s2307_s4 + $0xc0] sm:$0xf]  ;;  %v1924_v14 = vld [vmem:[%s2307_s4 + $0xc4] sm:$0xf0]  ;;  %v1729_v17 = vor.u32 %v1956_v12, %v1728_v11  ;;  %v1906_v19 = vld [vmem:[%s2307_s4 + $0x34] sm:$0xf0] }
  0x87   : > { %1232 = vmatpush.bf16.msra.mxu0 %v1545_v0  ;;  %v1656_v20 = vld [vmem:[%s2307_s4 + $0x130] sm:$0xf]  ;;  %v1601_v21 = vor.u32 %v1924_v14, %v1600_v13  ;;  %v1938_v22 = vld [vmem:[%s2307_s4 + $0x134] sm:$0xf0]  ;;  %v1529_v27 = vor.u32 %v1906_v19, %v1528_v18  ;;  %v1520_v30 = vld [vmem:[%s2307_s4 + $0x20] sm:$0xf] }
  0x88   : > { %1258 = vmatpush.bf16.msra.mxu2 %v1673_v4  ;;  %v1720_v23 = vld [vmem:[%s2307_s4 + $0x1b0] sm:$0xf]  ;;  %v1954_v24 = vld [vmem:[%s2307_s4 + $0x1b4] sm:$0xf0]  ;;  %v1657_v28 = vor.u32 %v1938_v22, %v1656_v20  ;;  %v1904_v31 = vld [vmem:[%s2307_s4 + $0x24] sm:$0xf0] }
  0x89   : > { %1271 = vmatpush.bf16.msra.mxu3 %v1737_v5  ;;  %v1592_v25 = vld [vmem:[%s2307_s4 + $0xb0] sm:$0xf]  ;;  %v1922_v26 = vld [vmem:[%s2307_s4 + $0xb4] sm:$0xf0]  ;;  %v1721_v29 = vor.u32 %v1954_v24, %v1720_v23  ;;  %v1648_v32 = vld [vmem:[%s2307_s4 + $0x120] sm:$0xf]  ;;  %v1521_v39 = vor.u32 %v1904_v31, %v1520_v30 }
  0x8a   : > { %1245 = vmatpush.bf16.msra.mxu1 %v1609_v9  ;;  %v1593_v33 = vor.u32 %v1922_v26, %v1592_v25  ;;  %v1936_v34 = vld [vmem:[%s2307_s4 + $0x124] sm:$0xf0]  ;;  %v1712_v35 = vld [vmem:[%s2307_s4 + $0x1a0] sm:$0xf]  ;;  %v1512_v42 = vld [vmem:[%s2307_s4 + $0x10] sm:$0xf] }
  0x8b   : > { %1233 = vmatpush.bf16.msra.mxu0 %v1537_v15  ;;  %v1952_v36 = vld [vmem:[%s2307_s4 + $0x1a4] sm:$0xf0]  ;;  %v1584_v37 = vld [vmem:[%s2307_s4 + $0xa0] sm:$0xf]  ;;  %v1649_v40 = vor.u32 %v1936_v34, %v1648_v32  ;;  %v1902_v43 = vld [vmem:[%s2307_s4 + $0x14] sm:$0xf0] }
  0x8c   : > { %1259 = vmatpush.bf16.msra.mxu2 %v1665_v16  ;;  %v1920_v38 = vld [vmem:[%s2307_s4 + $0xa4] sm:$0xf0]  ;;  %v1713_v41 = vor.u32 %v1952_v36, %v1712_v35  ;;  %v1640_v44 = vld [vmem:[%s2307_s4 + $0x110] sm:$0xf]  ;;  %v1934_v46 = vld [vmem:[%s2307_s4 + $0x114] sm:$0xf0]  ;;  %v1513_v51 = vor.u32 %v1902_v43, %v1512_v42 }
  0x8d   : > { %1272 = vmatpush.bf16.msra.mxu3 %v1729_v17  ;;  %v1585_v45 = vor.u32 %v1920_v38, %v1584_v37  ;;  %v1704_v47 = vld [vmem:[%s2307_s4 + $0x190] sm:$0xf]  ;;  %v1950_v48 = vld [vmem:[%s2307_s4 + $0x194] sm:$0xf0]  ;;  %v1504_v52 = vld [vmem:[%s2307_s4] sm:$0xf]  ;;  %v1641_v54 = vor.u32 %v1934_v46, %v1640_v44 }
  0x8e   : > { %1246 = vmatpush.bf16.msra.mxu1 %v1601_v21  ;;  %v1576_v49 = vld [vmem:[%s2307_s4 + $0x90] sm:$0xf]  ;;  %v1918_v50 = vld [vmem:[%s2307_s4 + $0x94] sm:$0xf0]  ;;  %v1900_v53 = vld [vmem:[%s2307_s4 + $0x4] sm:$0xf0]  ;;  %v1705_v55 = vor.u32 %v1950_v48, %v1704_v47 }
  0x8f   : > { %1234 = vmatpush.bf16.msra.mxu0 %v1529_v27  ;;  %v1632_v56 = vld [vmem:[%s2307_s4 + $0x100] sm:$0xf]  ;;  %v1932_v57 = vld [vmem:[%s2307_s4 + $0x104] sm:$0xf0]  ;;  %v1577_v59 = vor.u32 %v1918_v50, %v1576_v49  ;;  %v1816_v61 = vld [vmem:[%s2307_s4 + $0x270] sm:$0xf]  ;;  %v1505_v2 = vor.u32 %v1900_v53, %v1504_v52 }
  0x90   : > { %1260 = vmatpush.bf16.msra.mxu2 %v1657_v28  ;;  %v1696_v58 = vld [vmem:[%s2307_s4 + $0x180] sm:$0xf]  ;;  %v1948_v60 = vld [vmem:[%s2307_s4 + $0x184] sm:$0xf0]  ;;  %v1978_v62 = vld [vmem:[%s2307_s4 + $0x274] sm:$0xf0]  ;;  %v1633_v6 = vor.u32 %v1932_v57, %v1632_v56 }
  0x91   : > { %1273 = vmatpush.bf16.msra.mxu3 %v1721_v29  ;;  %v1913_v63 = vld [vmem:[%s2307_s4 + $0x74] sm:$0xf]  ;;  %v1562_v0 = vld [vmem:[%s2307_s4 + $0x78] sm:$0xf0]  ;;  %v1568_v1 = vld [vmem:[%s2307_s4 + $0x80] sm:$0xf]  ;;  %v1697_v7 = vor.u32 %v1948_v60, %v1696_v58  ;;  %v1817_v10 = vor.u32 %v1978_v62, %v1816_v61 }
  0x92   : > { %1247 = vmatpush.bf16.msra.mxu1 %v1593_v33  ;;  %v1916_v3 = vld [vmem:[%s2307_s4 + $0x84] sm:$0xf0]  ;;  %v1888_v4 = vld [vmem:[%s2307_s4 + $0x300] sm:$0xf]  ;;  %v1880_v8 = vld [vmem:[%s2307_s4 + $0x2f0] sm:$0xf]  ;;  %v1565_v11 = vor.u32 %v1913_v63, %v1562_v0 }
  0x93   : > { %1235 = vmatpush.bf16.msra.mxu0 %v1521_v39  ;;  %v1996_v5 = vld [vmem:[%s2307_s4 + $0x304] sm:$0xf0]  ;;  %v1994_v9 = vld [vmem:[%s2307_s4 + $0x2f4] sm:$0xf0]  ;;  %v1929_v12 = vld [vmem:[%s2307_s4 + $0xf4] sm:$0xf]  ;;  %v1569_v15 = vor.u32 %v1916_v3, %v1568_v1 }
  0x94   : > { %1261 = vmatpush.bf16.msra.mxu2 %v1649_v40  ;;  %v1626_v13 = vld [vmem:[%s2307_s4 + $0xf8] sm:$0xf0]  ;;  %v1808_v14 = vld [vmem:[%s2307_s4 + $0x260] sm:$0xf]  ;;  %v1889_v16 = vor.u32 %v1996_v5, %v1888_v4  ;;  %v1976_v17 = vld [vmem:[%s2307_s4 + $0x264] sm:$0xf0]  ;;  %v1881_v21 = vor.u32 %v1994_v9, %v1880_v8 }
  0x95   : > { %1274 = vmatpush.bf16.msra.mxu3 %v1713_v41  ;;  %v1911_v18 = vld [vmem:[%s2307_s4 + $0x64] sm:$0xf]  ;;  %v1554_v19 = vld [vmem:[%s2307_s4 + $0x68] sm:$0xf0]  ;;  %v1629_v22 = vor.u32 %v1929_v12, %v1626_v13  ;;  %v1872_v23 = vld [vmem:[%s2307_s4 + $0x2e0] sm:$0xf]  ;;  %v1809_v26 = vor.u32 %v1976_v17, %v1808_v14 }
  0x96   : > { %1248 = vmatpush.bf16.msra.mxu1 %v1585_v45  ;;  %v2387_v20 = vld [vmem:[#allocation1 + $0x12] sm:$0xff]  ;;  %v1927_v25 = vld [vmem:[%s2307_s4 + $0xe4] sm:$0xf]  ;;  %v1557_v27 = vor.u32 %v1911_v18, %v1554_v19  ;;  %v2394_v30 = vld [vmem:[#allocation1] sm:$0xff]  ;;  %vm1227_vm0 = vcmask 130048   ;;  %s2565_s5 = smov (!%p606_p8, %s1499_s5), 3 }
  0x97   : > { %1236 = vmatpush.bf16.msra.mxu0 %v1513_v51  ;;  %v1992_v24 = vld [vmem:[%s2307_s4 + $0x2e4] sm:$0xf0]  ;;  %v1618_v28 = vld [vmem:[%s2307_s4 + $0xe8] sm:$0xf0]  ;;  %v1800_v29 = vld [vmem:[%s2307_s4 + $0x250] sm:$0xf]  ;;  %s608_s8 = scalar_lea.vmem %s2559_s2, %s2565_s5 }
  0x98   : > { %1262 = vmatpush.bf16.msra.mxu2 %v1641_v54  ;;  %v1974_v31 = vld [vmem:[%s2307_s4 + $0x254] sm:$0xf0]  ;;  %v1909_v32 = vld [vmem:[%s2307_s4 + $0x54] sm:$0xf]  ;;  %v1546_v33 = vld [vmem:[%s2307_s4 + $0x58] sm:$0xf0]  ;;  %v1873_v34 = vor.u32 %v1992_v24, %v1872_v23  ;;  %v1621_v37 = vor.u32 %v1927_v25, %v1618_v28 }
  0x99   : > { %1275 = vmatpush.bf16.msra.mxu3 %v1705_v55  ;;  %v2400_v35 = vld [vmem:[#allocation1 + $0x1b] sm:$0xff]  ;;  %v2402_v36 = vld [vmem:[#allocation1 + $0x9] sm:$0xff]  ;;  %v1801_v40 = vor.u32 %v1974_v31, %v1800_v29  ;;  %v1549_v41 = vor.u32 %v1909_v32, %v1546_v33  ;;  %v1610_v43 = vld [vmem:[%s2307_s4 + $0xd8] sm:$0xf0]  ;;  %s1501_s9 = sshll.u32 %s2565_s5, 1  ;;  %vm1417_vm1 = vcmask 1041408  }
  0x9a   : > { %1249 = vmatpush.bf16.msra.mxu1 %v1577_v59  ;;  %v1864_v38 = vld [vmem:[%s2307_s4 + $0x2d0] sm:$0xf]  ;;  %v1990_v39 = vld [vmem:[%s2307_s4 + $0x2d4] sm:$0xf0]  ;;  %v1925_v42 = vld [vmem:[%s2307_s4 + $0xd4] sm:$0xf]  ;;  %s614_s12 = scalar_lea.vmem %s2560_s3, %s1501_s9 }
  0x9b   : > { %1237 = vmatpush.bf16.msra.mxu0 %v1505_v2  ;;  %v1792_v44 = vld [vmem:[%s2307_s4 + $0x240] sm:$0xf]  ;;  %v1972_v45 = vld [vmem:[%s2307_s4 + $0x244] sm:$0xf0]  ;;  %v1907_v46 = vld [vmem:[%s2307_s4 + $0x44] sm:$0xf]  ;;  %v1865_v48 = vor.u32 %v1990_v39, %v1864_v38  ;;  %v1613_v49 = vor.u32 %v1925_v42, %v1610_v43 }
  0x9c   : > { %1263 = vmatpush.bf16.msra.mxu2 %v1633_v6  ;;  %v1538_v47 = vld [vmem:[%s2307_s4 + $0x48] sm:$0xf0]  ;;  %v1856_v50 = vld [vmem:[%s2307_s4 + $0x2c0] sm:$0xf]  ;;  %v1988_v51 = vld [vmem:[%s2307_s4 + $0x2c4] sm:$0xf0]  ;;  %v1793_v52 = vor.u32 %v1972_v45, %v1792_v44 }
  0x9d   : > { %1276 = vmatpush.bf16.msra.mxu3 %v1697_v7  ;;  %v1541_v53 = vor.u32 %v1907_v46, %v1538_v47  ;;  %v1923_v54 = vld [vmem:[%s2307_s4 + $0xc4] sm:$0xf]  ;;  %v1602_v55 = vld [vmem:[%s2307_s4 + $0xc8] sm:$0xf0]  ;;  %v1784_v56 = vld [vmem:[%s2307_s4 + $0x230] sm:$0xf]  ;;  %v1857_v60 = vor.u32 %v1988_v51, %v1856_v50 }
  0x9e   : > { %1250 = vmatpush.bf16.msra.mxu1 %v1569_v15  ;;  %1238 = vmatmul.bf16.vlgmr.msra.gmra.mxu0 %v2394_v30  ;;  %v1970_v57 = vld [vmem:[%s2307_s4 + $0x234] sm:$0xf0]  ;;  %v1905_v58 = vld [vmem:[%s2307_s4 + $0x34] sm:$0xf]  ;;  %v1530_v59 = vld [vmem:[%s2307_s4 + $0x38] sm:$0xf0]  ;;  %v1605_v61 = vor.u32 %v1923_v54, %v1602_v55 }
  0x9f   : > { %1282 = vmatpush.bf16.msrb.mxu0 %v1817_v10  ;;  %1264 = vmatmul.bf16.vlgmr.msra.gmra.mxu2 %v2387_v20  ;;  %v1848_v62 = vld [vmem:[%s2307_s4 + $0x2b0] sm:$0xf]  ;;  %v1986_v63 = vld [vmem:[%s2307_s4 + $0x2b4] sm:$0xf0]  ;;  %v1785_v0 = vor.u32 %v1970_v57, %v1784_v56  ;;  %v1533_v1 = vor.u32 %v1905_v58, %v1530_v59  ;;  %v1921_v2 = vld [vmem:[%s2307_s4 + $0xb4] sm:$0xf] }
  0xa0   : > { %1315 = vmatpush.bf16.msrb.mxu2 %v1889_v16  ;;  %1277 = vmatmul.bf16.vlgmr.msra.gmra.mxu3 %v2400_v35  ;;  %v1594_v3 = vld [vmem:[%s2307_s4 + $0xb8] sm:$0xf0]  ;;  %v1776_v4 = vld [vmem:[%s2307_s4 + $0x220] sm:$0xf]  ;;  %v1968_v5 = vld [vmem:[%s2307_s4 + $0x224] sm:$0xf0]  ;;  %v1849_v8 = vor.u32 %v1986_v63, %v1848_v62 }
  0xa1   : > { %1321 = vmatpush.bf16.msrb.mxu3 %v1565_v11  ;;  %1251 = vmatmul.bf16.vlgmr.msra.gmra.mxu1 %v2402_v36  ;;  %v1903_v6 = vld [vmem:[%s2307_s4 + $0x24] sm:$0xf]  ;;  %v1522_v7 = vld [vmem:[%s2307_s4 + $0x28] sm:$0xf0]  ;;  %v1597_v9 = vor.u32 %v1921_v2, %v1594_v3  ;;  %v1840_v10 = vld [vmem:[%s2307_s4 + $0x2a0] sm:$0xf]  ;;  %v1777_v13 = vor.u32 %v1968_v5, %v1776_v4 }
  0xa2   : > { %1295 = vmatpush.bf16.msrb.mxu1 %v1881_v21  ;;  %v1984_v11 = vld [vmem:[%s2307_s4 + $0x2a4] sm:$0xf0]  ;;  %v2433_v12 = vld [vmem:[#allocation1 + $0x36] sm:$0xff]  ;;  %v1525_v14 = vor.u32 %v1903_v6, %v1522_v7  ;;  %v1966_v18 = vld [vmem:[%s2307_s4 + $0x214] sm:$0xf0] }
  0xa3   : > { %1283 = vmatpush.bf16.msrb.mxu0 %v1809_v26  ;;  %v1919_v15 = vld [vmem:[%s2307_s4 + $0xa4] sm:$0xf]  ;;  %v1586_v16 = vld [vmem:[%s2307_s4 + $0xa8] sm:$0xf0]  ;;  %v1768_v17 = vld [vmem:[%s2307_s4 + $0x210] sm:$0xf] }
  0xa4   : > { %1334 = vmatpush.bf16.msra.mxu2 %v1629_v22  ;;  %v1901_v19 = vld [vmem:[%s2307_s4 + $0x14] sm:$0xf]  ;;  %v1514_v21 = vld [vmem:[%s2307_s4 + $0x18] sm:$0xf0]  ;;  %v1841_v22 = vor.u32 %v1984_v11, %v1840_v10  ;;  %v1589_v23 = vor.u32 %v1919_v15, %v1586_v16  ;;  %v1832_v24 = vld [vmem:[%s2307_s4 + $0x290] sm:$0xf] }
  0xa5   : > { %1322 = vmatpush.bf16.msrb.mxu3 %v1557_v27  ;;  %v1982_v25 = vld [vmem:[%s2307_s4 + $0x294] sm:$0xf0]  ;;  %v1917_v26 = vld [vmem:[%s2307_s4 + $0x94] sm:$0xf]  ;;  %v1769_v27 = vor.u32 %v1966_v18, %v1768_v17  ;;  %v1517_v28 = vor.u32 %v1901_v19, %v1514_v21  ;;  %v1578_v29 = vld [vmem:[%s2307_s4 + $0x98] sm:$0xf0] }
  0xa6   : > { %1296 = vmatpush.bf16.msrb.mxu1 %v1873_v34  ;;  %v1760_v31 = vld [vmem:[%s2307_s4 + $0x200] sm:$0xf]  ;;  %v1964_v32 = vld [vmem:[%s2307_s4 + $0x204] sm:$0xf0]  ;;  %v1899_v33 = vld [vmem:[%s2307_s4 + $0x4] sm:$0xf]  ;;  %v1833_v38 = vor.u32 %v1982_v25, %v1832_v24  ;;  %v1581_v42 = vor.u32 %v1917_v26, %v1578_v29 }
  0xa7   : > { %1284 = vmatpush.bf16.msrb.mxu0 %v1801_v40  ;;  %v1506_v34 = vld [vmem:[%s2307_s4 + $0x8] sm:$0xf0]  ;;  %v1690_v39 = vld [vmem:[%s2307_s4 + $0x178] sm:$0xf0]  ;;  %v1977_v40 = vld [vmem:[%s2307_s4 + $0x274] sm:$0xf]  ;;  %v1761_v45 = vor.u32 %v1964_v32, %v1760_v31 }
  0xa8   : > { %1335 = vmatpush.bf16.msra.mxu2 %v1621_v37  ;;  %v1945_v37 = vld [vmem:[%s2307_s4 + $0x174] sm:$0xf]  ;;  %v1824_v43 = vld [vmem:[%s2307_s4 + $0x280] sm:$0xf]  ;;  %v1980_v44 = vld [vmem:[%s2307_s4 + $0x284] sm:$0xf0]  ;;  %v1509_v46 = vor.u32 %v1899_v33, %v1506_v34 }
  0xa9   : > { %1323 = vmatpush.bf16.msrb.mxu3 %v1549_v41  ;;  %v1818_v41 = vld [vmem:[%s2307_s4 + $0x278] sm:$0xf0]  ;;  %v1915_v47 = vld [vmem:[%s2307_s4 + $0x84] sm:$0xf]  ;;  %v1693_v50 = vor.u32 %v1945_v37, %v1690_v39  ;;  %v1825_v55 = vor.u32 %v1980_v44, %v1824_v43  ;;  %v1682_v57 = vld [vmem:[%s2307_s4 + $0x168] sm:$0xf0] }
  0xaa   : > { %1297 = vmatpush.bf16.msrb.mxu1 %v1865_v48  ;;  %v1570_v48 = vld [vmem:[%s2307_s4 + $0x88] sm:$0xf0]  ;;  %v1821_v51 = vor.u32 %v1977_v40, %v1818_v41  ;;  %v1882_v54 = vld [vmem:[%s2307_s4 + $0x2f8] sm:$0xf0]  ;;  %v1943_v56 = vld [vmem:[%s2307_s4 + $0x164] sm:$0xf] }
  0xab   : > { %1285 = vmatpush.bf16.msrb.mxu0 %v1793_v52  ;;  %v1754_v52 = vld [vmem:[%s2307_s4 + $0x1f8] sm:$0xf0]  ;;  %v1573_v58 = vor.u32 %v1915_v47, %v1570_v48  ;;  %v1975_v59 = vld [vmem:[%s2307_s4 + $0x264] sm:$0xf]  ;;  %v1746_v2 = vld [vmem:[%s2307_s4 + $0x1e8] sm:$0xf0] }
  0xac   : > { %1336 = vmatpush.bf16.msra.mxu2 %v1613_v49  ;;  %v1961_v49 = vld [vmem:[%s2307_s4 + $0x1f4] sm:$0xf]  ;;  %v1991_v3 = vld [vmem:[%s2307_s4 + $0x2e4] sm:$0xf]  ;;  %v1874_v4 = vld [vmem:[%s2307_s4 + $0x2e8] sm:$0xf0] }
  0xad   : > { %1324 = vmatpush.bf16.msrb.mxu3 %v1541_v53  ;;  %v1993_v53 = vld [vmem:[%s2307_s4 + $0x2f4] sm:$0xf]  ;;  %v1757_v62 = vor.u32 %v1961_v49, %v1754_v52  ;;  %v1802_v10 = vld [vmem:[%s2307_s4 + $0x258] sm:$0xf0]  ;;  %v1939_v21 = vld [vmem:[%s2307_s4 + $0x144] sm:$0xf] }
  0xae   : > { %1298 = vmatpush.bf16.msrb.mxu1 %v1857_v60  ;;  %v1810_v60 = vld [vmem:[%s2307_s4 + $0x268] sm:$0xf0]  ;;  %v1885_v63 = vor.u32 %v1993_v53, %v1882_v54  ;;  %v1941_v7 = vld [vmem:[%s2307_s4 + $0x154] sm:$0xf]  ;;  %v1738_v16 = vld [vmem:[%s2307_s4 + $0x1d8] sm:$0xf0] }
  0xaf   : > { %1286 = vmatpush.bf16.msrb.mxu0 %v1785_v0  ;;  %1894 = vmatmul.msk.bf16.vlgmr.msrb.gmra.mxu2 %vm1227_vm0, %v2433_v12  ;;  %v1959_v0 = vld [vmem:[%s2307_s4 + $0x1e4] sm:$0xf]  ;;  %v1813_v6 = vor.u32 %v1975_v59, %v1810_v60  ;;  %v1989_v17 = vld [vmem:[%s2307_s4 + $0x2d4] sm:$0xf]  ;;  %v1866_v18 = vld [vmem:[%s2307_s4 + $0x2d8] sm:$0xf0] }
  0xb0   : > { %1337 = vmatpush.bf16.msra.mxu2 %v1605_v61  ;;  %v2467_v61 = vld [vmem:[#allocation1 + $0x24] sm:$0xff]  ;;  %v2473_v5 = vld [vmem:[#allocation1 + $0x2d] sm:$0xff]  ;;  %v1749_v11 = vor.u32 %v1959_v0, %v1746_v2  ;;  %v1869_v26 = vor.u32 %v1989_v17, %v1866_v18 }
  0xb1   : > { %1325 = vmatpush.bf16.msrb.mxu3 %v1533_v1  ;;  %v1685_v1 = vor.u32 %v1943_v56, %v1682_v57  ;;  %v1794_v24 = vld [vmem:[%s2307_s4 + $0x248] sm:$0xf0]  ;;  %v1987_v31 = vld [vmem:[%s2307_s4 + $0x2c4] sm:$0xf]  ;;  %v1937_v33 = vld [vmem:[%s2307_s4 + $0x134] sm:$0xf] }
  0xb2   : > { %1299 = vmatpush.bf16.msrb.mxu1 %v1849_v8  ;;  %v1674_v8 = vld [vmem:[%s2307_s4 + $0x158] sm:$0xf0]  ;;  %v1730_v29 = vld [vmem:[%s2307_s4 + $0x1c8] sm:$0xf0]  ;;  %v1969_v34 = vld [vmem:[%s2307_s4 + $0x234] sm:$0xf] }
  0xb3   : > { %1287 = vmatpush.bf16.msrb.mxu0 %v1777_v13  ;;  %v1877_v13 = vor.u32 %v1991_v3, %v1874_v4  ;;  %v1677_v15 = vor.u32 %v1941_v7, %v1674_v8  ;;  %v1786_v37 = vld [vmem:[%s2307_s4 + $0x238] sm:$0xf0]  ;;  %v1953_v40 = vld [vmem:[%s2307_s4 + $0x1b4] sm:$0xf]  ;;  %v1650_v47 = vld [vmem:[%s2307_s4 + $0x128] sm:$0xf0] }
  0xb4   : > { %1338 = vmatpush.bf16.msra.mxu2 %v1597_v9  ;;  %v1973_v9 = vld [vmem:[%s2307_s4 + $0x254] sm:$0xf]  ;;  %v1850_v44 = vld [vmem:[%s2307_s4 + $0x2b8] sm:$0xf0]  ;;  %v1967_v48 = vld [vmem:[%s2307_s4 + $0x224] sm:$0xf] }
  0xb5   : > { %1326 = vmatpush.bf16.msrb.mxu3 %v1525_v14  ;;  %v1957_v14 = vld [vmem:[%s2307_s4 + $0x1d4] sm:$0xf]  ;;  %v1805_v19 = vor.u32 %v1973_v9, %v1802_v10  ;;  %v1778_v49 = vld [vmem:[%s2307_s4 + $0x228] sm:$0xf0]  ;;  %v1951_v52 = vld [vmem:[%s2307_s4 + $0x1a4] sm:$0xf] }
  0xb6   : > { %1300 = vmatpush.bf16.msrb.mxu1 %v1841_v22  ;;  %v1666_v22 = vld [vmem:[%s2307_s4 + $0x148] sm:$0xf0]  ;;  %v1741_v25 = vor.u32 %v1957_v14, %v1738_v16  ;;  %v1985_v43 = vld [vmem:[%s2307_s4 + $0x2b4] sm:$0xf]  ;;  %v1781_v57 = vor.u32 %v1967_v48, %v1778_v49  ;;  %v1642_v59 = vld [vmem:[%s2307_s4 + $0x118] sm:$0xf0] }
  0xb7   : > { %1288 = vmatpush.bf16.msrb.mxu0 %v1769_v27  ;;  %v1955_v27 = vld [vmem:[%s2307_s4 + $0x1c4] sm:$0xf]  ;;  %v1714_v54 = vld [vmem:[%s2307_s4 + $0x1a8] sm:$0xf0]  ;;  %v1965_v60 = vld [vmem:[%s2307_s4 + $0x214] sm:$0xf] }
  0xb8   : > { %1339 = vmatpush.bf16.msra.mxu2 %v1589_v23  ;;  %v1971_v23 = vld [vmem:[%s2307_s4 + $0x244] sm:$0xf]  ;;  %v1842_v56 = vld [vmem:[%s2307_s4 + $0x2a8] sm:$0xf0]  ;;  %v1706_v3 = vld [vmem:[%s2307_s4 + $0x198] sm:$0xf0] }
  0xb9   : > { %1327 = vmatpush.bf16.msrb.mxu3 %v1517_v28  ;;  %v1669_v28 = vor.u32 %v1939_v21, %v1666_v22  ;;  %v1797_v32 = vor.u32 %v1971_v23, %v1794_v24  ;;  %v1981_v4 = vld [vmem:[%s2307_s4 + $0x294] sm:$0xf]  ;;  %v1931_v8 = vld [vmem:[%s2307_s4 + $0x104] sm:$0xf]  ;;  %v1634_v9 = vld [vmem:[%s2307_s4 + $0x108] sm:$0xf0] }
  0xba   : > { %1301 = vmatpush.bf16.msrb.mxu1 %v1833_v38  ;;  %v1733_v38 = vor.u32 %v1955_v27, %v1730_v29  ;;  %v1963_v10 = vld [vmem:[%s2307_s4 + $0x204] sm:$0xf]  ;;  %v1890_v14 = vld [vmem:[%s2307_s4 + $0x308] sm:$0xf0]  ;;  %v1637_v17 = vor.u32 %v1931_v8, %v1634_v9 }
  0xbb   : > { %1289 = vmatpush.bf16.msrb.mxu0 %v1761_v45  ;;  %v1789_v45 = vor.u32 %v1969_v34, %v1786_v37  ;;  %v1947_v18 = vld [vmem:[%s2307_s4 + $0x184] sm:$0xf]  ;;  %v1826_v23 = vld [vmem:[%s2307_s4 + $0x288] sm:$0xf0] }
  0xbc   : > { %1340 = vmatpush.bf16.msra.mxu2 %v1581_v42  ;;  %v1722_v42 = vld [vmem:[%s2307_s4 + $0x1b8] sm:$0xf0]  ;;  %v1979_v22 = vld [vmem:[%s2307_s4 + $0x284] sm:$0xf] }
  0xbd   : > { %1328 = vmatpush.bf16.msrb.mxu3 %v1509_v46  ;;  %v1935_v46 = vld [vmem:[%s2307_s4 + $0x124] sm:$0xf] }
  0xbe   : > { %1302 = vmatpush.bf16.msrb.mxu1 %v1825_v55  ;;  %1290 = vmatmul.bf16.vlgmr.msrb.gmra.mxu0 %v2467_v61  ;;  %v1653_v53 = vor.u32 %v1935_v46, %v1650_v47  ;;  %v1983_v55 = vld [vmem:[%s2307_s4 + $0x2a4] sm:$0xf] }
  0xbf   : > { %1347 = vmatpush.bf16.msra.mxu0 %v1693_v50  ;;  %v1725_v50 = vor.u32 %v1953_v40, %v1722_v42  ;;  %v1845_v0 = vor.u32 %v1983_v55, %v1842_v56 }
  0xc0   : > { %1341 = vmatpush.bf16.msra.mxu2 %v1573_v58  ;;  %1329 = vmatmul.bf16.vlgmr.msrb.gmra.mxu3 %v2394_v30  ;;  %v1658_v30 = vld [vmem:[%s2307_s4 + $0x138] sm:$0xf0]  ;;  %v1933_v58 = vld [vmem:[%s2307_s4 + $0x114] sm:$0xf] }
  0xc1   : > { %1373 = vmatpush.bf16.msra.mxu3 %v1821_v51  ;;  %1303 = vmatmul.bf16.vlgmr.msrb.gmra.mxu1 %v2473_v5  ;;  %v1661_v41 = vor.u32 %v1937_v33, %v1658_v30  ;;  %v1853_v51 = vor.u32 %v1985_v43, %v1850_v44  ;;  %v1645_v2 = vor.u32 %v1933_v58, %v1642_v59 }
  0xc2   : > { %1360 = vmatpush.bf16.msra.mxu1 %v1757_v62  ;;  %v1770_v62 = vld [vmem:[%s2307_s4 + $0x218] sm:$0xf0] }
  0xc3   : > { %1348 = vmatpush.bf16.msra.mxu0 %v1685_v1  ;;  %1342 = vmatmul.bf16.vlgmr.msra.gmra.mxu2 %v2402_v36  ;;  %v1858_v36 = vld [vmem:[%s2307_s4 + $0x2c8] sm:$0xf0]  ;;  %v1949_v1 = vld [vmem:[%s2307_s4 + $0x194] sm:$0xf]  ;;  %v1773_v7 = vor.u32 %v1965_v60, %v1770_v62 }
  0xc4   : > { %1386 = vmatpush.bf16.msrb.mxu2 %v1885_v63  ;;  %v1861_v39 = vor.u32 %v1987_v31, %v1858_v36  ;;  %v1717_v63 = vor.u32 %v1951_v52, %v1714_v54 }
  0xc5   : > { %1374 = vmatpush.bf16.msra.mxu3 %v1813_v6  ;;  %v1834_v6 = vld [vmem:[%s2307_s4 + $0x298] sm:$0xf0] }
  0xc6   : > { %1361 = vmatpush.bf16.msra.mxu1 %v1749_v11  ;;  %v1762_v11 = vld [vmem:[%s2307_s4 + $0x208] sm:$0xf0]  ;;  %v1837_v16 = vor.u32 %v1981_v4, %v1834_v6 }
  0xc7   : > { %1349 = vmatpush.bf16.msra.mxu0 %v1677_v15  ;;  %v1709_v15 = vor.u32 %v1949_v1, %v1706_v3  ;;  %v1765_v21 = vor.u32 %v1963_v10, %v1762_v11 }
  0xc8   : > { %1387 = vmatpush.bf16.msrb.mxu2 %v1877_v13  ;;  %v1995_v13 = vld [vmem:[%s2307_s4 + $0x304] sm:$0xf] }
  0xc9   : > { %1375 = vmatpush.bf16.msra.mxu3 %v1805_v19  ;;  %v1698_v19 = vld [vmem:[%s2307_s4 + $0x188] sm:$0xf0]  ;;  %v1893_v24 = vor.u32 %v1995_v13, %v1890_v14 }
  0xca   : > { %1362 = vmatpush.bf16.msra.mxu1 %v1741_v25  ;;  %v1701_v25 = vor.u32 %v1947_v18, %v1698_v19 }
  0xcb   : > { %1350 = vmatpush.bf16.msra.mxu0 %v1669_v28 }
  0xcc   : > { %1388 = vmatpush.bf16.msrb.mxu2 %v1869_v26  ;;  %v1829_v26 = vor.u32 %v1979_v22, %v1826_v23 }
  0xcd   : > { %1376 = vmatpush.bf16.msra.mxu3 %v1797_v32 }
  0xce   : > { %1363 = vmatpush.bf16.msra.mxu1 %v1733_v38 }
  0xcf   : > { %1351 = vmatpush.bf16.msra.mxu0 %v1661_v41 }
  0xd0   : > { %1389 = vmatpush.bf16.msrb.mxu2 %v1861_v39  ;;  %v716_v39 = vld [vmem:[%s608_s8] sm:$0x3] }
  0xd1   : > { %1377 = vmatpush.bf16.msra.mxu3 %v1789_v45  ;;  %v718_v42 = vperm.slane %v716_v39, 0  ;;  %v719_v43 = vperm.slane %v716_v39, 1 }
  0xd2   : > { %1364 = vmatpush.bf16.msra.mxu1 %v1725_v50 }
  0xd3   : > { %1352 = vmatpush.bf16.msra.mxu0 %v1653_v53 }
  0xd4   : > { %1390 = vmatpush.bf16.msrb.mxu2 %v1853_v51 }
  0xd5   : > { %1378 = vmatpush.bf16.msra.mxu3 %v1781_v57 }
  0xd6   : > { %1365 = vmatpush.bf16.msra.mxu1 %v1717_v63 }
  0xd7   : > { %1353 = vmatpush.bf16.msra.mxu0 %v1645_v2 }
  0xd8   : > { %1391 = vmatpush.bf16.msrb.mxu2 %v1845_v0 }
  0xd9   : > { %1379 = vmatpush.bf16.msra.mxu3 %v1773_v7 }
  0xda   : > { %1366 = vmatpush.bf16.msra.mxu1 %v1709_v15 }
  0xdb   : > { %1354 = vmatpush.bf16.msra.mxu0 %v1637_v17 }
  0xdc   : > { %1392 = vmatpush.bf16.msrb.mxu2 %v1837_v16 }
  0xdd   : > { %1380 = vmatpush.bf16.msra.mxu3 %v1765_v21 }
  0xde   : > { %1367 = vmatpush.bf16.msra.mxu1 %v1701_v25  ;;  %1355 = vmatmul.bf16.vlgmr.msra.gmra.mxu0 %v2387_v20 }
  0xdf   : > { %1406 = vmatpush.bf16.msrb.mxu0 %v1893_v24 }
  0xe0   : > { %1381 = vmatmul.bf16.vlgmr.msra.gmra.mxu3 %v2467_v61  ;;  %1393 = vmatpush.bf16.msrb.mxu2 %v1829_v26 }
  0xe1   : > { %1368 = vmatmul.bf16.vlgmr.msra.gmra.mxu1 %v2400_v35 }
  0xe3   : > { %1394 = vmatmul.bf16.vlgmr.msrb.gmra.mxu2 %v2473_v5 }
  0xee   : > { %1895 = vmatmul.msk.bf16.vlgmr.msrb.gmra.mxu0 %vm1227_vm0, %v2433_v12 }
 0x11b   : > { %v1239_v27 = vpop.f32.mrf.mxu0 }
 0x11c   : > { %v1240_v44 = vadd.f32 %v1239_v27, %v718_v42 }
 0x11e   : > { %v1252_v28 = vpop.f32.mrf.mxu1 }
 0x11f   : > { %v1253_v46 = vadd.f32 %v1252_v28, %v1240_v44 }
 0x122   : > { %v1265_v29 = vpop.f32.mrf.mxu2 }
 0x123   : > { %v1278_v31 = vpop.f32.mrf.mxu3  ;;  %v1241_v36 = vpop.f32.mrf.mxu0  ;;  %v1266_v49 = vadd.f32 %v1265_v29, %v1253_v46 }
 0x125   : > { %v1279_v52 = vadd.f32 %v1278_v31, %v1266_v49 }
 0x126   : > { %v1254_v32 = vpop.f32.mrf.mxu1 }
 0x12a   : > { %v1267_v33 = vpop.f32.mrf.mxu2 }
 0x12b   : > { %v1280_v30 = vpop.f32.mrf.mxu3 }
 0x132   : > { %v1317_v20 = vpop.f32.mrf.mxu2 }
 0x13a   : > { %v1319_v61 = vpop.f32.mrf.mxu2 }
 0x13b   : > { %v1291_v34 = vpop.f32.mrf.mxu0 }
 0x13c   : > { %v1292_v55 = vadd.f32 %v1291_v34, %v1279_v52 }
 0x13e   : > { %v1304_v37 = vpop.f32.mrf.mxu1 }
 0x13f   : > { %v1305_v60 = vadd.f32 %v1304_v37, %v1292_v55 }
 0x141   : > { %v1318_v1 = vadd.f32 %v1317_v20, %v1305_v60 }
 0x143   : > { %v1293_v35 = vpop.f32.mrf.mxu0  ;;  %v1330_v12 = vpop.f32.mrf.mxu3  ;;  %v1412_v6 = vmax.f32 %v1318_v1, 0.0 }
 0x144   : > { %v1331_v45 = vadd.f32 %v1330_v12, %v719_v43 }
 0x146   : > { %v1343_v5 = vpop.f32.mrf.mxu2  ;;  %v1306_v38 = vpop.f32.mrf.mxu1 }
 0x147   : > { %v1344_v48 = vadd.f32 %v1343_v5, %v1331_v45 }
 0x14b   : > { %v1332_v41 = vpop.f32.mrf.mxu3 }
 0x14e   : > { %v1345_v40 = vpop.f32.mrf.mxu2 }
 0x15b   : > { %v1356_v47 = vpop.f32.mrf.mxu0 }
 0x15c   : > { %v1357_v51 = vadd.f32 %v1356_v47, %v1344_v48 }
 0x15e   : > { %v1369_v50 = vpop.f32.mrf.mxu1 }
 0x15f   : > { %v1370_v56 = vadd.f32 %v1369_v50, %v1357_v51 }
 0x163   : > { %v1382_v53 = vpop.f32.mrf.mxu3  ;;  %v1358_v54 = vpop.f32.mrf.mxu0 }
 0x164   : > { %v1383_v58 = vadd.f32 %v1382_v53, %v1370_v56 }
 0x166   : > { %v1395_v57 = vpop.f32.mrf.mxu2  ;;  %v1371_v59 = vpop.f32.mrf.mxu1 }
 0x167   : > { %v1396_v62 = vadd.f32 %v1395_v57, %v1383_v58 }
 0x16b   : > { %v1384_v63 = vpop.f32.mrf.mxu3  ;;  %v1408_v0 = vpop.f32.mrf.mxu0 }
 0x16c   : > { %v1409_v2 = vadd.f32 %v1408_v0, %v1396_v62 }
 0x16e   : > { %v1397_v3 = vpop.f32.mrf.mxu2  ;;  %v1413_v4 = vmax.f32 %v1409_v2, 0.0 }
 0x170   : > { %v1416_v7 = vrot.slane %v1413_v4, 6 }
 0x172   : > { %v1418_v8 = vsel %vm1417_vm1, %v1412_v6, %v1416_v7 }
 0x173   : > { %1420 = vst [vmem:[%s614_s12] sm:$0xf] %v1418_v8  ;;  %v1410_v9 = vpop.f32.mrf.mxu0 }
 0x174 PF: > { %p10_p9 = scmp.ge.s32.totalorder %s2084_s16, 4   ;;  %s2561_s12 = smov %s2041_s13 }
 0x175   : > { %s2562_s13 = smov %s2093_s19  ;;  %s2563_s14 = smov %s2084_s16 }
 0x176   :  { %12 = sbr.rel (!%p10_p9) target bundleno = 2 (0x2), region = 108 }

</bundles_post_ra>
